<compile_context>
chip_gen: v5e
topology: v5e:2x2
jax: 0.10.0
libtpu: 0.0.40
codegen_flags: <defaults>
</compile_context>

<pallas_src>
import functools

import numpy as np
import jax
import jax.numpy as jnp
from jax import lax
from jax.experimental import pallas as pl
from jax.experimental.pallas import tpu as pltpu

# 8th-order central finite-difference coefficients for d2/dx2 (deepwave accuracy=8)
_FD_COEFFS = (-205.0 / 72.0, 8.0 / 5.0, -1.0 / 5.0, 8.0 / 315.0, -1.0 / 560.0)


def _fd_band_matrix(n):
    """Symmetric banded (n, n) 8th-order 2nd-derivative matrix (non-circular)."""
    c = jnp.asarray(list(_FD_COEFFS) + [0.0], jnp.float32)
    i = jnp.arange(n)
    d = jnp.abs(i[:, None] - i[None, :])
    return jnp.take(c, jnp.minimum(d, 5))


# ----------------------------------------------------------------------------
# Fused propagation + receiver-recording kernel (one grid step == one shot)
# ----------------------------------------------------------------------------
def _make_fwi_kernel(nz, nx, nsteps, uniform_rz):
    assert nsteps % 8 == 0
    n_chunks = nsteps // 8

    def kernel(sz_ref,          # SMEM (n_shots,)              int32 source z cell
               rz_ref,          # SMEM (n_shots,)              int32 receiver z cell (uniform path)
               v2_ref,          # VMEM (nz, nx)                (v*dt)^2/dx^2, 0 in 4-cell halo
               dz_ref,          # VMEM (nz, nz)                banded d2/dz2 FD matrix
               dx_ref,          # VMEM (nx, nx)                banded d2/dx2 FD matrix
               src_ref,         # VMEM (1, 1, nx)              v2[sz,sx] at lane sx, else 0
               rzT_ref,         # VMEM (1, nz, n_rec_pad)      receiver z one-hot (fallback path)
               rxT_ref,         # VMEM (1, nx, n_rec_pad)      receiver x one-hot
               amp_ref,         # SMEM (n_shots, nsteps)       source amplitudes per step
               out_ref,         # VMEM (1, nsteps, n_rec_pad)  receiver traces (time-major)
               ua_ref, ub_ref,  # VMEM (nz, nx)                ping-pong wavefields
               ring_ref):       # VMEM (8, n_rec_pad)          receiver sample ring buffer
        s = pl.program_id(0)
        src_row = sz_ref[s]
        rec_row = rz_ref[s]

        # Zero the wavefields once per shot (boundary stays 0 by induction:
        # v2_ref is zero in the 4-cell Dirichlet halo).
        ua_ref[...] = jnp.zeros_like(ua_ref)
        ub_ref[...] = jnp.zeros_like(ub_ref)

        def one_step(cur, prv, t, j):
            # cur holds u_t, prv holds u_{t-1}; on exit prv holds u_{t+1}.
            u = cur[...]
            # Whole stencil on the MXU (f32, multi-pass): lap = Dz @ u + u @ Dx.
            # The banded matrices are non-circular, so no wrap-around aliasing.
            lap = (jnp.dot(dz_ref[...], u,
                           preferred_element_type=jnp.float32,
                           precision=lax.Precision.HIGHEST)
                   + jnp.dot(u, dx_ref[...],
                             preferred_element_type=jnp.float32,
                             precision=lax.Precision.HIGHEST))
            u_new = 2.0 * u - prv[...] + v2_ref[...] * lap
            prv[...] = u_new

            # Point-source injection: scalar amplitude from SMEM * (1, nx) row.
            amp = amp_ref[s, t]
            row = prv[pl.ds(src_row, 1), :]
            prv[pl.ds(src_row, 1), :] = row + amp * src_ref[0]

            # Receiver recording -> ring buffer row j (static index).
            if uniform_rz:
                # All receivers of this shot share one depth: single-row gather
                # + tiny (1, nx) @ (nx, n_rec_pad) matmul, no sublane reduce.
                u_row = prv[pl.ds(rec_row, 1), :]
                rec = jnp.dot(u_row, rxT_ref[0],
                              preferred_element_type=jnp.float32)
            else:
                v = jnp.dot(prv[...], rxT_ref[0],
                            preferred_element_type=jnp.float32)
                rec = jnp.sum(rzT_ref[0] * v, axis=0, keepdims=True)
            ring_ref[pl.ds(j, 1), :] = rec

        def body(i, carry):
            t0 = pl.multiple_of(i * 8, 8)
            # 8 fully-unrolled leapfrog steps (ping-pong, no parity indexing).
            for j in range(0, 8, 2):
                one_step(ua_ref, ub_ref, t0 + j, j)        # ub <- u_{t0+j+1}
                one_step(ub_ref, ua_ref, t0 + j + 1, j + 1)  # ua <- u_{t0+j+2}
            # One aligned (8, n_rec_pad) store instead of 8 masked row stores.
            out_ref[0, pl.ds(t0, 8), :] = ring_ref[...]
            return carry

        lax.fori_loop(0, n_chunks, body, 0)

    return kernel


# ----------------------------------------------------------------------------
# All-shot shoot (one pallas_call for the whole survey)
# ----------------------------------------------------------------------------
def _shoot(model, wav, src_loc, rec_loc, dx, dt, uniform_rz):
    """Propagate all shots; returns receiver data (n_shots, n_rec, nt)."""
    n_shots, _, nt = wav.shape
    nz, nx = model.shape
    n_rec = rec_loc.shape[1]
    n_rec_pad = max(8, -(-n_rec // 8) * 8)
    nsteps = -(-nt // 8) * 8                     # 8-aligned number of leapfrog steps

    # (v*dt)^2/dx^2 with the 4-cell zero-Dirichlet halo folded in.
    # TODO(synk): deepwave uses a 20-cell PML absorbing boundary; not implemented.
    v2 = (model.astype(jnp.float32) * dt) ** 2 / (dx * dx)
    zi = jnp.arange(nz)
    xi = jnp.arange(nx)
    interior = ((zi[:, None] >= 4) & (zi[:, None] < nz - 4) &
                (xi[None, :] >= 4) & (xi[None, :] < nx - 4))
    v2m = jnp.where(interior, v2, 0.0).astype(jnp.float32)

    # Banded FD matrices (constant per call; same for every shot).
    dz_mat = _fd_band_matrix(nz)
    dx_mat = _fd_band_matrix(nx)

    sz = src_loc[:, 0, 0].astype(jnp.int32)
    sx = src_loc[:, 0, 1].astype(jnp.int32)
    # Per-shot source row: v2m[sz, sx] at lane sx, zero elsewhere.
    # TODO(synk): injection scaling keeps the (v*dt)^2/dx^2 factor; verify vs deepwave.
    src_rows = (v2m[sz, :] * (xi[None, :] == sx[:, None]).astype(jnp.float32))
    src_rows = src_rows[:, None, :]                                   # (n_shots, 1, nx)

    rz = rec_loc[..., 0].astype(jnp.int32)                            # (n_shots, n_rec)
    rx = rec_loc[..., 1].astype(jnp.int32)
    rz0 = rz[:, 0]                                                    # per-shot depth (uniform path)
    rzT = (zi[None, :, None] == rz[:, None, :]).astype(jnp.float32)   # (n_shots, nz, n_rec)
    rxT = (xi[None, :, None] == rx[:, None, :]).astype(jnp.float32)   # (n_shots, nx, n_rec)
    pad = n_rec_pad - n_rec
    if pad:
        rzT = jnp.pad(rzT, ((0, 0), (0, 0), (0, pad)))
        rxT = jnp.pad(rxT, ((0, 0), (0, 0), (0, pad)))

    amps = wav[:, 0, :].astype(jnp.float32)                           # (n_shots, nt)
    amps = jnp.pad(amps, ((0, 0), (0, nsteps - nt)))                  # (n_shots, nsteps) -> SMEM

    # Explicit VMEM budget (double-buffered blocks + persistent scratch), capped
    # at 64 MiB so it is valid on v7x as well as v5e/v6e.
    f32 = 4
    block_bytes = (nz * nx + nz * nz + nx * nx + nx
                   + nz * n_rec_pad + nx * n_rec_pad
                   + nsteps * n_rec_pad) * f32
    scratch_bytes = (2 * nz * nx + 8 * n_rec_pad) * f32
    vmem_limit = int(min(64 * 2**20,
                         max(2 * block_bytes + scratch_bytes + (8 << 20),
                             32 * 2**20)))

    kernel = _make_fwi_kernel(nz, nx, nsteps, uniform_rz)
    out = pl.pallas_call(
        kernel,
        out_shape=jax.ShapeDtypeStruct((n_shots, nsteps, n_rec_pad), jnp.float32),
        grid_spec=pltpu.PrefetchScalarGridSpec(
            num_scalar_prefetch=2,                 # sz, rz0 -> SMEM
            grid=(n_shots,),
            in_specs=[
                pl.BlockSpec((nz, nx), lambda s, sz_p, rz_p: (0, 0)),
                pl.BlockSpec((nz, nz), lambda s, sz_p, rz_p: (0, 0)),
                pl.BlockSpec((nx, nx), lambda s, sz_p, rz_p: (0, 0)),
                pl.BlockSpec((1, 1, nx), lambda s, sz_p, rz_p: (s, 0, 0)),
                pl.BlockSpec((1, nz, n_rec_pad), lambda s, sz_p, rz_p: (s, 0, 0)),
                pl.BlockSpec((1, nx, n_rec_pad), lambda s, sz_p, rz_p: (s, 0, 0)),
                pl.BlockSpec(memory_space=pltpu.MemorySpace.SMEM),  # amps (scalars)
            ],
            out_specs=pl.BlockSpec((1, nsteps, n_rec_pad),
                                   lambda s, sz_p, rz_p: (s, 0, 0)),
            scratch_shapes=[
                pltpu.VMEM((nz, nx), jnp.float32),
                pltpu.VMEM((nz, nx), jnp.float32),
                pltpu.VMEM((8, n_rec_pad), jnp.float32),
            ],
        ),
        compiler_params=pltpu.CompilerParams(
            # TODO(synk): on v7x consider pltpu.CORE_PARALLEL / pl.core_map for
            # explicit 2-TensorCore sharding of the shot axis.
            dimension_semantics=("parallel",),
            vmem_limit_bytes=vmem_limit,
        ),
    )(sz, rz0, v2m, dz_mat, dx_mat, src_rows, rzT, rxT, amps)

    # TODO(synk): verify the record-after-update (u_{t+1}) timing convention
    # against deepwave before comparing to real data.
    pred = out[:, :nt, :n_rec]                 # (n_shots, nt, n_rec)
    return jnp.transpose(pred, (0, 2, 1))      # (n_shots, n_rec, nt)


@functools.partial(jax.jit, static_argnames=("num_batches", "uniform_rz"))
def _total_loss(model, wav, src_loc, rec_loc, obs, dx, dt, num_batches, uniform_rz):
    """Sum over batches of per-batch MSE means (== the torch module's loop)."""
    pred = _shoot(model, wav, src_loc, rec_loc, dx, dt, uniform_rz)
    obs = obs.astype(jnp.float32)
    total = jnp.float32(0.0)
    for it in range(num_batches):
        p = pred[it::num_batches]
        o = obs[it::num_batches]
        total = total + jnp.mean((p - o) ** 2)   # torch.nn.MSELoss() per batch
    return total


# ----------------------------------------------------------------------------
# FWI wrapper (forward / loss path of the PyTorch module)
# ----------------------------------------------------------------------------
class FWI_LBFGS:
    def __init__(self, data_true, source_wavelet, x_s, x_r, dx, dt,
                 num_batches, model_dims, msk, scaling):
        self.data_true = data_true            # (n_shots, n_rec, nt)
        self.source_wavelet = source_wavelet  # (n_shots, 1, nt)
        self.x_s = x_s                        # (n_shots, 1, 2) int32 grid cells
        self.x_r = x_r                        # (n_shots, n_rec, 2) int32 grid cells
        self.dx = float(dx)
        self.dt = float(dt)
        self.num_batches = num_batches
        self.model_dims = model_dims
        self.msk = msk
        self.scaling = float(scaling)
        self.running_loss = 0.0
        self.nWE = 0
        # Static (host-side) check: do all receivers of each shot share a depth?
        xr = np.asarray(x_r)
        self._uniform_rz = bool(np.all(xr[..., 0] == xr[:, :1, 0]))

    def forward(self, model, gradt=False, scipy=False):
        # TODO(synk): gradt=True path (loss.backward -> msk * grad / scaling) needs a
        # custom VJP for the Pallas propagator; only the forward loss is computed.
        model = jnp.asarray(model, jnp.float32).reshape(self.model_dims)
        loss = _total_loss(model, self.source_wavelet, self.x_s, self.x_r,
                           self.data_true, self.dx, self.dt,
                           num_batches=self.num_batches,
                           uniform_rz=self._uniform_rz)
        self.nWE += self.num_batches           # one wave-equation solve per batch
        loss = loss / self.scaling
        self.running_loss = float(loss)
        return loss

    def grad(self, model, scipy=False):
        return self.forward(model, gradt=True, scipy=scipy)


# ----------------------------------------------------------------------------
# Driver
# ----------------------------------------------------------------------------
if __name__ == "__main__":
    key = jax.random.PRNGKey(0)
    k1, k2 = jax.random.split(key, 2)

    nz, nx = 64, 128          # model_dims
    n_shots, n_src, n_rec, nt = 4, 1, 8, 32
    num_batches = 2
    dx, dt = 10.0, 0.001
    scaling = 1.0

    # Deterministic Ricker source wavelet
    f0 = 15.0
    t = jnp.arange(nt, dtype=jnp.float32) * dt - 1.0 / f0
    arg = (jnp.pi * f0 * t) ** 2
    ricker = (1.0 - 2.0 * arg) * jnp.exp(-arg)
    source_wavelet = (1e3 * jnp.tile(ricker[None, None, :],
                                     (n_shots, n_src, 1))).astype(jnp.float32)

    # Source / receiver grid coordinates (integer cells, like deepwave)
    sx = jnp.linspace(20, nx - 20, n_shots).astype(jnp.int32)
    x_s = jnp.stack([jnp.full((n_shots,), 8, jnp.int32), sx], axis=-1)[:, None, :]
    rxs = jnp.linspace(10, nx - 10, n_rec).astype(jnp.int32)
    x_r = jnp.tile(
        jnp.stack([jnp.full((n_rec,), 10, jnp.int32), rxs], axis=-1)[None],
        (n_shots, 1, 1))

    data_true = 1e-3 * jax.random.normal(k1, (n_shots, n_rec, nt), jnp.float32)
    msk = jnp.ones((nz, nx), jnp.float32)
    model = 1500.0 + 100.0 * jax.random.normal(k2, (nz, nx), jnp.float32)

    fwi = FWI_LBFGS(data_true, source_wavelet, x_s, x_r, dx, dt,
                    num_batches, (nz, nx), msk, scaling)

    loss = fwi.forward(model, gradt=False)
    loss = jax.block_until_ready(loss)
    assert bool(jnp.isfinite(loss)), "loss is not finite"
    print("KERNEL_OK")
</pallas_src>

<mosaic_0001>
module attributes {stable_mosaic.version = 11 : i64} {
  func.func @kernel(%arg0: i32, %arg1: memref<4xi32, #tpu.memory_space<smem>>, %arg2: memref<4xi32, #tpu.memory_space<smem>>, %arg3: memref<64x128xf32, #tpu.memory_space<vmem>>, %arg4: memref<64x64xf32, #tpu.memory_space<vmem>>, %arg5: memref<128x128xf32, #tpu.memory_space<vmem>>, %arg6: memref<1x1x128xf32, #tpu.memory_space<vmem>>, %arg7: memref<1x64x8xf32, #tpu.memory_space<vmem>>, %arg8: memref<1x128x8xf32, #tpu.memory_space<vmem>>, %arg9: memref<4x32xf32, #tpu.memory_space<smem>>, %arg10: memref<1x32x8xf32, #tpu.memory_space<vmem>>, %arg11: memref<64x128xf32, #tpu.memory_space<vmem>>, %arg12: memref<64x128xf32, #tpu.memory_space<vmem>>, %arg13: memref<8x8xf32, #tpu.memory_space<vmem>>) attributes {dimension_semantics = [#tpu.dimension_semantics<parallel>], iteration_bounds = array<i64: 4>, scalar_prefetch = 2 : i64, scratch_operands = 3 : i64, tpu.core_type = #tpu.core_type<tc>, window_params = [{pipeline_mode = #tpu.pipeline_mode<synchronous>, transform_indices = @transform_0, window_bounds = array<i64: 64, 128>}, {pipeline_mode = #tpu.pipeline_mode<synchronous>, transform_indices = @transform_1, window_bounds = array<i64: 64, 64>}, {pipeline_mode = #tpu.pipeline_mode<synchronous>, transform_indices = @transform_2, window_bounds = array<i64: 128, 128>}, {transform_indices = @transform_3, window_bounds = array<i64: 1, 1, 128>}, {transform_indices = @transform_4, window_bounds = array<i64: 1, 64, 8>}, {transform_indices = @transform_5, window_bounds = array<i64: 1, 128, 8>}, {transform_indices = @transform_6, window_bounds = array<i64: 4, 32>}, {transform_indices = @transform_7, window_bounds = array<i64: 1, 32, 8>}]} {
    %0 = arith.index_cast %arg0 : i32 to index
    %1 = memref.load %arg1[%0] : memref<4xi32, #tpu.memory_space<smem>>
    %2 = arith.index_cast %arg0 : i32 to index
    %3 = memref.load %arg2[%2] : memref<4xi32, #tpu.memory_space<smem>>
    %cst = arith.constant 0.000000e+00 : f32
    %4 = vector.broadcast %cst : f32 to vector<64x128xf32>
    %c0 = arith.constant 0 : index
    %c0_0 = arith.constant 0 : index
    %5 = vector.load %arg11[%c0, %c0_0] : memref<64x128xf32, #tpu.memory_space<vmem>>, vector<64x128xf32>
    tpu.vector_store %arg11[%c0, %c0_0], %4 {strides = array<i32>} : memref<64x128xf32, #tpu.memory_space<vmem>>, vector<64x128xf32>,
    %cst_1 = arith.constant 0.000000e+00 : f32
    %6 = vector.broadcast %cst_1 : f32 to vector<64x128xf32>
    %c0_2 = arith.constant 0 : index
    %c0_3 = arith.constant 0 : index
    %7 = vector.load %arg12[%c0_2, %c0_3] : memref<64x128xf32, #tpu.memory_space<vmem>>, vector<64x128xf32>
    tpu.vector_store %arg12[%c0_2, %c0_3], %6 {strides = array<i32>} : memref<64x128xf32, #tpu.memory_space<vmem>>, vector<64x128xf32>,
    %c0_i32 = arith.constant 0 : i32
    %c4_i32 = arith.constant 4 : i32
    %8 = arith.addi %c0_i32, %c4_i32 : i32
    %c1_i32 = arith.constant 1 : i32
    scf.for %arg14 = %c0_i32 to %8 step %c1_i32  : i32 {
      %c8_i32 = arith.constant 8 : i32
      %9 = arith.muli %arg14, %c8_i32 : i32
      %10 = tpu.assume_multiple %9, 8 : i32
      %c0_i32_5 = arith.constant 0 : i32
      %11 = arith.addi %10, %c0_i32_5 : i32
      %c0_6 = arith.constant 0 : index
      %c0_7 = arith.constant 0 : index
      %12 = vector.load %arg11[%c0_6, %c0_7] : memref<64x128xf32, #tpu.memory_space<vmem>>, vector<64x128xf32>
      %c0_8 = arith.constant 0 : index
      %c0_9 = arith.constant 0 : index
      %13 = vector.load %arg4[%c0_8, %c0_9] : memref<64x64xf32, #tpu.memory_space<vmem>>, vector<64x64xf32>
      %cst_10 = arith.constant dense<0.000000e+00> : vector<64x128xf32>
      %14 = tpu.matmul %13, %12, %cst_10 {dimension_numbers = #tpu.dot_dimension_numbers<[1], [0], [0], [1], [0, 0, 1, 1], [], []>, precision = #tpu.contract_precision<fp32>} : vector<64x64xf32>, vector<64x128xf32>, vector<64x128xf32> -> vector<64x128xf32>
      %c0_11 = arith.constant 0 : index
      %c0_12 = arith.constant 0 : index
      %15 = vector.load %arg5[%c0_11, %c0_12] : memref<128x128xf32, #tpu.memory_space<vmem>>, vector<128x128xf32>
      %cst_13 = arith.constant dense<0.000000e+00> : vector<64x128xf32>
      %16 = tpu.matmul %12, %15, %cst_13 {dimension_numbers = #tpu.dot_dimension_numbers<[1], [0], [0], [1], [0, 0, 1, 1], [], []>, precision = #tpu.contract_precision<fp32>} : vector<64x128xf32>, vector<128x128xf32>, vector<64x128xf32> -> vector<64x128xf32>
      %17 = arith.addf %14, %16 : vector<64x128xf32>
      %cst_14 = arith.constant 2.000000e+00 : f32
      %18 = vector.broadcast %cst_14 : f32 to vector<64x128xf32>
      %19 = arith.mulf %18, %12 : vector<64x128xf32>
      %c0_15 = arith.constant 0 : index
      %c0_16 = arith.constant 0 : index
      %20 = vector.load %arg12[%c0_15, %c0_16] : memref<64x128xf32, #tpu.memory_space<vmem>>, vector<64x128xf32>
      %21 = arith.subf %19, %20 : vector<64x128xf32>
      %c0_17 = arith.constant 0 : index
      %c0_18 = arith.constant 0 : index
      %22 = vector.load %arg3[%c0_17, %c0_18] : memref<64x128xf32, #tpu.memory_space<vmem>>, vector<64x128xf32>
      %23 = arith.mulf %22, %17 : vector<64x128xf32>
      %24 = arith.addf %21, %23 : vector<64x128xf32>
      %c0_19 = arith.constant 0 : index
      %c0_20 = arith.constant 0 : index
      %25 = vector.load %arg12[%c0_19, %c0_20] : memref<64x128xf32, #tpu.memory_space<vmem>>, vector<64x128xf32>
      tpu.vector_store %arg12[%c0_19, %c0_20], %24 {strides = array<i32>} : memref<64x128xf32, #tpu.memory_space<vmem>>, vector<64x128xf32>,
      %26 = arith.index_cast %arg0 : i32 to index
      %27 = arith.index_cast %11 : i32 to index
      %28 = memref.load %arg9[%26, %27] : memref<4x32xf32, #tpu.memory_space<smem>>
      %29 = arith.index_cast %1 : i32 to index
      %c0_21 = arith.constant 0 : index
      %30 = vector.load %arg12[%29, %c0_21] : memref<64x128xf32, #tpu.memory_space<vmem>>, vector<1x128xf32>
      %c0_22 = arith.constant 0 : index
      %c0_23 = arith.constant 0 : index
      %c0_24 = arith.constant 0 : index
      %31 = vector.load %arg6[%c0_22, %c0_23, %c0_24] : memref<1x1x128xf32, #tpu.memory_space<vmem>>, vector<1x1x128xf32>
      %32 = vector.shape_cast %31 : vector<1x1x128xf32> to vector<1x128xf32>
      %33 = vector.broadcast %28 : f32 to vector<1x128xf32>
      %34 = arith.mulf %33, %32 : vector<1x128xf32>
      %35 = arith.addf %30, %34 : vector<1x128xf32>
      %36 = arith.index_cast %1 : i32 to index
      %c0_25 = arith.constant 0 : index
      %37 = vector.load %arg12[%36, %c0_25] : memref<64x128xf32, #tpu.memory_space<vmem>>, vector<1x128xf32>
      tpu.vector_store %arg12[%36, %c0_25], %35 {strides = array<i32>} : memref<64x128xf32, #tpu.memory_space<vmem>>, vector<1x128xf32>,
      %38 = arith.index_cast %3 : i32 to index
      %c0_26 = arith.constant 0 : index
      %39 = vector.load %arg12[%38, %c0_26] : memref<64x128xf32, #tpu.memory_space<vmem>>, vector<1x128xf32>
      %c0_27 = arith.constant 0 : index
      %c0_28 = arith.constant 0 : index
      %c0_29 = arith.constant 0 : index
      %40 = vector.load %arg8[%c0_27, %c0_28, %c0_29] : memref<1x128x8xf32, #tpu.memory_space<vmem>>, vector<1x128x8xf32>
      %41 = vector.shape_cast %40 : vector<1x128x8xf32> to vector<128x8xf32>
      %cst_30 = arith.constant dense<0.000000e+00> : vector<1x8xf32>
      %42 = tpu.matmul %39, %41, %cst_30 {dimension_numbers = #tpu.dot_dimension_numbers<[1], [0], [0], [1], [0, 0, 1, 1], [], []>} : vector<1x128xf32>, vector<128x8xf32>, vector<1x8xf32> -> vector<1x8xf32>
      %c0_31 = arith.constant 0 : index
      %c0_32 = arith.constant 0 : index
      %43 = vector.load %arg13[%c0_31, %c0_32] : memref<8x8xf32, #tpu.memory_space<vmem>>, vector<1x8xf32>
      tpu.vector_store %arg13[%c0_31, %c0_32], %42 {strides = array<i32>} : memref<8x8xf32, #tpu.memory_space<vmem>>, vector<1x8xf32>,
      %c0_i32_33 = arith.constant 0 : i32
      %44 = arith.addi %10, %c0_i32_33 : i32
      %c1_i32_34 = arith.constant 1 : i32
      %45 = arith.addi %44, %c1_i32_34 : i32
      %c0_35 = arith.constant 0 : index
      %c0_36 = arith.constant 0 : index
      %46 = vector.load %arg12[%c0_35, %c0_36] : memref<64x128xf32, #tpu.memory_space<vmem>>, vector<64x128xf32>
      %c0_37 = arith.constant 0 : index
      %c0_38 = arith.constant 0 : index
      %47 = vector.load %arg4[%c0_37, %c0_38] : memref<64x64xf32, #tpu.memory_space<vmem>>, vector<64x64xf32>
      %cst_39 = arith.constant dense<0.000000e+00> : vector<64x128xf32>
      %48 = tpu.matmul %47, %46, %cst_39 {dimension_numbers = #tpu.dot_dimension_numbers<[1], [0], [0], [1], [0, 0, 1, 1], [], []>, precision = #tpu.contract_precision<fp32>} : vector<64x64xf32>, vector<64x128xf32>, vector<64x128xf32> -> vector<64x128xf32>
      %c0_40 = arith.constant 0 : index
      %c0_41 = arith.constant 0 : index
      %49 = vector.load %arg5[%c0_40, %c0_41] : memref<128x128xf32, #tpu.memory_space<vmem>>, vector<128x128xf32>
      %cst_42 = arith.constant dense<0.000000e+00> : vector<64x128xf32>
      %50 = tpu.matmul %46, %49, %cst_42 {dimension_numbers = #tpu.dot_dimension_numbers<[1], [0], [0], [1], [0, 0, 1, 1], [], []>, precision = #tpu.contract_precision<fp32>} : vector<64x128xf32>, vector<128x128xf32>, vector<64x128xf32> -> vector<64x128xf32>
      %51 = arith.addf %48, %50 : vector<64x128xf32>
      %cst_43 = arith.constant 2.000000e+00 : f32
      %52 = vector.broadcast %cst_43 : f32 to vector<64x128xf32>
      %53 = arith.mulf %52, %46 : vector<64x128xf32>
      %c0_44 = arith.constant 0 : index
      %c0_45 = arith.constant 0 : index
      %54 = vector.load %arg11[%c0_44, %c0_45] : memref<64x128xf32, #tpu.memory_space<vmem>>, vector<64x128xf32>
      %55 = arith.subf %53, %54 : vector<64x128xf32>
      %c0_46 = arith.constant 0 : index
      %c0_47 = arith.constant 0 : index
      %56 = vector.load %arg3[%c0_46, %c0_47] : memref<64x128xf32, #tpu.memory_space<vmem>>, vector<64x128xf32>
      %57 = arith.mulf %56, %51 : vector<64x128xf32>
      %58 = arith.addf %55, %57 : vector<64x128xf32>
      %c0_48 = arith.constant 0 : index
      %c0_49 = arith.constant 0 : index
      %59 = vector.load %arg11[%c0_48, %c0_49] : memref<64x128xf32, #tpu.memory_space<vmem>>, vector<64x128xf32>
      tpu.vector_store %arg11[%c0_48, %c0_49], %58 {strides = array<i32>} : memref<64x128xf32, #tpu.memory_space<vmem>>, vector<64x128xf32>,
      %60 = arith.index_cast %arg0 : i32 to index
      %61 = arith.index_cast %45 : i32 to index
      %62 = memref.load %arg9[%60, %61] : memref<4x32xf32, #tpu.memory_space<smem>>
      %63 = arith.index_cast %1 : i32 to index
      %c0_50 = arith.constant 0 : index
      %64 = vector.load %arg11[%63, %c0_50] : memref<64x128xf32, #tpu.memory_space<vmem>>, vector<1x128xf32>
      %c0_51 = arith.constant 0 : index
      %c0_52 = arith.constant 0 : index
      %c0_53 = arith.constant 0 : index
      %65 = vector.load %arg6[%c0_51, %c0_52, %c0_53] : memref<1x1x128xf32, #tpu.memory_space<vmem>>, vector<1x1x128xf32>
      %66 = vector.shape_cast %65 : vector<1x1x128xf32> to vector<1x128xf32>
      %67 = vector.broadcast %62 : f32 to vector<1x128xf32>
      %68 = arith.mulf %67, %66 : vector<1x128xf32>
      %69 = arith.addf %64, %68 : vector<1x128xf32>
      %70 = arith.index_cast %1 : i32 to index
      %c0_54 = arith.constant 0 : index
      %71 = vector.load %arg11[%70, %c0_54] : memref<64x128xf32, #tpu.memory_space<vmem>>, vector<1x128xf32>
      tpu.vector_store %arg11[%70, %c0_54], %69 {strides = array<i32>} : memref<64x128xf32, #tpu.memory_space<vmem>>, vector<1x128xf32>,
      %72 = arith.index_cast %3 : i32 to index
      %c0_55 = arith.constant 0 : index
      %73 = vector.load %arg11[%72, %c0_55] : memref<64x128xf32, #tpu.memory_space<vmem>>, vector<1x128xf32>
      %c0_56 = arith.constant 0 : index
      %c0_57 = arith.constant 0 : index
      %c0_58 = arith.constant 0 : index
      %74 = vector.load %arg8[%c0_56, %c0_57, %c0_58] : memref<1x128x8xf32, #tpu.memory_space<vmem>>, vector<1x128x8xf32>
      %75 = vector.shape_cast %74 : vector<1x128x8xf32> to vector<128x8xf32>
      %cst_59 = arith.constant dense<0.000000e+00> : vector<1x8xf32>
      %76 = tpu.matmul %73, %75, %cst_59 {dimension_numbers = #tpu.dot_dimension_numbers<[1], [0], [0], [1], [0, 0, 1, 1], [], []>} : vector<1x128xf32>, vector<128x8xf32>, vector<1x8xf32> -> vector<1x8xf32>
      %c1 = arith.constant 1 : index
      %c0_60 = arith.constant 0 : index
      %77 = vector.load %arg13[%c1, %c0_60] : memref<8x8xf32, #tpu.memory_space<vmem>>, vector<1x8xf32>
      tpu.vector_store %arg13[%c1, %c0_60], %76 {strides = array<i32>} : memref<8x8xf32, #tpu.memory_space<vmem>>, vector<1x8xf32>,
      %c2_i32 = arith.constant 2 : i32
      %78 = arith.addi %10, %c2_i32 : i32
      %c0_61 = arith.constant 0 : index
      %c0_62 = arith.constant 0 : index
      %79 = vector.load %arg11[%c0_61, %c0_62] : memref<64x128xf32, #tpu.memory_space<vmem>>, vector<64x128xf32>
      %c0_63 = arith.constant 0 : index
      %c0_64 = arith.constant 0 : index
      %80 = vector.load %arg4[%c0_63, %c0_64] : memref<64x64xf32, #tpu.memory_space<vmem>>, vector<64x64xf32>
      %cst_65 = arith.constant dense<0.000000e+00> : vector<64x128xf32>
      %81 = tpu.matmul %80, %79, %cst_65 {dimension_numbers = #tpu.dot_dimension_numbers<[1], [0], [0], [1], [0, 0, 1, 1], [], []>, precision = #tpu.contract_precision<fp32>} : vector<64x64xf32>, vector<64x128xf32>, vector<64x128xf32> -> vector<64x128xf32>
      %c0_66 = arith.constant 0 : index
      %c0_67 = arith.constant 0 : index
      %82 = vector.load %arg5[%c0_66, %c0_67] : memref<128x128xf32, #tpu.memory_space<vmem>>, vector<128x128xf32>
      %cst_68 = arith.constant dense<0.000000e+00> : vector<64x128xf32>
      %83 = tpu.matmul %79, %82, %cst_68 {dimension_numbers = #tpu.dot_dimension_numbers<[1], [0], [0], [1], [0, 0, 1, 1], [], []>, precision = #tpu.contract_precision<fp32>} : vector<64x128xf32>, vector<128x128xf32>, vector<64x128xf32> -> vector<64x128xf32>
      %84 = arith.addf %81, %83 : vector<64x128xf32>
      %cst_69 = arith.constant 2.000000e+00 : f32
      %85 = vector.broadcast %cst_69 : f32 to vector<64x128xf32>
      %86 = arith.mulf %85, %79 : vector<64x128xf32>
      %c0_70 = arith.constant 0 : index
      %c0_71 = arith.constant 0 : index
      %87 = vector.load %arg12[%c0_70, %c0_71] : memref<64x128xf32, #tpu.memory_space<vmem>>, vector<64x128xf32>
      %88 = arith.subf %86, %87 : vector<64x128xf32>
      %c0_72 = arith.constant 0 : index
      %c0_73 = arith.constant 0 : index
      %89 = vector.load %arg3[%c0_72, %c0_73] : memref<64x128xf32, #tpu.memory_space<vmem>>, vector<64x128xf32>
      %90 = arith.mulf %89, %84 : vector<64x128xf32>
      %91 = arith.addf %88, %90 : vector<64x128xf32>
      %c0_74 = arith.constant 0 : index
      %c0_75 = arith.constant 0 : index
      %92 = vector.load %arg12[%c0_74, %c0_75] : memref<64x128xf32, #tpu.memory_space<vmem>>, vector<64x128xf32>
      tpu.vector_store %arg12[%c0_74, %c0_75], %91 {strides = array<i32>} : memref<64x128xf32, #tpu.memory_space<vmem>>, vector<64x128xf32>,
      %93 = arith.index_cast %arg0 : i32 to index
      %94 = arith.index_cast %78 : i32 to index
      %95 = memref.load %arg9[%93, %94] : memref<4x32xf32, #tpu.memory_space<smem>>
      %96 = arith.index_cast %1 : i32 to index
      %c0_76 = arith.constant 0 : index
      %97 = vector.load %arg12[%96, %c0_76] : memref<64x128xf32, #tpu.memory_space<vmem>>, vector<1x128xf32>
      %c0_77 = arith.constant 0 : index
      %c0_78 = arith.constant 0 : index
      %c0_79 = arith.constant 0 : index
      %98 = vector.load %arg6[%c0_77, %c0_78, %c0_79] : memref<1x1x128xf32, #tpu.memory_space<vmem>>, vector<1x1x128xf32>
      %99 = vector.shape_cast %98 : vector<1x1x128xf32> to vector<1x128xf32>
      %100 = vector.broadcast %95 : f32 to vector<1x128xf32>
      %101 = arith.mulf %100, %99 : vector<1x128xf32>
      %102 = arith.addf %97, %101 : vector<1x128xf32>
      %103 = arith.index_cast %1 : i32 to index
      %c0_80 = arith.constant 0 : index
      %104 = vector.load %arg12[%103, %c0_80] : memref<64x128xf32, #tpu.memory_space<vmem>>, vector<1x128xf32>
      tpu.vector_store %arg12[%103, %c0_80], %102 {strides = array<i32>} : memref<64x128xf32, #tpu.memory_space<vmem>>, vector<1x128xf32>,
      %105 = arith.index_cast %3 : i32 to index
      %c0_81 = arith.constant 0 : index
      %106 = vector.load %arg12[%105, %c0_81] : memref<64x128xf32, #tpu.memory_space<vmem>>, vector<1x128xf32>
      %c0_82 = arith.constant 0 : index
      %c0_83 = arith.constant 0 : index
      %c0_84 = arith.constant 0 : index
      %107 = vector.load %arg8[%c0_82, %c0_83, %c0_84] : memref<1x128x8xf32, #tpu.memory_space<vmem>>, vector<1x128x8xf32>
      %108 = vector.shape_cast %107 : vector<1x128x8xf32> to vector<128x8xf32>
      %cst_85 = arith.constant dense<0.000000e+00> : vector<1x8xf32>
      %109 = tpu.matmul %106, %108, %cst_85 {dimension_numbers = #tpu.dot_dimension_numbers<[1], [0], [0], [1], [0, 0, 1, 1], [], []>} : vector<1x128xf32>, vector<128x8xf32>, vector<1x8xf32> -> vector<1x8xf32>
      %c2 = arith.constant 2 : index
      %c0_86 = arith.constant 0 : index
      %110 = vector.load %arg13[%c2, %c0_86] : memref<8x8xf32, #tpu.memory_space<vmem>>, vector<1x8xf32>
      tpu.vector_store %arg13[%c2, %c0_86], %109 {strides = array<i32>} : memref<8x8xf32, #tpu.memory_space<vmem>>, vector<1x8xf32>,
      %c2_i32_87 = arith.constant 2 : i32
      %111 = arith.addi %10, %c2_i32_87 : i32
      %c1_i32_88 = arith.constant 1 : i32
      %112 = arith.addi %111, %c1_i32_88 : i32
      %c0_89 = arith.constant 0 : index
      %c0_90 = arith.constant 0 : index
      %113 = vector.load %arg12[%c0_89, %c0_90] : memref<64x128xf32, #tpu.memory_space<vmem>>, vector<64x128xf32>
      %c0_91 = arith.constant 0 : index
      %c0_92 = arith.constant 0 : index
      %114 = vector.load %arg4[%c0_91, %c0_92] : memref<64x64xf32, #tpu.memory_space<vmem>>, vector<64x64xf32>
      %cst_93 = arith.constant dense<0.000000e+00> : vector<64x128xf32>
      %115 = tpu.matmul %114, %113, %cst_93 {dimension_numbers = #tpu.dot_dimension_numbers<[1], [0], [0], [1], [0, 0, 1, 1], [], []>, precision = #tpu.contract_precision<fp32>} : vector<64x64xf32>, vector<64x128xf32>, vector<64x128xf32> -> vector<64x128xf32>
      %c0_94 = arith.constant 0 : index
      %c0_95 = arith.constant 0 : index
      %116 = vector.load %arg5[%c0_94, %c0_95] : memref<128x128xf32, #tpu.memory_space<vmem>>, vector<128x128xf32>
      %cst_96 = arith.constant dense<0.000000e+00> : vector<64x128xf32>
      %117 = tpu.matmul %113, %116, %cst_96 {dimension_numbers = #tpu.dot_dimension_numbers<[1], [0], [0], [1], [0, 0, 1, 1], [], []>, precision = #tpu.contract_precision<fp32>} : vector<64x128xf32>, vector<128x128xf32>, vector<64x128xf32> -> vector<64x128xf32>
      %118 = arith.addf %115, %117 : vector<64x128xf32>
      %cst_97 = arith.constant 2.000000e+00 : f32
      %119 = vector.broadcast %cst_97 : f32 to vector<64x128xf32>
      %120 = arith.mulf %119, %113 : vector<64x128xf32>
      %c0_98 = arith.constant 0 : index
      %c0_99 = arith.constant 0 : index
      %121 = vector.load %arg11[%c0_98, %c0_99] : memref<64x128xf32, #tpu.memory_space<vmem>>, vector<64x128xf32>
      %122 = arith.subf %120, %121 : vector<64x128xf32>
      %c0_100 = arith.constant 0 : index
      %c0_101 = arith.constant 0 : index
      %123 = vector.load %arg3[%c0_100, %c0_101] : memref<64x128xf32, #tpu.memory_space<vmem>>, vector<64x128xf32>
      %124 = arith.mulf %123, %118 : vector<64x128xf32>
      %125 = arith.addf %122, %124 : vector<64x128xf32>
      %c0_102 = arith.constant 0 : index
      %c0_103 = arith.constant 0 : index
      %126 = vector.load %arg11[%c0_102, %c0_103] : memref<64x128xf32, #tpu.memory_space<vmem>>, vector<64x128xf32>
      tpu.vector_store %arg11[%c0_102, %c0_103], %125 {strides = array<i32>} : memref<64x128xf32, #tpu.memory_space<vmem>>, vector<64x128xf32>,
      %127 = arith.index_cast %arg0 : i32 to index
      %128 = arith.index_cast %112 : i32 to index
      %129 = memref.load %arg9[%127, %128] : memref<4x32xf32, #tpu.memory_space<smem>>
      %130 = arith.index_cast %1 : i32 to index
      %c0_104 = arith.constant 0 : index
      %131 = vector.load %arg11[%130, %c0_104] : memref<64x128xf32, #tpu.memory_space<vmem>>, vector<1x128xf32>
      %c0_105 = arith.constant 0 : index
      %c0_106 = arith.constant 0 : index
      %c0_107 = arith.constant 0 : index
      %132 = vector.load %arg6[%c0_105, %c0_106, %c0_107] : memref<1x1x128xf32, #tpu.memory_space<vmem>>, vector<1x1x128xf32>
      %133 = vector.shape_cast %132 : vector<1x1x128xf32> to vector<1x128xf32>
      %134 = vector.broadcast %129 : f32 to vector<1x128xf32>
      %135 = arith.mulf %134, %133 : vector<1x128xf32>
      %136 = arith.addf %131, %135 : vector<1x128xf32>
      %137 = arith.index_cast %1 : i32 to index
      %c0_108 = arith.constant 0 : index
      %138 = vector.load %arg11[%137, %c0_108] : memref<64x128xf32, #tpu.memory_space<vmem>>, vector<1x128xf32>
      tpu.vector_store %arg11[%137, %c0_108], %136 {strides = array<i32>} : memref<64x128xf32, #tpu.memory_space<vmem>>, vector<1x128xf32>,
      %139 = arith.index_cast %3 : i32 to index
      %c0_109 = arith.constant 0 : index
      %140 = vector.load %arg11[%139, %c0_109] : memref<64x128xf32, #tpu.memory_space<vmem>>, vector<1x128xf32>
      %c0_110 = arith.constant 0 : index
      %c0_111 = arith.constant 0 : index
      %c0_112 = arith.constant 0 : index
      %141 = vector.load %arg8[%c0_110, %c0_111, %c0_112] : memref<1x128x8xf32, #tpu.memory_space<vmem>>, vector<1x128x8xf32>
      %142 = vector.shape_cast %141 : vector<1x128x8xf32> to vector<128x8xf32>
      %cst_113 = arith.constant dense<0.000000e+00> : vector<1x8xf32>
      %143 = tpu.matmul %140, %142, %cst_113 {dimension_numbers = #tpu.dot_dimension_numbers<[1], [0], [0], [1], [0, 0, 1, 1], [], []>} : vector<1x128xf32>, vector<128x8xf32>, vector<1x8xf32> -> vector<1x8xf32>
      %c3 = arith.constant 3 : index
      %c0_114 = arith.constant 0 : index
      %144 = vector.load %arg13[%c3, %c0_114] : memref<8x8xf32, #tpu.memory_space<vmem>>, vector<1x8xf32>
      tpu.vector_store %arg13[%c3, %c0_114], %143 {strides = array<i32>} : memref<8x8xf32, #tpu.memory_space<vmem>>, vector<1x8xf32>,
      %c4_i32_115 = arith.constant 4 : i32
      %145 = arith.addi %10, %c4_i32_115 : i32
      %c0_116 = arith.constant 0 : index
      %c0_117 = arith.constant 0 : index
      %146 = vector.load %arg11[%c0_116, %c0_117] : memref<64x128xf32, #tpu.memory_space<vmem>>, vector<64x128xf32>
      %c0_118 = arith.constant 0 : index
      %c0_119 = arith.constant 0 : index
      %147 = vector.load %arg4[%c0_118, %c0_119] : memref<64x64xf32, #tpu.memory_space<vmem>>, vector<64x64xf32>
      %cst_120 = arith.constant dense<0.000000e+00> : vector<64x128xf32>
      %148 = tpu.matmul %147, %146, %cst_120 {dimension_numbers = #tpu.dot_dimension_numbers<[1], [0], [0], [1], [0, 0, 1, 1], [], []>, precision = #tpu.contract_precision<fp32>} : vector<64x64xf32>, vector<64x128xf32>, vector<64x128xf32> -> vector<64x128xf32>
      %c0_121 = arith.constant 0 : index
      %c0_122 = arith.constant 0 : index
      %149 = vector.load %arg5[%c0_121, %c0_122] : memref<128x128xf32, #tpu.memory_space<vmem>>, vector<128x128xf32>
      %cst_123 = arith.constant dense<0.000000e+00> : vector<64x128xf32>
      %150 = tpu.matmul %146, %149, %cst_123 {dimension_numbers = #tpu.dot_dimension_numbers<[1], [0], [0], [1], [0, 0, 1, 1], [], []>, precision = #tpu.contract_precision<fp32>} : vector<64x128xf32>, vector<128x128xf32>, vector<64x128xf32> -> vector<64x128xf32>
      %151 = arith.addf %148, %150 : vector<64x128xf32>
      %cst_124 = arith.constant 2.000000e+00 : f32
      %152 = vector.broadcast %cst_124 : f32 to vector<64x128xf32>
      %153 = arith.mulf %152, %146 : vector<64x128xf32>
      %c0_125 = arith.constant 0 : index
      %c0_126 = arith.constant 0 : index
      %154 = vector.load %arg12[%c0_125, %c0_126] : memref<64x128xf32, #tpu.memory_space<vmem>>, vector<64x128xf32>
      %155 = arith.subf %153, %154 : vector<64x128xf32>
      %c0_127 = arith.constant 0 : index
      %c0_128 = arith.constant 0 : index
      %156 = vector.load %arg3[%c0_127, %c0_128] : memref<64x128xf32, #tpu.memory_space<vmem>>, vector<64x128xf32>
      %157 = arith.mulf %156, %151 : vector<64x128xf32>
      %158 = arith.addf %155, %157 : vector<64x128xf32>
      %c0_129 = arith.constant 0 : index
      %c0_130 = arith.constant 0 : index
      %159 = vector.load %arg12[%c0_129, %c0_130] : memref<64x128xf32, #tpu.memory_space<vmem>>, vector<64x128xf32>
      tpu.vector_store %arg12[%c0_129, %c0_130], %158 {strides = array<i32>} : memref<64x128xf32, #tpu.memory_space<vmem>>, vector<64x128xf32>,
      %160 = arith.index_cast %arg0 : i32 to index
      %161 = arith.index_cast %145 : i32 to index
      %162 = memref.load %arg9[%160, %161] : memref<4x32xf32, #tpu.memory_space<smem>>
      %163 = arith.index_cast %1 : i32 to index
      %c0_131 = arith.constant 0 : index
      %164 = vector.load %arg12[%163, %c0_131] : memref<64x128xf32, #tpu.memory_space<vmem>>, vector<1x128xf32>
      %c0_132 = arith.constant 0 : index
      %c0_133 = arith.constant 0 : index
      %c0_134 = arith.constant 0 : index
      %165 = vector.load %arg6[%c0_132, %c0_133, %c0_134] : memref<1x1x128xf32, #tpu.memory_space<vmem>>, vector<1x1x128xf32>
      %166 = vector.shape_cast %165 : vector<1x1x128xf32> to vector<1x128xf32>
      %167 = vector.broadcast %162 : f32 to vector<1x128xf32>
      %168 = arith.mulf %167, %166 : vector<1x128xf32>
      %169 = arith.addf %164, %168 : vector<1x128xf32>
      %170 = arith.index_cast %1 : i32 to index
      %c0_135 = arith.constant 0 : index
      %171 = vector.load %arg12[%170, %c0_135] : memref<64x128xf32, #tpu.memory_space<vmem>>, vector<1x128xf32>
      tpu.vector_store %arg12[%170, %c0_135], %169 {strides = array<i32>} : memref<64x128xf32, #tpu.memory_space<vmem>>, vector<1x128xf32>,
      %172 = arith.index_cast %3 : i32 to index
      %c0_136 = arith.constant 0 : index
      %173 = vector.load %arg12[%172, %c0_136] : memref<64x128xf32, #tpu.memory_space<vmem>>, vector<1x128xf32>
      %c0_137 = arith.constant 0 : index
      %c0_138 = arith.constant 0 : index
      %c0_139 = arith.constant 0 : index
      %174 = vector.load %arg8[%c0_137, %c0_138, %c0_139] : memref<1x128x8xf32, #tpu.memory_space<vmem>>, vector<1x128x8xf32>
      %175 = vector.shape_cast %174 : vector<1x128x8xf32> to vector<128x8xf32>
      %cst_140 = arith.constant dense<0.000000e+00> : vector<1x8xf32>
      %176 = tpu.matmul %173, %175, %cst_140 {dimension_numbers = #tpu.dot_dimension_numbers<[1], [0], [0], [1], [0, 0, 1, 1], [], []>} : vector<1x128xf32>, vector<128x8xf32>, vector<1x8xf32> -> vector<1x8xf32>
      %c4 = arith.constant 4 : index
      %c0_141 = arith.constant 0 : index
      %177 = vector.load %arg13[%c4, %c0_141] : memref<8x8xf32, #tpu.memory_space<vmem>>, vector<1x8xf32>
      tpu.vector_store %arg13[%c4, %c0_141], %176 {strides = array<i32>} : memref<8x8xf32, #tpu.memory_space<vmem>>, vector<1x8xf32>,
      %c4_i32_142 = arith.constant 4 : i32
      %178 = arith.addi %10, %c4_i32_142 : i32
      %c1_i32_143 = arith.constant 1 : i32
      %179 = arith.addi %178, %c1_i32_143 : i32
      %c0_144 = arith.constant 0 : index
      %c0_145 = arith.constant 0 : index
      %180 = vector.load %arg12[%c0_144, %c0_145] : memref<64x128xf32, #tpu.memory_space<vmem>>, vector<64x128xf32>
      %c0_146 = arith.constant 0 : index
      %c0_147 = arith.constant 0 : index
      %181 = vector.load %arg4[%c0_146, %c0_147] : memref<64x64xf32, #tpu.memory_space<vmem>>, vector<64x64xf32>
      %cst_148 = arith.constant dense<0.000000e+00> : vector<64x128xf32>
      %182 = tpu.matmul %181, %180, %cst_148 {dimension_numbers = #tpu.dot_dimension_numbers<[1], [0], [0], [1], [0, 0, 1, 1], [], []>, precision = #tpu.contract_precision<fp32>} : vector<64x64xf32>, vector<64x128xf32>, vector<64x128xf32> -> vector<64x128xf32>
      %c0_149 = arith.constant 0 : index
      %c0_150 = arith.constant 0 : index
      %183 = vector.load %arg5[%c0_149, %c0_150] : memref<128x128xf32, #tpu.memory_space<vmem>>, vector<128x128xf32>
      %cst_151 = arith.constant dense<0.000000e+00> : vector<64x128xf32>
      %184 = tpu.matmul %180, %183, %cst_151 {dimension_numbers = #tpu.dot_dimension_numbers<[1], [0], [0], [1], [0, 0, 1, 1], [], []>, precision = #tpu.contract_precision<fp32>} : vector<64x128xf32>, vector<128x128xf32>, vector<64x128xf32> -> vector<64x128xf32>
      %185 = arith.addf %182, %184 : vector<64x128xf32>
      %cst_152 = arith.constant 2.000000e+00 : f32
      %186 = vector.broadcast %cst_152 : f32 to vector<64x128xf32>
      %187 = arith.mulf %186, %180 : vector<64x128xf32>
      %c0_153 = arith.constant 0 : index
      %c0_154 = arith.constant 0 : index
      %188 = vector.load %arg11[%c0_153, %c0_154] : memref<64x128xf32, #tpu.memory_space<vmem>>, vector<64x128xf32>
      %189 = arith.subf %187, %188 : vector<64x128xf32>
      %c0_155 = arith.constant 0 : index
      %c0_156 = arith.constant 0 : index
      %190 = vector.load %arg3[%c0_155, %c0_156] : memref<64x128xf32, #tpu.memory_space<vmem>>, vector<64x128xf32>
      %191 = arith.mulf %190, %185 : vector<64x128xf32>
      %192 = arith.addf %189, %191 : vector<64x128xf32>
      %c0_157 = arith.constant 0 : index
      %c0_158 = arith.constant 0 : index
      %193 = vector.load %arg11[%c0_157, %c0_158] : memref<64x128xf32, #tpu.memory_space<vmem>>, vector<64x128xf32>
      tpu.vector_store %arg11[%c0_157, %c0_158], %192 {strides = array<i32>} : memref<64x128xf32, #tpu.memory_space<vmem>>, vector<64x128xf32>,
      %194 = arith.index_cast %arg0 : i32 to index
      %195 = arith.index_cast %179 : i32 to index
      %196 = memref.load %arg9[%194, %195] : memref<4x32xf32, #tpu.memory_space<smem>>
      %197 = arith.index_cast %1 : i32 to index
      %c0_159 = arith.constant 0 : index
      %198 = vector.load %arg11[%197, %c0_159] : memref<64x128xf32, #tpu.memory_space<vmem>>, vector<1x128xf32>
      %c0_160 = arith.constant 0 : index
      %c0_161 = arith.constant 0 : index
      %c0_162 = arith.constant 0 : index
      %199 = vector.load %arg6[%c0_160, %c0_161, %c0_162] : memref<1x1x128xf32, #tpu.memory_space<vmem>>, vector<1x1x128xf32>
      %200 = vector.shape_cast %199 : vector<1x1x128xf32> to vector<1x128xf32>
      %201 = vector.broadcast %196 : f32 to vector<1x128xf32>
      %202 = arith.mulf %201, %200 : vector<1x128xf32>
      %203 = arith.addf %198, %202 : vector<1x128xf32>
      %204 = arith.index_cast %1 : i32 to index
      %c0_163 = arith.constant 0 : index
      %205 = vector.load %arg11[%204, %c0_163] : memref<64x128xf32, #tpu.memory_space<vmem>>, vector<1x128xf32>
      tpu.vector_store %arg11[%204, %c0_163], %203 {strides = array<i32>} : memref<64x128xf32, #tpu.memory_space<vmem>>, vector<1x128xf32>,
      %206 = arith.index_cast %3 : i32 to index
      %c0_164 = arith.constant 0 : index
      %207 = vector.load %arg11[%206, %c0_164] : memref<64x128xf32, #tpu.memory_space<vmem>>, vector<1x128xf32>
      %c0_165 = arith.constant 0 : index
      %c0_166 = arith.constant 0 : index
      %c0_167 = arith.constant 0 : index
      %208 = vector.load %arg8[%c0_165, %c0_166, %c0_167] : memref<1x128x8xf32, #tpu.memory_space<vmem>>, vector<1x128x8xf32>
      %209 = vector.shape_cast %208 : vector<1x128x8xf32> to vector<128x8xf32>
      %cst_168 = arith.constant dense<0.000000e+00> : vector<1x8xf32>
      %210 = tpu.matmul %207, %209, %cst_168 {dimension_numbers = #tpu.dot_dimension_numbers<[1], [0], [0], [1], [0, 0, 1, 1], [], []>} : vector<1x128xf32>, vector<128x8xf32>, vector<1x8xf32> -> vector<1x8xf32>
      %c5 = arith.constant 5 : index
      %c0_169 = arith.constant 0 : index
      %211 = vector.load %arg13[%c5, %c0_169] : memref<8x8xf32, #tpu.memory_space<vmem>>, vector<1x8xf32>
      tpu.vector_store %arg13[%c5, %c0_169], %210 {strides = array<i32>} : memref<8x8xf32, #tpu.memory_space<vmem>>, vector<1x8xf32>,
      %c6_i32 = arith.constant 6 : i32
      %212 = arith.addi %10, %c6_i32 : i32
      %c0_170 = arith.constant 0 : index
      %c0_171 = arith.constant 0 : index
      %213 = vector.load %arg11[%c0_170, %c0_171] : memref<64x128xf32, #tpu.memory_space<vmem>>, vector<64x128xf32>
      %c0_172 = arith.constant 0 : index
      %c0_173 = arith.constant 0 : index
      %214 = vector.load %arg4[%c0_172, %c0_173] : memref<64x64xf32, #tpu.memory_space<vmem>>, vector<64x64xf32>
      %cst_174 = arith.constant dense<0.000000e+00> : vector<64x128xf32>
      %215 = tpu.matmul %214, %213, %cst_174 {dimension_numbers = #tpu.dot_dimension_numbers<[1], [0], [0], [1], [0, 0, 1, 1], [], []>, precision = #tpu.contract_precision<fp32>} : vector<64x64xf32>, vector<64x128xf32>, vector<64x128xf32> -> vector<64x128xf32>
      %c0_175 = arith.constant 0 : index
      %c0_176 = arith.constant 0 : index
      %216 = vector.load %arg5[%c0_175, %c0_176] : memref<128x128xf32, #tpu.memory_space<vmem>>, vector<128x128xf32>
      %cst_177 = arith.constant dense<0.000000e+00> : vector<64x128xf32>
      %217 = tpu.matmul %213, %216, %cst_177 {dimension_numbers = #tpu.dot_dimension_numbers<[1], [0], [0], [1], [0, 0, 1, 1], [], []>, precision = #tpu.contract_precision<fp32>} : vector<64x128xf32>, vector<128x128xf32>, vector<64x128xf32> -> vector<64x128xf32>
      %218 = arith.addf %215, %217 : vector<64x128xf32>
      %cst_178 = arith.constant 2.000000e+00 : f32
      %219 = vector.broadcast %cst_178 : f32 to vector<64x128xf32>
      %220 = arith.mulf %219, %213 : vector<64x128xf32>
      %c0_179 = arith.constant 0 : index
      %c0_180 = arith.constant 0 : index
      %221 = vector.load %arg12[%c0_179, %c0_180] : memref<64x128xf32, #tpu.memory_space<vmem>>, vector<64x128xf32>
      %222 = arith.subf %220, %221 : vector<64x128xf32>
      %c0_181 = arith.constant 0 : index
      %c0_182 = arith.constant 0 : index
      %223 = vector.load %arg3[%c0_181, %c0_182] : memref<64x128xf32, #tpu.memory_space<vmem>>, vector<64x128xf32>
      %224 = arith.mulf %223, %218 : vector<64x128xf32>
      %225 = arith.addf %222, %224 : vector<64x128xf32>
      %c0_183 = arith.constant 0 : index
      %c0_184 = arith.constant 0 : index
      %226 = vector.load %arg12[%c0_183, %c0_184] : memref<64x128xf32, #tpu.memory_space<vmem>>, vector<64x128xf32>
      tpu.vector_store %arg12[%c0_183, %c0_184], %225 {strides = array<i32>} : memref<64x128xf32, #tpu.memory_space<vmem>>, vector<64x128xf32>,
      %227 = arith.index_cast %arg0 : i32 to index
      %228 = arith.index_cast %212 : i32 to index
      %229 = memref.load %arg9[%227, %228] : memref<4x32xf32, #tpu.memory_space<smem>>
      %230 = arith.index_cast %1 : i32 to index
      %c0_185 = arith.constant 0 : index
      %231 = vector.load %arg12[%230, %c0_185] : memref<64x128xf32, #tpu.memory_space<vmem>>, vector<1x128xf32>
      %c0_186 = arith.constant 0 : index
      %c0_187 = arith.constant 0 : index
      %c0_188 = arith.constant 0 : index
      %232 = vector.load %arg6[%c0_186, %c0_187, %c0_188] : memref<1x1x128xf32, #tpu.memory_space<vmem>>, vector<1x1x128xf32>
      %233 = vector.shape_cast %232 : vector<1x1x128xf32> to vector<1x128xf32>
      %234 = vector.broadcast %229 : f32 to vector<1x128xf32>
      %235 = arith.mulf %234, %233 : vector<1x128xf32>
      %236 = arith.addf %231, %235 : vector<1x128xf32>
      %237 = arith.index_cast %1 : i32 to index
      %c0_189 = arith.constant 0 : index
      %238 = vector.load %arg12[%237, %c0_189] : memref<64x128xf32, #tpu.memory_space<vmem>>, vector<1x128xf32>
      tpu.vector_store %arg12[%237, %c0_189], %236 {strides = array<i32>} : memref<64x128xf32, #tpu.memory_space<vmem>>, vector<1x128xf32>,
      %239 = arith.index_cast %3 : i32 to index
      %c0_190 = arith.constant 0 : index
      %240 = vector.load %arg12[%239, %c0_190] : memref<64x128xf32, #tpu.memory_space<vmem>>, vector<1x128xf32>
      %c0_191 = arith.constant 0 : index
      %c0_192 = arith.constant 0 : index
      %c0_193 = arith.constant 0 : index
      %241 = vector.load %arg8[%c0_191, %c0_192, %c0_193] : memref<1x128x8xf32, #tpu.memory_space<vmem>>, vector<1x128x8xf32>
      %242 = vector.shape_cast %241 : vector<1x128x8xf32> to vector<128x8xf32>
      %cst_194 = arith.constant dense<0.000000e+00> : vector<1x8xf32>
      %243 = tpu.matmul %240, %242, %cst_194 {dimension_numbers = #tpu.dot_dimension_numbers<[1], [0], [0], [1], [0, 0, 1, 1], [], []>} : vector<1x128xf32>, vector<128x8xf32>, vector<1x8xf32> -> vector<1x8xf32>
      %c6 = arith.constant 6 : index
      %c0_195 = arith.constant 0 : index
      %244 = vector.load %arg13[%c6, %c0_195] : memref<8x8xf32, #tpu.memory_space<vmem>>, vector<1x8xf32>
      tpu.vector_store %arg13[%c6, %c0_195], %243 {strides = array<i32>} : memref<8x8xf32, #tpu.memory_space<vmem>>, vector<1x8xf32>,
      %c6_i32_196 = arith.constant 6 : i32
      %245 = arith.addi %10, %c6_i32_196 : i32
      %c1_i32_197 = arith.constant 1 : i32
      %246 = arith.addi %245, %c1_i32_197 : i32
      %c0_198 = arith.constant 0 : index
      %c0_199 = arith.constant 0 : index
      %247 = vector.load %arg12[%c0_198, %c0_199] : memref<64x128xf32, #tpu.memory_space<vmem>>, vector<64x128xf32>
      %c0_200 = arith.constant 0 : index
      %c0_201 = arith.constant 0 : index
      %248 = vector.load %arg4[%c0_200, %c0_201] : memref<64x64xf32, #tpu.memory_space<vmem>>, vector<64x64xf32>
      %cst_202 = arith.constant dense<0.000000e+00> : vector<64x128xf32>
      %249 = tpu.matmul %248, %247, %cst_202 {dimension_numbers = #tpu.dot_dimension_numbers<[1], [0], [0], [1], [0, 0, 1, 1], [], []>, precision = #tpu.contract_precision<fp32>} : vector<64x64xf32>, vector<64x128xf32>, vector<64x128xf32> -> vector<64x128xf32>
      %c0_203 = arith.constant 0 : index
      %c0_204 = arith.constant 0 : index
      %250 = vector.load %arg5[%c0_203, %c0_204] : memref<128x128xf32, #tpu.memory_space<vmem>>, vector<128x128xf32>
      %cst_205 = arith.constant dense<0.000000e+00> : vector<64x128xf32>
      %251 = tpu.matmul %247, %250, %cst_205 {dimension_numbers = #tpu.dot_dimension_numbers<[1], [0], [0], [1], [0, 0, 1, 1], [], []>, precision = #tpu.contract_precision<fp32>} : vector<64x128xf32>, vector<128x128xf32>, vector<64x128xf32> -> vector<64x128xf32>
      %252 = arith.addf %249, %251 : vector<64x128xf32>
      %cst_206 = arith.constant 2.000000e+00 : f32
      %253 = vector.broadcast %cst_206 : f32 to vector<64x128xf32>
      %254 = arith.mulf %253, %247 : vector<64x128xf32>
      %c0_207 = arith.constant 0 : index
      %c0_208 = arith.constant 0 : index
      %255 = vector.load %arg11[%c0_207, %c0_208] : memref<64x128xf32, #tpu.memory_space<vmem>>, vector<64x128xf32>
      %256 = arith.subf %254, %255 : vector<64x128xf32>
      %c0_209 = arith.constant 0 : index
      %c0_210 = arith.constant 0 : index
      %257 = vector.load %arg3[%c0_209, %c0_210] : memref<64x128xf32, #tpu.memory_space<vmem>>, vector<64x128xf32>
      %258 = arith.mulf %257, %252 : vector<64x128xf32>
      %259 = arith.addf %256, %258 : vector<64x128xf32>
      %c0_211 = arith.constant 0 : index
      %c0_212 = arith.constant 0 : index
      %260 = vector.load %arg11[%c0_211, %c0_212] : memref<64x128xf32, #tpu.memory_space<vmem>>, vector<64x128xf32>
      tpu.vector_store %arg11[%c0_211, %c0_212], %259 {strides = array<i32>} : memref<64x128xf32, #tpu.memory_space<vmem>>, vector<64x128xf32>,
      %261 = arith.index_cast %arg0 : i32 to index
      %262 = arith.index_cast %246 : i32 to index
      %263 = memref.load %arg9[%261, %262] : memref<4x32xf32, #tpu.memory_space<smem>>
      %264 = arith.index_cast %1 : i32 to index
      %c0_213 = arith.constant 0 : index
      %265 = vector.load %arg11[%264, %c0_213] : memref<64x128xf32, #tpu.memory_space<vmem>>, vector<1x128xf32>
      %c0_214 = arith.constant 0 : index
      %c0_215 = arith.constant 0 : index
      %c0_216 = arith.constant 0 : index
      %266 = vector.load %arg6[%c0_214, %c0_215, %c0_216] : memref<1x1x128xf32, #tpu.memory_space<vmem>>, vector<1x1x128xf32>
      %267 = vector.shape_cast %266 : vector<1x1x128xf32> to vector<1x128xf32>
      %268 = vector.broadcast %263 : f32 to vector<1x128xf32>
      %269 = arith.mulf %268, %267 : vector<1x128xf32>
      %270 = arith.addf %265, %269 : vector<1x128xf32>
      %271 = arith.index_cast %1 : i32 to index
      %c0_217 = arith.constant 0 : index
      %272 = vector.load %arg11[%271, %c0_217] : memref<64x128xf32, #tpu.memory_space<vmem>>, vector<1x128xf32>
      tpu.vector_store %arg11[%271, %c0_217], %270 {strides = array<i32>} : memref<64x128xf32, #tpu.memory_space<vmem>>, vector<1x128xf32>,
      %273 = arith.index_cast %3 : i32 to index
      %c0_218 = arith.constant 0 : index
      %274 = vector.load %arg11[%273, %c0_218] : memref<64x128xf32, #tpu.memory_space<vmem>>, vector<1x128xf32>
      %c0_219 = arith.constant 0 : index
      %c0_220 = arith.constant 0 : index
      %c0_221 = arith.constant 0 : index
      %275 = vector.load %arg8[%c0_219, %c0_220, %c0_221] : memref<1x128x8xf32, #tpu.memory_space<vmem>>, vector<1x128x8xf32>
      %276 = vector.shape_cast %275 : vector<1x128x8xf32> to vector<128x8xf32>
      %cst_222 = arith.constant dense<0.000000e+00> : vector<1x8xf32>
      %277 = tpu.matmul %274, %276, %cst_222 {dimension_numbers = #tpu.dot_dimension_numbers<[1], [0], [0], [1], [0, 0, 1, 1], [], []>} : vector<1x128xf32>, vector<128x8xf32>, vector<1x8xf32> -> vector<1x8xf32>
      %c7 = arith.constant 7 : index
      %c0_223 = arith.constant 0 : index
      %278 = vector.load %arg13[%c7, %c0_223] : memref<8x8xf32, #tpu.memory_space<vmem>>, vector<1x8xf32>
      tpu.vector_store %arg13[%c7, %c0_223], %277 {strides = array<i32>} : memref<8x8xf32, #tpu.memory_space<vmem>>, vector<1x8xf32>,
      %c0_224 = arith.constant 0 : index
      %c0_225 = arith.constant 0 : index
      %279 = vector.load %arg13[%c0_224, %c0_225] : memref<8x8xf32, #tpu.memory_space<vmem>>, vector<8x8xf32>
      %c0_226 = arith.constant 0 : index
      %280 = arith.index_cast %10 : i32 to index
      %c0_227 = arith.constant 0 : index
      %281 = vector.load %arg10[%c0_226, %280, %c0_227] : memref<1x32x8xf32, #tpu.memory_space<vmem>>, vector<1x8x8xf32>
      %282 = vector.shape_cast %281 : vector<1x8x8xf32> to vector<8x8xf32>
      %283 = vector.shape_cast %279 : vector<8x8xf32> to vector<1x8x8xf32>
      tpu.vector_store %arg10[%c0_226, %280, %c0_227], %283 {strides = array<i32>} : memref<1x32x8xf32, #tpu.memory_space<vmem>>, vector<1x8x8xf32>,
    }
    %c4_i32_4 = arith.constant 4 : i32
    return
  }
  func.func @transform_0(%arg0: i32, %arg1: memref<4xi32, #tpu.memory_space<smem>>, %arg2: memref<4xi32, #tpu.memory_space<smem>>) -> (i32, i32) {
    %c0_i32 = arith.constant 0 : i32
    %c0_i32_0 = arith.constant 0 : i32
    %c0_i32_1 = arith.constant 0 : i32
    return %c0_i32, %c0_i32_0 : i32, i32
  }
  func.func @transform_1(%arg0: i32, %arg1: memref<4xi32, #tpu.memory_space<smem>>, %arg2: memref<4xi32, #tpu.memory_space<smem>>) -> (i32, i32) {
    %c0_i32 = arith.constant 0 : i32
    %c0_i32_0 = arith.constant 0 : i32
    %c0_i32_1 = arith.constant 0 : i32
    return %c0_i32, %c0_i32_0 : i32, i32
  }
  func.func @transform_2(%arg0: i32, %arg1: memref<4xi32, #tpu.memory_space<smem>>, %arg2: memref<4xi32, #tpu.memory_space<smem>>) -> (i32, i32) {
    %c0_i32 = arith.constant 0 : i32
    %c0_i32_0 = arith.constant 0 : i32
    %c0_i32_1 = arith.constant 0 : i32
    return %c0_i32, %c0_i32_0 : i32, i32
  }
  func.func @transform_3(%arg0: i32, %arg1: memref<4xi32, #tpu.memory_space<smem>>, %arg2: memref<4xi32, #tpu.memory_space<smem>>) -> (i32, i32, i32) {
    %c0_i32 = arith.constant 0 : i32
    %c0_i32_0 = arith.constant 0 : i32
    %c0_i32_1 = arith.constant 0 : i32
    return %arg0, %c0_i32, %c0_i32_0 : i32, i32, i32
  }
  func.func @transform_4(%arg0: i32, %arg1: memref<4xi32, #tpu.memory_space<smem>>, %arg2: memref<4xi32, #tpu.memory_space<smem>>) -> (i32, i32, i32) {
    %c0_i32 = arith.constant 0 : i32
    %c0_i32_0 = arith.constant 0 : i32
    %c0_i32_1 = arith.constant 0 : i32
    return %arg0, %c0_i32, %c0_i32_0 : i32, i32, i32
  }
  func.func @transform_5(%arg0: i32, %arg1: memref<4xi32, #tpu.memory_space<smem>>, %arg2: memref<4xi32, #tpu.memory_space<smem>>) -> (i32, i32, i32) {
    %c0_i32 = arith.constant 0 : i32
    %c0_i32_0 = arith.constant 0 : i32
    %c0_i32_1 = arith.constant 0 : i32
    return %arg0, %c0_i32, %c0_i32_0 : i32, i32, i32
  }
  func.func @transform_6(%arg0: i32, %arg1: memref<4xi32, #tpu.memory_space<smem>>, %arg2: memref<4xi32, #tpu.memory_space<smem>>) -> (i32, i32) {
    %c0_i32 = arith.constant 0 : i32
    %c0_i32_0 = arith.constant 0 : i32
    %c0_i32_1 = arith.constant 0 : i32
    return %c0_i32, %c0_i32_0 : i32, i32
  }
  func.func @transform_7(%arg0: i32, %arg1: memref<4xi32, #tpu.memory_space<smem>>, %arg2: memref<4xi32, #tpu.memory_space<smem>>) -> (i32, i32, i32) {
    %c0_i32 = arith.constant 0 : i32
    %c0_i32_0 = arith.constant 0 : i32
    %c0_i32_1 = arith.constant 0 : i32
    return %arg0, %c0_i32, %c0_i32_0 : i32, i32, i32
  }
}

</mosaic_0001>

<bundles_post_ra>
// kernel: _total_loss.1
= control target key start
LH: loop header
LB: loop body
LE: loop exit
PB: predicated region body
PF: predicated region fallthrough
CT: control target
= control target key end

     0   :  { %s10045_s14 = smov [#allocation6]   ;;  %s10046_s15 = smov [#allocation7]   ;;  %s16956_s0 = inlined_call_operand.vmem [shape: s32[4], index: 0, kind: input, shape index: {}]   ;;  %s16957_s2 = inlined_call_operand.vmem [shape: f32[64,128], index: 2, kind: input, shape index: {}]   ;;  %s16958_s3 = inlined_call_operand.vmem [shape: f32[64,64], index: 3, kind: input, shape index: {}]   ;;  %s16959_s4 = inlined_call_operand.vmem [shape: f32[128,128], index: 4, kind: input, shape index: {}]   ;;  %s16960_s5 = inlined_call_operand.vmem [shape: f32[4,1,128], index: 5, kind: input, shape index: {}]   ;;  %s16961_s6 = inlined_call_operand.vmem [shape: f32[4,64,8], index: 6, kind: input, shape index: {}]   ;;  %s16962_s7 = inlined_call_operand.vmem [shape: f32[4,128,8], index: 7, kind: input, shape index: {}]   ;;  %s16963_s8 = inlined_call_operand.vmem [shape: f32[4,32], index: 8, kind: input, shape index: {}]   ;;  %s16964_s9 = inlined_call_operand.vmem [shape: f32[4,32,8], index: 9, kind: output, shape index: {}]   ;;  %s16965_s1 = inlined_call_operand.vmem [shape: s32[4], index: 1, kind: input, shape index: {}]  }
   0x1   :  { %s15_s11 = sshll.u32 %s16956_s0, 4  ;;  %s20_s6 = sshll.u32 %s16965_s1, 4  ;;  %s16_s11 = int_to_ptr.vmem [resolvable:$true] %s15_s11  ;;  %s21_s6 = int_to_ptr.vmem [resolvable:$true] %s20_s6 }
   0x2   :  { %18 = dma.vmem_to_smem %s16_s11, 16, %s10045_s14, [#allocation5] }
   0x3   :  { %23 = dma.vmem_to_smem %s21_s6, 16, %s10046_s15, [#allocation5] }
   0x4   :  { %10031 = dma.done.wait [#allocation5], 32 }
   0x5   :  { %10032 = vsyncadd [#allocation5], 4294967264 }
   0x6   :  { %26 = sfence }
   0x7   :  { %27 = vsyncpa [#allocation9], 0  ;;  %s10105_s16 = smov 0  }
   0x8 LB: > { %s10111_s0 = sadd.s32 4294967295, %s10039_s16   ;;  %p9893_p0 = scmp.ge.s32.totalorder %s10039_s16, 1  ;;  %s10039_s16 = sphi %s10105_s16, %s33_s16  }
   0x9   : > { %p226_p1 = scmp.lt.s32.totalorder %s10039_s16, 5  ;;  %s247_s18 = sshll.u32 %s16963_s8, 4  ;;  %s248_s18 = int_to_ptr.vmem [resolvable:$true] %s247_s18 }
   0xa   : > { %p9923_p3 = scmp.eq.s32.totalorder %s10111_s0, 0  ;;  %s10047_s19 = smov [#allocation8]  }
   0xb   : > { %p227_p2 = pnand %p9893_p0, %p226_p1 }
   0xd   : > { %p9919_p4 = pneg %p227_p2  ;;  %282 = sbr.rel (%p227_p2) target bundleno = 3062 (0xbf6), region = 48 }
   0xf   : > { %p9920_p5 = pnand %p9923_p3, %p9919_p4 }
  0x11   : > { %9922 = dma.vmem_to_smem (!%p9920_p5), %s248_s18, 64, %s10047_s19, [#allocation9]  }
  0x12   : > { %10034 = dma.done.wait (%p9923_p3), [#allocation9], 64  }
  0x13   : > { %10036 = vsyncadd (%p9923_p3), [#allocation9], 4294967232 }
  0x14   : > { %289 = sfence }
  0x15   : > { %p324_p6 = scmp.lt.s32.totalorder %s10111_s0, 3  ;;  %s10121_s20 = sld [smem:[#allocation6 + %s10111_s0]]  ;;  %v10048_v0 = vmov 0.0  }
  0x16   : > { %s10124_s21 = sld [smem:[#allocation7 + %s10111_s0]]  ;;  %344 = vst [vmem:[#allocation2] sm:$0xff] %v10048_v0  ;;  %s10142_s13 = smov 0  }
  0x17   : > { %s325_s22 = scalar_select %p324_p6, %s10111_s0, 3  ;;  %345 = vst [vmem:[#allocation2 + $0x8] sm:$0xff] %v10048_v0 }
  0x18   : > { %346 = vst [vmem:[#allocation2 + $0x10] sm:$0xff] %v10048_v0 }
  0x19   : > { %s10130_s25 = scalar_lea.vmem %s16960_s5, %s325_s22  ;;  %s9913_s26 = sshll.u32 %s325_s22, 7  ;;  %347 = vst [vmem:[#allocation2 + $0x18] sm:$0xff] %v10048_v0 }
  0x1a   : > { %s10135_s29 = scalar_lea.vmem %s16962_s7, %s9913_s26  ;;  %s9914_s30 = sshll.u32 %s325_s22, 5  ;;  %348 = vst [vmem:[#allocation2 + $0x20] sm:$0xff] %v10048_v0 }
  0x1b   : > { %s10140_s12 = scalar_lea.vmem %s16964_s9, %s9914_s30  ;;  %349 = vst [vmem:[#allocation2 + $0x28] sm:$0xff] %v10048_v0 }
  0x1c   : > { %350 = vst [vmem:[#allocation2 + $0x30] sm:$0xff] %v10048_v0 }
  0x1d   : > { %351 = vst [vmem:[#allocation2 + $0x38] sm:$0xff] %v10048_v0 }
  0x1e   : > { %352 = vst [vmem:[#allocation3] sm:$0xff] %v10048_v0 }
  0x1f   : > { %353 = vst [vmem:[#allocation3 + $0x8] sm:$0xff] %v10048_v0 }
  0x20   : > { %354 = vst [vmem:[#allocation3 + $0x10] sm:$0xff] %v10048_v0 }
  0x21   : > { %355 = vst [vmem:[#allocation3 + $0x18] sm:$0xff] %v10048_v0 }
  0x22   : > { %356 = vst [vmem:[#allocation3 + $0x20] sm:$0xff] %v10048_v0 }
  0x23   : > { %357 = vst [vmem:[#allocation3 + $0x28] sm:$0xff] %v10048_v0 }
  0x24   : > { %358 = vst [vmem:[#allocation3 + $0x30] sm:$0xff] %v10048_v0 }
  0x25   : > { %359 = vst [vmem:[#allocation3 + $0x38] sm:$0xff] %v10048_v0 }
  0x26 LB: >> { %v398_v1 = vld [vmem:[%s16959_s4 + $0x78] sm:$0xff]  ;;  %v397_v2 = vld [vmem:[%s16959_s4 + $0x70] sm:$0xff]  ;;  %v396_v3 = vld [vmem:[%s16959_s4 + $0x68] sm:$0xff]  ;;  %vm957_vm0 = vcmask 523264   ;;  %s11253_s28 = sshll.u32 %s10043_s13, 3  ;;  %s11286_s22 = scalar_lea.vmem [#allocation3], %s10121_s20  ;;  %s10043_s13 = sphi %s10142_s13, %s365_s13  }
  0x27   : >> { %v10156_v4 = vand.u32 4294901760, %v398_v1  ;;  %v10158_v5 = vand.u32 4294901760, %v397_v2  ;;  %v10160_v6 = vand.u32 4294901760, %v396_v3  ;;  %v395_v7 = vld [vmem:[%s16959_s4 + $0x60] sm:$0xff]  ;;  %v394_v8 = vld [vmem:[%s16959_s4 + $0x58] sm:$0xff]  ;;  %v393_v9 = vld [vmem:[%s16959_s4 + $0x50] sm:$0xff] }
  0x28   : >> { %v10171_v10 = vand.u32 4294901760, %v395_v7  ;;  %v10173_v11 = vand.u32 4294901760, %v394_v8  ;;  %v10175_v12 = vand.u32 4294901760, %v393_v9  ;;  %v392_v13 = vld [vmem:[%s16959_s4 + $0x48] sm:$0xff]  ;;  %v391_v14 = vld [vmem:[%s16959_s4 + $0x40] sm:$0xff]  ;;  %v390_v19 = vld [vmem:[%s16959_s4 + $0x38] sm:$0xff] }
  0x29   : >> { %400 = vmatpush.msra.mxu0 %v10156_v4  ;;  %v10185_v15 = vsub.f32 %v398_v1, %v10156_v4  ;;  %v10188_v16 = vsub.f32 %v397_v2, %v10158_v5  ;;  %715 = vmatpush.msra.mxu3 %v10156_v4  ;;  %v10192_v17 = vsub.f32 %v396_v3, %v10160_v6  ;;  %v10194_v18 = vand.u32 4294901760, %v392_v13  ;;  %v389_v30 = vld [vmem:[%s16959_s4 + $0x30] sm:$0xff]  ;;  %v388_v35 = vld [vmem:[%s16959_s4 + $0x28] sm:$0xff]  ;;  %v387_v45 = vld [vmem:[%s16959_s4 + $0x20] sm:$0xff]  ;;  %s1492_s30 = sshra.s32 %s11253_s28, 7  ;;  %s1497_s15 = sand.u32 127, %s11253_s28 }
  0x2a   : >> { %v10200_v20 = vsub.f32 %v395_v7, %v10171_v10  ;;  %v10203_v21 = vsub.f32 %v394_v8, %v10173_v11  ;;  %v10205_v22 = vand.u32 4294901760, %v391_v14  ;;  %v10208_v23 = vsub.f32 %v393_v9, %v10175_v12  ;;  %v386_v50 = vld [vmem:[%s16959_s4 + $0x18] sm:$0xff]  ;;  %v385_v57 = vld [vmem:[%s16959_s4 + $0x10] sm:$0xff]  ;;  %v367_v58 = vld [vmem:[#allocation2] sm:$0xff]  ;;  %s1494_s10 = sadd.s32 %s10111_s0, %s1492_s30  ;;  %s11291_s23 = scalar_lea.vmem [#allocation3], %s10124_s21 }
  0x2b   : >> { %402 = vmatpush.msra.mxu0 %v10158_v5  ;;  %627 = vmatpush.msra.mxu2 %v10185_v15  ;;  %v16981_v24 = vand.u32 4294901760, %v10185_v15  ;;  %v16979_v25 = vand.u32 4294901760, %v10188_v16  ;;  %v16978_v26 = vand.u32 4294901760, %v10192_v17  ;;  %v10217_v28 = vand.u32 4294901760, %v390_v19  ;;  %v384_v63 = vld [vmem:[%s16959_s4 + $0x8] sm:$0xff]  ;;  %v374_v0 = vld [vmem:[#allocation2 + $0x38] sm:$0xff] }
  0x2c   : >> { %717 = vmatpush.msra.mxu3 %v10158_v5  ;;  %v16976_v27 = vand.u32 4294901760, %v10200_v20  ;;  %v10220_v29 = vsub.f32 %v392_v13, %v10194_v18  ;;  %v16974_v34 = vand.u32 4294901760, %v10203_v21  ;;  %v16973_v36 = vand.u32 4294901760, %v10208_v23  ;;  %s9903_s14 = sshll.u32 %s1494_s10, 7  ;;  %s12144_s6 = scalar_lea.vmem [#allocation2], %s10121_s20 }
  0x2d   : >> { %404 = vmatpush.msra.mxu0 %v10160_v6  ;;  %630 = vmatpush.msra.mxu2 %v10188_v16  ;;  %v499_v31 = vsub.f32 %v10185_v15, %v16981_v24  ;;  %v505_v32 = vsub.f32 %v10188_v16, %v16979_v25  ;;  %v511_v33 = vsub.f32 %v10192_v17, %v16978_v26  ;;  %v10250_v41 = vand.u32 4294901760, %v389_v30  ;;  %s1498_s1 = sadd.s32 %s9903_s14, %s1497_s15  ;;  %s1547_s15 = sadd.s32 1, %s11253_s28 }
  0x2e   : >> { %719 = vmatpush.msra.mxu3 %v10160_v6  ;;  %v10243_v37 = vsub.f32 %v391_v14, %v10205_v22  ;;  %v517_v40 = vsub.f32 %v10200_v20, %v16976_v27  ;;  %v10253_v42 = vand.u32 4294901760, %v388_v35  ;;  %v16972_v43 = vand.u32 4294901760, %v10220_v29  ;;  %v383_v14 = vld [vmem:[%s16959_s4] sm:$0xff]  ;;  %s1499_s19 = sld [smem:[#allocation8 + %s1498_s1]]  ;;  %s2672_s1 = sshra.s32 %s1547_s15, 7 }
  0x2f   : >> { %406 = vmatpush.msra.mxu0 %v10171_v10  ;;  %v500_v38 = vand.u32 4294901760, %v499_v31  ;;  %633 = vmatpush.msra.mxu2 %v10192_v17  ;;  %v506_v39 = vand.u32 4294901760, %v505_v32  ;;  %v10257_v44 = vsub.f32 %v390_v19, %v10217_v28  ;;  %v512_v46 = vand.u32 4294901760, %v511_v33  ;;  %v368_v33 = vld [vmem:[#allocation2 + $0x8] sm:$0xff]  ;;  %s2674_s17 = sadd.s32 %s10111_s0, %s2672_s1  ;;  %s2677_s26 = sand.u32 127, %s1547_s15 }
  0x30   : >> { %721 = vmatpush.msra.mxu3 %v10171_v10  ;;  %v523_v47 = vsub.f32 %v10203_v21, %v16974_v34  ;;  %v529_v48 = vsub.f32 %v10208_v23, %v16973_v36  ;;  %v16971_v49 = vand.u32 4294901760, %v10243_v37  ;;  %v518_v51 = vand.u32 4294901760, %v517_v40  ;;  %s9904_s24 = sshll.u32 %s2674_s17, 7  ;;  %s12149_s14 = scalar_lea.vmem [#allocation2], %s10124_s21 }
  0x31   : >> { %408 = vmatpush.msra.mxu0 %v10173_v11  ;;  %501 = vmatpush.msra.mxu1 %v500_v38  ;;  %v10276_v52 = vand.u32 4294901760, %v387_v45  ;;  %v10279_v53 = vsub.f32 %v389_v30, %v10250_v41  ;;  %v535_v54 = vsub.f32 %v10220_v29, %v16972_v43  ;;  %v16969_v55 = vand.u32 4294901760, %v10257_v44  ;;  %v373_v38 = vld [vmem:[#allocation2 + $0x30] sm:$0xff]  ;;  %s2678_s27 = sadd.s32 %s9904_s24, %s2677_s26  ;;  %s2726_s24 = sadd.s32 2, %s11253_s28 }
  0x32   : >> { %636 = vmatpush.msra.mxu2 %v10200_v20  ;;  %723 = vmatpush.msra.mxu3 %v10173_v11  ;;  %v10288_v56 = vsub.f32 %v388_v35, %v10253_v42  ;;  %v524_v59 = vand.u32 4294901760, %v523_v47  ;;  %v10294_v60 = vand.u32 4294901760, %v386_v50  ;;  %v530_v61 = vand.u32 4294901760, %v529_v48  ;;  %s2679_s11 = sld [smem:[#allocation8 + %s2678_s27]]  ;;  %s3851_s26 = sshra.s32 %s2726_s24, 7 }
  0x33   : >> { %410 = vmatpush.msra.mxu0 %v10175_v12  ;;  %507 = vmatpush.msra.mxu1 %v506_v39  ;;  %v541_v62 = vsub.f32 %v10243_v37, %v16971_v49  ;;  %v10305_v1 = vand.u32 4294901760, %v385_v57  ;;  %v16968_v2 = vand.u32 4294901760, %v10279_v53  ;;  %v10309_v3 = vsub.f32 %v387_v45, %v10276_v52  ;;  %s3853_s27 = sadd.s32 %s10111_s0, %s3851_s26  ;;  %s3856_s15 = sand.u32 127, %s2726_s24 }
  0x34   : >> { %639 = vmatpush.msra.mxu2 %v10203_v21  ;;  %725 = vmatpush.msra.mxu3 %v10175_v12  ;;  %v10311_v7 = vand.u32 4294901760, %v367_v58  ;;  %v536_v8 = vand.u32 4294901760, %v535_v54  ;;  %v547_v9 = vsub.f32 %v10257_v44, %v16969_v55  ;;  %v16966_v13 = vand.u32 4294901760, %v10288_v56  ;;  %v371_v55 = vld [vmem:[#allocation2 + $0x20] sm:$0xff]  ;;  %s365_s13 = sadd.s32 1, %s10043_s13  }
  0x35   : >> { %412 = vmatpush.msra.mxu0 %v10194_v18  ;;  %513 = vmatpush.msra.mxu1 %v512_v46  ;;  %v10323_v19 = vand.u32 4294901760, %v384_v63  ;;  %v10326_v30 = vsub.f32 %v386_v50, %v10294_v60  ;;  %v10331_v32 = vand.u32 4294901760, %v374_v0  ;;  %v542_v35 = vand.u32 4294901760, %v541_v62  ;;  %p362_p7 = scmp.ge.s32.totalorder %s365_s13, 4  }
  0x36   : >> { %642 = vmatpush.msra.mxu2 %v10208_v23  ;;  %727 = vmatpush.msra.mxu3 %v10194_v18  ;;  %v10329_v31 = vsub.f32 %v367_v58, %v10311_v7  ;;  %v553_v39 = vsub.f32 %v10279_v53, %v16968_v2  ;;  %v10339_v40 = vand.u32 4294901760, %v383_v14  ;;  %v16967_v45 = vand.u32 4294901760, %v10309_v3  ;;  %v369_v2 = vld [vmem:[#allocation2 + $0x10] sm:$0xff] }
  0x37   : >> { %414 = vmatpush.msra.mxu0 %v10205_v22  ;;  %519 = vmatpush.msra.mxu1 %v518_v51  ;;  %v10343_v46 = vsub.f32 %v385_v57, %v10305_v1  ;;  %v548_v47 = vand.u32 4294901760, %v547_v9  ;;  %v559_v48 = vsub.f32 %v10288_v56, %v16966_v13  ;;  %v10353_v51 = vand.u32 4294901760, %v368_v33 }
  0x38   : >> { %645 = vmatpush.msra.mxu2 %v10220_v29  ;;  %729 = vmatpush.msra.mxu3 %v10205_v22  ;;  %v10351_v50 = vand.u32 4294901760, %v10329_v31  ;;  %v16970_v54 = vand.u32 4294901760, %v10326_v30  ;;  %v10358_v57 = vsub.f32 %v384_v63, %v10323_v19  ;;  %v10361_v58 = vsub.f32 %v374_v0, %v10331_v32  ;;  %v372_v0 = vld [vmem:[#allocation2 + $0x28] sm:$0xff] }
  0x39   : >> { %416 = vmatpush.msra.mxu0 %v10217_v28  ;;  %525 = vmatpush.msra.mxu1 %v524_v59  ;;  %v10363_v59 = vand.u32 4294901760, %v373_v38  ;;  %v565_v62 = vsub.f32 %v10309_v3, %v16967_v45  ;;  %v16975_v63 = vand.u32 4294901760, %v10343_v46  ;;  %v560_v9 = vand.u32 4294901760, %v559_v48 }
  0x3a   : >> { %648 = vmatpush.msra.mxu2 %v10243_v37  ;;  %731 = vmatpush.msra.mxu3 %v10217_v28  ;;  %17119 = vst [vmem:[#allocation12_spill] sm:$0xff] %v10351_v50  ;;  %v434_v13 = vsub.f32 %v10329_v31, %v10351_v50  ;;  %v10388_v45 = vand.u32 4294901760, %v10361_v58  ;;  %v10409_v36 = vand.u32 4294901760, %v369_v2  ;;  %v10411_v34 = vand.u32 4294901760, %v371_v55 }
  0x3b   : >> { %418 = vmatpush.msra.mxu0 %v10250_v41  ;;  %531 = vmatpush.msra.mxu1 %v530_v61  ;;  %v554_v61 = vand.u32 4294901760, %v553_v39  ;;  %v16977_v39 = vand.u32 4294901760, %v10358_v57  ;;  %v10391_v48 = vsub.f32 %v373_v38, %v10363_v59  ;;  %vm1545_vm1 = vcmask 57344  }
  0x3c   : >> { %651 = vmatpush.msra.mxu2 %v10257_v44  ;;  %733 = vmatpush.msra.mxu3 %v10250_v41  ;;  %v10403_v38 = vand.u32 4294901760, %v434_v13  ;;  %v490_v13 = vsub.f32 %v10361_v58, %v10388_v45  ;;  %v10436_v25 = vsub.f32 %v369_v2, %v10409_v36  ;;  %vm9790_vm2 = vcmask 64512  }
  0x3d   : >> { %420 = vmatpush.msra.mxu0 %v10253_v42  ;;  %537 = vmatpush.msra.mxu1 %v536_v8  ;;  %v10373_v8 = vsub.f32 %v383_v14, %v10339_v40  ;;  %v571_v14 = vsub.f32 %v10326_v30, %v16970_v54  ;;  %17120 = vst [vmem:[#allocation13_spill] sm:$0xff] %v10391_v48 }
  0x3e   : >> { %654 = vmatpush.msra.mxu2 %v10279_v53  ;;  %735 = vmatpush.msra.mxu3 %v10253_v42  ;;  %v577_v54 = vsub.f32 %v10343_v46, %v16975_v63  ;;  %v10420_v63 = vand.u32 4294901760, %v10391_v48 }
  0x3f   : >> { %422 = vmatpush.msra.mxu0 %v10276_v52  ;;  %543 = vmatpush.msra.mxu1 %v542_v35  ;;  %v10380_v35 = vsub.f32 %v368_v33, %v10353_v51  ;;  %v10395_v33 = vand.u32 4294901760, %v372_v0  ;;  %v16980_v49 = vand.u32 4294901760, %v10373_v8 }
  0x40   : >> { %657 = vmatpush.msra.mxu2 %v10288_v56  ;;  %737 = vmatpush.msra.mxu3 %v10276_v52 }
  0x41   : >> { %424 = vmatpush.msra.mxu0 %v10294_v60  ;;  %549 = vmatpush.msra.mxu1 %v548_v47  ;;  %v566_v47 = vand.u32 4294901760, %v565_v62  ;;  %v10407_v43 = vand.u32 4294901760, %v10380_v35  ;;  %v583_v62 = vsub.f32 %v10358_v57, %v16977_v39  ;;  %v10425_v27 = vsub.f32 %v372_v0, %v10395_v33  ;;  %v370_v39 = vld [vmem:[#allocation2 + $0x18] sm:$0xff] }
  0x42   : >> { %660 = vmatpush.msra.mxu2 %v10309_v3  ;;  %739 = vmatpush.msra.mxu3 %v10294_v60  ;;  %v10439_v0 = vsub.f32 %v371_v55, %v10411_v34  ;;  %v10451_v2 = vand.u32 4294901760, %v370_v39 }
  0x43   : >> { %426 = vmatpush.msra.mxu0 %v10305_v1  ;;  %555 = vmatpush.msra.mxu1 %v554_v61  ;;  %v572_v61 = vand.u32 4294901760, %v571_v14  ;;  %v589_v14 = vsub.f32 %v10373_v8, %v16980_v49  ;;  %v442_v26 = vsub.f32 %v10380_v35, %v10407_v43  ;;  %v482_v49 = vsub.f32 %v10391_v48, %v10420_v63 }
  0x44   : >> { %663 = vmatpush.msra.mxu2 %v10326_v30  ;;  %741 = vmatpush.msra.mxu3 %v10305_v1  ;;  %v10449_v24 = vand.u32 4294901760, %v10425_v27 }
  0x45   : >> { %428 = vmatpush.msra.mxu0 %v10323_v19  ;;  %561 = vmatpush.msra.mxu1 %v560_v9  ;;  %v578_v9 = vand.u32 4294901760, %v577_v54  ;;  %v584_v54 = vand.u32 4294901760, %v583_v62  ;;  %v590_v55 = vand.u32 4294901760, %v589_v14  ;;  %v443_v62 = vand.u32 4294901760, %v442_v26 }
  0x46   : >> { %666 = vmatpush.msra.mxu2 %v10343_v46  ;;  %743 = vmatpush.msra.mxu3 %v10323_v19  ;;  %v10464_v48 = vand.u32 4294901760, %v482_v49  ;;  %v10472_v26 = vsub.f32 %v370_v39, %v10451_v2  ;;  %v17123_v14 = vand.u32 4294901760, %v10192_v17  ;;  %v17125_v17 = vand.u32 4294901760, %v10203_v21 }
  0x47   : >> { %430 = vmatpush.msra.mxu0 %v10339_v40  ;;  %567 = vmatpush.msra.mxu1 %v566_v47  ;;  %v10442_v47 = vand.u32 4294901760, %v490_v13  ;;  %v10458_v13 = vand.u32 4294901760, %v10436_v25  ;;  %v17132_v21 = vand.u32 4294901760, %v10309_v3 }
  0x48   : >> { %436 = vmatmul.f32.vlgmr.msra.gmra.mxu0 %v10403_v38  ;;  %669 = vmatpush.msra.mxu2 %v10358_v57 }
  0x49   : >> { %573 = vmatpush.msra.mxu1 %v572_v61  ;;  %745 = vmatpush.msra.mxu3 %v10339_v40  ;;  %v17121_v61 = vand.u32 4294901760, %v10185_v15  ;;  %v474_v15 = vsub.f32 %v10425_v27, %v10449_v24  ;;  %v450_v49 = vsub.f32 %v10436_v25, %v10458_v13 }
  0x4a   : >> { %672 = vmatpush.msra.mxu2 %v10373_v8  ;;  %749 = vmatmul.f32.vlgmr.msra.gmra.mxu3 %v10351_v50  ;;  %v10461_v50 = vand.u32 4294901760, %v10439_v0 }
  0x4b   : >> { %579 = vmatpush.msra.mxu1 %v578_v9  ;;  %675 = vmatmul.f32.vlgmr.msra.gmra.mxu2 %v10329_v31  ;;  %v17122_v9 = vand.u32 4294901760, %v10188_v16  ;;  %v10485_v39 = vand.u32 4294901760, %v474_v15 }
  0x4c   : >> { %991 = vmatpush.msrb.mxu2 %v10331_v32  ;;  %798 = vmatpush.msrb.mxu0 %v17121_v61  ;;  %v466_v16 = vsub.f32 %v10439_v0, %v10461_v50  ;;  %v17124_v61 = vand.u32 4294901760, %v10200_v20  ;;  %v17131_v20 = vand.u32 4294901760, %v10288_v56 }
  0x4d   : >> { %585 = vmatpush.msra.mxu1 %v584_v54  ;;  %1084 = vmatpush.msrb.mxu3 %v10442_v47  ;;  %v457_v54 = vand.u32 4294901760, %v10472_v26 }
  0x4e   : >> { %802 = vmatpush.msrb.mxu0 %v17122_v9  ;;  %993 = vmatpush.msrb.mxu2 %v10363_v59 }
  0x4f   : >> { %591 = vmatpush.msra.mxu1 %v590_v55  ;;  %1090 = vmatpush.msrb.mxu3 %v10464_v48  ;;  %v451_v55 = vand.u32 4294901760, %v450_v49  ;;  %v458_v9 = vsub.f32 %v10472_v26, %v457_v54 }
  0x50   : >> { %444 = vmatmul.f32.gmra.mxu0 %v443_v62  ;;  %593 = vmatmul.f32.vlgmr.msra.gmra.mxu1 %v10311_v7 }
  0x51   : >> { %893 = vmatpush.msrb.mxu1 %v10156_v4  ;;  %806 = vmatpush.msrb.mxu0 %v17123_v14  ;;  %v467_v4 = vand.u32 4294901760, %v466_v16  ;;  %v381_v14 = vld [vmem:[%s16958_s3 + $0x30] sm:$0xff] }
  0x52   : >> { %755 = vmatmul.f32.gmra.mxu3 %v10407_v43  ;;  %995 = vmatpush.msrb.mxu2 %v10395_v33 }
  0x53   : >> { %680 = vmatmul.f32.gmra.mxu2 %v10380_v35  ;;  %895 = vmatpush.msrb.mxu1 %v10158_v5  ;;  %v17126_v5 = vand.u32 4294901760, %v10208_v23  ;;  %v17134_v23 = vand.u32 4294901760, %v10343_v46 }
  0x54   : >> { %810 = vmatpush.msrb.mxu0 %v17124_v61  ;;  %1096 = vmatpush.msrb.mxu3 %v10485_v39 }
  0x55   : >> { %897 = vmatpush.msrb.mxu1 %v10160_v6  ;;  %997 = vmatpush.msrb.mxu2 %v10411_v34  ;;  %v459_v6 = vand.u32 4294901760, %v458_v9 }
  0x56   : >> { %814 = vmatpush.msrb.mxu0 %v17125_v17  ;;  %1102 = vmatpush.msrb.mxu3 %v467_v4  ;;  %v382_v17 = vld [vmem:[%s16958_s3 + $0x38] sm:$0xff] }
  0x57   : >> { %899 = vmatpush.msrb.mxu1 %v10171_v10  ;;  %999 = vmatpush.msrb.mxu2 %v10451_v2  ;;  %v17127_v10 = vand.u32 4294901760, %v10220_v29  ;;  %v17136_v29 = vand.u32 4294901760, %v10373_v8  ;;  %v379_v8 = vld [vmem:[%s16958_s3 + $0x20] sm:$0xff] }
  0x58   : >> { %452 = vmatmul.f32.gmra.mxu0 %v451_v55  ;;  %597 = vmatmul.f32.gmra.mxu1 %v10353_v51 }
  0x59   : >> { %901 = vmatpush.msrb.mxu1 %v10173_v11  ;;  %818 = vmatpush.msrb.mxu0 %v17126_v5  ;;  %v17128_v11 = vand.u32 4294901760, %v10243_v37  ;;  %v375_v37 = vld [vmem:[%s16958_s3] sm:$0xff] }
  0x5a   : >> { %761 = vmatmul.f32.gmra.mxu3 %v10458_v13  ;;  %1001 = vmatpush.msrb.mxu2 %v10409_v36 }
  0x5b   : >> { %685 = vmatmul.f32.gmra.mxu2 %v10436_v25  ;;  %903 = vmatpush.msrb.mxu1 %v10175_v12  ;;  %v17129_v12 = vand.u32 4294901760, %v10257_v44  ;;  %v376_v44 = vld [vmem:[%s16958_s3 + $0x8] sm:$0xff] }
  0x5c   : >> { %822 = vmatpush.msrb.mxu0 %v17127_v10  ;;  %1108 = vmatpush.msrb.mxu3 %v459_v6 }
  0x5d   : >> { %905 = vmatpush.msrb.mxu1 %v10194_v18  ;;  %1003 = vmatpush.msrb.mxu2 %v10353_v51  ;;  %v17130_v18 = vand.u32 4294901760, %v10279_v53 }
  0x5e   : >> { %826 = vmatpush.msrb.mxu0 %v17128_v11  ;;  %1114 = vmatpush.msrb.mxu3 %v451_v55  ;;  %v977_v55 = vsel %vm957_vm0, %v381_v14, 0 }
  0x5f   : >> { %907 = vmatpush.msrb.mxu1 %v10205_v22  ;;  %1005 = vmatpush.msrb.mxu2 %v10311_v7  ;;  %v17133_v22 = vand.u32 4294901760, %v10326_v30 }
  0x60   : >> { %460 = vmatmul.f32.gmra.mxu0 %v459_v6  ;;  %601 = vmatmul.f32.gmra.mxu1 %v10409_v36  ;;  %v980_v6 = vsel %vm957_vm0, %v382_v17, 0 }
  0x61   : >> { %830 = vmatpush.msrb.mxu0 %v17129_v12  ;;  %909 = vmatpush.msrb.mxu1 %v10217_v28  ;;  %v17135_v28 = vand.u32 4294901760, %v10358_v57 }
  0x62   : >> { %767 = vmatmul.f32.gmra.mxu3 %v457_v54  ;;  %1317 = vmatpush.msra.mxu2 %v10388_v45 }
  0x63   : >> { %690 = vmatmul.f32.gmra.mxu2 %v10472_v26  ;;  %834 = vmatpush.msrb.mxu0 %v17130_v18 }
  0x64   : >> { %911 = vmatpush.msrb.mxu1 %v10250_v41  ;;  %1120 = vmatpush.msrb.mxu3 %v443_v62  ;;  %v959_v41 = vsel %vm957_vm0, %v375_v37, 0  ;;  %v380_v62 = vld [vmem:[%s16958_s3 + $0x28] sm:$0xff] }
  0x65   : >> { %838 = vmatpush.msrb.mxu0 %v17131_v20  ;;  %1321 = vmatpush.msra.mxu2 %v10420_v63 }
  0x66   : >> { %913 = vmatpush.msrb.mxu1 %v10253_v42  ;;  %1126 = vmatpush.msrb.mxu3 %v10403_v38  ;;  %v17137_v42 = vld [vmem:[#allocation13_spill] sm:$0xff]  ;;  %v971_v38 = vsel %vm957_vm0, %v379_v8, 0 }
  0x67   : >> { %842 = vmatpush.msrb.mxu0 %v17132_v21  ;;  %1325 = vmatpush.msra.mxu2 %v10449_v24 }
  0x68   : >> { %1388 = vmatpush.msra.mxu3 %v10331_v32  ;;  %468 = vmatmul.f32.gmra.mxu0 %v467_v4 }
  0x69   : >> { %605 = vmatmul.f32.gmra.mxu1 %v10451_v2  ;;  %846 = vmatpush.msrb.mxu0 %v17133_v22 }
  0x6a   : >> { %915 = vmatpush.msrb.mxu1 %v10276_v52  ;;  %773 = vmatmul.f32.gmra.mxu3 %v10461_v50  ;;  %v962_v52 = vsel %vm957_vm0, %v376_v44, 0 }
  0x6b   : >> { %695 = vmatmul.f32.gmra.mxu2 %v10439_v0  ;;  %850 = vmatpush.msrb.mxu0 %v17134_v23  ;;  %v10594_v56 = vand.u32 4294901760, %v962_v52 }
  0x6c   : >> { %917 = vmatpush.msrb.mxu1 %v10294_v60  ;;  %1390 = vmatpush.msra.mxu3 %v10363_v59  ;;  %v377_v60 = vld [vmem:[%s16958_s3 + $0x10] sm:$0xff] }
  0x6d   : >> { %1329 = vmatpush.msra.mxu2 %v10461_v50  ;;  %854 = vmatpush.msrb.mxu0 %v17135_v28  ;;  %v965_v3 = vsel %vm957_vm0, %v377_v60, 0 }
  0x6e   : >> { %919 = vmatpush.msrb.mxu1 %v10305_v1  ;;  %1392 = vmatpush.msra.mxu3 %v10395_v33  ;;  %v10610_v1 = vsub.f32 %v962_v52, %v10594_v56 }
  0x6f   : >> { %1333 = vmatpush.msra.mxu2 %v457_v54  ;;  %858 = vmatpush.msrb.mxu0 %v17136_v29 }
  0x70   : >> { %921 = vmatpush.msrb.mxu1 %v10323_v19  ;;  %476 = vmatmul.f32.gmra.mxu0 %v10485_v39  ;;  %v1016_v30 = vand.u32 4294901760, %v10610_v1 }
  0x71   : >> { %609 = vmatmul.f32.gmra.mxu1 %v10411_v34  ;;  %1170 = vmatpush.msra.mxu0 %v10361_v58 }
  0x72   : >> { %923 = vmatpush.msrb.mxu1 %v10339_v40  ;;  %779 = vmatmul.f32.gmra.mxu3 %v10449_v24  ;;  %v10569_v24 = vand.u32 4294901760, %v959_v41  ;;  %v378_v40 = vld [vmem:[%s16958_s3 + $0x18] sm:$0xff] }
  0x73   : >> { %700 = vmatmul.f32.gmra.mxu2 %v10425_v27  ;;  %1173 = vmatpush.msra.mxu0 %v17137_v42  ;;  %v968_v50 = vsel %vm957_vm0, %v378_v40, 0 }
  0x74   : >> { %1242 = vmatpush.msra.mxu1 %v10331_v32  ;;  %1394 = vmatpush.msra.mxu3 %v10411_v34 }
  0x75   : >> { %1337 = vmatpush.msra.mxu2 %v10458_v13  ;;  %1176 = vmatpush.msra.mxu0 %v10425_v27  ;;  %v17138_v27 = vld [vmem:[#allocation12_spill] sm:$0xff] }
  0x76   : >> { %1244 = vmatpush.msra.mxu1 %v10363_v59  ;;  %1396 = vmatpush.msra.mxu3 %v10451_v2 }
  0x77   : >> { %1341 = vmatpush.msra.mxu2 %v10407_v43  ;;  %1179 = vmatpush.msra.mxu0 %v10439_v0  ;;  %v10584_v43 = vsub.f32 %v959_v41, %v10569_v24 }
  0x78   : >> { %1246 = vmatpush.msra.mxu1 %v10395_v33  ;;  %484 = vmatmul.f32.gmra.mxu0 %v10464_v48 }
  0x79   : >> { %613 = vmatmul.f32.gmra.mxu1 %v10395_v33  ;;  %1345 = vmatpush.msra.mxu2 %v17138_v27  ;;  %v1008_v53 = vand.u32 4294901760, %v10584_v43 }
  0x7a   : >> { %1248 = vmatpush.msra.mxu1 %v10411_v34  ;;  %785 = vmatmul.f32.gmra.mxu3 %v10420_v63  ;;  %v10632_v63 = vand.u32 4294901760, %v968_v50 }
  0x7b   : >> { %705 = vmatmul.f32.gmra.mxu2 %v17137_v42  ;;  %1182 = vmatpush.msra.mxu0 %v10472_v26  ;;  %v974_v26 = vsel %vm957_vm0, %v380_v62, 0 }
  0x7c   : >> { %1250 = vmatpush.msra.mxu1 %v10451_v2  ;;  %1398 = vmatpush.msra.mxu3 %v10409_v36  ;;  %v10644_v48 = vsub.f32 %v968_v50, %v10632_v63 }
  0x7d   : >> { %1185 = vmatpush.msra.mxu0 %v10436_v25  ;;  %v1009_v25 = vsub.f32 %v10584_v43, %v1008_v53 }
  0x7e   : >> { %1252 = vmatpush.msra.mxu1 %v10409_v36  ;;  %1400 = vmatpush.msra.mxu3 %v10353_v51 }
  0x7f   : >> { %1188 = vmatpush.msra.mxu0 %v10380_v35  ;;  %v1010_v19 = vand.u32 4294901760, %v1009_v25 }
  0x80   : >> { %492 = vmatmul.f32.gmra.mxu0 %v10442_v47  ;;  %1254 = vmatpush.msra.mxu1 %v10353_v51  ;;  %v1032_v47 = vand.u32 4294901760, %v10644_v48 }
  0x81   : >> { %617 = vmatmul.f32.gmra.mxu1 %v10363_v59  ;;  %1191 = vmatpush.msra.mxu0 %v10329_v31  ;;  %v10616_v31 = vand.u32 4294901760, %v965_v3 }
  0x82   : >> { %791 = vmatmul.f32.gmra.mxu3 %v10388_v45  ;;  %1256 = vmatpush.msra.mxu1 %v10311_v7  ;;  %v1017_v45 = vsub.f32 %v10610_v1, %v1016_v30  ;;  %v1033_v13 = vsub.f32 %v10644_v48, %v1032_v47 }
  0x83   : >> { %710 = vmatmul.f32.gmra.mxu2 %v10361_v58  ;;  %1402 = vmatpush.msra.mxu3 %v10311_v7  ;;  %v10628_v46 = vsub.f32 %v965_v3, %v10616_v31 }
  0x84   : >> { %v1018_v57 = vand.u32 4294901760, %v1017_v45  ;;  %v1034_v49 = vand.u32 4294901760, %v1033_v13 }
  0x85   : >> { %v1024_v58 = vand.u32 4294901760, %v10628_v46 }
  0x87   : >> { %v1025_v35 = vsub.f32 %v10628_v46, %v1024_v58 }
  0x88   : >> { %860 = vmatmul.f32.vlgmr.msrb.gmra.mxu0 %v10311_v7 }
  0x89   : >> { %621 = vmatmul.f32.gmra.mxu1 %v10331_v32  ;;  %v1026_v0 = vand.u32 4294901760, %v1025_v35 }
  0x8a   : >> { %1128 = vmatmul.f32.vlgmr.msrb.gmra.mxu3 %v10569_v24 }
  0x8b   : >> { %1011 = vmatmul.f32.vlgmr.msrb.gmra.mxu2 %v1010_v19 }
  0x90   : >> { %864 = vmatmul.f32.gmra.mxu0 %v10353_v51 }
  0x91   : >> { %925 = vmatmul.f32.vlgmr.msrb.gmra.mxu1 %v10311_v7  ;;  %v10648_v7 = vand.u32 4294901760, %v971_v38 }
  0x92   : >> { %1132 = vmatmul.f32.gmra.mxu3 %v10594_v56 }
  0x93   : >> { %1019 = vmatmul.f32.gmra.mxu2 %v1018_v57  ;;  %v10660_v15 = vsub.f32 %v971_v38, %v10648_v7 }
  0x95   : >> { %v1040_v16 = vand.u32 4294901760, %v10660_v15 }
  0x97   : >> { %v1041_v39 = vsub.f32 %v10660_v15, %v1040_v16 }
  0x98   : >> { %868 = vmatmul.f32.gmra.mxu0 %v10409_v36 }
  0x99   : >> { %929 = vmatmul.f32.gmra.mxu1 %v10353_v51  ;;  %v10664_v51 = vand.u32 4294901760, %v974_v26  ;;  %v1042_v61 = vand.u32 4294901760, %v1041_v39 }
  0x9a   : >> { %1136 = vmatmul.f32.gmra.mxu3 %v10616_v31 }
  0x9b   : >> { %1027 = vmatmul.f32.gmra.mxu2 %v1026_v0  ;;  %v10676_v54 = vsub.f32 %v974_v26, %v10664_v51 }
  0x9d   : >> { %v1048_v4 = vand.u32 4294901760, %v10676_v54 }
  0x9f   : >> { %v1049_v9 = vsub.f32 %v10676_v54, %v1048_v4 }
  0xa0   : >> { %872 = vmatmul.f32.gmra.mxu0 %v10451_v2 }
  0xa1   : >> { %933 = vmatmul.f32.gmra.mxu1 %v10409_v36  ;;  %v10680_v36 = vand.u32 4294901760, %v977_v55  ;;  %v1050_v10 = vand.u32 4294901760, %v1049_v9 }
  0xa2   : >> { %1140 = vmatmul.f32.gmra.mxu3 %v10632_v63 }
  0xa3   : >> { %1035 = vmatmul.f32.gmra.mxu2 %v1034_v49  ;;  %v10692_v5 = vsub.f32 %v977_v55, %v10680_v36 }
  0xa5   : >> { %v1056_v11 = vand.u32 4294901760, %v10692_v5 }
  0xa7   : >> { %v1057_v12 = vsub.f32 %v10692_v5, %v1056_v11 }
  0xa8   : >> { %876 = vmatmul.f32.gmra.mxu0 %v10411_v34 }
  0xa9   : >> { %937 = vmatmul.f32.gmra.mxu1 %v10451_v2  ;;  %v10696_v2 = vand.u32 4294901760, %v980_v6  ;;  %v1058_v20 = vand.u32 4294901760, %v1057_v12 }
  0xaa   : >> { %1144 = vmatmul.f32.gmra.mxu3 %v10648_v7 }
  0xab   : >> { %1043 = vmatmul.f32.gmra.mxu2 %v1042_v61  ;;  %v10705_v18 = vsub.f32 %v980_v6, %v10696_v2 }
  0xad   : >> { %v1064_v21 = vand.u32 4294901760, %v10705_v18 }
  0xb0   : >> { %880 = vmatmul.f32.gmra.mxu0 %v10395_v33 }
  0xb1   : >> { %941 = vmatmul.f32.gmra.mxu1 %v10411_v34  ;;  %v1065_v34 = vsub.f32 %v10705_v18, %v1064_v21 }
  0xb2   : >> { %1148 = vmatmul.f32.gmra.mxu3 %v10664_v51 }
  0xb3   : >> { %1051 = vmatmul.f32.gmra.mxu2 %v1050_v10  ;;  %v1066_v22 = vand.u32 4294901760, %v1065_v34 }
  0xb8   : >> { %884 = vmatmul.f32.gmra.mxu0 %v10363_v59 }
  0xb9   : >> { %945 = vmatmul.f32.gmra.mxu1 %v10395_v33 }
  0xba   : >> { %1152 = vmatmul.f32.gmra.mxu3 %v10680_v36 }
  0xbb   : >> { %1059 = vmatmul.f32.gmra.mxu2 %v1058_v20  ;;  %v1579_v20 = vld [vmem:[%s16959_s4 + $0x78] sm:$0xff] }
  0xc0   : >> { %888 = vmatmul.f32.gmra.mxu0 %v10331_v32 }
  0xc1   : >> { %949 = vmatmul.f32.gmra.mxu1 %v10363_v59 }
  0xc2   : >> { %1156 = vmatmul.f32.gmra.mxu3 %v10696_v2 }
  0xc3   : >> { %1067 = vmatmul.f32.gmra.mxu2 %v1066_v22 }
  0xc5   : >> { %v10717_v23 = vpop.f32.mrf.mxu0 }
  0xc8   : >> { %1194 = vmatmul.f32.vlgmr.msra.gmra.mxu0 %v10584_v43 }
  0xc9   : >> { %953 = vmatmul.f32.gmra.mxu1 %v10331_v32 }
  0xca   : >> { %1404 = vmatmul.f32.vlgmr.msra.gmra.mxu3 %v10569_v24 }
  0xcb   : >> { %1347 = vmatmul.f32.vlgmr.msra.gmra.mxu2 %v10569_v24 }
  0xcd   : >> { %v10723_v33 = vpop.f32.mrf.mxu0  ;;  %v10725_v28 = vpop.f32.mrf.mxu1 }
  0xce   : >> { %v10727_v29 = vpop.f32.mrf.mxu2  ;;  %v10729_v59 = vpop.f32.mrf.mxu3  ;;  %v595_v10 = vadd.f32 %v10725_v28, %v10717_v23  ;;  %v1578_v23 = vld [vmem:[%s16959_s4 + $0x70] sm:$0xff] }
  0xd0   : >> { %1199 = vmatmul.f32.gmra.mxu0 %v10610_v1  ;;  %v677_v12 = vadd.f32 %v10727_v29, %v595_v10 }
  0xd1   : >> { %1260 = vmatmul.f32.vlgmr.msra.gmra.mxu1 %v1008_v53 }
  0xd2   : >> { %1408 = vmatmul.f32.gmra.mxu3 %v10594_v56  ;;  %v751_v28 = vadd.f32 %v10729_v59, %v677_v12  ;;  %v1577_v59 = vld [vmem:[%s16959_s4 + $0x68] sm:$0xff] }
  0xd3   : >> { %1351 = vmatmul.f32.gmra.mxu2 %v10594_v56 }
  0xd5   : >> { %v10736_v32 = vpop.f32.mrf.mxu0  ;;  %v10738_v37 = vpop.f32.mrf.mxu1 }
  0xd6   : >> { %v10740_v41 = vpop.f32.mrf.mxu2  ;;  %v10742_v42 = vpop.f32.mrf.mxu3 }
  0xd8   : >> { %1204 = vmatmul.f32.gmra.mxu0 %v10628_v46 }
  0xd9   : >> { %1266 = vmatmul.f32.gmra.mxu1 %v1016_v30 }
  0xda   : >> { %1412 = vmatmul.f32.gmra.mxu3 %v10616_v31 }
  0xdb   : >> { %1355 = vmatmul.f32.gmra.mxu2 %v10616_v31 }
  0xdd   : >> { %v10749_v24 = vpop.f32.mrf.mxu0  ;;  %v10751_v44 = vpop.f32.mrf.mxu1 }
  0xde   : >> { %v10753_v27 = vpop.f32.mrf.mxu2  ;;  %v10755_v43 = vpop.f32.mrf.mxu3 }
  0xe0   : >> { %1209 = vmatmul.f32.gmra.mxu0 %v10644_v48 }
  0xe1   : >> { %1272 = vmatmul.f32.gmra.mxu1 %v1024_v58 }
  0xe2   : >> { %1416 = vmatmul.f32.gmra.mxu3 %v10632_v63 }
  0xe3   : >> { %1359 = vmatmul.f32.gmra.mxu2 %v10632_v63 }
  0xe5   : >> { %v10762_v52 = vpop.f32.mrf.mxu0 }
  0xe6   : >> { %v10764_v53 = vpop.f32.mrf.mxu1  ;;  %v10766_v56 = vpop.f32.mrf.mxu2 }
  0xe7   : >> { %v10768_v60 = vpop.f32.mrf.mxu3 }
  0xe8   : >> { %1214 = vmatmul.f32.gmra.mxu0 %v10660_v15 }
  0xe9   : >> { %1278 = vmatmul.f32.gmra.mxu1 %v1032_v47 }
  0xea   : >> { %1420 = vmatmul.f32.gmra.mxu3 %v10648_v7 }
  0xeb   : >> { %1363 = vmatmul.f32.gmra.mxu2 %v10648_v7 }
  0xed   : >> { %v10775_v25 = vpop.f32.mrf.mxu0 }
  0xee   : >> { %v10777_v1 = vpop.f32.mrf.mxu1  ;;  %v10779_v3 = vpop.f32.mrf.mxu2 }
  0xef   : >> { %v10781_v19 = vpop.f32.mrf.mxu3 }
  0xf0   : >> { %1219 = vmatmul.f32.gmra.mxu0 %v10676_v54 }
  0xf1   : >> { %1284 = vmatmul.f32.gmra.mxu1 %v1040_v16 }
  0xf2   : >> { %1424 = vmatmul.f32.gmra.mxu3 %v10664_v51 }
  0xf3   : >> { %1367 = vmatmul.f32.gmra.mxu2 %v10664_v51 }
  0xf5   : >> { %v10788_v30 = vpop.f32.mrf.mxu0 }
  0xf6   : >> { %v10790_v31 = vpop.f32.mrf.mxu1  ;;  %v10792_v40 = vpop.f32.mrf.mxu2 }
  0xf7   : >> { %v10794_v45 = vpop.f32.mrf.mxu3 }
  0xf8   : >> { %1224 = vmatmul.f32.gmra.mxu0 %v10692_v5 }
  0xf9   : >> { %1290 = vmatmul.f32.gmra.mxu1 %v1048_v4 }
  0xfa   : >> { %1428 = vmatmul.f32.gmra.mxu3 %v10680_v36 }
  0xfb   : >> { %1371 = vmatmul.f32.gmra.mxu2 %v10680_v36 }
  0xfd   : >> { %v10801_v46 = vpop.f32.mrf.mxu0 }
  0xfe   : >> { %v10803_v50 = vpop.f32.mrf.mxu1  ;;  %v10805_v57 = vpop.f32.mrf.mxu2 }
  0xff   : >> { %v10807_v58 = vpop.f32.mrf.mxu3 }
 0x100   : >> { %1229 = vmatmul.f32.gmra.mxu0 %v10705_v18  ;;  %v599_v18 = vadd.f32 %v10738_v37, %v10723_v33 }
 0x101   : >> { %1296 = vmatmul.f32.gmra.mxu1 %v1056_v11 }
 0x102   : >> { %1432 = vmatmul.f32.gmra.mxu3 %v10696_v2  ;;  %v682_v29 = vadd.f32 %v10740_v41, %v599_v18 }
 0x103   : >> { %1375 = vmatmul.f32.gmra.mxu2 %v10696_v2 }
 0x105   : >> { %v861_v8 = vpop.f32.mrf.mxu0 }
 0x106   : >> { %v10814_v63 = vpop.f32.mrf.mxu1  ;;  %v10816_v35 = vpop.f32.mrf.mxu2  ;;  %v862_v12 = vadd.f32 %v861_v8, %v751_v28 }
 0x107   : >> { %17139 = vst [vmem:[#allocation13_spill] sm:$0xff] %v10816_v35  ;;  %v10818_v48 = vpop.f32.mrf.mxu3 }
 0x108   : >> { %17140 = vst [vmem:[#allocation12_spill] sm:$0xff] %v10818_v48  ;;  %v10892_v48 = vand.u32 4294901760, %v1578_v23 }
 0x109   : >> { %1302 = vmatmul.f32.gmra.mxu1 %v1064_v21  ;;  %v10874_v21 = vand.u32 4294901760, %v1579_v20 }
 0x10a   : >> { %v10902_v18 = vsub.f32 %v1578_v23, %v10892_v48 }
 0x10b   : >> { %v10890_v37 = vsub.f32 %v1579_v20, %v10874_v21  ;;  %1581 = vmatpush.msrb.mxu1 %v10874_v21  ;;  %v607_v20 = vadd.f32 %v10764_v53, %v10749_v24 }
 0x10c   : >> { %v16986_v28 = vand.u32 4294901760, %v10902_v18 }
 0x10d   : >> { %v865_v38 = vpop.f32.mrf.mxu0  ;;  %v16985_v41 = vand.u32 4294901760, %v10890_v37  ;;  %1808 = vmatpush.msrb.mxu3 %v10890_v37  ;;  %1583 = vmatpush.msrb.mxu1 %v10892_v48 }
 0x10e   : >> { %v926_v0 = vpop.f32.mrf.mxu1  ;;  %v10822_v47 = vpop.f32.mrf.mxu2 }
 0x10f   : >> { %v10824_v7 = vpop.f32.mrf.mxu3  ;;  %v927_v8 = vadd.f32 %v926_v0, %v862_v12  ;;  %v1680_v23 = vsub.f32 %v10890_v37, %v16985_v41  ;;  %1811 = vmatpush.msrb.mxu3 %v10902_v18  ;;  %v1686_v12 = vsub.f32 %v10902_v18, %v16986_v28 }
 0x111   : >> { %v1687_v28 = vand.u32 4294901760, %v1686_v12 }
 0x115   : >> { %v10826_v62 = vpop.f32.mrf.mxu0 }
 0x116   : >> { %v10828_v13 = vpop.f32.mrf.mxu1  ;;  %v10830_v15 = vpop.f32.mrf.mxu2 }
 0x117   : >> { %v10832_v26 = vpop.f32.mrf.mxu3 }
 0x11d   : >> { %v10834_v49 = vpop.f32.mrf.mxu0 }
 0x11e   : >> { %v10836_v16 = vpop.f32.mrf.mxu1  ;;  %v10838_v51 = vpop.f32.mrf.mxu2 }
 0x11f   : >> { %v10840_v14 = vpop.f32.mrf.mxu3 }
 0x125   : >> { %v10842_v39 = vpop.f32.mrf.mxu0 }
 0x126   : >> { %v10844_v54 = vpop.f32.mrf.mxu1  ;;  %v10846_v55 = vpop.f32.mrf.mxu2 }
 0x127   : >> { %v10848_v61 = vpop.f32.mrf.mxu3 }
 0x12d   : >> { %v10850_v4 = vpop.f32.mrf.mxu0 }
 0x12e   : >> { %v10852_v36 = vpop.f32.mrf.mxu1  ;;  %v10854_v17 = vpop.f32.mrf.mxu2 }
 0x12f   : >> { %v10856_v9 = vpop.f32.mrf.mxu3 }
 0x135   : >> { %v10858_v5 = vpop.f32.mrf.mxu0 }
 0x136   : >> { %17141 = vst [vmem:[#allocation14_spill] sm:$0xff] %v10858_v5  ;;  %v10860_v6 = vpop.f32.mrf.mxu1  ;;  %v10864_v11 = vpop.f32.mrf.mxu2  ;;  %v1522_v5 = vld [vmem:[%s10135_s29 + $0x68] sm:$0xff] }
 0x137   : >> { %v10866_v2 = vpop.f32.mrf.mxu3 }
 0x138   : >> { %17142 = vst [vmem:[#allocation15_spill] sm:$0xff] %v10866_v2 }
 0x13d   : >> { %v10876_v34 = vpop.f32.mrf.mxu0 }
 0x13e   : >> { %17143 = vst [vmem:[#allocation16_spill] sm:$0xff] %v10876_v34  ;;  %v10878_v22 = vpop.f32.mrf.mxu1  ;;  %v10885_v10 = vpop.f32.mrf.mxu2  ;;  %v603_v34 = vadd.f32 %v10751_v44, %v10736_v32  ;;  %v1576_v32 = vld [vmem:[%s16959_s4 + $0x60] sm:$0xff]  ;;  %v757_v44 = vadd.f32 %v10742_v42, %v682_v29  ;;  %v1575_v42 = vld [vmem:[%s16959_s4 + $0x58] sm:$0xff]  ;;  %v1681_v29 = vand.u32 4294901760, %v1680_v23 }
 0x13f   : >> { %17144 = vst [vmem:[#allocation17_spill] sm:$0xff] %v10878_v22  ;;  %v10887_v33 = vpop.f32.mrf.mxu3  ;;  %v10924_v53 = vand.u32 4294901760, %v1576_v32  ;;  %v10932_v41 = vand.u32 4294901760, %v1575_v42  ;;  %v692_v22 = vadd.f32 %v10766_v56, %v607_v20 }
 0x140   : >> { %17145 = vst [vmem:[#allocation18_spill] sm:$0xff] %v10885_v10  ;;  %v687_v10 = vadd.f32 %v10753_v27, %v603_v34  ;;  %v866_v0 = vadd.f32 %v865_v38, %v757_v44  ;;  %v1574_v38 = vld [vmem:[%s16959_s4 + $0x50] sm:$0xff]  ;;  %v1013_v44 = vadd.f32 %v10822_v47, %v927_v8  ;;  %1682 = vmatpush.msrb.mxu2 %v1681_v29 }
 0x141   : >> { %17146 = vst [vmem:[#allocation19_spill] sm:$0xff] %v10887_v33  ;;  %v10904_v33 = vand.u32 4294901760, %v1577_v59  ;;  %v10939_v2 = vsub.f32 %v1576_v32, %v10924_v53  ;;  %v10953_v32 = vsub.f32 %v1575_v42, %v10932_v41  ;;  %v10961_v8 = vand.u32 4294901760, %v1574_v38 }
 0x142   : >> { %17147 = vst [vmem:[#allocation20_spill] sm:$0xff] %v10932_v41  ;;  %v931_v56 = vadd.f32 %v10828_v13, %v866_v0  ;;  %v1573_v13 = vld [vmem:[%s16959_s4 + $0x48] sm:$0xff]  ;;  %v763_v42 = vadd.f32 %v10755_v43, %v687_v10  ;;  %1688 = vmatpush.msrb.mxu2 %v1687_v28  ;;  %v10973_v0 = vadd.f32 %v10768_v60, %v692_v22  ;;  %v1572_v43 = vld [vmem:[%s16959_s4 + $0x40] sm:$0xff] }
 0x143   : >> { %1585 = vmatpush.msrb.mxu1 %v10904_v33  ;;  %v10922_v24 = vsub.f32 %v1577_v59, %v10904_v33  ;;  %v611_v59 = vadd.f32 %v10777_v1, %v10762_v52  ;;  %v16987_v47 = vand.u32 4294901760, %v10939_v2  ;;  %17152 = vst [vmem:[#allocation24_spill] sm:$0xff] %v10961_v8  ;;  %v16988_v52 = vand.u32 4294901760, %v10953_v32 }
 0x144   : >> { %v10970_v1 = vand.u32 4294901760, %v1573_v13  ;;  %v1130_v10 = vadd.f32 %v10824_v7, %v1013_v44  ;;  %v1021_v60 = vadd.f32 %v10830_v15, %v931_v56  ;;  %v1571_v7 = vld [vmem:[%s16959_s4 + $0x38] sm:$0xff]  ;;  %v870_v56 = vadd.f32 %v10826_v62, %v763_v42 }
 0x145   : >> { %v1195_v34 = vpop.f32.mrf.mxu0  ;;  %1814 = vmatpush.msrb.mxu3 %v10922_v24  ;;  %1587 = vmatpush.msrb.mxu1 %v10924_v53  ;;  %v1698_v12 = vsub.f32 %v10939_v2, %v16987_v47  ;;  %v10995_v28 = vadd.f32 %v10779_v3, %v611_v59  ;;  %v11006_v59 = vand.u32 4294901760, %v1571_v7  ;;  %v1444_v3 = vld [vmem:[#allocation3] sm:$0xff] }
 0x146   : >> { %v10935_v27 = vpop.f32.mrf.mxu1  ;;  %v10948_v20 = vpop.f32.mrf.mxu2  ;;  %17153 = vst [vmem:[#allocation25_spill] sm:$0xff] %v10970_v1  ;;  %v10992_v22 = vsub.f32 %v1573_v13, %v10970_v1  ;;  %v1196_v15 = vadd.f32 %v1195_v34, %v1130_v10  ;;  %v1134_v62 = vadd.f32 %v10832_v26, %v1021_v60 }
 0x147   : >> { %17148 = vst [vmem:[#allocation21_spill] sm:$0xff] %v10935_v27  ;;  %v10950_v23 = vpop.f32.mrf.mxu3  ;;  %v17151_v27 = vand.u32 4294901760, %v10922_v24  ;;  %1589 = vmatpush.msrb.mxu1 %v10932_v41  ;;  %1817 = vmatpush.msrb.mxu3 %v10939_v2  ;;  %v1699_v47 = vand.u32 4294901760, %v1698_v12  ;;  %v9945_v12 = vld [vmem:[#allocation2] sm:$0xff] }
 0x148   : >> { %17149 = vst [vmem:[#allocation22_spill] sm:$0xff] %v10948_v20  ;;  %v10999_v20 = vand.u32 4294901760, %v1572_v43 }
 0x149   : >> { %17150 = vst [vmem:[#allocation23_spill] sm:$0xff] %v10950_v23  ;;  %v1692_v35 = vsub.f32 %v10922_v24, %v17151_v27  ;;  %v10979_v27 = vsub.f32 %v1574_v38, %v10961_v8  ;;  %1591 = vmatpush.msrb.mxu1 %v10961_v8  ;;  %1820 = vmatpush.msrb.mxu3 %v10953_v32  ;;  %v1524_v38 = vld [vmem:[%s10135_s29 + $0x78] sm:$0xff]  ;;  %v1523_v23 = vld [vmem:[%s10135_s29 + $0x70] sm:$0xff] }
 0x14a   : >> { %17154 = vst [vmem:[#allocation26_spill] sm:$0xff] %v10999_v20  ;;  %1525 = vmatpush.msrb.mxu0 %v1524_v38  ;;  %v1570_v38 = vld [vmem:[%s16959_s4 + $0x30] sm:$0xff]  ;;  %v935_v8 = vadd.f32 %v10836_v16, %v870_v56  ;;  %v1460_v56 = vld [vmem:[%s16957_s2] sm:$0xff] }
 0x14b   : >> { %v1693_v29 = vand.u32 4294901760, %v1692_v35  ;;  %v1704_v35 = vsub.f32 %v10953_v32, %v16988_v52  ;;  %1593 = vmatpush.msrb.mxu1 %v10970_v1  ;;  %17155 = vst [vmem:[#allocation27_spill] sm:$0xff] %v11006_v59  ;;  %1823 = vmatpush.msrb.mxu3 %v10979_v27  ;;  %v11010_v52 = vmul.f32 2.0, %v9945_v12  ;;  %v17156_v34 = vand.u32 4294901760, %v10979_v27 }
 0x14c   : >> { %1526 = vmatpush.msrb.mxu0 %v1523_v23  ;;  %v17157_v1 = vand.u32 4294901760, %v10992_v22  ;;  %v11033_v60 = vand.u32 4294901760, %v1570_v38  ;;  %v1569_v23 = vld [vmem:[%s16959_s4 + $0x28] sm:$0xff] }
 0x14d   : >> { %1694 = vmatpush.msrb.mxu2 %v1693_v29  ;;  %v1705_v44 = vand.u32 4294901760, %v1704_v35  ;;  %v1200_v13 = vpop.f32.mrf.mxu0  ;;  %v1710_v10 = vsub.f32 %v10979_v27, %v17156_v34  ;;  %v11017_v35 = vsub.f32 %v1572_v43, %v10999_v20  ;;  %1595 = vmatpush.msrb.mxu1 %v10999_v20  ;;  %v11028_v43 = vsub.f32 %v1571_v7, %v11006_v59 }
 0x14e   : >> { %v1261_v29 = vpop.f32.mrf.mxu1  ;;  %v1348_v12 = vpop.f32.mrf.mxu2  ;;  %v1716_v34 = vsub.f32 %v10992_v22, %v17157_v1  ;;  %17159 = vst [vmem:[#allocation29_spill] sm:$0xff] %v11033_v60  ;;  %1527 = vmatpush.msrb.mxu0 %v1522_v5  ;;  %v11040_v16 = vand.u32 4294901760, %v1569_v23  ;;  %1826 = vmatpush.msrb.mxu3 %v10992_v22 }
 0x14f   : >> { %1700 = vmatpush.msrb.mxu2 %v1699_v47  ;;  %v1262_v42 = vadd.f32 %v1261_v29, %v1196_v15  ;;  %v1405_v47 = vpop.f32.mrf.mxu3  ;;  %17158 = vst [vmem:[#allocation28_spill] sm:$0xff] %v11028_v43  ;;  %v1711_v20 = vand.u32 4294901760, %v1710_v10  ;;  %v16995_v26 = vand.u32 4294901760, %v11017_v35  ;;  %1597 = vmatpush.msrb.mxu1 %v11006_v59  ;;  %v16998_v15 = vand.u32 4294901760, %v11028_v43  ;;  %v1521_v29 = vld [vmem:[%s10135_s29 + $0x60] sm:$0xff]  ;;  %v1518_v59 = vld [vmem:[%s10135_s29 + $0x48] sm:$0xff] }
 0x150   : >> { %v1717_v7 = vand.u32 4294901760, %v1716_v34  ;;  %17160 = vst [vmem:[#allocation30_spill] sm:$0xff] %v11040_v16  ;;  %v11052_v10 = vsub.f32 %v1570_v38, %v11033_v60  ;;  %1528 = vmatpush.msrb.mxu0 %v1521_v29  ;;  %1829 = vmatpush.msrb.mxu3 %v11017_v35  ;;  %v1029_v38 = vadd.f32 %v10838_v51, %v935_v8 }
 0x151   : >> { %1706 = vmatpush.msrb.mxu2 %v1705_v44  ;;  %v1349_v1 = vadd.f32 %v1348_v12, %v1262_v42  ;;  %v1452_v44 = vsub.f32 %v11010_v52, %v1444_v3  ;;  %v1722_v5 = vsub.f32 %v11017_v35, %v16995_v26  ;;  %v1568_v42 = vld [vmem:[%s16959_s4 + $0x20] sm:$0xff]  ;;  %1599 = vmatpush.msrb.mxu1 %v11033_v60  ;;  %v1520_v12 = vld [vmem:[%s10135_s29 + $0x58] sm:$0xff] }
 0x152   : >> { %v11062_v3 = vsub.f32 %v1569_v23, %v11040_v16  ;;  %v17001_v26 = vand.u32 4294901760, %v11052_v10  ;;  %v11068_v60 = vand.u32 4294901760, %v1568_v42  ;;  %v1201_v23 = vadd.f32 %v1200_v13, %v1134_v62  ;;  %1529 = vmatpush.msrb.mxu0 %v1520_v12  ;;  %1832 = vmatpush.msrb.mxu3 %v11028_v43  ;;  %v9946_v12 = vld [vmem:[#allocation2 + $0x8] sm:$0xff] }
 0x153   : >> { %1712 = vmatpush.msrb.mxu2 %v1711_v20  ;;  %v1406_v52 = vadd.f32 %v1405_v47, %v1349_v1  ;;  %v1728_v20 = vsub.f32 %v11028_v43, %v16998_v15  ;;  %v1723_v34 = vand.u32 4294901760, %v1722_v5  ;;  %v1567_v47 = vld [vmem:[%s16959_s4 + $0x18] sm:$0xff]  ;;  %1601 = vmatpush.msrb.mxu1 %v11040_v16  ;;  %v874_v8 = vadd.f32 %v10834_v49, %v10973_v0  ;;  %v1519_v15 = vld [vmem:[%s10135_s29 + $0x50] sm:$0xff] }
 0x154   : >> { %17161 = vst [vmem:[#allocation31_spill] sm:$0xff] %v11068_v60  ;;  %v1739_v51 = vand.u32 4294901760, %v11062_v3  ;;  %v1734_v16 = vsub.f32 %v11052_v10, %v17001_v26  ;;  %v11083_v13 = vsub.f32 %v1568_v42, %v11068_v60  ;;  %v11085_v62 = vand.u32 4294901760, %v1567_v47  ;;  %1530 = vmatpush.msrb.mxu0 %v1519_v15  ;;  %v1445_v26 = vld [vmem:[#allocation3 + $0x8] sm:$0xff]  ;;  %1835 = vmatpush.msrb.mxu3 %v11052_v10 }
 0x155   : >> { %1718 = vmatpush.msrb.mxu2 %v1717_v7  ;;  %v1468_v1 = vmul.f32 %v1460_v56, %v1406_v52  ;;  %v1729_v29 = vand.u32 4294901760, %v1728_v20  ;;  %v1205_v7 = vpop.f32.mrf.mxu0  ;;  %v1566_v56 = vld [vmem:[%s16959_s4 + $0x10] sm:$0xff]  ;;  %1603 = vmatpush.msrb.mxu1 %v11068_v60  ;;  %v1565_v15 = vld [vmem:[%s16959_s4 + $0x8] sm:$0xff] }
 0x156   : >> { %v1267_v5 = vpop.f32.mrf.mxu1  ;;  %v1352_v52 = vpop.f32.mrf.mxu2  ;;  %v1740_v42 = vsub.f32 %v11062_v3, %v1739_v51  ;;  %v1735_v43 = vand.u32 4294901760, %v1734_v16  ;;  %v17010_v41 = vand.u32 4294901760, %v11083_v13  ;;  %v11097_v60 = vsub.f32 %v1567_v47, %v11085_v62  ;;  %1531 = vmatpush.msrb.mxu0 %v1518_v59  ;;  %1838 = vmatpush.msrb.mxu3 %v11062_v3  ;;  %v9950_v3 = vld [vmem:[#allocation2 + $0x28] sm:$0xff] }
 0x157   : >> { %1724 = vmatpush.msrb.mxu2 %v1723_v34  ;;  %v1476_v49 = vadd.f32 %v1468_v1, %v1452_v44  ;;  %v1268_v0 = vadd.f32 %v1267_v5, %v1201_v23  ;;  %v1409_v20 = vpop.f32.mrf.mxu3  ;;  %v1437_v34 = vmul.f32 2.0, %v9946_v12  ;;  %v11099_v44 = vand.u32 4294901760, %v1566_v56  ;;  %1605 = vmatpush.msrb.mxu1 %v11085_v62  ;;  %v1461_v5 = vld [vmem:[%s16957_s2 + $0x8] sm:$0xff]  ;;  %v1517_v12 = vld [vmem:[%s10135_s29 + $0x40] sm:$0xff] }
 0x158   : >> { %v1138_v23 = vadd.f32 %v10840_v14, %v1029_v38  ;;  %v1741_v16 = vand.u32 4294901760, %v1740_v42  ;;  %v939_v47 = vadd.f32 %v10844_v54, %v874_v8  ;;  %v1746_v14 = vsub.f32 %v11083_v13, %v17010_v41  ;;  %v1564_v54 = vld [vmem:[%s16959_s4] sm:$0xff]  ;;  %1532 = vmatpush.msrb.mxu0 %v1517_v12  ;;  %1841 = vmatpush.msrb.mxu3 %v11083_v13  ;;  %v9947_v41 = vld [vmem:[#allocation2 + $0x10] sm:$0xff] }
 0x159   : >> { %1730 = vmatpush.msrb.mxu2 %v1729_v29  ;;  %1484 = vst [vmem:[#allocation3] sm:$0xff] %v1476_v49  ;;  %v1353_v1 = vadd.f32 %v1352_v52, %v1268_v0  ;;  %v11106_v29 = vand.u32 4294901760, %v1565_v15  ;;  %v17009_v59 = vand.u32 4294901760, %v11097_v60  ;;  %v11119_v38 = vsub.f32 %v1566_v56, %v11099_v44  ;;  %1607 = vmatpush.msrb.mxu1 %v11099_v44  ;;  %v1516_v52 = vld [vmem:[%s10135_s29 + $0x38] sm:$0xff] }
 0x15a   : >> { %v1453_v49 = vsub.f32 %v1437_v34, %v1445_v26  ;;  %v11128_v0 = vand.u32 4294901760, %v1564_v54  ;;  %v775_v56 = vadd.f32 %v10781_v19, %v10995_v28  ;;  %v1747_v42 = vand.u32 4294901760, %v1746_v14  ;;  %1533 = vmatpush.msrb.mxu0 %v1516_v52  ;;  %1844 = vmatpush.msrb.mxu3 %v11097_v60 }
 0x15b   : >> { %1736 = vmatpush.msrb.mxu2 %v1735_v43  ;;  %v1410_v8 = vadd.f32 %v1409_v20, %v1353_v1  ;;  %v11126_v43 = vsub.f32 %v1565_v15, %v11106_v29  ;;  %v1752_v20 = vsub.f32 %v11097_v60, %v17009_v59  ;;  %v17011_v26 = vand.u32 4294901760, %v11119_v38  ;;  %1609 = vmatpush.msrb.mxu1 %v11106_v29  ;;  %v1515_v59 = vld [vmem:[%s10135_s29 + $0x30] sm:$0xff] }
 0x15c   : >> { %v1206_v34 = vadd.f32 %v1205_v7, %v1138_v23  ;;  %v11141_v12 = vsub.f32 %v1564_v54, %v11128_v0  ;;  %v615_v19 = vadd.f32 %v10790_v31, %v10775_v25  ;;  %v1037_v28 = vadd.f32 %v10846_v55, %v939_v47  ;;  %1534 = vmatpush.msrb.mxu0 %v1515_v59  ;;  %v1446_v47 = vld [vmem:[#allocation3 + $0x10] sm:$0xff] }
 0x15d   : >> { %1742 = vmatpush.msrb.mxu2 %v1741_v16  ;;  %v1469_v15 = vmul.f32 %v1461_v5, %v1410_v8  ;;  %v1763_v1 = vand.u32 4294901760, %v11126_v43  ;;  %v1210_v16 = vpop.f32.mrf.mxu0  ;;  %v1753_v7 = vand.u32 4294901760, %v1752_v20  ;;  %v1758_v23 = vsub.f32 %v11119_v38, %v17011_v26  ;;  %1611 = vmatpush.msrb.mxu1 %v11128_v0 }
 0x15e   : >> { %v1273_v14 = vpop.f32.mrf.mxu1  ;;  %v1356_v8 = vpop.f32.mrf.mxu2  ;;  %v1438_v25 = vmul.f32 2.0, %v9947_v41  ;;  %v878_v55 = vadd.f32 %v10842_v39, %v775_v56  ;;  %v1769_v26 = vand.u32 4294901760, %v11141_v12  ;;  %v702_v59 = vadd.f32 %v10792_v40, %v615_v19  ;;  %v1462_v56 = vld [vmem:[%s16957_s2 + $0x10] sm:$0xff]  ;;  %1847 = vmatpush.msrb.mxu3 %v11119_v38  ;;  %v1512_v40 = vld [vmem:[%s10135_s29 + $0x18] sm:$0xff] }
 0x15f   : >> { %1748 = vmatpush.msrb.mxu2 %v1747_v42  ;;  %v1477_v5 = vadd.f32 %v1469_v15, %v1453_v49  ;;  %v1274_v54 = vadd.f32 %v1273_v14, %v1206_v34  ;;  %v1413_v52 = vpop.f32.mrf.mxu3  ;;  %v1764_v31 = vsub.f32 %v11126_v43, %v1763_v1  ;;  %v1514_v42 = vld [vmem:[%s10135_s29 + $0x28] sm:$0xff]  ;;  %v1759_v20 = vand.u32 4294901760, %v1758_v23  ;;  %v1513_v15 = vld [vmem:[%s10135_s29 + $0x20] sm:$0xff] }
 0x160   : >> { %v17162_v49 = vand.u32 4294901760, %v10890_v37  ;;  %1535 = vmatpush.msrb.mxu0 %v1514_v42  ;;  %v943_v39 = vadd.f32 %v10852_v36, %v878_v55  ;;  %v1770_v37 = vsub.f32 %v11141_v12, %v1769_v26  ;;  %v17163_v14 = vand.u32 4294901760, %v10902_v18  ;;  %1850 = vmatpush.msrb.mxu3 %v11126_v43  ;;  %v9951_v43 = vld [vmem:[#allocation2 + $0x30] sm:$0xff] }
 0x161   : >> { %1754 = vmatpush.msrb.mxu2 %v1753_v7  ;;  %1485 = vst [vmem:[#allocation3 + $0x8] sm:$0xff] %v1477_v5  ;;  %v1357_v34 = vadd.f32 %v1356_v8, %v1274_v54  ;;  %v1765_v41 = vand.u32 4294901760, %v1764_v31  ;;  %v1142_v7 = vadd.f32 %v10848_v61, %v1037_v28  ;;  %v1454_v5 = vsub.f32 %v1438_v25, %v1446_v47  ;;  %v1511_v25 = vld [vmem:[%s10135_s29 + $0x10] sm:$0xff] }
 0x162   : >> { %1979 = vmatpush.msra.mxu1 %v17162_v49  ;;  %1536 = vmatpush.msrb.mxu0 %v1513_v15  ;;  %v1771_v36 = vand.u32 4294901760, %v1770_v37  ;;  %v17164_v19 = vand.u32 4294901760, %v10922_v24  ;;  %v619_v61 = vadd.f32 %v10803_v50, %v10788_v30  ;;  %v1045_v18 = vadd.f32 %v10854_v17, %v943_v39  ;;  %v1447_v30 = vld [vmem:[#allocation3 + $0x18] sm:$0xff]  ;;  %v1510_v50 = vld [vmem:[%s10135_s29 + $0x8] sm:$0xff]  ;;  %v1509_v39 = vld [vmem:[%s10135_s29] sm:$0xff] }
 0x163   : >> { %1760 = vmatpush.msrb.mxu2 %v1759_v20  ;;  %v1414_v23 = vadd.f32 %v1413_v52, %v1357_v34  ;;  %v1211_v54 = vadd.f32 %v1210_v16, %v1142_v7  ;;  %v17165_v31 = vand.u32 4294901760, %v10939_v2  ;;  %v781_v24 = vadd.f32 %v10794_v45, %v702_v59  ;;  %v9948_v20 = vld [vmem:[#allocation2 + $0x18] sm:$0xff]  ;;  %1853 = vmatpush.msrb.mxu3 %v11141_v12  ;;  %v1466_v12 = vld [vmem:[%s16957_s2 + $0x30] sm:$0xff] }
 0x164   : >> { %1983 = vmatpush.msra.mxu1 %v17163_v14  ;;  %1537 = vmatpush.msrb.mxu0 %v1512_v40  ;;  %v1439_v49 = vmul.f32 2.0, %v9948_v20  ;;  %v17166_v17 = vand.u32 4294901760, %v10953_v32  ;;  %v707_v34 = vadd.f32 %v10805_v57, %v619_v61  ;;  %v1463_v59 = vld [vmem:[%s16957_s2 + $0x18] sm:$0xff]  ;;  %v17167_v32 = vand.u32 4294901760, %v10979_v27 }
 0x165   : >> { %1766 = vmatpush.msrb.mxu2 %v1765_v41  ;;  %v1470_v8 = vmul.f32 %v1462_v56, %v1414_v23  ;;  %v1215_v28 = vpop.f32.mrf.mxu0  ;;  %v882_v2 = vadd.f32 %v10850_v4, %v781_v24  ;;  %v1146_v41 = vadd.f32 %v10856_v9, %v1045_v18  ;;  %v17168_v57 = vand.u32 4294901760, %v10992_v22  ;;  %v17174_v18 = vld [vmem:[#allocation24_spill] sm:$0xff]  ;;  %v17178_v24 = vld [vmem:[#allocation17_spill] sm:$0xff] }
 0x166   : >> { %1987 = vmatpush.msra.mxu1 %v17164_v19  ;;  %v1279_v52 = vpop.f32.mrf.mxu1  ;;  %v1360_v47 = vpop.f32.mrf.mxu2  ;;  %1538 = vmatpush.msrb.mxu0 %v1511_v25  ;;  %v1455_v15 = vsub.f32 %v1439_v49, %v1447_v30  ;;  %v787_v14 = vadd.f32 %v10807_v58, %v707_v34  ;;  %v623_v27 = vadd.f32 %v10814_v63, %v10801_v46  ;;  %v17169_v23 = vand.u32 4294901760, %v11017_v35  ;;  %v9949_v19 = vld [vmem:[#allocation2 + $0x20] sm:$0xff]  ;;  %v17171_v46 = vld [vmem:[#allocation28_spill] sm:$0xff]  ;;  %v17180_v30 = vld [vmem:[#allocation26_spill] sm:$0xff] }
 0x167   : >> { %1772 = vmatpush.msrb.mxu2 %v1771_v36  ;;  %v1478_v16 = vadd.f32 %v1470_v8, %v1454_v5  ;;  %v1280_v55 = vadd.f32 %v1279_v52, %v1211_v54  ;;  %v1417_v42 = vpop.f32.mrf.mxu3  ;;  %v947_v56 = vadd.f32 %v10860_v6, %v882_v2  ;;  %v1216_v9 = vadd.f32 %v1215_v28, %v1146_v41  ;;  %v17170_v8 = vld [vmem:[#allocation20_spill] sm:$0xff]  ;;  %v1448_v58 = vld [vmem:[#allocation3 + $0x20] sm:$0xff]  ;;  %v17183_v2 = vld [vmem:[#allocation18_spill] sm:$0xff] }
 0x168   : >> { %1991 = vmatpush.msra.mxu1 %v17165_v31  ;;  %1539 = vmatpush.msrb.mxu0 %v1510_v50  ;;  %v1440_v54 = vmul.f32 2.0, %v9949_v19  ;;  %v17172_v63 = vand.u32 4294901760, %v17171_v46  ;;  %v1464_v52 = vld [vmem:[%s16957_s2 + $0x20] sm:$0xff]  ;;  %v17176_v25 = vand.u32 4294901760, %v11052_v10 }
 0x169   : >> { %2074 = vmatpush.msra.mxu2 %v10874_v21  ;;  %1486 = vst [vmem:[#allocation3 + $0x10] sm:$0xff] %v1478_v16  ;;  %v1361_v45 = vadd.f32 %v1360_v47, %v1280_v55 }
 0x16a   : >> { %1995 = vmatpush.msra.mxu1 %v17166_v17  ;;  %1540 = vmatpush.msrb.mxu0 %v1509_v39  ;;  %v1456_v47 = vsub.f32 %v1440_v54, %v1448_v58  ;;  %v17182_v17 = vand.u32 4294901760, %v11083_v13  ;;  %v17186_v13 = vld [vmem:[#allocation16_spill] sm:$0xff]  ;;  %v17193_v54 = vld [vmem:[#allocation22_spill] sm:$0xff] }
 0x16b   : >> { %2076 = vmatpush.msra.mxu2 %v10892_v48  ;;  %v1418_v4 = vadd.f32 %v1417_v42, %v1361_v45  ;;  %v17179_v42 = vld [vmem:[#allocation25_spill] sm:$0xff] }
 0x16c   : >> { %1999 = vmatpush.msra.mxu1 %v17167_v32  ;;  %1896 = vmatpush.msra.mxu0 %v10874_v21  ;;  %v1053_v21 = vadd.f32 %v10864_v11, %v947_v56  ;;  %v17175_v11 = vld [vmem:[#allocation13_spill] sm:$0xff]  ;;  %v17184_v32 = vld [vmem:[#allocation27_spill] sm:$0xff] }
 0x16d   : >> { %2078 = vmatpush.msra.mxu2 %v10904_v33  ;;  %v1471_v37 = vmul.f32 %v1463_v59, %v1418_v4  ;;  %v1220_v6 = vpop.f32.mrf.mxu0  ;;  %v712_v28 = vadd.f32 %v17175_v11, %v623_v27  ;;  %v1449_v4 = vld [vmem:[#allocation3 + $0x28] sm:$0xff]  ;;  %v17188_v27 = vand.u32 4294901760, %v11119_v38  ;;  %v17192_v38 = vld [vmem:[#allocation31_spill] sm:$0xff] }
 0x16e   : >> { %2003 = vmatpush.msra.mxu1 %v17168_v57  ;;  %v1285_v7 = vpop.f32.mrf.mxu1  ;;  %1898 = vmatpush.msra.mxu0 %v10892_v48  ;;  %v1364_v40 = vpop.f32.mrf.mxu2  ;;  %v17173_v48 = vld [vmem:[#allocation14_spill] sm:$0xff] }
 0x16f   : >> { %2080 = vmatpush.msra.mxu2 %v10924_v53  ;;  %v1479_v22 = vadd.f32 %v1471_v37, %v1455_v15  ;;  %v1286_v5 = vadd.f32 %v1285_v7, %v1216_v9  ;;  %v1421_v36 = vpop.f32.mrf.mxu3  ;;  %v886_v61 = vadd.f32 %v17173_v48, %v787_v14  ;;  %v17185_v15 = vand.u32 4294901760, %v11097_v60  ;;  %v17187_v37 = vld [vmem:[#allocation29_spill] sm:$0xff]  ;;  %v1465_v14 = vld [vmem:[%s16957_s2 + $0x28] sm:$0xff] }
 0x170   : >> { %2007 = vmatpush.msra.mxu1 %v17169_v23  ;;  %1900 = vmatpush.msra.mxu0 %v10904_v33  ;;  %v17177_v33 = vld [vmem:[#allocation15_spill] sm:$0xff]  ;;  %v17190_v23 = vld [vmem:[#allocation21_spill] sm:$0xff] }
 0x171   : >> { %2082 = vmatpush.msra.mxu2 %v17170_v8  ;;  %1487 = vst [vmem:[#allocation3 + $0x18] sm:$0xff] %v1479_v22  ;;  %v1365_v35 = vadd.f32 %v1364_v40, %v1286_v5  ;;  %v1150_v31 = vadd.f32 %v17177_v33, %v1053_v21  ;;  %v951_v16 = vadd.f32 %v17178_v24, %v886_v61  ;;  %v17191_v5 = vld [vmem:[#allocation30_spill] sm:$0xff]  ;;  %v1450_v61 = vld [vmem:[#allocation3 + $0x30] sm:$0xff] }
 0x172   : >> { %2011 = vmatpush.msra.mxu1 %v17172_v63  ;;  %1902 = vmatpush.msra.mxu0 %v10924_v53  ;;  %v17181_v53 = vld [vmem:[#allocation12_spill] sm:$0xff] }
 0x173   : >> { %2084 = vmatpush.msra.mxu2 %v17174_v18  ;;  %v1422_v55 = vadd.f32 %v1421_v36, %v1365_v35  ;;  %v1221_v20 = vadd.f32 %v1220_v6, %v1150_v31  ;;  %v793_v10 = vadd.f32 %v17181_v53, %v712_v28  ;;  %v1061_v45 = vadd.f32 %v17183_v2, %v951_v16  ;;  %v17189_v6 = vld [vmem:[#allocation19_spill] sm:$0xff] }
 0x174   : >> { %2015 = vmatpush.msra.mxu1 %v17176_v25  ;;  %1904 = vmatpush.msra.mxu0 %v17170_v8  ;;  %v1503_v2 = vstv %s1499_s19 }
 0x175   : >> { %2086 = vmatpush.msra.mxu2 %v17179_v42  ;;  %v1472_v49 = vmul.f32 %v1464_v52, %v1422_v55  ;;  %v1225_v56 = vpop.f32.mrf.mxu0  ;;  %v890_v57 = vadd.f32 %v17186_v13, %v793_v10  ;;  %v1154_v7 = vadd.f32 %v17189_v6, %v1061_v45 }
 0x176   : >> { %2019 = vmatpush.msra.mxu1 %v1739_v51  ;;  %v1291_v50 = vpop.f32.mrf.mxu1  ;;  %1906 = vmatpush.msra.mxu0 %v17174_v18  ;;  %v1368_v59 = vpop.f32.mrf.mxu2  ;;  %v1441_v51 = vmul.f32 2.0, %v9950_v3  ;;  %v17194_v18 = vld [vmem:[#allocation23_spill] sm:$0xff] }
 0x177   : >> { %2088 = vmatpush.msra.mxu2 %v17180_v30  ;;  %v1480_v34 = vadd.f32 %v1472_v49, %v1456_v47  ;;  %v1292_v41 = vadd.f32 %v1291_v50, %v1221_v20  ;;  %v1425_v39 = vpop.f32.mrf.mxu3  ;;  %v955_v60 = vadd.f32 %v17190_v23, %v890_v57  ;;  %v1226_v40 = vadd.f32 %v1225_v56, %v1154_v7  ;;  %v9952_v47 = vld [vmem:[#allocation2 + $0x38] sm:$0xff] }
 0x178   : >> { %2023 = vmatpush.msra.mxu1 %v17182_v17  ;;  %1908 = vmatpush.msra.mxu0 %v17179_v42  ;;  %v1457_v22 = vsub.f32 %v1441_v51, %v1449_v4  ;;  %v1443_v42 = vmul.f32 2.0, %v9952_v47  ;;  %v1451_v49 = vld [vmem:[#allocation3 + $0x38] sm:$0xff]  ;;  %v1502_v17 = vld [vmem:[%s10130_s25] sm:$0x1] }
 0x179   : >> { %2090 = vmatpush.msra.mxu2 %v17184_v32  ;;  %1488 = vst [vmem:[#allocation3 + $0x20] sm:$0xff] %v1480_v34  ;;  %v1369_v9 = vadd.f32 %v1368_v59, %v1292_v41  ;;  %v1069_v8 = vadd.f32 %v17193_v54, %v955_v60  ;;  %v1504_v45 = vmul.f32 %v1503_v2, %v1502_v17  ;;  %v1556_v47 = vld [vmem:[%s16958_s3] sm:$0xff] }
 0x17a   : >> { %2027 = vmatpush.msra.mxu1 %v17185_v15  ;;  %1910 = vmatpush.msra.mxu0 %v17180_v30  ;;  %v1467_v30 = vld [vmem:[%s16957_s2 + $0x38] sm:$0xff]  ;;  %v1459_v53 = vsub.f32 %v1443_v42, %v1451_v49  ;;  %v2139_v42 = vsel %vm957_vm0, %v1556_v47, 0  ;;  %v1557_v49 = vld [vmem:[%s16958_s3 + $0x8] sm:$0xff] }
 0x17b   : >> { %2092 = vmatpush.msra.mxu2 %v17187_v37  ;;  %v1426_v21 = vadd.f32 %v1425_v39, %v1369_v9  ;;  %v1158_v11 = vadd.f32 %v17194_v18, %v1069_v8 }
 0x17c   : >> { %2031 = vmatpush.msra.mxu1 %v17188_v27  ;;  %1912 = vmatpush.msra.mxu0 %v17184_v32 }
 0x17d   : >> { %2094 = vmatpush.msra.mxu2 %v17191_v5  ;;  %v1473_v36 = vmul.f32 %v1465_v14, %v1426_v21 }
 0x17e   : >> { %2035 = vmatpush.msra.mxu1 %v1763_v1  ;;  %v1297_v19 = vpop.f32.mrf.mxu1  ;;  %1914 = vmatpush.msra.mxu0 %v17187_v37  ;;  %v1372_v63 = vpop.f32.mrf.mxu2  ;;  %v1442_v1 = vmul.f32 2.0, %v9951_v43 }
 0x17f   : >> { %2096 = vmatpush.msra.mxu2 %v17192_v38  ;;  %v1481_v58 = vadd.f32 %v1473_v36, %v1457_v22  ;;  %v1298_v46 = vadd.f32 %v1297_v19, %v1226_v40  ;;  %v1429_v48 = vpop.f32.mrf.mxu3 }
 0x180   : >> { %2039 = vmatpush.msra.mxu1 %v1769_v26  ;;  %1916 = vmatpush.msra.mxu0 %v17191_v5  ;;  %v1230_v26 = vpop.f32.mrf.mxu0  ;;  %v1458_v52 = vsub.f32 %v1442_v1, %v1450_v61 }
 0x181   : >> { %2098 = vmatpush.msra.mxu2 %v11085_v62  ;;  %1489 = vst [vmem:[#allocation3 + $0x28] sm:$0xff] %v1481_v58  ;;  %v1373_v35 = vadd.f32 %v1372_v63, %v1298_v46  ;;  %v1231_v25 = vadd.f32 %v1230_v26, %v1158_v11 }
 0x182   : >> { %1918 = vmatpush.msra.mxu0 %v17192_v38 }
 0x183   : >> { %2100 = vmatpush.msra.mxu2 %v11099_v44  ;;  %v1430_v28 = vadd.f32 %v1429_v48, %v1373_v35 }
 0x184   : >> { %1920 = vmatpush.msra.mxu0 %v11085_v62 }
 0x185   : >> { %2102 = vmatpush.msra.mxu2 %v11106_v29  ;;  %v1474_v33 = vmul.f32 %v1466_v12, %v1430_v28 }
 0x186   : >> { %v1303_v31 = vpop.f32.mrf.mxu1  ;;  %1922 = vmatpush.msra.mxu0 %v11099_v44  ;;  %v1376_v55 = vpop.f32.mrf.mxu2 }
 0x187   : >> { %2104 = vmatpush.msra.mxu2 %v11128_v0  ;;  %v1482_v24 = vadd.f32 %v1474_v33, %v1458_v52  ;;  %v1304_v16 = vadd.f32 %v1303_v31, %v1231_v25  ;;  %v1433_v20 = vpop.f32.mrf.mxu3 }
 0x188   : >> { %1924 = vmatpush.msra.mxu0 %v11106_v29 }
 0x189   : >> { %1490 = vst [vmem:[#allocation3 + $0x30] sm:$0xff] %v1482_v24  ;;  %v1377_v62 = vadd.f32 %v1376_v55, %v1304_v16 }
 0x18a   : >> { %1926 = vmatpush.msra.mxu0 %v11128_v0 }
 0x18b   : >> { %v1434_v44 = vadd.f32 %v1433_v20, %v1377_v62  ;;  %v11430_v20 = vand.u32 4294901760, %v2139_v42 }
 0x18d   : >> { %v1475_v10 = vmul.f32 %v1467_v30, %v1434_v44  ;;  %v11439_v62 = vsub.f32 %v2139_v42, %v11430_v20  ;;  %v2142_v30 = vsel %vm957_vm0, %v1557_v49, 0 }
 0x18f   : >> { %v1483_v50 = vadd.f32 %v1475_v10, %v1459_v53  ;;  %v2188_v44 = vand.u32 4294901760, %v11439_v62  ;;  %v11444_v53 = vand.u32 4294901760, %v2142_v30  ;;  %v1558_v10 = vld [vmem:[%s16958_s3 + $0x10] sm:$0xff] }
 0x190   : >> { %v2145_v2 = vsel %vm957_vm0, %v1558_v10, 0 }
 0x191   : >> { %1491 = vst [vmem:[#allocation3 + $0x38] sm:$0xff] %v1483_v50  ;;  %v2189_v50 = vsub.f32 %v11439_v62, %v2188_v44  ;;  %v11456_v17 = vsub.f32 %v2142_v30, %v11444_v53 }
 0x198   : >> { %v1501_v29 = vld [vmem:[%s11286_s22] sm:$0x1] }
 0x199   : >> { %v1505_v34 = vadd.f32 %v1504_v45, %v1501_v29  ;;  %v2190_v45 = vand.u32 4294901760, %v2189_v50  ;;  %v2196_v29 = vand.u32 4294901760, %v11456_v17 }
 0x19b   : >> { %1506 = vst [vmem:[%s11286_s22] sm:$0x1] %v1505_v34  ;;  %v11461_v34 = vand.u32 4294901760, %v2145_v2 }
 0x1a2   : >> { %v1508_v41 = vld [vmem:[%s11291_s23] sm:$0x1]  ;;  %v1555_v59 = vld [vmem:[#allocation3 + $0x38] sm:$0xff]  ;;  %v1554_v51 = vld [vmem:[#allocation3 + $0x30] sm:$0xff] }
 0x1a3   : >> { %v11294_v0 = vld [vmem:[#allocation3] sm:$0xff]  ;;  %1541 = vmatmul.f32.vlgmr.msrb.gmra.mxu0 %v1508_v41  ;;  %v11299_v3 = vand.u32 4294901760, %v1555_v59  ;;  %v1553_v32 = vld [vmem:[#allocation3 + $0x28] sm:$0xff]  ;;  %v11301_v4 = vand.u32 4294901760, %v1554_v51  ;;  %v1551_v9 = vld [vmem:[#allocation3 + $0x18] sm:$0xff] }
 0x1a4   : >> { %v11297_v39 = vand.u32 4294901760, %v11294_v0  ;;  %v1552_v56 = vld [vmem:[#allocation3 + $0x20] sm:$0xff]  ;;  %v11303_v15 = vand.u32 4294901760, %v1553_v32  ;;  %v11307_v57 = vld [vmem:[#allocation3 + $0x8] sm:$0xff]  ;;  %v11321_v6 = vld [vmem:[#allocation3 + $0x10] sm:$0xff]  ;;  %v11324_v7 = vand.u32 4294901760, %v1551_v9 }
 0x1a5   : >> { %v11305_v13 = vand.u32 4294901760, %v1552_v56  ;;  %2171 = vmatpush.msra.mxu3 %v11299_v3  ;;  %v11316_v14 = vand.u32 4294901760, %v11307_v57  ;;  %v11319_v27 = vsub.f32 %v1555_v59, %v11299_v3  ;;  %v11327_v23 = vsub.f32 %v1554_v51, %v11301_v4  ;;  %v1559_v41 = vld [vmem:[%s16958_s3 + $0x18] sm:$0xff] }
 0x1a6   : >> { %1774 = vmatmul.f32.vlgmr.msrb.gmra.mxu2 %v11297_v39  ;;  %v11313_v37 = vsub.f32 %v11294_v0, %v11297_v39  ;;  %v11330_v60 = vsub.f32 %v1553_v32, %v11303_v15  ;;  %v11345_v40 = vand.u32 4294901760, %v11321_v6  ;;  %v11364_v46 = vsub.f32 %v1551_v9, %v11324_v7 }
 0x1a7   : >> { %2422 = vmatpush.msrb.mxu2 %v11299_v3  ;;  %v11337_v22 = vand.u32 4294901760, %v11319_v27  ;;  %v11340_v5 = vsub.f32 %v1552_v56, %v11305_v13  ;;  %2173 = vmatpush.msra.mxu3 %v11301_v4  ;;  %v11348_v36 = vand.u32 4294901760, %v11327_v23  ;;  %v1621_v8 = vsub.f32 %v11307_v57, %v11316_v14 }
 0x1a8   : >> { %1856 = vmatmul.f32.vlgmr.msrb.gmra.mxu3 %v11313_v37  ;;  %v11334_v21 = vand.u32 4294901760, %v11313_v37  ;;  %v11351_v38 = vand.u32 4294901760, %v11330_v60  ;;  %v1629_v61 = vsub.f32 %v11321_v6, %v11345_v40  ;;  %v1638_v12 = vand.u32 4294901760, %v11364_v46 }
 0x1a9   : >> { %2424 = vmatpush.msrb.mxu2 %v11301_v4  ;;  %v1671_v54 = vsub.f32 %v11319_v27, %v11337_v22  ;;  %2175 = vmatpush.msra.mxu3 %v11303_v15  ;;  %v1663_v58 = vsub.f32 %v11327_v23, %v11348_v36  ;;  %v11370_v43 = vand.u32 4294901760, %v11340_v5  ;;  %v1622_v35 = vand.u32 4294901760, %v1621_v8 }
 0x1aa   : >> { %v1615_v19 = vsub.f32 %v11313_v37, %v11334_v21  ;;  %v1655_v1 = vsub.f32 %v11330_v60, %v11351_v38  ;;  %v1630_v28 = vand.u32 4294901760, %v1629_v61  ;;  %v1639_v25 = vsub.f32 %v11364_v46, %v1638_v12 }
 0x1ab   : >> { %2426 = vmatpush.msrb.mxu2 %v11303_v15  ;;  %1930 = vmatmul.f32.vlgmr.msra.gmra.mxu0 %v11334_v21  ;;  %v11367_v48 = vand.u32 4294901760, %v1671_v54  ;;  %v11381_v26 = vand.u32 4294901760, %v1663_v58  ;;  %v1647_v18 = vsub.f32 %v11340_v5, %v11370_v43  ;;  %v1623_v52 = vsub.f32 %v1621_v8, %v1622_v35 }
 0x1ac   : >> { %v1616_v63 = vand.u32 4294901760, %v1615_v19  ;;  %2177 = vmatpush.msra.mxu3 %v11305_v13  ;;  %v11389_v11 = vand.u32 4294901760, %v1655_v1  ;;  %v1631_v31 = vsub.f32 %v1629_v61, %v1630_v28  ;;  %v1640_v16 = vand.u32 4294901760, %v1639_v25 }
 0x1ad   : >> { %2428 = vmatpush.msrb.mxu2 %v11305_v13  ;;  %2264 = vmatpush.msrb.mxu0 %v11367_v48  ;;  %v1648_v33 = vand.u32 4294901760, %v1647_v18  ;;  %v1624_v24 = vand.u32 4294901760, %v1623_v52  ;;  %v2197_v59 = vsub.f32 %v11456_v17, %v2196_v29  ;;  %v11472_v51 = vsub.f32 %v2145_v2, %v11461_v34 }
 0x1ae   : >> { %1617 = vmatmul.f32.vlgmr.msrb.gmra.mxu1 %v1616_v63  ;;  %1778 = vmatmul.f32.gmra.mxu2 %v11316_v14  ;;  %v1632_v55 = vand.u32 4294901760, %v1631_v31  ;;  %v2148_v32 = vsel %vm957_vm0, %v1559_v41, 0 }
 0x1af   : >> { %2179 = vmatpush.msra.mxu3 %v11324_v7  ;;  %2350 = vmatpush.msrb.mxu1 %v11319_v27  ;;  %v2198_v56 = vand.u32 4294901760, %v2197_v59  ;;  %v2204_v9 = vand.u32 4294901760, %v11472_v51 }
 0x1b0   : >> { %2430 = vmatpush.msrb.mxu2 %v11324_v7  ;;  %1861 = vmatmul.f32.gmra.mxu3 %v1621_v8 }
 0x1b1   : >> { %2270 = vmatpush.msrb.mxu0 %v11381_v26  ;;  %2181 = vmatpush.msra.mxu3 %v11345_v40 }
 0x1b2   : >> { %2353 = vmatpush.msrb.mxu1 %v11327_v23  ;;  %2432 = vmatpush.msrb.mxu2 %v11345_v40 }
 0x1b3   : >> { %2276 = vmatpush.msrb.mxu0 %v11389_v11  ;;  %2183 = vmatpush.msra.mxu3 %v11316_v14 }
 0x1b4   : >> { %2356 = vmatpush.msrb.mxu1 %v11330_v60  ;;  %2434 = vmatpush.msrb.mxu2 %v11316_v14 }
 0x1b5   : >> { %1936 = vmatmul.f32.gmra.mxu0 %v1622_v35  ;;  %2185 = vmatpush.msra.mxu3 %v11297_v39 }
 0x1b6   : >> { %2282 = vmatpush.msrb.mxu0 %v1648_v33  ;;  %2359 = vmatpush.msrb.mxu1 %v11340_v5 }
 0x1b7   : >> { %2436 = vmatpush.msrb.mxu2 %v11297_v39  ;;  %2497 = vmatpush.msrb.mxu3 %v11337_v22 }
 0x1b8   : >> { %1625 = vmatmul.f32.gmra.mxu1 %v1624_v24  ;;  %1782 = vmatmul.f32.gmra.mxu2 %v11345_v40 }
 0x1b9   : >> { %2288 = vmatpush.msrb.mxu0 %v1640_v16  ;;  %2362 = vmatpush.msrb.mxu1 %v11364_v46 }
 0x1ba   : >> { %2501 = vmatpush.msrb.mxu3 %v11348_v36 }
 0x1bb   : >> { %1866 = vmatmul.f32.gmra.mxu3 %v1629_v61  ;;  %2294 = vmatpush.msrb.mxu0 %v1632_v55 }
 0x1bc   : >> { %2365 = vmatpush.msrb.mxu1 %v1629_v61  ;;  %2505 = vmatpush.msrb.mxu3 %v11351_v38 }
 0x1bd   : >> { %2300 = vmatpush.msrb.mxu0 %v1624_v24 }
 0x1be   : >> { %2368 = vmatpush.msrb.mxu1 %v1621_v8  ;;  %2509 = vmatpush.msrb.mxu3 %v11370_v43 }
 0x1bf   : >> { %1942 = vmatmul.f32.gmra.mxu0 %v1630_v28 }
 0x1c0   : >> { %2306 = vmatpush.msrb.mxu0 %v1616_v63  ;;  %2371 = vmatpush.msrb.mxu1 %v11313_v37  ;;  %v11477_v37 = vand.u32 4294901760, %v2148_v32 }
 0x1c1   : >> { %2513 = vmatpush.msrb.mxu3 %v1638_v12  ;;  %1633 = vmatmul.f32.gmra.mxu1 %v1632_v55 }
 0x1c2   : >> { %2568 = vmatpush.msra.mxu0 %v11299_v3  ;;  %1786 = vmatmul.f32.gmra.mxu2 %v11324_v7 }
 0x1c3   : >> { %2517 = vmatpush.msrb.mxu3 %v1630_v28 }
 0x1c4   : >> { %2570 = vmatpush.msra.mxu0 %v11301_v4  ;;  %1871 = vmatmul.f32.gmra.mxu3 %v11364_v46  ;;  %v1562_v46 = vld [vmem:[%s16958_s3 + $0x30] sm:$0xff] }
 0x1c5   : >> { %2521 = vmatpush.msrb.mxu3 %v1622_v35  ;;  %v1563_v35 = vld [vmem:[%s16958_s3 + $0x38] sm:$0xff] }
 0x1c6   : >> { %2572 = vmatpush.msra.mxu0 %v11303_v15  ;;  %v2160_v18 = vsel %vm957_vm0, %v1563_v35, 0 }
 0x1c7   : >> { %2525 = vmatpush.msrb.mxu3 %v11334_v21  ;;  %1948 = vmatmul.f32.gmra.mxu0 %v1638_v12  ;;  %v11541_v28 = vand.u32 4294901760, %v2160_v18 }
 0x1c8   : >> { %2574 = vmatpush.msra.mxu0 %v11305_v13 }
 0x1c9   : >> { %1641 = vmatmul.f32.gmra.mxu1 %v1640_v16  ;;  %v11549_v25 = vsub.f32 %v2160_v18, %v11541_v28 }
 0x1ca   : >> { %2576 = vmatpush.msra.mxu0 %v11324_v7  ;;  %1790 = vmatmul.f32.gmra.mxu2 %v11305_v13 }
 0x1cb   : >> { %v2244_v31 = vand.u32 4294901760, %v11549_v25 }
 0x1cc   : >> { %2578 = vmatpush.msra.mxu0 %v11345_v40  ;;  %1876 = vmatmul.f32.gmra.mxu3 %v11340_v5 }
 0x1ce   : >> { %2580 = vmatpush.msra.mxu0 %v11316_v14 }
 0x1cf   : >> { %1954 = vmatmul.f32.gmra.mxu0 %v11370_v43  ;;  %v2157_v43 = vsel %vm957_vm0, %v1562_v46, 0 }
 0x1d0   : >> { %2582 = vmatpush.msra.mxu0 %v11297_v39  ;;  %v11525_v61 = vand.u32 4294901760, %v2157_v43 }
 0x1d1   : >> { %1649 = vmatmul.f32.gmra.mxu1 %v1648_v33 }
 0x1d2   : >> { %1794 = vmatmul.f32.gmra.mxu2 %v11303_v15  ;;  %v11536_v12 = vsub.f32 %v2157_v43, %v11525_v61 }
 0x1d4   : >> { %1881 = vmatmul.f32.gmra.mxu3 %v11330_v60  ;;  %v11488_v60 = vsub.f32 %v2148_v32, %v11477_v37 }
 0x1d7   : >> { %1960 = vmatmul.f32.gmra.mxu0 %v11351_v38 }
 0x1d9   : >> { %1657 = vmatmul.f32.gmra.mxu1 %v11389_v11 }
 0x1da   : >> { %1798 = vmatmul.f32.gmra.mxu2 %v11301_v4 }
 0x1dc   : >> { %1886 = vmatmul.f32.gmra.mxu3 %v11327_v23  ;;  %v2205_v23 = vsub.f32 %v11472_v51, %v2204_v9 }
 0x1df   : >> { %1966 = vmatmul.f32.gmra.mxu0 %v11348_v36  ;;  %v1561_v36 = vld [vmem:[%s16958_s3 + $0x28] sm:$0xff] }
 0x1e0   : >> { %v2154_v54 = vsel %vm957_vm0, %v1561_v36, 0 }
 0x1e1   : >> { %1665 = vmatmul.f32.gmra.mxu1 %v11381_v26  ;;  %v11509_v58 = vand.u32 4294901760, %v2154_v54 }
 0x1e2   : >> { %1802 = vmatmul.f32.gmra.mxu2 %v11299_v3 }
 0x1e4   : >> { %1891 = vmatmul.f32.gmra.mxu3 %v11319_v27  ;;  %v1560_v27 = vld [vmem:[%s16958_s3 + $0x20] sm:$0xff] }
 0x1e5   : >> { %v2151_v21 = vsel %vm957_vm0, %v1560_v27, 0 }
 0x1e6   : >> { %v11493_v5 = vand.u32 4294901760, %v2151_v21 }
 0x1e7   : >> { %1972 = vmatmul.f32.gmra.mxu0 %v11337_v22  ;;  %v2206_v22 = vand.u32 4294901760, %v2205_v23 }
 0x1e8   : >> { %v11504_v19 = vsub.f32 %v2151_v21, %v11493_v5 }
 0x1e9   : >> { %1673 = vmatmul.f32.gmra.mxu1 %v11367_v48  ;;  %v11520_v48 = vsub.f32 %v2154_v54, %v11509_v58 }
 0x1ea   : >> { %2106 = vmatmul.f32.vlgmr.msra.gmra.mxu2 %v11297_v39 }
 0x1ec   : >> { %2191 = vmatmul.f32.vlgmr.msra.gmra.mxu3 %v2190_v45 }
 0x1ef   : >> { %2308 = vmatmul.f32.vlgmr.msrb.gmra.mxu0 %v11430_v20 }
 0x1f1   : >> { %2041 = vmatmul.f32.vlgmr.msra.gmra.mxu1 %v11297_v39  ;;  %v2212_v39 = vand.u32 4294901760, %v11488_v60 }
 0x1f2   : >> { %2110 = vmatmul.f32.gmra.mxu2 %v11316_v14 }
 0x1f3   : >> { %v2213_v38 = vsub.f32 %v11488_v60, %v2212_v39 }
 0x1f4   : >> { %2199 = vmatmul.f32.gmra.mxu3 %v2198_v56 }
 0x1f5   : >> { %v2214_v8 = vand.u32 4294901760, %v2213_v38 }
 0x1f7   : >> { %2312 = vmatmul.f32.gmra.mxu0 %v11444_v53 }
 0x1f9   : >> { %2045 = vmatmul.f32.gmra.mxu1 %v11316_v14  ;;  %v2220_v14 = vand.u32 4294901760, %v11504_v19 }
 0x1fa   : >> { %2114 = vmatmul.f32.gmra.mxu2 %v11345_v40 }
 0x1fb   : >> { %v2221_v63 = vsub.f32 %v11504_v19, %v2220_v14 }
 0x1fc   : >> { %2207 = vmatmul.f32.gmra.mxu3 %v2206_v22 }
 0x1fd   : >> { %v2222_v1 = vand.u32 4294901760, %v2221_v63 }
 0x1ff   : >> { %2316 = vmatmul.f32.gmra.mxu0 %v11461_v34 }
 0x201   : >> { %2049 = vmatmul.f32.gmra.mxu1 %v11345_v40  ;;  %v2228_v40 = vand.u32 4294901760, %v11520_v48 }
 0x202   : >> { %2118 = vmatmul.f32.gmra.mxu2 %v11324_v7 }
 0x203   : >> { %v2229_v26 = vsub.f32 %v11520_v48, %v2228_v40 }
 0x204   : >> { %2215 = vmatmul.f32.gmra.mxu3 %v2214_v8 }
 0x205   : >> { %v2230_v11 = vand.u32 4294901760, %v2229_v26 }
 0x207   : >> { %2320 = vmatmul.f32.gmra.mxu0 %v11477_v37 }
 0x209   : >> { %2053 = vmatmul.f32.gmra.mxu1 %v11324_v7  ;;  %v2236_v7 = vand.u32 4294901760, %v11536_v12 }
 0x20a   : >> { %2122 = vmatmul.f32.gmra.mxu2 %v11305_v13 }
 0x20b   : >> { %v2237_v52 = vsub.f32 %v11536_v12, %v2236_v7 }
 0x20c   : >> { %2223 = vmatmul.f32.gmra.mxu3 %v2222_v1 }
 0x20d   : >> { %v2238_v33 = vand.u32 4294901760, %v2237_v52 }
 0x20f   : >> { %2324 = vmatmul.f32.gmra.mxu0 %v11493_v5 }
 0x211   : >> { %2057 = vmatmul.f32.gmra.mxu1 %v11305_v13  ;;  %v2245_v13 = vsub.f32 %v11549_v25, %v2244_v31 }
 0x212   : >> { %2126 = vmatmul.f32.gmra.mxu2 %v11303_v15 }
 0x213   : >> { %v2246_v24 = vand.u32 4294901760, %v2245_v13 }
 0x214   : >> { %2231 = vmatmul.f32.gmra.mxu3 %v2230_v11 }
 0x217   : >> { %2328 = vmatmul.f32.gmra.mxu0 %v11509_v58 }
 0x219   : >> { %2061 = vmatmul.f32.gmra.mxu1 %v11303_v15 }
 0x21a   : >> { %2130 = vmatmul.f32.gmra.mxu2 %v11301_v4 }
 0x21c   : >> { %2239 = vmatmul.f32.gmra.mxu3 %v2238_v33 }
 0x21f   : >> { %2332 = vmatmul.f32.gmra.mxu0 %v11525_v61 }
 0x220   : >> { %v1542_v16 = vpop.f32.mrf.mxu0 }
 0x221   : >> { %2065 = vmatmul.f32.gmra.mxu1 %v11301_v4  ;;  %1546 = vst.msk [vmem:[#allocation4] sm:$0x1] %vm1545_vm1, %v1542_v16 }
 0x222   : >> { %2134 = vmatmul.f32.gmra.mxu2 %v11299_v3 }
 0x224   : >> { %2247 = vmatmul.f32.gmra.mxu3 %v2246_v24 }
 0x227   : >> { %2336 = vmatmul.f32.gmra.mxu0 %v11541_v28 }
 0x228   : >> { %v11565_v55 = vpop.f32.mrf.mxu0 }
 0x229   : >> { %v11563_v15 = vpop.f32.mrf.mxu2  ;;  %2069 = vmatmul.f32.gmra.mxu1 %v11299_v3 }
 0x22a   : >> { %2440 = vmatmul.f32.vlgmr.msrb.gmra.mxu2 %v2188_v44 }
 0x22b   : >> { %v11570_v47 = vpop.f32.mrf.mxu1  ;;  %v11572_v42 = vpop.f32.mrf.mxu3 }
 0x22c   : >> { %2527 = vmatmul.f32.vlgmr.msrb.gmra.mxu3 %v11430_v20  ;;  %v1776_v33 = vadd.f32 %v11563_v15, %v11570_v47 }
 0x22f   : >> { %2584 = vmatmul.f32.vlgmr.msra.gmra.mxu0 %v11430_v20 }
 0x231   : >> { %2374 = vmatmul.f32.vlgmr.msrb.gmra.mxu1 %v11439_v62  ;;  %v11577_v4 = vpop.f32.mrf.mxu2 }
 0x232   : >> { %v11579_v49 = vpop.f32.mrf.mxu0  ;;  %2446 = vmatmul.f32.gmra.mxu2 %v2196_v29 }
 0x233   : >> { %v11583_v3 = vpop.f32.mrf.mxu3 }
 0x234   : >> { %2531 = vmatmul.f32.gmra.mxu3 %v11444_v53 }
 0x235   : >> { %v11586_v30 = vpop.f32.mrf.mxu1 }
 0x236   : >> { %v1780_v16 = vadd.f32 %v11577_v4, %v11586_v30  ;;  %v2758_v4 = vld [vmem:[%s16959_s4 + $0x78] sm:$0xff] }
 0x237   : >> { %2588 = vmatmul.f32.gmra.mxu0 %v11444_v53 }
 0x239   : >> { %2379 = vmatmul.f32.gmra.mxu1 %v11456_v17 }
 0x23a   : >> { %2452 = vmatmul.f32.gmra.mxu2 %v2204_v9 }
 0x23b   : >> { %v11592_v20 = vpop.f32.mrf.mxu2 }
 0x23c   : >> { %v11594_v62 = vpop.f32.mrf.mxu0  ;;  %2535 = vmatmul.f32.gmra.mxu3 %v11461_v34 }
 0x23e   : >> { %v11597_v44 = vpop.f32.mrf.mxu3  ;;  %v11599_v10 = vpop.f32.mrf.mxu1 }
 0x23f   : >> { %2592 = vmatmul.f32.gmra.mxu0 %v11461_v34  ;;  %v1784_v15 = vadd.f32 %v11592_v20, %v11599_v10  ;;  %v2757_v10 = vld [vmem:[%s16959_s4 + $0x70] sm:$0xff] }
 0x241   : >> { %2384 = vmatmul.f32.gmra.mxu1 %v11472_v51 }
 0x242   : >> { %2458 = vmatmul.f32.gmra.mxu2 %v2212_v39 }
 0x244   : >> { %2539 = vmatmul.f32.gmra.mxu3 %v11477_v37  ;;  %v11608_v50 = vpop.f32.mrf.mxu0 }
 0x245   : >> { %v11606_v53 = vpop.f32.mrf.mxu2 }
 0x246   : >> { %v11610_v17 = vpop.f32.mrf.mxu1 }
 0x247   : >> { %v11612_v2 = vpop.f32.mrf.mxu3  ;;  %2596 = vmatmul.f32.gmra.mxu0 %v11477_v37 }
 0x249   : >> { %2389 = vmatmul.f32.gmra.mxu1 %v11488_v60 }
 0x24a   : >> { %2464 = vmatmul.f32.gmra.mxu2 %v2220_v14 }
 0x24c   : >> { %2543 = vmatmul.f32.gmra.mxu3 %v11493_v5  ;;  %v11621_v29 = vpop.f32.mrf.mxu0 }
 0x24d   : >> { %v11619_v45 = vpop.f32.mrf.mxu2 }
 0x24e   : >> { %v11623_v34 = vpop.f32.mrf.mxu1 }
 0x24f   : >> { %v11625_v41 = vpop.f32.mrf.mxu3  ;;  %2600 = vmatmul.f32.gmra.mxu0 %v11493_v5 }
 0x251   : >> { %2394 = vmatmul.f32.gmra.mxu1 %v11504_v19 }
 0x252   : >> { %2470 = vmatmul.f32.gmra.mxu2 %v2228_v40 }
 0x254   : >> { %2547 = vmatmul.f32.gmra.mxu3 %v11509_v58  ;;  %v11634_v51 = vpop.f32.mrf.mxu0 }
 0x255   : >> { %v11632_v59 = vpop.f32.mrf.mxu2 }
 0x256   : >> { %v11636_v32 = vpop.f32.mrf.mxu1 }
 0x257   : >> { %v11638_v56 = vpop.f32.mrf.mxu3  ;;  %2604 = vmatmul.f32.gmra.mxu0 %v11509_v58 }
 0x259   : >> { %2399 = vmatmul.f32.gmra.mxu1 %v11520_v48 }
 0x25a   : >> { %2476 = vmatmul.f32.gmra.mxu2 %v2236_v7 }
 0x25c   : >> { %2551 = vmatmul.f32.gmra.mxu3 %v11525_v61  ;;  %v11647_v37 = vpop.f32.mrf.mxu0 }
 0x25d   : >> { %v11645_v9 = vpop.f32.mrf.mxu2  ;;  %17195 = vst [vmem:[#allocation20_spill] sm:$0xff] %v11647_v37 }
 0x25e   : >> { %v11649_v27 = vpop.f32.mrf.mxu1 }
 0x25f   : >> { %v11651_v23 = vpop.f32.mrf.mxu3  ;;  %2608 = vmatmul.f32.gmra.mxu0 %v11525_v61 }
 0x261   : >> { %2404 = vmatmul.f32.gmra.mxu1 %v11536_v12 }
 0x262   : >> { %2482 = vmatmul.f32.gmra.mxu2 %v2244_v31  ;;  %v1858_v31 = vadd.f32 %v11572_v42, %v1776_v33 }
 0x264   : >> { %2555 = vmatmul.f32.gmra.mxu3 %v11541_v28  ;;  %v11660_v21 = vpop.f32.mrf.mxu0 }
 0x265   : >> { %v11658_v60 = vpop.f32.mrf.mxu2  ;;  %17196 = vst [vmem:[#allocation28_spill] sm:$0xff] %v11660_v21 }
 0x266   : >> { %v11662_v22 = vpop.f32.mrf.mxu1 }
 0x267   : >> { %v11664_v39 = vpop.f32.mrf.mxu3  ;;  %2612 = vmatmul.f32.gmra.mxu0 %v11541_v28 }
 0x268   : >> { %17197 = vst [vmem:[#allocation14_spill] sm:$0xff] %v11664_v39 }
 0x269   : >> { %2409 = vmatmul.f32.gmra.mxu1 %v11549_v25 }
 0x26c   : >> { %v11668_v36 = vpop.f32.mrf.mxu0 }
 0x26d   : >> { %v2107_v5 = vpop.f32.mrf.mxu2 }
 0x26e   : >> { %v2042_v38 = vpop.f32.mrf.mxu1 }
 0x26f   : >> { %v2192_v19 = vpop.f32.mrf.mxu3 }
 0x274   : >> { %v11670_v8 = vpop.f32.mrf.mxu0 }
 0x275   : >> { %v2111_v54 = vpop.f32.mrf.mxu2 }
 0x276   : >> { %v2046_v14 = vpop.f32.mrf.mxu1 }
 0x277   : >> { %v11672_v58 = vpop.f32.mrf.mxu3 }
 0x27c   : >> { %v11676_v63 = vpop.f32.mrf.mxu0 }
 0x27d   : >> { %v11674_v46 = vpop.f32.mrf.mxu2 }
 0x27e   : >> { %v2050_v48 = vpop.f32.mrf.mxu1 }
 0x27f   : >> { %v11678_v43 = vpop.f32.mrf.mxu3 }
 0x284   : >> { %v11682_v40 = vpop.f32.mrf.mxu0 }
 0x285   : >> { %v11680_v1 = vpop.f32.mrf.mxu2 }
 0x286   : >> { %v11684_v61 = vpop.f32.mrf.mxu1 }
 0x287   : >> { %v11686_v35 = vpop.f32.mrf.mxu3 }
 0x28c   : >> { %v11690_v12 = vpop.f32.mrf.mxu0 }
 0x28d   : >> { %v11688_v26 = vpop.f32.mrf.mxu2 }
 0x28e   : >> { %v11692_v18 = vpop.f32.mrf.mxu1 }
 0x28f   : >> { %v11694_v11 = vpop.f32.mrf.mxu3 }
 0x294   : >> { %v11698_v28 = vpop.f32.mrf.mxu0 }
 0x295   : >> { %v11696_v7 = vpop.f32.mrf.mxu2  ;;  %17198 = vst [vmem:[#allocation24_spill] sm:$0xff] %v11698_v28  ;;  %v1932_v28 = vadd.f32 %v11565_v55, %v1858_v31 }
 0x296   : >> { %v11700_v52 = vpop.f32.mrf.mxu1 }
 0x297   : >> { %v11702_v25 = vpop.f32.mrf.mxu3  ;;  %v2043_v37 = vadd.f32 %v2042_v38, %v1932_v28  ;;  %v1868_v38 = vadd.f32 %v11597_v44, %v1784_v15  ;;  %v11746_v28 = vmul.f32 2.0, %v11294_v0  ;;  %v2756_v44 = vld [vmem:[%s16959_s4 + $0x68] sm:$0xff]  ;;  %v1788_v0 = vadd.f32 %v11606_v53, %v11610_v17  ;;  %v2755_v15 = vld [vmem:[%s16959_s4 + $0x60] sm:$0xff] }
 0x298   : >> { %17199 = vst [vmem:[#allocation13_spill] sm:$0xff] %v11702_v25  ;;  %v1863_v25 = vadd.f32 %v11583_v3, %v1780_v16  ;;  %v11733_v3 = vand.u32 4294901760, %v2758_v4 }
 0x299   : >> { %v2108_v33 = vadd.f32 %v2107_v5, %v2043_v37  ;;  %v1944_v16 = vadd.f32 %v11594_v62, %v1868_v38 }
 0x29a   : >> { %v11740_v37 = vsub.f32 %v2758_v4, %v11733_v3  ;;  %2760 = vmatpush.msra.mxu2 %v11733_v3 }
 0x29b   : >> { %v2193_v5 = vadd.f32 %v2192_v19, %v2108_v33  ;;  %v2051_v53 = vadd.f32 %v2050_v48, %v1944_v16 }
 0x29c   : >> { %v11709_v24 = vpop.f32.mrf.mxu0  ;;  %2987 = vmatpush.msrb.mxu0 %v11740_v37 }
 0x29d   : >> { %v11707_v13 = vpop.f32.mrf.mxu2  ;;  %17200 = vst [vmem:[#allocation15_spill] sm:$0xff] %v11709_v24  ;;  %v1938_v24 = vadd.f32 %v11579_v49, %v1863_v25  ;;  %v11742_v49 = vand.u32 4294901760, %v2757_v10  ;;  %v17012_v25 = vand.u32 4294901760, %v11740_v37  ;;  %v2310_v62 = vadd.f32 %v11668_v36, %v2193_v5 }
 0x29e   : >> { %v11713_v21 = vpop.f32.mrf.mxu1  ;;  %v1873_v36 = vadd.f32 %v11612_v2, %v1788_v0  ;;  %v2116_v2 = vadd.f32 %v11674_v46, %v2051_v53  ;;  %v11809_v0 = vmul.f32 2.0, %v11307_v57 }
 0x29f   : >> { %v11715_v39 = vpop.f32.mrf.mxu3  ;;  %v2047_v20 = vadd.f32 %v2046_v14, %v1938_v24  ;;  %v11751_v14 = vld [vmem:[#allocation2] sm:$0xff]  ;;  %v11755_v31 = vsub.f32 %v2757_v10, %v11742_v49  ;;  %v11757_v24 = vand.u32 4294901760, %v2756_v44  ;;  %2762 = vmatpush.msra.mxu2 %v11742_v49  ;;  %v2859_v10 = vsub.f32 %v11740_v37, %v17012_v25 }
 0x2a0   : >> { %17201 = vst [vmem:[#allocation17_spill] sm:$0xff] %v11715_v39  ;;  %v1950_v53 = vadd.f32 %v11608_v50, %v1873_v36  ;;  %v2751_v36 = vld [vmem:[%s16959_s4 + $0x40] sm:$0xff] }
 0x2a1   : >> { %17206 = vst [vmem:[#allocation27_spill] sm:$0xff] %v11757_v24  ;;  %v2112_v19 = vadd.f32 %v2111_v54, %v2047_v20  ;;  %2764 = vmatpush.msra.mxu2 %v11757_v24  ;;  %2990 = vmatpush.msrb.mxu0 %v11755_v31  ;;  %v2754_v54 = vld [vmem:[%s16959_s4 + $0x58] sm:$0xff] }
 0x2a2   : >> { %v11795_v16 = vand.u32 4294901760, %v2754_v54 }
 0x2a3   : >> { %v2201_v48 = vadd.f32 %v11672_v58, %v2112_v19  ;;  %v2752_v19 = vld [vmem:[%s16959_s4 + $0x48] sm:$0xff] }
 0x2a4   : >> { %v11723_v42 = vpop.f32.mrf.mxu0  ;;  %17208 = vst [vmem:[#allocation29_spill] sm:$0xff] %v11795_v16  ;;  %v11824_v57 = vand.u32 4294901760, %v2752_v19 }
 0x2a5   : >> { %v11721_v47 = vpop.f32.mrf.mxu2  ;;  %17203 = vst [vmem:[#allocation26_spill] sm:$0xff] %v11723_v42  ;;  %v17013_v42 = vand.u32 4294901760, %v11755_v31 }
 0x2a6   : >> { %17202 = vst [vmem:[#allocation25_spill] sm:$0xff] %v11721_v47  ;;  %v11729_v30 = vpop.f32.mrf.mxu1  ;;  %v11774_v47 = vand.u32 4294901760, %v2755_v15 }
 0x2a7   : >> { %17204 = vst [vmem:[#allocation12_spill] sm:$0xff] %v11729_v30  ;;  %v11731_v55 = vpop.f32.mrf.mxu3  ;;  %v2865_v25 = vsub.f32 %v11755_v31, %v17013_v42 }
 0x2a8   : >> { %17205 = vst [vmem:[#allocation18_spill] sm:$0xff] %v11731_v55  ;;  %v11772_v55 = vsub.f32 %v2756_v44, %v11757_v24  ;;  %v2860_v44 = vand.u32 4294901760, %v2859_v10  ;;  %v11789_v39 = vsub.f32 %v2755_v15, %v11774_v47  ;;  %2766 = vmatpush.msra.mxu2 %v11774_v47  ;;  %v2753_v10 = vld [vmem:[%s16959_s4 + $0x50] sm:$0xff] }
 0x2a9   : >> { %17207 = vst [vmem:[#allocation16_spill] sm:$0xff] %v11774_v47  ;;  %v2866_v42 = vand.u32 4294901760, %v2865_v25  ;;  %v11804_v47 = vand.u32 4294901760, %v2753_v10  ;;  %v11812_v25 = vsub.f32 %v2754_v54, %v11795_v16 }
 0x2aa   : >> { %v17017_v30 = vand.u32 4294901760, %v11772_v55  ;;  %2993 = vmatpush.msrb.mxu0 %v11772_v55  ;;  %2861 = vmatpush.msra.mxu3 %v2860_v44  ;;  %v17016_v17 = vand.u32 4294901760, %v11789_v39  ;;  %17210 = vst [vmem:[#allocation21_spill] sm:$0xff] %v11824_v57  ;;  %v2704_v44 = vld [vmem:[%s10135_s29 + $0x78] sm:$0xff] }
 0x2ab   : >> { %17209 = vst [vmem:[#allocation19_spill] sm:$0xff] %v11804_v47  ;;  %2768 = vmatpush.msra.mxu2 %v11795_v16  ;;  %v11822_v46 = vsub.f32 %v2753_v10, %v11804_v47  ;;  %v2314_v10 = vadd.f32 %v11670_v8, %v2201_v48  ;;  %2705 = vmatpush.msra.mxu1 %v2704_v44 }
 0x2ac   : >> { %v2585_v4 = vpop.f32.mrf.mxu0  ;;  %v2871_v15 = vsub.f32 %v11772_v55, %v17017_v30  ;;  %2996 = vmatpush.msrb.mxu0 %v11789_v39  ;;  %2867 = vmatpush.msra.mxu3 %v2866_v42  ;;  %v17018_v42 = vand.u32 4294901760, %v11812_v25  ;;  %v2209_v8 = vadd.f32 %v11678_v43, %v2116_v2  ;;  %v2702_v30 = vld [vmem:[%s10135_s29 + $0x68] sm:$0xff] }
 0x2ad   : >> { %v2441_v33 = vpop.f32.mrf.mxu2  ;;  %2770 = vmatpush.msra.mxu2 %v11804_v47 }
 0x2ae   : >> { %v2375_v38 = vpop.f32.mrf.mxu1  ;;  %2999 = vmatpush.msrb.mxu0 %v11812_v25 }
 0x2af   : >> { %v2528_v20 = vpop.f32.mrf.mxu3  ;;  %v2376_v5 = vadd.f32 %v2375_v38, %v2310_v62  ;;  %v2872_v62 = vand.u32 4294901760, %v2871_v15  ;;  %v2877_v38 = vsub.f32 %v11789_v39, %v17016_v17  ;;  %v2640_v15 = vld [vmem:[%s16957_s2] sm:$0xff]  ;;  %2772 = vmatpush.msra.mxu2 %v11824_v57 }
 0x2b0   : >> { %3002 = vmatpush.msrb.mxu0 %v11822_v46 }
 0x2b1   : >> { %v2442_v58 = vadd.f32 %v2441_v33, %v2376_v5  ;;  %v1792_v33 = vadd.f32 %v11619_v45, %v11623_v34  ;;  %v2703_v5 = vld [vmem:[%s10135_s29 + $0x70] sm:$0xff]  ;;  %2873 = vmatpush.msra.mxu3 %v2872_v62  ;;  %v2878_v50 = vand.u32 4294901760, %v2877_v38  ;;  %v2888_v34 = vand.u32 4294901760, %v11822_v46  ;;  %v2750_v38 = vld [vmem:[%s16959_s4 + $0x38] sm:$0xff] }
 0x2b2   : >> { %v11852_v62 = vand.u32 4294901760, %v2751_v36  ;;  %2706 = vmatpush.msra.mxu1 %v2703_v5 }
 0x2b3   : >> { %v2529_v54 = vadd.f32 %v2528_v20, %v2442_v58  ;;  %v11842_v20 = vsub.f32 %v2752_v19, %v11824_v57  ;;  %v2883_v58 = vsub.f32 %v11812_v25, %v17018_v42  ;;  %v2055_v19 = vadd.f32 %v11684_v61, %v1950_v53  ;;  %2879 = vmatpush.msra.mxu3 %v2878_v50  ;;  %v2749_v61 = vld [vmem:[%s16959_s4 + $0x30] sm:$0xff] }
 0x2b4   : >> { %v11838_v45 = vpop.f32.mrf.mxu0  ;;  %v2889_v2 = vsub.f32 %v11822_v46, %v2888_v34  ;;  %v11866_v42 = vand.u32 4294901760, %v2750_v38  ;;  %v11869_v24 = vsub.f32 %v2751_v36, %v11852_v62  ;;  %2774 = vmatpush.msra.mxu2 %v11852_v62  ;;  %2707 = vmatpush.msra.mxu1 %v2702_v30  ;;  %v17211_v50 = vsub.f32 %v11746_v28, %v11751_v14 }
 0x2b5   : >> { %v2447_v17 = vpop.f32.mrf.mxu2  ;;  %v2586_v48 = vadd.f32 %v2585_v4, %v2529_v54  ;;  %v11860_v4 = vld [vmem:[#allocation2 + $0x8] sm:$0xff]  ;;  %v17027_v54 = vand.u32 4294901760, %v11842_v20  ;;  %v2884_v16 = vand.u32 4294901760, %v2883_v58  ;;  %3005 = vmatpush.msrb.mxu0 %v11842_v20  ;;  %v11901_v14 = vmul.f32 2.0, %v11321_v6 }
 0x2b6   : >> { %v2380_v44 = vpop.f32.mrf.mxu1  ;;  %v2890_v53 = vand.u32 4294901760, %v2889_v2  ;;  %v2633_v30 = vsub.f32 %v11809_v0, %v11860_v4  ;;  %v17029_v58 = vand.u32 4294901760, %v11869_v24  ;;  %2776 = vmatpush.msra.mxu2 %v11866_v42  ;;  %v2641_v6 = vld [vmem:[%s16957_s2 + $0x8] sm:$0xff]  ;;  %v17222_v46 = vand.u32 4294901760, %v11842_v20 }
 0x2b7   : >> { %v2532_v43 = vpop.f32.mrf.mxu3  ;;  %v2648_v47 = vmul.f32 %v2640_v15, %v2586_v48  ;;  %v2381_v57 = vadd.f32 %v2380_v44, %v2314_v10  ;;  %v2895_v5 = vsub.f32 %v11842_v20, %v17027_v54  ;;  %v11880_v10 = vsub.f32 %v2750_v38, %v11866_v42  ;;  %2885 = vmatpush.msra.mxu3 %v2884_v16  ;;  %v17228_v20 = vld [vmem:[#allocation29_spill] sm:$0xff] }
 0x2b8   : >> { %v11882_v15 = vand.u32 4294901760, %v2749_v61  ;;  %v1878_v38 = vadd.f32 %v11625_v41, %v1792_v33  ;;  %3008 = vmatpush.msrb.mxu0 %v11869_v24  ;;  %v2700_v41 = vld [vmem:[%s10135_s29 + $0x58] sm:$0xff]  ;;  %v2901_v16 = vsub.f32 %v11869_v24, %v17029_v58  ;;  %v2120_v33 = vadd.f32 %v11680_v1, %v2055_v19  ;;  %v2699_v19 = vld [vmem:[%s10135_s29 + $0x50] sm:$0xff] }
 0x2b9   : >> { %v2656_v36 = vadd.f32 %v2648_v47, %v17211_v50  ;;  %v2448_v48 = vadd.f32 %v2447_v17, %v2381_v57  ;;  %v2896_v44 = vand.u32 4294901760, %v2895_v5  ;;  %v17028_v2 = vand.u32 4294901760, %v11880_v10  ;;  %v2748_v47 = vld [vmem:[%s16959_s4 + $0x28] sm:$0xff]  ;;  %2891 = vmatpush.msra.mxu3 %v2890_v53  ;;  %v2701_v17 = vld [vmem:[%s10135_s29 + $0x60] sm:$0xff]  ;;  %v11944_v58 = vld [vmem:[#allocation2 + $0x10] sm:$0xff] }
 0x2ba   : >> { %v11894_v54 = vsub.f32 %v2749_v61, %v11882_v15  ;;  %v11908_v0 = vand.u32 4294901760, %v2748_v47  ;;  %2778 = vmatpush.msra.mxu2 %v11882_v15  ;;  %v2318_v57 = vadd.f32 %v11676_v63, %v2209_v8  ;;  %2708 = vmatpush.msra.mxu1 %v2701_v17  ;;  %v2747_v63 = vld [vmem:[%s16959_s4 + $0x20] sm:$0xff]  ;;  %v2902_v8 = vand.u32 4294901760, %v2901_v16 }
 0x2bb   : >> { %2664 = vst [vmem:[#allocation2] sm:$0xff] %v2656_v36  ;;  %v2533_v28 = vadd.f32 %v2532_v43, %v2448_v48  ;;  %v2907_v61 = vsub.f32 %v11880_v10, %v17028_v2  ;;  %3011 = vmatpush.msrb.mxu0 %v11880_v10  ;;  %2897 = vmatpush.msra.mxu3 %v2896_v44  ;;  %v11931_v50 = vand.u32 4294901760, %v2747_v63 }
 0x2bc   : >> { %v11916_v4 = vpop.f32.mrf.mxu0  ;;  %v17030_v53 = vand.u32 4294901760, %v11894_v54  ;;  %v11929_v5 = vsub.f32 %v2748_v47, %v11908_v0  ;;  %2780 = vmatpush.msra.mxu2 %v11908_v0  ;;  %v1796_v36 = vadd.f32 %v11632_v59, %v11636_v32  ;;  %v1956_v48 = vadd.f32 %v11621_v29, %v1878_v38  ;;  %2709 = vmatpush.msra.mxu1 %v2700_v41  ;;  %v2746_v47 = vld [vmem:[%s16959_s4 + $0x18] sm:$0xff]  ;;  %v2698_v29 = vld [vmem:[%s10135_s29 + $0x48] sm:$0xff] }
 0x2bd   : >> { %v2453_v43 = vpop.f32.mrf.mxu2  ;;  %v2590_v1 = vadd.f32 %v11838_v45, %v2533_v28  ;;  %v2908_v45 = vand.u32 4294901760, %v2907_v61  ;;  %3014 = vmatpush.msrb.mxu0 %v11894_v54  ;;  %2903 = vmatpush.msra.mxu3 %v2902_v8  ;;  %v11949_v32 = vsub.f32 %v2747_v63, %v11931_v50  ;;  %v2217_v38 = vadd.f32 %v11686_v35, %v2120_v33 }
 0x2be   : >> { %v2385_v17 = vpop.f32.mrf.mxu1  ;;  %v2913_v44 = vsub.f32 %v11894_v54, %v17030_v53  ;;  %v2918_v59 = vand.u32 4294901760, %v11929_v5  ;;  %2782 = vmatpush.msra.mxu2 %v11931_v50  ;;  %v2059_v41 = vadd.f32 %v11692_v18, %v1956_v48  ;;  %2710 = vmatpush.msra.mxu1 %v2699_v19  ;;  %v11954_v53 = vand.u32 4294901760, %v2746_v47  ;;  %v2697_v48 = vld [vmem:[%s10135_s29 + $0x40] sm:$0xff] }
 0x2bf   : >> { %v2536_v2 = vpop.f32.mrf.mxu3  ;;  %v2649_v28 = vmul.f32 %v2641_v6, %v2590_v1  ;;  %v2386_v16 = vadd.f32 %v2385_v17, %v2318_v57  ;;  %v2745_v57 = vld [vmem:[%s16959_s4 + $0x10] sm:$0xff]  ;;  %3017 = vmatpush.msrb.mxu0 %v11929_v5  ;;  %2909 = vmatpush.msra.mxu3 %v2908_v45  ;;  %v2924_v18 = vand.u32 4294901760, %v11949_v32  ;;  %v1883_v33 = vadd.f32 %v11638_v56, %v1796_v36  ;;  %v2696_v36 = vld [vmem:[%s10135_s29 + $0x38] sm:$0xff] }
 0x2c0   : >> { %v2914_v61 = vand.u32 4294901760, %v2913_v44  ;;  %v2919_v35 = vsub.f32 %v11929_v5, %v2918_v59  ;;  %v2634_v1 = vsub.f32 %v11901_v14, %v11944_v58  ;;  %2711 = vmatpush.msra.mxu1 %v2698_v29  ;;  %v11968_v8 = vsub.f32 %v2746_v47, %v11954_v53  ;;  %2784 = vmatpush.msra.mxu2 %v11954_v53  ;;  %v2743_v29 = vld [vmem:[%s16959_s4] sm:$0xff] }
 0x2c1   : >> { %v2657_v6 = vadd.f32 %v2649_v28, %v2633_v30  ;;  %v2454_v63 = vadd.f32 %v2453_v43, %v2386_v16  ;;  %v11970_v19 = vand.u32 4294901760, %v2745_v57  ;;  %v2744_v30 = vld [vmem:[%s16959_s4 + $0x8] sm:$0xff]  ;;  %v2925_v58 = vsub.f32 %v11949_v32, %v2924_v18  ;;  %3020 = vmatpush.msrb.mxu0 %v11949_v32  ;;  %v2630_v32 = vld [vmem:[#allocation2 + $0x30] sm:$0xff] }
 0x2c2   : >> { %2915 = vmatpush.msra.mxu3 %v2914_v61  ;;  %v2920_v56 = vand.u32 4294901760, %v2919_v35  ;;  %v11981_v14 = vand.u32 4294901760, %v2744_v30  ;;  %v2322_v17 = vadd.f32 %v11682_v40, %v2217_v38  ;;  %v2124_v45 = vadd.f32 %v11688_v26, %v2059_v41  ;;  %2712 = vmatpush.msra.mxu1 %v2697_v48  ;;  %v2695_v38 = vld [vmem:[%s10135_s29 + $0x30] sm:$0xff] }
 0x2c3   : >> { %2665 = vst [vmem:[#allocation2 + $0x8] sm:$0xff] %v2657_v6  ;;  %v2537_v43 = vadd.f32 %v2536_v2, %v2454_v63  ;;  %v2642_v2 = vld [vmem:[%s16957_s2 + $0x10] sm:$0xff]  ;;  %v2930_v28 = vand.u32 4294901760, %v11968_v8  ;;  %v11991_v16 = vsub.f32 %v2745_v57, %v11970_v19  ;;  %2786 = vmatpush.msra.mxu2 %v11970_v19  ;;  %v2926_v26 = vand.u32 4294901760, %v2925_v58  ;;  %3023 = vmatpush.msrb.mxu0 %v11968_v8 }
 0x2c4   : >> { %v2597_v47 = vpop.f32.mrf.mxu0  ;;  %2921 = vmatpush.msra.mxu3 %v2920_v56  ;;  %v12000_v41 = vsub.f32 %v2744_v30, %v11981_v14  ;;  %v12002_v61 = vand.u32 4294901760, %v2743_v29  ;;  %v1800_v57 = vadd.f32 %v11645_v9, %v11649_v27  ;;  %v1962_v6 = vadd.f32 %v11634_v51, %v1883_v33  ;;  %2713 = vmatpush.msra.mxu1 %v2696_v36  ;;  %v2694_v56 = vld [vmem:[%s10135_s29 + $0x28] sm:$0xff] }
 0x2c5   : >> { %v2459_v44 = vpop.f32.mrf.mxu2  ;;  %v2594_v40 = vadd.f32 %v11916_v4, %v2537_v43  ;;  %v2931_v4 = vsub.f32 %v11968_v8, %v2930_v28  ;;  %v2936_v43 = vand.u32 4294901760, %v11991_v16  ;;  %2788 = vmatpush.msra.mxu2 %v11981_v14  ;;  %3026 = vmatpush.msrb.mxu0 %v11991_v16  ;;  %v2225_v51 = vadd.f32 %v11694_v11, %v2124_v45  ;;  %v17236_v8 = vld [vmem:[#allocation26_spill] sm:$0xff] }
 0x2c6   : >> { %v2390_v63 = vpop.f32.mrf.mxu1  ;;  %2927 = vmatpush.msra.mxu3 %v2926_v26  ;;  %v2942_v58 = vand.u32 4294901760, %v12000_v41  ;;  %v12016_v9 = vsub.f32 %v2743_v29, %v12002_v61  ;;  %v2063_v27 = vadd.f32 %v11700_v52, %v1962_v6  ;;  %2714 = vmatpush.msra.mxu1 %v2695_v38  ;;  %v17212_v52 = vand.u32 4294901760, %v11740_v37  ;;  %v2627_v38 = vld [vmem:[#allocation2 + $0x18] sm:$0xff]  ;;  %v2693_v6 = vld [vmem:[%s10135_s29 + $0x20] sm:$0xff] }
 0x2c7   : >> { %v2540_v35 = vpop.f32.mrf.mxu3  ;;  %v2650_v30 = vmul.f32 %v2642_v2, %v2594_v40  ;;  %v2391_v48 = vadd.f32 %v2390_v63, %v2322_v17  ;;  %v2932_v33 = vand.u32 4294901760, %v2931_v4  ;;  %v2937_v36 = vsub.f32 %v11991_v16, %v2936_v43  ;;  %2790 = vmatpush.msra.mxu2 %v12002_v61  ;;  %3029 = vmatpush.msrb.mxu0 %v12000_v41  ;;  %v9953_v40 = vld [vmem:[#allocation3 + $0x18] sm:$0xff] }
 0x2c8   : >> { %v2943_v29 = vsub.f32 %v12000_v41, %v2942_v58  ;;  %v2948_v11 = vand.u32 4294901760, %v12016_v9  ;;  %v1888_v45 = vadd.f32 %v11651_v23, %v1800_v57  ;;  %v2619_v26 = vmul.f32 2.0, %v9953_v40  ;;  %2715 = vmatpush.msra.mxu1 %v2694_v56  ;;  %v2692_v4 = vld [vmem:[%s10135_s29 + $0x18] sm:$0xff] }
 0x2c9   : >> { %v2658_v17 = vadd.f32 %v2650_v30, %v2634_v1  ;;  %v2460_v2 = vadd.f32 %v2459_v44, %v2391_v48  ;;  %3158 = vmatpush.msrb.mxu2 %v17212_v52  ;;  %2933 = vmatpush.msra.mxu3 %v2932_v33  ;;  %v2938_v1 = vand.u32 4294901760, %v2937_v36  ;;  %v17213_v30 = vand.u32 4294901760, %v11755_v31  ;;  %v2643_v57 = vld [vmem:[%s16957_s2 + $0x18] sm:$0xff]  ;;  %v17215_v52 = vld [vmem:[#allocation20_spill] sm:$0xff] }
 0x2ca   : >> { %v2944_v63 = vand.u32 4294901760, %v2943_v29  ;;  %v2949_v37 = vsub.f32 %v12016_v9, %v2948_v11  ;;  %3032 = vmatpush.msrb.mxu0 %v12016_v9  ;;  %v2128_v23 = vadd.f32 %v11696_v7, %v2063_v27  ;;  %2716 = vmatpush.msra.mxu1 %v2693_v6  ;;  %v2326_v56 = vadd.f32 %v11690_v12, %v2225_v51 }
 0x2cb   : >> { %2666 = vst [vmem:[#allocation2 + $0x10] sm:$0xff] %v2658_v17  ;;  %v2541_v44 = vadd.f32 %v2540_v35, %v2460_v2  ;;  %3162 = vmatpush.msrb.mxu2 %v17213_v30  ;;  %2939 = vmatpush.msra.mxu3 %v2938_v1  ;;  %v2691_v17 = vld [vmem:[%s10135_s29 + $0x10] sm:$0xff]  ;;  %v17214_v31 = vand.u32 4294901760, %v11772_v55  ;;  %v2635_v2 = vsub.f32 %v2619_v26, %v2627_v38  ;;  %v2690_v30 = vld [vmem:[%s10135_s29 + $0x8] sm:$0xff]  ;;  %v17216_v12 = vand.u32 4294901760, %v11789_v39  ;;  %v9954_v38 = vld [vmem:[#allocation3 + $0x20] sm:$0xff] }
 0x2cc   : >> { %v2601_v48 = vpop.f32.mrf.mxu0  ;;  %v2950_v36 = vand.u32 4294901760, %v2949_v37  ;;  %2717 = vmatpush.msra.mxu1 %v2692_v4  ;;  %v1804_v27 = vadd.f32 %v11658_v60, %v11662_v22  ;;  %v1968_v40 = vadd.f32 %v17215_v52, %v1888_v45  ;;  %v17218_v60 = vand.u32 4294901760, %v11812_v25  ;;  %v17219_v22 = vld [vmem:[#allocation14_spill] sm:$0xff]  ;;  %v2644_v4 = vld [vmem:[%s16957_s2 + $0x20] sm:$0xff]  ;;  %v17224_v52 = vld [vmem:[#allocation16_spill] sm:$0xff] }
 0x2cd   : >> { %v2465_v35 = vpop.f32.mrf.mxu2  ;;  %v2598_v33 = vadd.f32 %v2597_v47, %v2541_v44  ;;  %3166 = vmatpush.msrb.mxu2 %v17214_v31  ;;  %2945 = vmatpush.msra.mxu3 %v2944_v63  ;;  %v17217_v47 = vld [vmem:[#allocation13_spill] sm:$0xff]  ;;  %v2620_v63 = vmul.f32 2.0, %v9954_v38  ;;  %v2689_v25 = vld [vmem:[%s10135_s29] sm:$0xff] }
 0x2ce   : >> { %v2395_v29 = vpop.f32.mrf.mxu1  ;;  %v2233_v51 = vadd.f32 %v17217_v47, %v2128_v23  ;;  %2718 = vmatpush.msra.mxu1 %v2691_v17  ;;  %v2067_v55 = vadd.f32 %v11713_v21, %v1968_v40  ;;  %v1893_v45 = vadd.f32 %v17219_v22, %v1804_v27  ;;  %v2628_v21 = vld [vmem:[#allocation2 + $0x20] sm:$0xff]  ;;  %v17220_v23 = vld [vmem:[#allocation24_spill] sm:$0xff] }
 0x2cf   : >> { %v2544_v7 = vpop.f32.mrf.mxu3  ;;  %v2651_v1 = vmul.f32 %v2643_v57, %v2598_v33  ;;  %v2396_v6 = vadd.f32 %v2395_v29, %v2326_v56  ;;  %3170 = vmatpush.msrb.mxu2 %v17216_v12  ;;  %2951 = vmatpush.msra.mxu3 %v2950_v36  ;;  %v17221_v36 = vld [vmem:[#allocation27_spill] sm:$0xff]  ;;  %v2636_v29 = vsub.f32 %v2620_v63, %v2628_v21  ;;  %v17229_v12 = vand.u32 4294901760, %v11880_v10  ;;  %v17234_v63 = vld [vmem:[#allocation21_spill] sm:$0xff] }
 0x2d0   : >> { %2719 = vmatpush.msra.mxu1 %v2690_v30  ;;  %v2330_v57 = vadd.f32 %v17220_v23, %v2233_v51  ;;  %v17232_v10 = vld [vmem:[#allocation15_spill] sm:$0xff] }
 0x2d1   : >> { %v2659_v26 = vadd.f32 %v2651_v1, %v2635_v2  ;;  %v2466_v44 = vadd.f32 %v2465_v35, %v2396_v6  ;;  %3253 = vmatpush.msrb.mxu3 %v11733_v3  ;;  %3174 = vmatpush.msrb.mxu2 %v17218_v60  ;;  %v2132_v35 = vadd.f32 %v11707_v13, %v2067_v55  ;;  %v17225_v13 = vand.u32 4294901760, %v11869_v24  ;;  %v17227_v1 = vld [vmem:[#allocation12_spill] sm:$0xff]  ;;  %v17230_v24 = vld [vmem:[#allocation19_spill] sm:$0xff] }
 0x2d2   : >> { %2720 = vmatpush.msra.mxu1 %v2689_v25  ;;  %v2629_v55 = vld [vmem:[#allocation2 + $0x28] sm:$0xff]  ;;  %v17231_v60 = vand.u32 4294901760, %v11894_v54 }
 0x2d3   : >> { %2667 = vst [vmem:[#allocation2 + $0x18] sm:$0xff] %v2659_v26  ;;  %v2545_v39 = vadd.f32 %v2544_v7, %v2466_v44  ;;  %3255 = vmatpush.msrb.mxu3 %v11742_v49  ;;  %3178 = vmatpush.msrb.mxu2 %v2888_v34  ;;  %v17223_v34 = vld [vmem:[#allocation28_spill] sm:$0xff] }
 0x2d4   : >> { %v2605_v33 = vpop.f32.mrf.mxu0  ;;  %3075 = vmatpush.msrb.mxu1 %v11733_v3  ;;  %v1974_v2 = vadd.f32 %v17223_v34, %v1893_v45  ;;  %v2645_v26 = vld [vmem:[%s16957_s2 + $0x28] sm:$0xff]  ;;  %v17233_v45 = vld [vmem:[#allocation25_spill] sm:$0xff] }
 0x2d5   : >> { %v2471_v37 = vpop.f32.mrf.mxu2  ;;  %v2602_v56 = vadd.f32 %v2601_v48, %v2545_v39  ;;  %3257 = vmatpush.msrb.mxu3 %v17221_v36  ;;  %3182 = vmatpush.msrb.mxu2 %v17222_v46  ;;  %v17226_v48 = vld [vmem:[#allocation17_spill] sm:$0xff] }
 0x2d6   : >> { %v2400_v17 = vpop.f32.mrf.mxu1  ;;  %3077 = vmatpush.msrb.mxu1 %v11742_v49  ;;  %v2241_v40 = vadd.f32 %v17226_v48, %v2132_v35  ;;  %v2071_v6 = vadd.f32 %v17227_v1, %v1974_v2  ;;  %v9955_v49 = vld [vmem:[#allocation3 + $0x28] sm:$0xff]  ;;  %v2683_v48 = vstv %s2679_s11  ;;  %s9905_s11 = sshll.u32 %s3853_s27, 7 }
 0x2d7   : >> { %v2548_v31 = vpop.f32.mrf.mxu3  ;;  %v2652_v7 = vmul.f32 %v2644_v4, %v2602_v56  ;;  %v2401_v27 = vadd.f32 %v2400_v17, %v2330_v57  ;;  %3259 = vmatpush.msrb.mxu3 %v17224_v52  ;;  %3186 = vmatpush.msrb.mxu2 %v17225_v13  ;;  %v2621_v51 = vmul.f32 2.0, %v9955_v49  ;;  %v17235_v57 = vld [vmem:[#allocation18_spill] sm:$0xff]  ;;  %v2682_v13 = vld [vmem:[%s10130_s25] sm:$0x1]  ;;  %s3857_s1 = sadd.s32 %s9905_s11, %s3856_s15  ;;  %s3903_s11 = sadd.s32 3, %s11253_s28 }
 0x2d8   : >> { %3079 = vmatpush.msrb.mxu1 %v17221_v36  ;;  %v2334_v22 = vadd.f32 %v17232_v10, %v2241_v40  ;;  %v2136_v39 = vadd.f32 %v17233_v45, %v2071_v6  ;;  %s3858_s19 = sld [smem:[#allocation8 + %s3857_s1]]  ;;  %s5028_s15 = sshra.s32 %s3903_s11, 7 }
 0x2d9   : >> { %v2660_v3 = vadd.f32 %v2652_v7, %v2636_v29  ;;  %v2472_v30 = vadd.f32 %v2471_v37, %v2401_v27  ;;  %3261 = vmatpush.msrb.mxu3 %v17228_v20  ;;  %3190 = vmatpush.msrb.mxu2 %v17229_v12  ;;  %v2637_v37 = vsub.f32 %v2621_v51, %v2629_v55  ;;  %v2631_v27 = vld [vmem:[#allocation2 + $0x38] sm:$0xff]  ;;  %s5030_s1 = sadd.s32 %s10111_s0, %s5028_s15  ;;  %s5033_s24 = sand.u32 127, %s3903_s11 }
 0x2da   : >> { %3081 = vmatpush.msrb.mxu1 %v17224_v52  ;;  %v2249_v35 = vadd.f32 %v17235_v57, %v2136_v39 }
 0x2db   : >> { %2668 = vst [vmem:[#allocation2 + $0x20] sm:$0xff] %v2660_v3  ;;  %v2549_v47 = vadd.f32 %v2548_v31, %v2472_v30  ;;  %3263 = vmatpush.msrb.mxu3 %v17230_v24  ;;  %3194 = vmatpush.msrb.mxu2 %v17231_v60 }
 0x2dc   : >> { %3083 = vmatpush.msrb.mxu1 %v17228_v20  ;;  %v2609_v23 = vpop.f32.mrf.mxu0 }
 0x2dd   : >> { %v2477_v44 = vpop.f32.mrf.mxu2  ;;  %v2606_v38 = vadd.f32 %v2605_v33, %v2549_v47  ;;  %3265 = vmatpush.msrb.mxu3 %v17234_v63  ;;  %3198 = vmatpush.msrb.mxu2 %v2918_v59  ;;  %v9956_v59 = vld [vmem:[#allocation3 + $0x30] sm:$0xff] }
 0x2de   : >> { %v2405_v21 = vpop.f32.mrf.mxu1  ;;  %3085 = vmatpush.msrb.mxu1 %v17230_v24  ;;  %v2622_v36 = vmul.f32 2.0, %v9956_v59 }
 0x2df   : >> { %v2552_v4 = vpop.f32.mrf.mxu3  ;;  %v2653_v25 = vmul.f32 %v2645_v26, %v2606_v38  ;;  %v2406_v54 = vadd.f32 %v2405_v21, %v2334_v22  ;;  %3267 = vmatpush.msrb.mxu3 %v11852_v62  ;;  %3202 = vmatpush.msrb.mxu2 %v2924_v18  ;;  %v2646_v18 = vld [vmem:[%s16957_s2 + $0x30] sm:$0xff] }
 0x2e0   : >> { %3087 = vmatpush.msrb.mxu1 %v17234_v63  ;;  %v2638_v34 = vsub.f32 %v2622_v36, %v2630_v32 }
 0x2e1   : >> { %v2661_v56 = vadd.f32 %v2653_v25, %v2637_v37  ;;  %v2478_v33 = vadd.f32 %v2477_v44, %v2406_v54  ;;  %3269 = vmatpush.msrb.mxu3 %v11866_v42  ;;  %3206 = vmatpush.msrb.mxu2 %v2930_v28  ;;  %v2338_v28 = vadd.f32 %v17236_v8, %v2249_v35 }
 0x2e2   : >> { %3089 = vmatpush.msrb.mxu1 %v11852_v62 }
 0x2e3   : >> { %2669 = vst [vmem:[#allocation2 + $0x28] sm:$0xff] %v2661_v56  ;;  %v2553_v5 = vadd.f32 %v2552_v4, %v2478_v33  ;;  %3271 = vmatpush.msrb.mxu3 %v11882_v15  ;;  %3210 = vmatpush.msrb.mxu2 %v2936_v43 }
 0x2e4   : >> { %3091 = vmatpush.msrb.mxu1 %v11866_v42  ;;  %v2613_v42 = vpop.f32.mrf.mxu0 }
 0x2e5   : >> { %v2610_v17 = vadd.f32 %v2609_v23, %v2553_v5  ;;  %3273 = vmatpush.msrb.mxu3 %v11908_v0  ;;  %v2483_v46 = vpop.f32.mrf.mxu2  ;;  %3214 = vmatpush.msrb.mxu2 %v2942_v58  ;;  %v9957_v58 = vld [vmem:[#allocation3 + $0x38] sm:$0xff] }
 0x2e6   : >> { %v2410_v31 = vpop.f32.mrf.mxu1  ;;  %3093 = vmatpush.msrb.mxu1 %v11882_v15  ;;  %v2623_v7 = vmul.f32 2.0, %v9957_v58  ;;  %v2647_v15 = vld [vmem:[%s16957_s2 + $0x38] sm:$0xff] }
 0x2e7   : >> { %v2654_v62 = vmul.f32 %v2646_v18, %v2610_v17  ;;  %v2411_v2 = vadd.f32 %v2410_v31, %v2338_v28  ;;  %3275 = vmatpush.msrb.mxu3 %v11931_v50  ;;  %v2556_v16 = vpop.f32.mrf.mxu3  ;;  %3218 = vmatpush.msrb.mxu2 %v2948_v11 }
 0x2e8   : >> { %3095 = vmatpush.msrb.mxu1 %v11908_v0  ;;  %v2639_v0 = vsub.f32 %v2623_v7, %v2631_v27  ;;  %v2736_v27 = vld [vmem:[%s16958_s3 + $0x8] sm:$0xff] }
 0x2e9   : >> { %v2662_v43 = vadd.f32 %v2654_v62, %v2638_v34  ;;  %v2484_v29 = vadd.f32 %v2483_v46, %v2411_v2  ;;  %3277 = vmatpush.msrb.mxu3 %v11954_v53 }
 0x2ea   : >> { %3097 = vmatpush.msrb.mxu1 %v11931_v50  ;;  %v2684_v50 = vmul.f32 %v2683_v48, %v2682_v13  ;;  %v2737_v13 = vld [vmem:[%s16958_s3 + $0x10] sm:$0xff] }
 0x2eb   : >> { %2670 = vst [vmem:[#allocation2 + $0x30] sm:$0xff] %v2662_v43  ;;  %v2557_v41 = vadd.f32 %v2556_v16, %v2484_v29  ;;  %3279 = vmatpush.msrb.mxu3 %v11970_v19  ;;  %v3324_v48 = vsel %vm957_vm0, %v2737_v13, 0 }
 0x2ec   : >> { %3099 = vmatpush.msrb.mxu1 %v11954_v53 }
 0x2ed   : >> { %v2614_v9 = vadd.f32 %v2613_v42, %v2557_v41  ;;  %3281 = vmatpush.msrb.mxu3 %v11981_v14  ;;  %v2735_v42 = vld [vmem:[%s16958_s3] sm:$0xff] }
 0x2ee   : >> { %3101 = vmatpush.msrb.mxu1 %v11970_v19  ;;  %v3318_v41 = vsel %vm957_vm0, %v2735_v42, 0 }
 0x2ef   : >> { %v2655_v11 = vmul.f32 %v2647_v15, %v2614_v9  ;;  %3283 = vmatpush.msrb.mxu3 %v12002_v61  ;;  %v12288_v58 = vand.u32 4294901760, %v3318_v41  ;;  %v3321_v15 = vsel %vm957_vm0, %v2736_v27, 0 }
 0x2f0   : >> { %3103 = vmatpush.msrb.mxu1 %v11981_v14 }
 0x2f1   : >> { %v2663_v52 = vadd.f32 %v2655_v11, %v2639_v0  ;;  %v12294_v7 = vsub.f32 %v3318_v41, %v12288_v58  ;;  %v12302_v0 = vand.u32 4294901760, %v3321_v15 }
 0x2f2   : >> { %3105 = vmatpush.msrb.mxu1 %v12002_v61 }
 0x2f3   : >> { %2671 = vst [vmem:[#allocation2 + $0x38] sm:$0xff] %v2663_v52  ;;  %v3367_v9 = vand.u32 4294901760, %v12294_v7  ;;  %v12311_v52 = vsub.f32 %v3321_v15, %v12302_v0 }
 0x2f5   : >> { %v3368_v11 = vsub.f32 %v12294_v7, %v3367_v9 }
 0x2fa   : >> { %v2681_v53 = vld [vmem:[%s12144_s6] sm:$0x1] }
 0x2fb   : >> { %v2685_v40 = vadd.f32 %v2684_v50, %v2681_v53  ;;  %v3369_v50 = vand.u32 4294901760, %v3368_v11  ;;  %v3375_v53 = vand.u32 4294901760, %v12311_v52 }
 0x2fd   : >> { %2686 = vst [vmem:[%s12144_s6] sm:$0x1] %v2685_v40  ;;  %v12319_v40 = vand.u32 4294901760, %v3324_v48 }
 0x304   : >> { %v2688_v19 = vld [vmem:[%s12149_s14] sm:$0x1]  ;;  %v2734_v14 = vld [vmem:[#allocation2 + $0x38] sm:$0xff]  ;;  %v2733_v3 = vld [vmem:[#allocation2 + $0x30] sm:$0xff] }
 0x305   : >> { %v12152_v1 = vld [vmem:[#allocation2] sm:$0xff]  ;;  %2721 = vmatmul.f32.vlgmr.msra.gmra.mxu1 %v2688_v19  ;;  %v12157_v61 = vand.u32 4294901760, %v2734_v14  ;;  %v2732_v30 = vld [vmem:[#allocation2 + $0x28] sm:$0xff]  ;;  %v12159_v12 = vand.u32 4294901760, %v2733_v3  ;;  %v2730_v24 = vld [vmem:[#allocation2 + $0x18] sm:$0xff]  ;;  %v3376_v19 = vsub.f32 %v12311_v52, %v3375_v53 }
 0x306   : >> { %v12155_v6 = vand.u32 4294901760, %v12152_v1  ;;  %v2731_v20 = vld [vmem:[#allocation2 + $0x20] sm:$0xff]  ;;  %v12161_v47 = vand.u32 4294901760, %v2732_v30  ;;  %v12165_v51 = vld [vmem:[#allocation2 + $0x8] sm:$0xff]  ;;  %v12179_v60 = vld [vmem:[#allocation2 + $0x10] sm:$0xff]  ;;  %v12182_v10 = vand.u32 4294901760, %v2730_v24 }
 0x307   : >> { %v12163_v49 = vand.u32 4294901760, %v2731_v20  ;;  %3350 = vmatpush.msra.mxu0 %v12157_v61  ;;  %v12174_v26 = vand.u32 4294901760, %v12165_v51  ;;  %v12177_v44 = vsub.f32 %v2734_v14, %v12157_v61  ;;  %v12185_v22 = vsub.f32 %v2733_v3, %v12159_v12  ;;  %v2738_v3 = vld [vmem:[%s16958_s3 + $0x18] sm:$0xff] }
 0x308   : >> { %2953 = vmatmul.f32.vlgmr.msra.gmra.mxu3 %v12155_v6  ;;  %v12171_v55 = vsub.f32 %v12152_v1, %v12155_v6  ;;  %v12188_v45 = vsub.f32 %v2732_v30, %v12161_v47  ;;  %v12203_v21 = vand.u32 4294901760, %v12179_v60  ;;  %v12222_v35 = vsub.f32 %v2730_v24, %v12182_v10 }
 0x309   : >> { %3601 = vmatpush.msra.mxu3 %v12157_v61  ;;  %v12195_v38 = vand.u32 4294901760, %v12177_v44  ;;  %v12198_v63 = vsub.f32 %v2731_v20, %v12163_v49  ;;  %3352 = vmatpush.msra.mxu0 %v12159_v12  ;;  %v12206_v4 = vand.u32 4294901760, %v12185_v22  ;;  %v2800_v23 = vsub.f32 %v12165_v51, %v12174_v26 }
 0x30a   : >> { %3035 = vmatmul.f32.vlgmr.msrb.gmra.mxu0 %v12171_v55  ;;  %v12192_v39 = vand.u32 4294901760, %v12171_v55  ;;  %v12209_v37 = vand.u32 4294901760, %v12188_v45  ;;  %v2808_v36 = vsub.f32 %v12179_v60, %v12203_v21  ;;  %v2817_v8 = vand.u32 4294901760, %v12222_v35 }
 0x30b   : >> { %3603 = vmatpush.msra.mxu3 %v12159_v12  ;;  %v2850_v54 = vsub.f32 %v12177_v44, %v12195_v38  ;;  %3354 = vmatpush.msra.mxu0 %v12161_v47  ;;  %v2842_v57 = vsub.f32 %v12185_v22, %v12206_v4  ;;  %v12228_v5 = vand.u32 4294901760, %v12198_v63  ;;  %v2801_v32 = vand.u32 4294901760, %v2800_v23 }
 0x30c   : >> { %v2794_v25 = vsub.f32 %v12171_v55, %v12192_v39  ;;  %v2834_v59 = vsub.f32 %v12188_v45, %v12209_v37  ;;  %v2809_v31 = vand.u32 4294901760, %v2808_v36  ;;  %v2818_v34 = vsub.f32 %v12222_v35, %v2817_v8 }
 0x30d   : >> { %3605 = vmatpush.msra.mxu3 %v12161_v47  ;;  %3109 = vmatmul.f32.vlgmr.msrb.gmra.mxu1 %v12192_v39  ;;  %v12225_v33 = vand.u32 4294901760, %v2850_v54  ;;  %v12239_v18 = vand.u32 4294901760, %v2842_v57  ;;  %v2826_v28 = vsub.f32 %v12198_v63, %v12228_v5  ;;  %v2802_v46 = vsub.f32 %v2800_v23, %v2801_v32 }
 0x30e   : >> { %v2795_v56 = vand.u32 4294901760, %v2794_v25  ;;  %3356 = vmatpush.msra.mxu0 %v12163_v49  ;;  %v12247_v17 = vand.u32 4294901760, %v2834_v59  ;;  %v2810_v2 = vsub.f32 %v2808_v36, %v2809_v31  ;;  %v2819_v43 = vand.u32 4294901760, %v2818_v34  ;;  %v2740_v25 = vld [vmem:[%s16958_s3 + $0x28] sm:$0xff] }
 0x30f   : >> { %3607 = vmatpush.msra.mxu3 %v12163_v49  ;;  %3443 = vmatpush.msra.mxu1 %v12225_v33  ;;  %v2827_v62 = vand.u32 4294901760, %v2826_v28  ;;  %v2803_v16 = vand.u32 4294901760, %v2802_v46  ;;  %v12327_v14 = vsub.f32 %v3324_v48, %v12319_v40  ;;  %v3327_v30 = vsel %vm957_vm0, %v2738_v3, 0 }
 0x310   : >> { %2796 = vmatmul.f32.vlgmr.msra.gmra.mxu2 %v2795_v56  ;;  %2957 = vmatmul.f32.gmra.mxu3 %v12174_v26  ;;  %v2811_v29 = vand.u32 4294901760, %v2810_v2  ;;  %v3377_v20 = vand.u32 4294901760, %v3376_v19  ;;  %v3333_v54 = vsel %vm957_vm0, %v2740_v25, 0 }
 0x311   : >> { %3358 = vmatpush.msra.mxu0 %v12182_v10  ;;  %3529 = vmatpush.msra.mxu2 %v12177_v44  ;;  %v3383_v24 = vand.u32 4294901760, %v12327_v14  ;;  %v12367_v57 = vand.u32 4294901760, %v3333_v54 }
 0x312   : >> { %3609 = vmatpush.msra.mxu3 %v12182_v10  ;;  %3040 = vmatmul.f32.gmra.mxu0 %v2800_v23 }
 0x313   : >> { %3449 = vmatpush.msra.mxu1 %v12239_v18  ;;  %3360 = vmatpush.msra.mxu0 %v12203_v21 }
 0x314   : >> { %3532 = vmatpush.msra.mxu2 %v12185_v22  ;;  %3611 = vmatpush.msra.mxu3 %v12203_v21 }
 0x315   : >> { %3455 = vmatpush.msra.mxu1 %v12247_v17  ;;  %3362 = vmatpush.msra.mxu0 %v12174_v26 }
 0x316   : >> { %3535 = vmatpush.msra.mxu2 %v12188_v45  ;;  %3613 = vmatpush.msra.mxu3 %v12174_v26 }
 0x317   : >> { %3115 = vmatmul.f32.gmra.mxu1 %v2801_v32  ;;  %3364 = vmatpush.msra.mxu0 %v12155_v6 }
 0x318   : >> { %3461 = vmatpush.msra.mxu1 %v2827_v62  ;;  %3538 = vmatpush.msra.mxu2 %v12198_v63 }
 0x319   : >> { %3615 = vmatpush.msra.mxu3 %v12155_v6  ;;  %3676 = vmatpush.msrb.mxu0 %v12195_v38 }
 0x31a   : >> { %2804 = vmatmul.f32.gmra.mxu2 %v2803_v16  ;;  %2961 = vmatmul.f32.gmra.mxu3 %v12203_v21 }
 0x31b   : >> { %3467 = vmatpush.msra.mxu1 %v2819_v43  ;;  %3541 = vmatpush.msra.mxu2 %v12222_v35 }
 0x31c   : >> { %3680 = vmatpush.msrb.mxu0 %v12206_v4 }
 0x31d   : >> { %3045 = vmatmul.f32.gmra.mxu0 %v2808_v36  ;;  %3473 = vmatpush.msra.mxu1 %v2811_v29 }
 0x31e   : >> { %3544 = vmatpush.msra.mxu2 %v2808_v36  ;;  %3684 = vmatpush.msrb.mxu0 %v12209_v37 }
 0x31f   : >> { %3479 = vmatpush.msra.mxu1 %v2803_v16 }
 0x320   : >> { %3547 = vmatpush.msra.mxu2 %v2800_v23  ;;  %3688 = vmatpush.msrb.mxu0 %v12228_v5 }
 0x321   : >> { %3121 = vmatmul.f32.gmra.mxu1 %v2809_v31 }
 0x322   : >> { %3485 = vmatpush.msra.mxu1 %v2795_v56  ;;  %3550 = vmatpush.msra.mxu2 %v12171_v55  ;;  %v12335_v55 = vand.u32 4294901760, %v3327_v30  ;;  %v12375_v56 = vsub.f32 %v3333_v54, %v12367_v57 }
 0x323   : >> { %3692 = vmatpush.msrb.mxu0 %v2817_v8  ;;  %2812 = vmatmul.f32.gmra.mxu2 %v2811_v29 }
 0x324   : >> { %3747 = vmatpush.msrb.mxu1 %v12157_v61  ;;  %2965 = vmatmul.f32.gmra.mxu3 %v12182_v10 }
 0x325   : >> { %3696 = vmatpush.msrb.mxu0 %v2809_v31 }
 0x326   : >> { %3749 = vmatpush.msrb.mxu1 %v12159_v12  ;;  %3050 = vmatmul.f32.gmra.mxu0 %v12222_v35 }
 0x327   : >> { %3700 = vmatpush.msrb.mxu0 %v2801_v32 }
 0x328   : >> { %3751 = vmatpush.msrb.mxu1 %v12161_v47 }
 0x329   : >> { %3704 = vmatpush.msrb.mxu0 %v12192_v39  ;;  %3127 = vmatmul.f32.gmra.mxu1 %v2817_v8  ;;  %v2742_v8 = vld [vmem:[%s16958_s3 + $0x38] sm:$0xff] }
 0x32a   : >> { %3753 = vmatpush.msrb.mxu1 %v12163_v49  ;;  %v3339_v28 = vsel %vm957_vm0, %v2742_v8, 0 }
 0x32b   : >> { %2820 = vmatmul.f32.gmra.mxu2 %v2819_v43  ;;  %v12399_v31 = vand.u32 4294901760, %v3339_v28 }
 0x32c   : >> { %3755 = vmatpush.msrb.mxu1 %v12182_v10  ;;  %2969 = vmatmul.f32.gmra.mxu3 %v12163_v49 }
 0x32d   : >> { %v12407_v34 = vsub.f32 %v3339_v28, %v12399_v31 }
 0x32e   : >> { %3757 = vmatpush.msrb.mxu1 %v12203_v21  ;;  %3055 = vmatmul.f32.gmra.mxu0 %v12198_v63 }
 0x32f   : >> { %v3423_v2 = vand.u32 4294901760, %v12407_v34 }
 0x330   : >> { %3759 = vmatpush.msrb.mxu1 %v12174_v26 }
 0x331   : >> { %3133 = vmatmul.f32.gmra.mxu1 %v12228_v5 }
 0x332   : >> { %3761 = vmatpush.msrb.mxu1 %v12155_v6 }
 0x333   : >> { %2828 = vmatmul.f32.gmra.mxu2 %v2827_v62 }
 0x334   : >> { %2973 = vmatmul.f32.gmra.mxu3 %v12161_v47 }
 0x336   : >> { %3060 = vmatmul.f32.gmra.mxu0 %v12188_v45  ;;  %v2739_v45 = vld [vmem:[%s16958_s3 + $0x20] sm:$0xff] }
 0x337   : >> { %v3330_v39 = vsel %vm957_vm0, %v2739_v45, 0 }
 0x338   : >> { %v12351_v63 = vand.u32 4294901760, %v3330_v39 }
 0x339   : >> { %3139 = vmatmul.f32.gmra.mxu1 %v12209_v37 }
 0x33a   : >> { %v12359_v37 = vsub.f32 %v3330_v39, %v12351_v63 }
 0x33b   : >> { %2836 = vmatmul.f32.gmra.mxu2 %v12247_v17 }
 0x33c   : >> { %2977 = vmatmul.f32.gmra.mxu3 %v12159_v12 }
 0x33e   : >> { %3065 = vmatmul.f32.gmra.mxu0 %v12185_v22  ;;  %v12343_v22 = vsub.f32 %v3327_v30, %v12335_v55 }
 0x341   : >> { %3145 = vmatmul.f32.gmra.mxu1 %v12206_v4 }
 0x343   : >> { %2844 = vmatmul.f32.gmra.mxu2 %v12239_v18 }
 0x344   : >> { %2981 = vmatmul.f32.gmra.mxu3 %v12157_v61 }
 0x346   : >> { %3070 = vmatmul.f32.gmra.mxu0 %v12177_v44  ;;  %v3384_v44 = vsub.f32 %v12327_v14, %v3383_v24 }
 0x349   : >> { %3151 = vmatmul.f32.gmra.mxu1 %v12195_v38  ;;  %v3385_v38 = vand.u32 4294901760, %v3384_v44 }
 0x34b   : >> { %2852 = vmatmul.f32.gmra.mxu2 %v12225_v33  ;;  %v2741_v33 = vld [vmem:[%s16958_s3 + $0x30] sm:$0xff] }
 0x34c   : >> { %3285 = vmatmul.f32.vlgmr.msrb.gmra.mxu3 %v12155_v6  ;;  %v3336_v5 = vsel %vm957_vm0, %v2741_v33, 0 }
 0x34d   : >> { %v12383_v36 = vand.u32 4294901760, %v3336_v5 }
 0x34e   : >> { %3370 = vmatmul.f32.vlgmr.msra.gmra.mxu0 %v3369_v50 }
 0x34f   : >> { %v12391_v18 = vsub.f32 %v3336_v5, %v12383_v36 }
 0x351   : >> { %3487 = vmatmul.f32.vlgmr.msra.gmra.mxu1 %v12288_v58 }
 0x353   : >> { %3220 = vmatmul.f32.vlgmr.msrb.gmra.mxu2 %v12155_v6  ;;  %v3391_v6 = vand.u32 4294901760, %v12343_v22 }
 0x354   : >> { %3289 = vmatmul.f32.gmra.mxu3 %v12174_v26 }
 0x355   : >> { %v3392_v4 = vsub.f32 %v12343_v22, %v3391_v6 }
 0x356   : >> { %3378 = vmatmul.f32.gmra.mxu0 %v3377_v20 }
 0x357   : >> { %v3393_v23 = vand.u32 4294901760, %v3392_v4 }
 0x359   : >> { %3491 = vmatmul.f32.gmra.mxu1 %v12302_v0 }
 0x35b   : >> { %3224 = vmatmul.f32.gmra.mxu2 %v12174_v26  ;;  %v3399_v26 = vand.u32 4294901760, %v12359_v37 }
 0x35c   : >> { %3293 = vmatmul.f32.gmra.mxu3 %v12203_v21 }
 0x35d   : >> { %v3400_v35 = vsub.f32 %v12359_v37, %v3399_v26 }
 0x35e   : >> { %3386 = vmatmul.f32.gmra.mxu0 %v3385_v38 }
 0x35f   : >> { %v3401_v59 = vand.u32 4294901760, %v3400_v35 }
 0x361   : >> { %3495 = vmatmul.f32.gmra.mxu1 %v12319_v40 }
 0x363   : >> { %3228 = vmatmul.f32.gmra.mxu2 %v12203_v21  ;;  %v3407_v21 = vand.u32 4294901760, %v12375_v56 }
 0x364   : >> { %3297 = vmatmul.f32.gmra.mxu3 %v12182_v10 }
 0x365   : >> { %v3408_v32 = vsub.f32 %v12375_v56, %v3407_v21 }
 0x366   : >> { %3394 = vmatmul.f32.gmra.mxu0 %v3393_v23 }
 0x367   : >> { %v3409_v17 = vand.u32 4294901760, %v3408_v32 }
 0x369   : >> { %3499 = vmatmul.f32.gmra.mxu1 %v12335_v55 }
 0x36b   : >> { %3232 = vmatmul.f32.gmra.mxu2 %v12182_v10  ;;  %v3415_v10 = vand.u32 4294901760, %v12391_v18 }
 0x36c   : >> { %3301 = vmatmul.f32.gmra.mxu3 %v12163_v49 }
 0x36d   : >> { %v3416_v46 = vsub.f32 %v12391_v18, %v3415_v10 }
 0x36e   : >> { %3402 = vmatmul.f32.gmra.mxu0 %v3401_v59 }
 0x36f   : >> { %v3417_v62 = vand.u32 4294901760, %v3416_v46 }
 0x371   : >> { %3503 = vmatmul.f32.gmra.mxu1 %v12351_v63 }
 0x373   : >> { %3236 = vmatmul.f32.gmra.mxu2 %v12163_v49  ;;  %v3424_v49 = vsub.f32 %v12407_v34, %v3423_v2 }
 0x374   : >> { %3305 = vmatmul.f32.gmra.mxu3 %v12161_v47 }
 0x375   : >> { %v3425_v16 = vand.u32 4294901760, %v3424_v49 }
 0x376   : >> { %3410 = vmatmul.f32.gmra.mxu0 %v3409_v17 }
 0x379   : >> { %3507 = vmatmul.f32.gmra.mxu1 %v12367_v57 }
 0x37b   : >> { %3240 = vmatmul.f32.gmra.mxu2 %v12161_v47 }
 0x37c   : >> { %3309 = vmatmul.f32.gmra.mxu3 %v12159_v12 }
 0x37e   : >> { %3418 = vmatmul.f32.gmra.mxu0 %v3417_v62 }
 0x381   : >> { %3511 = vmatmul.f32.gmra.mxu1 %v12383_v36 }
 0x382   : >> { %v2722_v43 = vpop.f32.mrf.mxu1 }
 0x383   : >> { %3244 = vmatmul.f32.gmra.mxu2 %v12159_v12  ;;  %2725 = vst.msk [vmem:[#allocation4 + $0x1] sm:$0x1] %vm1545_vm1, %v2722_v43 }
 0x384   : >> { %3313 = vmatmul.f32.gmra.mxu3 %v12157_v61 }
 0x386   : >> { %3426 = vmatmul.f32.gmra.mxu0 %v3425_v16 }
 0x387   : >> { %v12420_v29 = vpop.f32.mrf.mxu0 }
 0x389   : >> { %3515 = vmatmul.f32.gmra.mxu1 %v12399_v31 }
 0x38a   : >> { %v12425_v42 = vpop.f32.mrf.mxu1 }
 0x38b   : >> { %v12423_v47 = vpop.f32.mrf.mxu3  ;;  %3248 = vmatmul.f32.gmra.mxu2 %v12157_v61 }
 0x38c   : >> { %3619 = vmatmul.f32.vlgmr.msra.gmra.mxu3 %v3367_v9 }
 0x38e   : >> { %3706 = vmatmul.f32.vlgmr.msrb.gmra.mxu0 %v12288_v58 }
 0x38f   : >> { %v12431_v12 = vpop.f32.mrf.mxu0 }
 0x391   : >> { %3763 = vmatmul.f32.vlgmr.msrb.gmra.mxu1 %v12288_v58 }
 0x393   : >> { %v12434_v41 = vpop.f32.mrf.mxu2  ;;  %3553 = vmatmul.f32.vlgmr.msra.gmra.mxu2 %v12294_v7  ;;  %v12437_v27 = vpop.f32.mrf.mxu3 }
 0x394   : >> { %v12439_v15 = vpop.f32.mrf.mxu1  ;;  %3625 = vmatmul.f32.gmra.mxu3 %v3375_v53  ;;  %v2955_v49 = vadd.f32 %v12423_v47, %v12434_v41 }
 0x396   : >> { %3710 = vmatmul.f32.gmra.mxu0 %v12302_v0 }
 0x399   : >> { %3767 = vmatmul.f32.gmra.mxu1 %v12302_v0 }
 0x39a   : >> { %v12444_v61 = vpop.f32.mrf.mxu0 }
 0x39b   : >> { %3558 = vmatmul.f32.gmra.mxu2 %v12311_v52 }
 0x39c   : >> { %3631 = vmatmul.f32.gmra.mxu3 %v3383_v24 }
 0x39d   : >> { %v12450_v58 = vpop.f32.mrf.mxu2  ;;  %v12452_v7 = vpop.f32.mrf.mxu3 }
 0x39e   : >> { %v12454_v9 = vpop.f32.mrf.mxu1  ;;  %3714 = vmatmul.f32.gmra.mxu0 %v12319_v40 }
 0x3a1   : >> { %3771 = vmatmul.f32.gmra.mxu1 %v12319_v40 }
 0x3a3   : >> { %v12458_v11 = vpop.f32.mrf.mxu0  ;;  %3563 = vmatmul.f32.gmra.mxu2 %v12327_v14 }
 0x3a4   : >> { %3637 = vmatmul.f32.gmra.mxu3 %v3391_v6 }
 0x3a6   : >> { %3718 = vmatmul.f32.gmra.mxu0 %v12335_v55  ;;  %v12464_v0 = vpop.f32.mrf.mxu2  ;;  %v12468_v13 = vpop.f32.mrf.mxu1 }
 0x3a7   : >> { %v12466_v52 = vpop.f32.mrf.mxu3 }
 0x3a9   : >> { %3775 = vmatmul.f32.gmra.mxu1 %v12335_v55 }
 0x3ab   : >> { %v12471_v48 = vpop.f32.mrf.mxu0  ;;  %3568 = vmatmul.f32.gmra.mxu2 %v12343_v22 }
 0x3ac   : >> { %3643 = vmatmul.f32.gmra.mxu3 %v3399_v26 }
 0x3ae   : >> { %3722 = vmatmul.f32.gmra.mxu0 %v12351_v63  ;;  %v12477_v50 = vpop.f32.mrf.mxu2  ;;  %v12481_v40 = vpop.f32.mrf.mxu1 }
 0x3af   : >> { %v12479_v53 = vpop.f32.mrf.mxu3 }
 0x3b1   : >> { %3779 = vmatmul.f32.gmra.mxu1 %v12351_v63 }
 0x3b3   : >> { %v12484_v19 = vpop.f32.mrf.mxu0  ;;  %3573 = vmatmul.f32.gmra.mxu2 %v12359_v37 }
 0x3b4   : >> { %3649 = vmatmul.f32.gmra.mxu3 %v3407_v21 }
 0x3b6   : >> { %3726 = vmatmul.f32.gmra.mxu0 %v12367_v57  ;;  %v12490_v14 = vpop.f32.mrf.mxu2  ;;  %v12494_v30 = vpop.f32.mrf.mxu1 }
 0x3b7   : >> { %v12492_v3 = vpop.f32.mrf.mxu3 }
 0x3b9   : >> { %3783 = vmatmul.f32.gmra.mxu1 %v12367_v57 }
 0x3bb   : >> { %v12497_v20 = vpop.f32.mrf.mxu0  ;;  %3578 = vmatmul.f32.gmra.mxu2 %v12375_v56 }
 0x3bc   : >> { %3655 = vmatmul.f32.gmra.mxu3 %v3415_v10 }
 0x3be   : >> { %3730 = vmatmul.f32.gmra.mxu0 %v12383_v36  ;;  %v12503_v24 = vpop.f32.mrf.mxu2  ;;  %v12507_v44 = vpop.f32.mrf.mxu1 }
 0x3bf   : >> { %v12505_v55 = vpop.f32.mrf.mxu3  ;;  %17237 = vst [vmem:[#allocation30_spill] sm:$0xff] %v12507_v44 }
 0x3c1   : >> { %3787 = vmatmul.f32.gmra.mxu1 %v12383_v36 }
 0x3c3   : >> { %v12510_v22 = vpop.f32.mrf.mxu0  ;;  %3583 = vmatmul.f32.gmra.mxu2 %v12391_v18 }
 0x3c4   : >> { %17238 = vst [vmem:[#allocation31_spill] sm:$0xff] %v12510_v22  ;;  %3661 = vmatmul.f32.gmra.mxu3 %v3423_v2  ;;  %v2959_v22 = vadd.f32 %v12437_v27, %v12450_v58  ;;  %v3935_v27 = vld [vmem:[%s16959_s4 + $0x78] sm:$0xff] }
 0x3c6   : >> { %3734 = vmatmul.f32.gmra.mxu0 %v12399_v31  ;;  %v12516_v45 = vpop.f32.mrf.mxu2  ;;  %v12520_v38 = vpop.f32.mrf.mxu1 }
 0x3c7   : >> { %v12518_v39 = vpop.f32.mrf.mxu3  ;;  %17239 = vst [vmem:[#allocation22_spill] sm:$0xff] %v12520_v38  ;;  %v3037_v38 = vadd.f32 %v12420_v29, %v2955_v49 }
 0x3c9   : >> { %3791 = vmatmul.f32.gmra.mxu1 %v12399_v31 }
 0x3cb   : >> { %v3371_v6 = vpop.f32.mrf.mxu0  ;;  %3588 = vmatmul.f32.gmra.mxu2 %v12407_v34 }
 0x3ce   : >> { %v12524_v63 = vpop.f32.mrf.mxu2  ;;  %v12526_v37 = vpop.f32.mrf.mxu1 }
 0x3cf   : >> { %v3286_v4 = vpop.f32.mrf.mxu3 }
 0x3d3   : >> { %v12528_v25 = vpop.f32.mrf.mxu0 }
 0x3d6   : >> { %v3221_v54 = vpop.f32.mrf.mxu2  ;;  %v12530_v26 = vpop.f32.mrf.mxu1 }
 0x3d7   : >> { %v3290_v23 = vpop.f32.mrf.mxu3 }
 0x3db   : >> { %v12532_v57 = vpop.f32.mrf.mxu0 }
 0x3de   : >> { %v3225_v35 = vpop.f32.mrf.mxu2  ;;  %v12536_v33 = vpop.f32.mrf.mxu1 }
 0x3df   : >> { %v12534_v56 = vpop.f32.mrf.mxu3 }
 0x3e3   : >> { %v12538_v5 = vpop.f32.mrf.mxu0 }
 0x3e6   : >> { %v3229_v59 = vpop.f32.mrf.mxu2  ;;  %v12542_v36 = vpop.f32.mrf.mxu1 }
 0x3e7   : >> { %v12540_v21 = vpop.f32.mrf.mxu3 }
 0x3eb   : >> { %v12544_v32 = vpop.f32.mrf.mxu0 }
 0x3ee   : >> { %v12546_v18 = vpop.f32.mrf.mxu2  ;;  %v12550_v28 = vpop.f32.mrf.mxu1 }
 0x3ef   : >> { %v12548_v8 = vpop.f32.mrf.mxu3 }
 0x3f3   : >> { %v12552_v17 = vpop.f32.mrf.mxu0 }
 0x3f4   : >> { %17240 = vst [vmem:[#allocation23_spill] sm:$0xff] %v12552_v17 }
 0x3f6   : >> { %v12554_v10 = vpop.f32.mrf.mxu2  ;;  %v12558_v46 = vpop.f32.mrf.mxu1 }
 0x3f7   : >> { %v12556_v31 = vpop.f32.mrf.mxu3  ;;  %17241 = vst [vmem:[#allocation20_spill] sm:$0xff] %v12558_v46 }
 0x3fb   : >> { %v12560_v34 = vpop.f32.mrf.mxu0 }
 0x3fc   : >> { %17242 = vst [vmem:[#allocation13_spill] sm:$0xff] %v12560_v34  ;;  %v3111_v34 = vadd.f32 %v12425_v42, %v3037_v38  ;;  %v12593_v38 = vand.u32 4294901760, %v3935_v27 }
 0x3fe   : >> { %v12562_v62 = vpop.f32.mrf.mxu2  ;;  %v12568_v16 = vpop.f32.mrf.mxu1  ;;  %v3222_v47 = vadd.f32 %v3221_v54, %v3111_v34  ;;  %3937 = vmatpush.msrb.mxu3 %v12593_v38  ;;  %v12608_v34 = vmul.f32 2.0, %v12152_v1 }
 0x3ff   : >> { %v12564_v2 = vpop.f32.mrf.mxu3  ;;  %17244 = vst [vmem:[#allocation24_spill] sm:$0xff] %v12568_v16 }
 0x400   : >> { %17243 = vst [vmem:[#allocation14_spill] sm:$0xff] %v12564_v2  ;;  %v3042_v2 = vadd.f32 %v12431_v12, %v2959_v22  ;;  %v3287_v29 = vadd.f32 %v3286_v4, %v3222_v47 }
 0x402   : >> { %v3117_v49 = vadd.f32 %v12439_v15, %v3042_v2  ;;  %v12602_v15 = vsub.f32 %v3935_v27, %v12593_v38  ;;  %v3372_v4 = vadd.f32 %v3371_v6, %v3287_v29  ;;  %v2967_v6 = vadd.f32 %v12466_v52, %v12477_v50  ;;  %v12629_v27 = vld [vmem:[#allocation3] sm:$0xff] }
 0x403   : >> { %v12570_v43 = vpop.f32.mrf.mxu0 }
 0x404   : >> { %17245 = vst [vmem:[#allocation27_spill] sm:$0xff] %v12570_v43  ;;  %v2963_v43 = vadd.f32 %v12452_v7, %v12464_v0  ;;  %v3226_v22 = vadd.f32 %v3225_v35, %v3117_v49  ;;  %v3934_v7 = vld [vmem:[%s16959_s4 + $0x70] sm:$0xff]  ;;  %v17031_v35 = vand.u32 4294901760, %v12602_v15  ;;  %4164 = vmatpush.msra.mxu1 %v12602_v15  ;;  %v3932_v49 = vld [vmem:[%s16959_s4 + $0x60] sm:$0xff] }
 0x405   : >> { %v12604_v0 = vand.u32 4294901760, %v3934_v7  ;;  %v12638_v52 = vand.u32 4294901760, %v3932_v49 }
 0x406   : >> { %v12575_v17 = vpop.f32.mrf.mxu2  ;;  %v12580_v44 = vpop.f32.mrf.mxu1  ;;  %v3047_v12 = vadd.f32 %v12444_v61, %v2963_v43  ;;  %v3933_v61 = vld [vmem:[%s16959_s4 + $0x68] sm:$0xff]  ;;  %v3291_v1 = vadd.f32 %v3290_v23, %v3226_v22 }
 0x407   : >> { %v12577_v46 = vpop.f32.mrf.mxu3  ;;  %17247 = vst [vmem:[#allocation16_spill] sm:$0xff] %v12580_v44  ;;  %v12615_v2 = vsub.f32 %v3934_v7, %v12604_v0  ;;  %v12617_v43 = vand.u32 4294901760, %v3933_v61  ;;  %3939 = vmatpush.msrb.mxu3 %v12604_v0  ;;  %v4036_v7 = vsub.f32 %v12602_v15, %v17031_v35 }
 0x408   : >> { %17246 = vst [vmem:[#allocation28_spill] sm:$0xff] %v12577_v46  ;;  %v3123_v47 = vadd.f32 %v12454_v9, %v3047_v12  ;;  %v3489_v9 = vadd.f32 %v12526_v37, %v3372_v4  ;;  %v3931_v12 = vld [vmem:[%s16959_s4 + $0x58] sm:$0xff]  ;;  %v12655_v37 = vsub.f32 %v3932_v49, %v12638_v52  ;;  %v3380_v4 = vadd.f32 %v12528_v25, %v3291_v1 }
 0x409   : >> { %17249 = vst [vmem:[#allocation12_spill] sm:$0xff] %v12617_v43  ;;  %v17032_v44 = vand.u32 4294901760, %v12615_v2  ;;  %v12636_v46 = vsub.f32 %v3933_v61, %v12617_v43  ;;  %3941 = vmatpush.msrb.mxu3 %v12617_v43  ;;  %4167 = vmatpush.msra.mxu1 %v12615_v2  ;;  %v4037_v61 = vand.u32 4294901760, %v4036_v7  ;;  %v12663_v7 = vand.u32 4294901760, %v3931_v12 }
 0x40a   : >> { %17250 = vst [vmem:[#allocation29_spill] sm:$0xff] %v12638_v52  ;;  %v3230_v50 = vadd.f32 %v3229_v59, %v3123_v47  ;;  %v3052_v59 = vadd.f32 %v12458_v11, %v2967_v6  ;;  %v17039_v43 = vand.u32 4294901760, %v12655_v37  ;;  %v12677_v1 = vmul.f32 2.0, %v12165_v51 }
 0x40b   : >> { %v12583_v41 = vpop.f32.mrf.mxu0  ;;  %v4042_v16 = vsub.f32 %v12615_v2, %v17032_v44  ;;  %3943 = vmatpush.msrb.mxu3 %v12638_v52  ;;  %4170 = vmatpush.msra.mxu1 %v12636_v46  ;;  %17251 = vst [vmem:[#allocation19_spill] sm:$0xff] %v12663_v7  ;;  %v3930_v44 = vld [vmem:[%s16959_s4 + $0x50] sm:$0xff] }
 0x40c   : >> { %4038 = vmatpush.msra.mxu0 %v4037_v61  ;;  %v12672_v11 = vand.u32 4294901760, %v3930_v44  ;;  %v3295_v25 = vadd.f32 %v12534_v56, %v3230_v50  ;;  %v4054_v61 = vsub.f32 %v12655_v37, %v17039_v43  ;;  %v3129_v50 = vadd.f32 %v12468_v13, %v3052_v59 }
 0x40d   : >> { %v4043_v49 = vand.u32 4294901760, %v4042_v16  ;;  %4173 = vmatpush.msra.mxu1 %v12655_v37  ;;  %v12680_v16 = vsub.f32 %v3931_v12, %v12663_v7  ;;  %3945 = vmatpush.msrb.mxu3 %v12663_v7 }
 0x40e   : >> { %v12591_v58 = vpop.f32.mrf.mxu2  ;;  %v12596_v54 = vpop.f32.mrf.mxu1  ;;  %17252 = vst [vmem:[#allocation15_spill] sm:$0xff] %v12672_v11  ;;  %v12690_v56 = vsub.f32 %v3930_v44, %v12672_v11  ;;  %v3493_v44 = vadd.f32 %v12530_v26, %v3380_v4  ;;  %v4055_v13 = vand.u32 4294901760, %v4054_v61  ;;  %v3388_v59 = vadd.f32 %v12532_v57, %v3295_v25 }
 0x40f   : >> { %17248 = vst [vmem:[#allocation17_spill] sm:$0xff] %v12591_v58  ;;  %v3620_v42 = vpop.f32.mrf.mxu3  ;;  %v17037_v58 = vand.u32 4294901760, %v12636_v46  ;;  %4044 = vmatpush.msra.mxu0 %v4043_v49  ;;  %3947 = vmatpush.msrb.mxu3 %v12672_v11  ;;  %v3819_v49 = vld [vmem:[%s16957_s2] sm:$0xff]  ;;  %v3234_v57 = vadd.f32 %v12546_v18, %v3129_v50  ;;  %v3926_v18 = vld [vmem:[%s16959_s4 + $0x30] sm:$0xff] }
 0x410   : >> { %4176 = vmatpush.msra.mxu1 %v12680_v16 }
 0x411   : >> { %v4048_v52 = vsub.f32 %v12636_v46, %v17037_v58  ;;  %v3880_v58 = vld [vmem:[%s10135_s29 + $0x70] sm:$0xff] }
 0x412   : >> { %4179 = vmatpush.msra.mxu1 %v12690_v56 }
 0x413   : >> { %v12624_v29 = vpop.f32.mrf.mxu0 }
 0x416   : >> { %v3554_v22 = vpop.f32.mrf.mxu2  ;;  %v12661_v23 = vpop.f32.mrf.mxu1 }
 0x417   : >> { %v12648_v35 = vpop.f32.mrf.mxu3  ;;  %v3555_v47 = vadd.f32 %v3554_v22, %v3489_v9  ;;  %v3929_v9 = vld [vmem:[%s16959_s4 + $0x48] sm:$0xff]  ;;  %v4049_v22 = vand.u32 4294901760, %v4048_v52  ;;  %v17038_v52 = vand.u32 4294901760, %v12680_v16 }
 0x418   : >> { %v12692_v51 = vand.u32 4294901760, %v3929_v9 }
 0x419   : >> { %v3621_v6 = vadd.f32 %v3620_v42, %v3555_v47  ;;  %v2971_v42 = vadd.f32 %v12479_v53, %v12490_v14  ;;  %v3881_v47 = vld [vmem:[%s10135_s29 + $0x78] sm:$0xff]  ;;  %4050 = vmatpush.msra.mxu0 %v4049_v22  ;;  %v17047_v53 = vand.u32 4294901760, %v12690_v56  ;;  %v3879_v22 = vld [vmem:[%s10135_s29 + $0x68] sm:$0xff] }
 0x41a   : >> { %17253 = vst [vmem:[#allocation25_spill] sm:$0xff] %v12692_v51  ;;  %3882 = vmatpush.msrb.mxu2 %v3881_v47  ;;  %v12709_v14 = vsub.f32 %v3929_v9, %v12692_v51  ;;  %v3927_v9 = vld [vmem:[%s16959_s4 + $0x38] sm:$0xff]  ;;  %3949 = vmatpush.msrb.mxu3 %v12692_v51 }
 0x41b   : >> { %v3708_v12 = vadd.f32 %v12583_v41, %v3621_v6  ;;  %v3928_v41 = vld [vmem:[%s16959_s4 + $0x40] sm:$0xff]  ;;  %v12716_v4 = vpop.f32.mrf.mxu0  ;;  %v4060_v6 = vsub.f32 %v12680_v16, %v17038_v52  ;;  %4056 = vmatpush.msra.mxu0 %v4055_v13  ;;  %v12736_v52 = vand.u32 4294901760, %v3927_v9 }
 0x41c   : >> { %v12722_v61 = vand.u32 4294901760, %v3928_v41  ;;  %3883 = vmatpush.msrb.mxu2 %v3880_v58  ;;  %v17046_v47 = vand.u32 4294901760, %v12709_v14  ;;  %4182 = vmatpush.msra.mxu1 %v12709_v14  ;;  %v12746_v58 = vld [vmem:[#allocation3 + $0x8] sm:$0xff] }
 0x41d   : >> { %v3765_v26 = vadd.f32 %v12596_v54, %v3708_v12  ;;  %v4066_v12 = vsub.f32 %v12690_v56, %v17047_v53  ;;  %v4061_v51 = vand.u32 4294901760, %v4060_v6 }
 0x41e   : >> { %v3559_v54 = vpop.f32.mrf.mxu2  ;;  %v12739_v7 = vsub.f32 %v3928_v41, %v12722_v61  ;;  %3951 = vmatpush.msrb.mxu3 %v12722_v61  ;;  %v12748_v50 = vpop.f32.mrf.mxu1  ;;  %3884 = vmatpush.msrb.mxu2 %v3879_v22  ;;  %v12756_v41 = vand.u32 4294901760, %v3926_v18  ;;  %v3812_v22 = vsub.f32 %v12677_v1, %v12746_v58 }
 0x41f   : >> { %v12730_v25 = vpop.f32.mrf.mxu3  ;;  %v3827_v43 = vmul.f32 %v3819_v49, %v3765_v26  ;;  %v3560_v11 = vadd.f32 %v3559_v54, %v3493_v44  ;;  %v4067_v13 = vand.u32 4294901760, %v4066_v12  ;;  %v4072_v44 = vsub.f32 %v12709_v14, %v17046_v47  ;;  %4062 = vmatpush.msra.mxu0 %v4061_v51 }
 0x420   : >> { %v12754_v49 = vsub.f32 %v3927_v9, %v12736_v52  ;;  %v17254_v26 = vsub.f32 %v12608_v34, %v12629_v27  ;;  %v4077_v12 = vand.u32 4294901760, %v12739_v7  ;;  %3953 = vmatpush.msrb.mxu3 %v12736_v52  ;;  %v3057_v9 = vadd.f32 %v12471_v48, %v2971_v42  ;;  %4185 = vmatpush.msra.mxu1 %v12739_v7  ;;  %v3878_v48 = vld [vmem:[%s10135_s29 + $0x60] sm:$0xff] }
 0x421   : >> { %v3627_v54 = vadd.f32 %v12648_v35, %v3560_v11  ;;  %v4073_v47 = vand.u32 4294901760, %v4072_v44  ;;  %v12769_v34 = vsub.f32 %v3926_v18, %v12756_v41  ;;  %v3925_v35 = vld [vmem:[%s16959_s4 + $0x28] sm:$0xff]  ;;  %v12777_v27 = vmul.f32 2.0, %v12179_v60  ;;  %4068 = vmatpush.msra.mxu0 %v4067_v13  ;;  %v3877_v11 = vld [vmem:[%s10135_s29 + $0x58] sm:$0xff]  ;;  %3885 = vmatpush.msrb.mxu2 %v3878_v48  ;;  %v3924_v13 = vld [vmem:[%s16959_s4 + $0x20] sm:$0xff] }
 0x422   : >> { %v3835_v6 = vadd.f32 %v3827_v43, %v17254_v26  ;;  %v17049_v53 = vand.u32 4294901760, %v12754_v49  ;;  %v4078_v1 = vsub.f32 %v12739_v7, %v4077_v12  ;;  %v12784_v51 = vand.u32 4294901760, %v3925_v35  ;;  %3955 = vmatpush.msrb.mxu3 %v12756_v41  ;;  %v3820_v60 = vld [vmem:[%s16957_s2 + $0x8] sm:$0xff]  ;;  %4188 = vmatpush.msra.mxu1 %v12754_v49  ;;  %v17274_v7 = vld [vmem:[#allocation15_spill] sm:$0xff] }
 0x423   : >> { %v3712_v43 = vadd.f32 %v12624_v29, %v3627_v54  ;;  %v3497_v42 = vadd.f32 %v12536_v33, %v3388_v59  ;;  %v3299_v18 = vadd.f32 %v12540_v21, %v3234_v57  ;;  %v17048_v58 = vand.u32 4294901760, %v12769_v34  ;;  %4074 = vmatpush.msra.mxu0 %v4073_v47  ;;  %v3876_v59 = vld [vmem:[%s10135_s29 + $0x50] sm:$0xff]  ;;  %3886 = vmatpush.msrb.mxu2 %v3877_v11 }
 0x424   : >> { %3843 = vst [vmem:[#allocation3] sm:$0xff] %v3835_v6  ;;  %v4084_v29 = vsub.f32 %v12754_v49, %v17049_v53  ;;  %v4079_v21 = vand.u32 4294901760, %v4078_v1  ;;  %v12803_v57 = vsub.f32 %v3925_v35, %v12784_v51  ;;  %v12805_v44 = vand.u32 4294901760, %v3924_v13  ;;  %3957 = vmatpush.msrb.mxu3 %v12784_v51  ;;  %v3923_v35 = vld [vmem:[%s16959_s4 + $0x18] sm:$0xff]  ;;  %4191 = vmatpush.msra.mxu1 %v12769_v34 }
 0x425   : >> { %v3769_v33 = vadd.f32 %v12661_v23, %v3712_v43  ;;  %v2975_v26 = vadd.f32 %v12492_v3, %v12503_v24  ;;  %v3135_v6 = vadd.f32 %v12481_v40, %v3057_v9  ;;  %v4090_v47 = vsub.f32 %v12769_v34, %v17048_v58  ;;  %v3875_v3 = vld [vmem:[%s10135_s29 + $0x48] sm:$0xff]  ;;  %3887 = vmatpush.msrb.mxu2 %v3876_v59 }
 0x426   : >> { %v3564_v54 = vpop.f32.mrf.mxu2  ;;  %v4085_v23 = vand.u32 4294901760, %v4084_v29  ;;  %4080 = vmatpush.msra.mxu0 %v4079_v21  ;;  %v4095_v40 = vand.u32 4294901760, %v12803_v57  ;;  %v12823_v24 = vsub.f32 %v3924_v13, %v12805_v44  ;;  %3959 = vmatpush.msrb.mxu3 %v12805_v44  ;;  %v3396_v9 = vadd.f32 %v12538_v5, %v3299_v18  ;;  %v12828_v29 = vpop.f32.mrf.mxu0 }
 0x427   : >> { %v12811_v48 = vpop.f32.mrf.mxu3  ;;  %v3828_v43 = vmul.f32 %v3820_v60, %v3769_v33  ;;  %v3565_v1 = vadd.f32 %v3564_v54, %v3497_v42  ;;  %v3238_v11 = vadd.f32 %v12554_v10, %v3135_v6  ;;  %v4091_v58 = vand.u32 4294901760, %v4090_v47  ;;  %v3922_v42 = vld [vmem:[%s16959_s4 + $0x10] sm:$0xff]  ;;  %4194 = vmatpush.msra.mxu1 %v12803_v57  ;;  %v12843_v59 = vpop.f32.mrf.mxu1  ;;  %3888 = vmatpush.msrb.mxu2 %v3875_v3  ;;  %v3921_v6 = vld [vmem:[%s16959_s4 + $0x8] sm:$0xff]  ;;  %v3920_v3 = vld [vmem:[%s16959_s4] sm:$0xff] }
 0x428   : >> { %v12830_v53 = vand.u32 4294901760, %v3923_v35  ;;  %v3805_v33 = vld [vmem:[#allocation3 + $0x10] sm:$0xff]  ;;  %4086 = vmatpush.msra.mxu0 %v4085_v23  ;;  %v4096_v5 = vsub.f32 %v12803_v57, %v4095_v40  ;;  %v4101_v10 = vand.u32 4294901760, %v12823_v24  ;;  %v3062_v18 = vadd.f32 %v12484_v19, %v2975_v26  ;;  %v3874_v19 = vld [vmem:[%s10135_s29 + $0x40] sm:$0xff]  ;;  %v3873_v26 = vld [vmem:[%s10135_s29 + $0x38] sm:$0xff] }
 0x429   : >> { %v3836_v60 = vadd.f32 %v3828_v43, %v3812_v22  ;;  %v3633_v13 = vadd.f32 %v12730_v25, %v3565_v1  ;;  %v3813_v21 = vsub.f32 %v12777_v27, %v3805_v33  ;;  %v12848_v25 = vand.u32 4294901760, %v3922_v42  ;;  %4197 = vmatpush.msra.mxu1 %v12823_v24  ;;  %3889 = vmatpush.msrb.mxu2 %v3874_v19  ;;  %v3871_v19 = vld [vmem:[%s10135_s29 + $0x28] sm:$0xff] }
 0x42a   : >> { %v12846_v22 = vsub.f32 %v3923_v35, %v12830_v53  ;;  %3961 = vmatpush.msrb.mxu3 %v12830_v53  ;;  %4092 = vmatpush.msra.mxu0 %v4091_v58  ;;  %v4097_v27 = vand.u32 4294901760, %v4096_v5  ;;  %v4102_v23 = vsub.f32 %v12823_v24, %v4101_v10  ;;  %v12860_v47 = vand.u32 4294901760, %v3921_v6  ;;  %v3825_v24 = vld [vmem:[%s16957_s2 + $0x30] sm:$0xff] }
 0x42b   : >> { %3844 = vst [vmem:[#allocation3 + $0x8] sm:$0xff] %v3836_v60  ;;  %v3716_v54 = vadd.f32 %v12716_v4, %v3633_v13  ;;  %v3501_v35 = vadd.f32 %v12542_v36, %v3396_v9  ;;  %v3303_v43 = vadd.f32 %v12548_v8, %v3238_v11  ;;  %v3821_v4 = vld [vmem:[%s16957_s2 + $0x10] sm:$0xff]  ;;  %v12870_v1 = vsub.f32 %v3922_v42, %v12848_v25 }
 0x42c   : >> { %v4107_v58 = vand.u32 4294901760, %v12846_v22  ;;  %3963 = vmatpush.msrb.mxu3 %v12848_v25  ;;  %4098 = vmatpush.msra.mxu0 %v4097_v27  ;;  %v4103_v8 = vand.u32 4294901760, %v4102_v23  ;;  %v3872_v9 = vld [vmem:[%s10135_s29 + $0x30] sm:$0xff]  ;;  %v12879_v11 = vsub.f32 %v3921_v6, %v12860_v47  ;;  %v12881_v60 = vand.u32 4294901760, %v3920_v3 }
 0x42d   : >> { %v3773_v36 = vadd.f32 %v12748_v50, %v3716_v54  ;;  %4200 = vmatpush.msra.mxu1 %v12846_v22  ;;  %v2979_v42 = vadd.f32 %v12505_v55, %v12516_v45  ;;  %v3141_v13 = vadd.f32 %v12494_v30, %v3062_v18  ;;  %3890 = vmatpush.msrb.mxu2 %v3873_v26  ;;  %v4113_v5 = vand.u32 4294901760, %v12870_v1 }
 0x42e   : >> { %v3569_v33 = vpop.f32.mrf.mxu2  ;;  %v4108_v50 = vsub.f32 %v12846_v22, %v4107_v58  ;;  %3965 = vmatpush.msrb.mxu3 %v12860_v47  ;;  %4104 = vmatpush.msra.mxu0 %v4103_v8  ;;  %v4119_v27 = vand.u32 4294901760, %v12879_v11  ;;  %v12895_v55 = vsub.f32 %v3920_v3, %v12881_v60  ;;  %v3404_v30 = vadd.f32 %v12544_v32, %v3303_v43 }
 0x42f   : >> { %v3829_v6 = vmul.f32 %v3821_v4, %v3773_v36  ;;  %v3570_v54 = vadd.f32 %v3569_v33, %v3501_v35  ;;  %4203 = vmatpush.msra.mxu1 %v12870_v1  ;;  %v3242_v45 = vadd.f32 %v12562_v62, %v3141_v13  ;;  %v3644_v18 = vpop.f32.mrf.mxu3  ;;  %3891 = vmatpush.msrb.mxu2 %v3872_v9  ;;  %v17255_v43 = vand.u32 4294901760, %v12602_v15  ;;  %v9958_v36 = vld [vmem:[#allocation2 + $0x18] sm:$0xff]  ;;  %v3723_v9 = vpop.f32.mrf.mxu0  ;;  %v3870_v13 = vld [vmem:[%s10135_s29 + $0x20] sm:$0xff] }
 0x430   : >> { %v4109_v26 = vand.u32 4294901760, %v4108_v50  ;;  %v4114_v23 = vsub.f32 %v12870_v1, %v4113_v5  ;;  %3967 = vmatpush.msrb.mxu3 %v12881_v60  ;;  %v4120_v32 = vsub.f32 %v12879_v11, %v4119_v27  ;;  %v4125_v62 = vand.u32 4294901760, %v12895_v55  ;;  %v3869_v50 = vld [vmem:[%s10135_s29 + $0x18] sm:$0xff] }
 0x431   : >> { %v3837_v35 = vadd.f32 %v3829_v6, %v3813_v21  ;;  %v3639_v4 = vadd.f32 %v12811_v48, %v3570_v54  ;;  %4206 = vmatpush.msra.mxu1 %v12879_v11  ;;  %v3067_v3 = vadd.f32 %v12497_v20, %v2979_v42  ;;  %v3798_v8 = vmul.f32 2.0, %v9958_v36  ;;  %3892 = vmatpush.msrb.mxu2 %v3871_v19  ;;  %v3822_v42 = vld [vmem:[%s16957_s2 + $0x18] sm:$0xff] }
 0x432   : >> { %4335 = vmatpush.msra.mxu3 %v17255_v43  ;;  %4110 = vmatpush.msra.mxu0 %v4109_v26  ;;  %v4115_v48 = vand.u32 4294901760, %v4114_v23  ;;  %v4121_v33 = vand.u32 4294901760, %v4120_v32  ;;  %v4126_v15 = vsub.f32 %v12895_v55, %v4125_v62  ;;  %v17256_v6 = vand.u32 4294901760, %v12615_v2  ;;  %v3806_v26 = vld [vmem:[#allocation3 + $0x18] sm:$0xff]  ;;  %v3868_v2 = vld [vmem:[%s10135_s29 + $0x10] sm:$0xff] }
 0x433   : >> { %3845 = vst [vmem:[#allocation3 + $0x10] sm:$0xff] %v3837_v35  ;;  %v3720_v21 = vadd.f32 %v12828_v29, %v3639_v4  ;;  %4209 = vmatpush.msra.mxu1 %v12895_v55  ;;  %v3307_v20 = vadd.f32 %v12556_v31, %v3242_v45  ;;  %v3780_v29 = vpop.f32.mrf.mxu1  ;;  %3893 = vmatpush.msrb.mxu2 %v3870_v13  ;;  %v17257_v35 = vand.u32 4294901760, %v12636_v46  ;;  %v17258_v32 = vld [vmem:[#allocation30_spill] sm:$0xff] }
 0x434   : >> { %4339 = vmatpush.msra.mxu3 %v17256_v6  ;;  %4116 = vmatpush.msra.mxu0 %v4115_v48  ;;  %v3505_v54 = vadd.f32 %v12550_v28, %v3404_v30  ;;  %v4127_v23 = vand.u32 4294901760, %v4126_v15  ;;  %v3814_v4 = vsub.f32 %v3798_v8, %v3806_v26  ;;  %v2983_v45 = vadd.f32 %v12518_v39, %v12524_v63  ;;  %v3867_v28 = vld [vmem:[%s10135_s29 + $0x8] sm:$0xff]  ;;  %v17260_v30 = vld [vmem:[#allocation23_spill] sm:$0xff] }
 0x435   : >> { %v3777_v19 = vadd.f32 %v12843_v59, %v3720_v21  ;;  %3894 = vmatpush.msrb.mxu2 %v3869_v50  ;;  %v3147_v43 = vadd.f32 %v17258_v32, %v3067_v3  ;;  %v17259_v59 = vand.u32 4294901760, %v12655_v37  ;;  %v3412_v21 = vadd.f32 %v17260_v30, %v3307_v20  ;;  %v17262_v3 = vld [vmem:[#allocation31_spill] sm:$0xff]  ;;  %v17264_v20 = vld [vmem:[#allocation20_spill] sm:$0xff] }
 0x436   : >> { %4343 = vmatpush.msra.mxu3 %v17257_v35  ;;  %v3574_v31 = vpop.f32.mrf.mxu2  ;;  %4122 = vmatpush.msra.mxu0 %v4121_v33  ;;  %v17261_v39 = vand.u32 4294901760, %v12680_v16  ;;  %v3072_v33 = vadd.f32 %v17262_v3, %v2983_v45  ;;  %v9959_v50 = vld [vmem:[#allocation2 + $0x20] sm:$0xff]  ;;  %v17277_v3 = vld [vmem:[#allocation28_spill] sm:$0xff] }
 0x437   : >> { %v3830_v36 = vmul.f32 %v3822_v42, %v3777_v19  ;;  %v3575_v48 = vadd.f32 %v3574_v31, %v3505_v54  ;;  %3895 = vmatpush.msrb.mxu2 %v3868_v2  ;;  %v3246_v46 = vadd.f32 %v12575_v17, %v3147_v43  ;;  %v3650_v63 = vpop.f32.mrf.mxu3  ;;  %v3799_v15 = vmul.f32 2.0, %v9959_v50  ;;  %v3727_v6 = vpop.f32.mrf.mxu0  ;;  %v3866_v16 = vld [vmem:[%s10135_s29] sm:$0xff]  ;;  %v17265_v54 = vld [vmem:[#allocation14_spill] sm:$0xff]  ;;  %v17278_v50 = vld [vmem:[#allocation25_spill] sm:$0xff] }
 0x438   : >> { %4347 = vmatpush.msra.mxu3 %v17259_v59  ;;  %4128 = vmatpush.msra.mxu0 %v4127_v23  ;;  %v17263_v17 = vand.u32 4294901760, %v12690_v56  ;;  %v3509_v42 = vadd.f32 %v17264_v20, %v3412_v21  ;;  %v17266_v23 = vld [vmem:[#allocation12_spill] sm:$0xff]  ;;  %v17267_v56 = vand.u32 4294901760, %v12709_v14  ;;  %v17272_v14 = vld [vmem:[#allocation19_spill] sm:$0xff]  ;;  %v17273_v21 = vand.u32 4294901760, %v12754_v49 }
 0x439   : >> { %v3838_v8 = vadd.f32 %v3830_v36, %v3814_v4  ;;  %v3645_v13 = vadd.f32 %v3644_v18, %v3575_v48  ;;  %3896 = vmatpush.msrb.mxu2 %v3867_v28  ;;  %v3823_v18 = vld [vmem:[%s16957_s2 + $0x20] sm:$0xff]  ;;  %v3311_v19 = vadd.f32 %v17265_v54, %v3246_v46  ;;  %v17268_v4 = vld [vmem:[#allocation22_spill] sm:$0xff]  ;;  %v17269_v36 = vld [vmem:[#allocation29_spill] sm:$0xff] }
 0x43a   : >> { %4430 = vmatpush.msrb.mxu0 %v12593_v38  ;;  %4351 = vmatpush.msra.mxu3 %v17261_v39  ;;  %v3153_v31 = vadd.f32 %v17268_v4, %v3072_v33  ;;  %v17271_v28 = vld [vmem:[#allocation17_spill] sm:$0xff]  ;;  %v17275_v39 = vand.u32 4294901760, %v12769_v34 }
 0x43b   : >> { %3846 = vst [vmem:[#allocation3 + $0x18] sm:$0xff] %v3838_v8  ;;  %v3724_v37 = vadd.f32 %v3723_v9, %v3645_v13  ;;  %3897 = vmatpush.msrb.mxu2 %v3866_v16  ;;  %v3807_v9 = vld [vmem:[#allocation3 + $0x20] sm:$0xff]  ;;  %v3784_v35 = vpop.f32.mrf.mxu1 }
 0x43c   : >> { %4432 = vmatpush.msrb.mxu0 %v12604_v0  ;;  %4355 = vmatpush.msra.mxu3 %v17263_v17  ;;  %v3815_v45 = vsub.f32 %v3799_v15, %v3807_v9  ;;  %v3250_v59 = vadd.f32 %v17271_v28, %v3153_v31  ;;  %v3808_v15 = vld [vmem:[#allocation3 + $0x28] sm:$0xff]  ;;  %v3809_v9 = vld [vmem:[#allocation3 + $0x30] sm:$0xff] }
 0x43d   : >> { %v3781_v26 = vadd.f32 %v3780_v29, %v3724_v37  ;;  %4252 = vmatpush.msra.mxu2 %v12593_v38  ;;  %v17270_v29 = vld [vmem:[#allocation13_spill] sm:$0xff] }
 0x43e   : >> { %4434 = vmatpush.msrb.mxu0 %v17266_v23  ;;  %v3579_v2 = vpop.f32.mrf.mxu2  ;;  %4359 = vmatpush.msra.mxu3 %v17267_v56  ;;  %v3420_v48 = vadd.f32 %v17270_v29, %v3311_v19  ;;  %v3315_v33 = vadd.f32 %v17277_v3, %v3250_v59 }
 0x43f   : >> { %v3831_v32 = vmul.f32 %v3823_v18, %v3781_v26  ;;  %v3580_v43 = vadd.f32 %v3579_v2, %v3509_v42  ;;  %4254 = vmatpush.msra.mxu2 %v12604_v0  ;;  %v9960_v0 = vld [vmem:[#allocation2 + $0x28] sm:$0xff]  ;;  %v3656_v13 = vpop.f32.mrf.mxu3  ;;  %v3731_v18 = vpop.f32.mrf.mxu0  ;;  %v17279_v42 = vld [vmem:[#allocation27_spill] sm:$0xff] }
 0x440   : >> { %4436 = vmatpush.msrb.mxu0 %v17269_v36  ;;  %4363 = vmatpush.msra.mxu3 %v4077_v12  ;;  %v3800_v8 = vmul.f32 2.0, %v9960_v0  ;;  %v3824_v12 = vld [vmem:[%s16957_s2 + $0x28] sm:$0xff]  ;;  %v3428_v54 = vadd.f32 %v17279_v42, %v3315_v33 }
 0x441   : >> { %v3839_v38 = vadd.f32 %v3831_v32, %v3815_v45  ;;  %v3651_v30 = vadd.f32 %v3650_v63, %v3580_v43  ;;  %4256 = vmatpush.msra.mxu2 %v17266_v23  ;;  %v17276_v63 = vld [vmem:[#allocation24_spill] sm:$0xff] }
 0x442   : >> { %4438 = vmatpush.msrb.mxu0 %v17272_v14  ;;  %4367 = vmatpush.msra.mxu3 %v17273_v21  ;;  %v3513_v49 = vadd.f32 %v17276_v63, %v3420_v48 }
 0x443   : >> { %3847 = vst [vmem:[#allocation3 + $0x20] sm:$0xff] %v3839_v38  ;;  %v3728_v46 = vadd.f32 %v3727_v6, %v3651_v30  ;;  %4258 = vmatpush.msra.mxu2 %v17269_v36  ;;  %v3816_v6 = vsub.f32 %v3800_v8, %v3808_v15  ;;  %v3788_v20 = vpop.f32.mrf.mxu1  ;;  %v3861_v36 = vstv %s3858_s19  ;;  %s9906_s19 = sshll.u32 %s5030_s1, 7 }
 0x444   : >> { %4440 = vmatpush.msrb.mxu0 %v17274_v7  ;;  %4371 = vmatpush.msra.mxu3 %v17275_v39  ;;  %s5034_s26 = sadd.s32 %s9906_s19, %s5033_s24  ;;  %s5080_s19 = sadd.s32 4, %s11253_s28 }
 0x445   : >> { %v3785_v37 = vadd.f32 %v3784_v35, %v3728_v46  ;;  %4260 = vmatpush.msra.mxu2 %v17272_v14  ;;  %s5035_s10 = sld [smem:[#allocation8 + %s5034_s26]]  ;;  %s6205_s24 = sshra.s32 %s5080_s19, 7 }
 0x446   : >> { %4442 = vmatpush.msrb.mxu0 %v17278_v50  ;;  %v3584_v17 = vpop.f32.mrf.mxu2  ;;  %4375 = vmatpush.msra.mxu3 %v4095_v40  ;;  %v9961_v40 = vld [vmem:[#allocation2 + $0x30] sm:$0xff]  ;;  %s6207_s26 = sadd.s32 %s10111_s0, %s6205_s24  ;;  %s6210_s11 = sand.u32 127, %s5080_s19 }
 0x447   : >> { %v3832_v34 = vmul.f32 %v3824_v12, %v3785_v37  ;;  %v3585_v16 = vadd.f32 %v3584_v17, %v3513_v49  ;;  %4262 = vmatpush.msra.mxu2 %v17274_v7  ;;  %v3801_v23 = vmul.f32 2.0, %v9961_v40  ;;  %v3662_v35 = vpop.f32.mrf.mxu3 }
 0x448   : >> { %4444 = vmatpush.msrb.mxu0 %v12722_v61  ;;  %4379 = vmatpush.msra.mxu3 %v4101_v10  ;;  %v17280_v10 = vld [vmem:[#allocation16_spill] sm:$0xff] }
 0x449   : >> { %v3840_v19 = vadd.f32 %v3832_v34, %v3816_v6  ;;  %v3657_v26 = vadd.f32 %v3656_v13, %v3585_v16  ;;  %4264 = vmatpush.msra.mxu2 %v17278_v50  ;;  %v3517_v22 = vadd.f32 %v17280_v10, %v3428_v54 }
 0x44a   : >> { %4446 = vmatpush.msrb.mxu0 %v12736_v52  ;;  %4383 = vmatpush.msra.mxu3 %v4107_v58 }
 0x44b   : >> { %3848 = vst [vmem:[#allocation3 + $0x28] sm:$0xff] %v3840_v19  ;;  %v3732_v57 = vadd.f32 %v3731_v18, %v3657_v26  ;;  %4266 = vmatpush.msra.mxu2 %v12722_v61  ;;  %v3817_v61 = vsub.f32 %v3801_v23, %v3809_v9 }
 0x44c   : >> { %4448 = vmatpush.msrb.mxu0 %v12756_v41  ;;  %4387 = vmatpush.msra.mxu3 %v4113_v5  ;;  %v3735_v5 = vpop.f32.mrf.mxu0 }
 0x44d   : >> { %v3789_v58 = vadd.f32 %v3788_v20, %v3732_v57  ;;  %4268 = vmatpush.msra.mxu2 %v12736_v52  ;;  %v3792_v52 = vpop.f32.mrf.mxu1 }
 0x44e   : >> { %4450 = vmatpush.msrb.mxu0 %v12784_v51  ;;  %v3589_v2 = vpop.f32.mrf.mxu2  ;;  %4391 = vmatpush.msra.mxu3 %v4119_v27  ;;  %v9962_v27 = vld [vmem:[#allocation2 + $0x38] sm:$0xff] }
 0x44f   : >> { %v3833_v56 = vmul.f32 %v3825_v24, %v3789_v58  ;;  %v3590_v1 = vadd.f32 %v3589_v2, %v3517_v22  ;;  %4270 = vmatpush.msra.mxu2 %v12756_v41  ;;  %v3802_v45 = vmul.f32 2.0, %v9962_v27  ;;  %v3826_v41 = vld [vmem:[%s16957_s2 + $0x38] sm:$0xff] }
 0x450   : >> { %4452 = vmatpush.msrb.mxu0 %v12805_v44  ;;  %4395 = vmatpush.msra.mxu3 %v4125_v62 }
 0x451   : >> { %v3841_v4 = vadd.f32 %v3833_v56, %v3817_v61  ;;  %v3663_v31 = vadd.f32 %v3662_v35, %v3590_v1  ;;  %4272 = vmatpush.msra.mxu2 %v12784_v51  ;;  %v3810_v51 = vld [vmem:[#allocation3 + $0x38] sm:$0xff] }
 0x452   : >> { %4454 = vmatpush.msrb.mxu0 %v12830_v53  ;;  %v3818_v62 = vsub.f32 %v3802_v45, %v3810_v51  ;;  %v3913_v45 = vld [vmem:[%s16958_s3 + $0x8] sm:$0xff] }
 0x453   : >> { %3849 = vst [vmem:[#allocation3 + $0x30] sm:$0xff] %v3841_v4  ;;  %v3736_v11 = vadd.f32 %v3735_v5, %v3663_v31  ;;  %4274 = vmatpush.msra.mxu2 %v12805_v44  ;;  %v3860_v44 = vld [vmem:[%s10130_s25] sm:$0x1] }
 0x454   : >> { %4456 = vmatpush.msrb.mxu0 %v12848_v25  ;;  %v3862_v29 = vmul.f32 %v3861_v36, %v3860_v44 }
 0x455   : >> { %v3793_v55 = vadd.f32 %v3792_v52, %v3736_v11  ;;  %4276 = vmatpush.msra.mxu2 %v12830_v53  ;;  %v3912_v52 = vld [vmem:[%s16958_s3] sm:$0xff] }
 0x456   : >> { %4458 = vmatpush.msrb.mxu0 %v12860_v47  ;;  %v4495_v11 = vsel %vm957_vm0, %v3912_v52, 0 }
 0x457   : >> { %v3834_v32 = vmul.f32 %v3826_v41, %v3793_v55  ;;  %4278 = vmatpush.msra.mxu2 %v12848_v25  ;;  %v13164_v27 = vand.u32 4294901760, %v4495_v11  ;;  %v4498_v55 = vsel %vm957_vm0, %v3913_v45, 0 }
 0x458   : >> { %4460 = vmatpush.msrb.mxu0 %v12881_v60 }
 0x459   : >> { %v3842_v43 = vadd.f32 %v3834_v32, %v3818_v62  ;;  %4280 = vmatpush.msra.mxu2 %v12860_v47  ;;  %v13173_v41 = vsub.f32 %v4495_v11, %v13164_v27  ;;  %v13178_v62 = vand.u32 4294901760, %v4498_v55  ;;  %v3914_v32 = vld [vmem:[%s16958_s3 + $0x10] sm:$0xff] }
 0x45a   : >> { %v4501_v36 = vsel %vm957_vm0, %v3914_v32, 0 }
 0x45b   : >> { %3850 = vst [vmem:[#allocation3 + $0x38] sm:$0xff] %v3842_v43  ;;  %4282 = vmatpush.msra.mxu2 %v12881_v60  ;;  %v4544_v51 = vand.u32 4294901760, %v13173_v41  ;;  %v13190_v44 = vsub.f32 %v4498_v55, %v13178_v62 }
 0x45d   : >> { %v4545_v43 = vsub.f32 %v13173_v41, %v4544_v51 }
 0x462   : >> { %v3859_v48 = vld [vmem:[%s11286_s22] sm:$0x1] }
 0x463   : >> { %v3863_v28 = vadd.f32 %v3862_v29, %v3859_v48  ;;  %v4546_v29 = vand.u32 4294901760, %v4545_v43  ;;  %v4552_v48 = vand.u32 4294901760, %v13190_v44 }
 0x465   : >> { %3864 = vst [vmem:[%s11286_s22] sm:$0x1] %v3863_v28  ;;  %v13195_v28 = vand.u32 4294901760, %v4501_v36 }
 0x46c   : >> { %v3865_v59 = vld [vmem:[%s11291_s23] sm:$0x1]  ;;  %v3911_v38 = vld [vmem:[#allocation3 + $0x38] sm:$0xff]  ;;  %v3910_v47 = vld [vmem:[#allocation3 + $0x30] sm:$0xff] }
 0x46d   : >> { %v13028_v53 = vld [vmem:[#allocation3] sm:$0xff]  ;;  %3898 = vmatmul.f32.vlgmr.msrb.gmra.mxu2 %v3865_v59  ;;  %v13033_v25 = vand.u32 4294901760, %v3911_v38  ;;  %v3909_v14 = vld [vmem:[#allocation3 + $0x28] sm:$0xff]  ;;  %v13035_v46 = vand.u32 4294901760, %v3910_v47  ;;  %v3907_v7 = vld [vmem:[#allocation3 + $0x18] sm:$0xff] }
 0x46e   : >> { %v13031_v30 = vand.u32 4294901760, %v13028_v53  ;;  %v3908_v21 = vld [vmem:[#allocation3 + $0x20] sm:$0xff]  ;;  %v13037_v60 = vand.u32 4294901760, %v3909_v14  ;;  %v13041_v8 = vld [vmem:[#allocation3 + $0x8] sm:$0xff]  ;;  %v13055_v63 = vld [vmem:[#allocation3 + $0x10] sm:$0xff]  ;;  %v13058_v49 = vand.u32 4294901760, %v3907_v7 }
 0x46f   : >> { %v13039_v0 = vand.u32 4294901760, %v3908_v21  ;;  %4527 = vmatpush.msrb.mxu1 %v13033_v25  ;;  %v13050_v13 = vand.u32 4294901760, %v13041_v8  ;;  %v13053_v39 = vsub.f32 %v3911_v38, %v13033_v25  ;;  %v13061_v3 = vsub.f32 %v3910_v47, %v13035_v46  ;;  %v3915_v59 = vld [vmem:[%s16958_s3 + $0x18] sm:$0xff] }
 0x470   : >> { %4130 = vmatmul.f32.vlgmr.msra.gmra.mxu0 %v13031_v30  ;;  %v13047_v12 = vsub.f32 %v13028_v53, %v13031_v30  ;;  %v13064_v33 = vsub.f32 %v3909_v14, %v13037_v60  ;;  %v13079_v17 = vand.u32 4294901760, %v13055_v63  ;;  %v13098_v54 = vsub.f32 %v3907_v7, %v13058_v49 }
 0x471   : >> { %4778 = vmatpush.msra.mxu0 %v13033_v25  ;;  %v13071_v50 = vand.u32 4294901760, %v13053_v39  ;;  %v13074_v15 = vsub.f32 %v3908_v21, %v13039_v0  ;;  %4529 = vmatpush.msrb.mxu1 %v13035_v46  ;;  %v13082_v18 = vand.u32 4294901760, %v13061_v3  ;;  %v3977_v20 = vsub.f32 %v13041_v8, %v13050_v13 }
 0x472   : >> { %4212 = vmatmul.f32.vlgmr.msra.gmra.mxu1 %v13047_v12  ;;  %v13068_v37 = vand.u32 4294901760, %v13047_v12  ;;  %v13085_v6 = vand.u32 4294901760, %v13064_v33  ;;  %v3985_v23 = vsub.f32 %v13055_v63, %v13079_v17  ;;  %v3994_v22 = vand.u32 4294901760, %v13098_v54 }
 0x473   : >> { %4780 = vmatpush.msra.mxu0 %v13035_v46  ;;  %v4027_v16 = vsub.f32 %v13053_v39, %v13071_v50  ;;  %4531 = vmatpush.msrb.mxu1 %v13037_v60  ;;  %v4019_v42 = vsub.f32 %v13061_v3, %v13082_v18  ;;  %v13104_v57 = vand.u32 4294901760, %v13074_v15  ;;  %v3978_v24 = vand.u32 4294901760, %v3977_v20 }
 0x474   : >> { %v3971_v34 = vsub.f32 %v13047_v12, %v13068_v37  ;;  %v4011_v40 = vsub.f32 %v13064_v33, %v13085_v6  ;;  %v3986_v2 = vand.u32 4294901760, %v3985_v23  ;;  %v3995_v61 = vsub.f32 %v13098_v54, %v3994_v22 }
 0x475   : >> { %4782 = vmatpush.msra.mxu0 %v13037_v60  ;;  %4286 = vmatmul.f32.vlgmr.msra.gmra.mxu2 %v13068_v37  ;;  %v13101_v26 = vand.u32 4294901760, %v4027_v16  ;;  %v13115_v10 = vand.u32 4294901760, %v4019_v42  ;;  %v4003_v58 = vsub.f32 %v13074_v15, %v13104_v57  ;;  %v3979_v35 = vsub.f32 %v3977_v20, %v3978_v24 }
 0x476   : >> { %v3972_v19 = vand.u32 4294901760, %v3971_v34  ;;  %4533 = vmatpush.msrb.mxu1 %v13039_v0  ;;  %v13123_v9 = vand.u32 4294901760, %v4011_v40  ;;  %v3987_v1 = vsub.f32 %v3985_v23, %v3986_v2  ;;  %v3996_v4 = vand.u32 4294901760, %v3995_v61 }
 0x477   : >> { %4784 = vmatpush.msra.mxu0 %v13039_v0  ;;  %4620 = vmatpush.msrb.mxu2 %v13101_v26  ;;  %v4004_v56 = vand.u32 4294901760, %v4003_v58  ;;  %v3980_v5 = vand.u32 4294901760, %v3979_v35  ;;  %v4553_v38 = vsub.f32 %v13190_v44, %v4552_v48  ;;  %v13206_v47 = vsub.f32 %v4501_v36, %v13195_v28 }
 0x478   : >> { %3973 = vmatmul.f32.vlgmr.msrb.gmra.mxu3 %v3972_v19  ;;  %4134 = vmatmul.f32.gmra.mxu0 %v13050_v13  ;;  %v3988_v31 = vand.u32 4294901760, %v3987_v1  ;;  %v4504_v14 = vsel %vm957_vm0, %v3915_v59, 0 }
 0x479   : >> { %4535 = vmatpush.msrb.mxu1 %v13058_v49  ;;  %4706 = vmatpush.msrb.mxu3 %v13053_v39  ;;  %v4554_v21 = vand.u32 4294901760, %v4553_v38  ;;  %v4560_v7 = vand.u32 4294901760, %v13206_v47 }
 0x47a   : >> { %4786 = vmatpush.msra.mxu0 %v13058_v49  ;;  %4217 = vmatmul.f32.gmra.mxu1 %v3977_v20 }
 0x47b   : >> { %4626 = vmatpush.msrb.mxu2 %v13115_v10  ;;  %4537 = vmatpush.msrb.mxu1 %v13079_v17 }
 0x47c   : >> { %4709 = vmatpush.msrb.mxu3 %v13061_v3  ;;  %4788 = vmatpush.msra.mxu0 %v13079_v17 }
 0x47d   : >> { %4632 = vmatpush.msrb.mxu2 %v13123_v9  ;;  %4539 = vmatpush.msrb.mxu1 %v13050_v13 }
 0x47e   : >> { %4712 = vmatpush.msrb.mxu3 %v13064_v33  ;;  %4790 = vmatpush.msra.mxu0 %v13050_v13 }
 0x47f   : >> { %4292 = vmatmul.f32.gmra.mxu2 %v3978_v24  ;;  %4541 = vmatpush.msrb.mxu1 %v13031_v30 }
 0x480   : >> { %4638 = vmatpush.msrb.mxu2 %v4004_v56  ;;  %4715 = vmatpush.msrb.mxu3 %v13074_v15 }
 0x481   : >> { %4792 = vmatpush.msra.mxu0 %v13031_v30  ;;  %4853 = vmatpush.msra.mxu1 %v13071_v50 }
 0x482   : >> { %3981 = vmatmul.f32.gmra.mxu3 %v3980_v5  ;;  %4138 = vmatmul.f32.gmra.mxu0 %v13079_v17 }
 0x483   : >> { %4644 = vmatpush.msrb.mxu2 %v3996_v4  ;;  %4718 = vmatpush.msrb.mxu3 %v13098_v54 }
 0x484   : >> { %4857 = vmatpush.msra.mxu1 %v13082_v18 }
 0x485   : >> { %4222 = vmatmul.f32.gmra.mxu1 %v3985_v23  ;;  %4650 = vmatpush.msrb.mxu2 %v3988_v31 }
 0x486   : >> { %4721 = vmatpush.msrb.mxu3 %v3985_v23  ;;  %4861 = vmatpush.msra.mxu1 %v13085_v6 }
 0x487   : >> { %4656 = vmatpush.msrb.mxu2 %v3980_v5 }
 0x488   : >> { %4724 = vmatpush.msrb.mxu3 %v3977_v20  ;;  %4865 = vmatpush.msra.mxu1 %v13104_v57 }
 0x489   : >> { %4298 = vmatmul.f32.gmra.mxu2 %v3986_v2 }
 0x48a   : >> { %4662 = vmatpush.msrb.mxu2 %v3972_v19  ;;  %4727 = vmatpush.msrb.mxu3 %v13047_v12  ;;  %v13211_v12 = vand.u32 4294901760, %v4504_v14 }
 0x48b   : >> { %4869 = vmatpush.msra.mxu1 %v3994_v22  ;;  %3989 = vmatmul.f32.gmra.mxu3 %v3988_v31 }
 0x48c   : >> { %4924 = vmatpush.msra.mxu2 %v13033_v25  ;;  %4142 = vmatmul.f32.gmra.mxu0 %v13058_v49 }
 0x48d   : >> { %4873 = vmatpush.msra.mxu1 %v3986_v2 }
 0x48e   : >> { %4926 = vmatpush.msra.mxu2 %v13035_v46  ;;  %4227 = vmatmul.f32.gmra.mxu1 %v13098_v54  ;;  %v3918_v54 = vld [vmem:[%s16958_s3 + $0x30] sm:$0xff] }
 0x48f   : >> { %4877 = vmatpush.msra.mxu1 %v3978_v24  ;;  %v3919_v24 = vld [vmem:[%s16958_s3 + $0x38] sm:$0xff] }
 0x490   : >> { %4928 = vmatpush.msra.mxu2 %v13037_v60  ;;  %v4516_v58 = vsel %vm957_vm0, %v3919_v24, 0 }
 0x491   : >> { %4881 = vmatpush.msra.mxu1 %v13068_v37  ;;  %4304 = vmatmul.f32.gmra.mxu2 %v3994_v22  ;;  %v13275_v2 = vand.u32 4294901760, %v4516_v58 }
 0x492   : >> { %4930 = vmatpush.msra.mxu2 %v13039_v0 }
 0x493   : >> { %3997 = vmatmul.f32.gmra.mxu3 %v3996_v4  ;;  %v13283_v61 = vsub.f32 %v4516_v58, %v13275_v2 }
 0x494   : >> { %4932 = vmatpush.msra.mxu2 %v13058_v49  ;;  %4146 = vmatmul.f32.gmra.mxu0 %v13039_v0 }
 0x495   : >> { %v4600_v1 = vand.u32 4294901760, %v13283_v61 }
 0x496   : >> { %4934 = vmatpush.msra.mxu2 %v13079_v17  ;;  %4232 = vmatmul.f32.gmra.mxu1 %v13074_v15 }
 0x498   : >> { %4936 = vmatpush.msra.mxu2 %v13050_v13 }
 0x499   : >> { %4310 = vmatmul.f32.gmra.mxu2 %v13104_v57  ;;  %v4513_v57 = vsel %vm957_vm0, %v3918_v54, 0 }
 0x49a   : >> { %4938 = vmatpush.msra.mxu2 %v13031_v30  ;;  %v13259_v23 = vand.u32 4294901760, %v4513_v57 }
 0x49b   : >> { %4005 = vmatmul.f32.gmra.mxu3 %v4004_v56 }
 0x49c   : >> { %4150 = vmatmul.f32.gmra.mxu0 %v13037_v60  ;;  %v13270_v22 = vsub.f32 %v4513_v57, %v13259_v23 }
 0x49e   : >> { %4237 = vmatmul.f32.gmra.mxu1 %v13064_v33  ;;  %v13222_v33 = vsub.f32 %v4504_v14, %v13211_v12 }
 0x4a1   : >> { %4316 = vmatmul.f32.gmra.mxu2 %v13085_v6 }
 0x4a3   : >> { %4013 = vmatmul.f32.gmra.mxu3 %v13123_v9 }
 0x4a4   : >> { %4154 = vmatmul.f32.gmra.mxu0 %v13035_v46 }
 0x4a6   : >> { %4242 = vmatmul.f32.gmra.mxu1 %v13061_v3  ;;  %v4561_v3 = vsub.f32 %v13206_v47, %v4560_v7 }
 0x4a9   : >> { %4322 = vmatmul.f32.gmra.mxu2 %v13082_v18  ;;  %v3917_v18 = vld [vmem:[%s16958_s3 + $0x28] sm:$0xff] }
 0x4aa   : >> { %v4510_v16 = vsel %vm957_vm0, %v3917_v18, 0 }
 0x4ab   : >> { %4021 = vmatmul.f32.gmra.mxu3 %v13115_v10  ;;  %v13243_v42 = vand.u32 4294901760, %v4510_v16 }
 0x4ac   : >> { %4158 = vmatmul.f32.gmra.mxu0 %v13033_v25 }
 0x4ae   : >> { %4247 = vmatmul.f32.gmra.mxu1 %v13053_v39  ;;  %v3916_v39 = vld [vmem:[%s16958_s3 + $0x20] sm:$0xff] }
 0x4af   : >> { %v4507_v37 = vsel %vm957_vm0, %v3916_v39, 0 }
 0x4b0   : >> { %v13227_v15 = vand.u32 4294901760, %v4507_v37 }
 0x4b1   : >> { %4328 = vmatmul.f32.gmra.mxu2 %v13071_v50  ;;  %v4562_v50 = vand.u32 4294901760, %v4561_v3 }
 0x4b2   : >> { %v13238_v34 = vsub.f32 %v4507_v37, %v13227_v15 }
 0x4b3   : >> { %4029 = vmatmul.f32.gmra.mxu3 %v13101_v26  ;;  %v13254_v26 = vsub.f32 %v4510_v16, %v13243_v42 }
 0x4b4   : >> { %4462 = vmatmul.f32.vlgmr.msrb.gmra.mxu0 %v13031_v30 }
 0x4b6   : >> { %4547 = vmatmul.f32.vlgmr.msrb.gmra.mxu1 %v4546_v29 }
 0x4b9   : >> { %4664 = vmatmul.f32.vlgmr.msrb.gmra.mxu2 %v13164_v27 }
 0x4bb   : >> { %4397 = vmatmul.f32.vlgmr.msra.gmra.mxu3 %v13031_v30  ;;  %v4568_v30 = vand.u32 4294901760, %v13222_v33 }
 0x4bc   : >> { %4466 = vmatmul.f32.gmra.mxu0 %v13050_v13 }
 0x4bd   : >> { %v4569_v6 = vsub.f32 %v13222_v33, %v4568_v30 }
 0x4be   : >> { %4555 = vmatmul.f32.gmra.mxu1 %v4554_v21 }
 0x4bf   : >> { %v4570_v20 = vand.u32 4294901760, %v4569_v6 }
 0x4c1   : >> { %4668 = vmatmul.f32.gmra.mxu2 %v13178_v62 }
 0x4c3   : >> { %4401 = vmatmul.f32.gmra.mxu3 %v13050_v13  ;;  %v4576_v13 = vand.u32 4294901760, %v13238_v34 }
 0x4c4   : >> { %4470 = vmatmul.f32.gmra.mxu0 %v13079_v17 }
 0x4c5   : >> { %v4577_v19 = vsub.f32 %v13238_v34, %v4576_v13 }
 0x4c6   : >> { %4563 = vmatmul.f32.gmra.mxu1 %v4562_v50 }
 0x4c7   : >> { %v4578_v40 = vand.u32 4294901760, %v4577_v19 }
 0x4c9   : >> { %4672 = vmatmul.f32.gmra.mxu2 %v13195_v28 }
 0x4cb   : >> { %4405 = vmatmul.f32.gmra.mxu3 %v13079_v17  ;;  %v4584_v17 = vand.u32 4294901760, %v13254_v26 }
 0x4cc   : >> { %4474 = vmatmul.f32.gmra.mxu0 %v13058_v49 }
 0x4cd   : >> { %v4585_v10 = vsub.f32 %v13254_v26, %v4584_v17 }
 0x4ce   : >> { %4571 = vmatmul.f32.gmra.mxu1 %v4570_v20 }
 0x4cf   : >> { %v4586_v9 = vand.u32 4294901760, %v4585_v10 }
 0x4d1   : >> { %4676 = vmatmul.f32.gmra.mxu2 %v13211_v12 }
 0x4d3   : >> { %4409 = vmatmul.f32.gmra.mxu3 %v13058_v49  ;;  %v4592_v49 = vand.u32 4294901760, %v13270_v22 }
 0x4d4   : >> { %4478 = vmatmul.f32.gmra.mxu0 %v13039_v0 }
 0x4d5   : >> { %v4593_v35 = vsub.f32 %v13270_v22, %v4592_v49 }
 0x4d6   : >> { %4579 = vmatmul.f32.gmra.mxu1 %v4578_v40 }
 0x4d7   : >> { %v4594_v56 = vand.u32 4294901760, %v4593_v35 }
 0x4d9   : >> { %4680 = vmatmul.f32.gmra.mxu2 %v13227_v15 }
 0x4db   : >> { %4413 = vmatmul.f32.gmra.mxu3 %v13039_v0  ;;  %v4601_v0 = vsub.f32 %v13283_v61, %v4600_v1 }
 0x4dc   : >> { %4482 = vmatmul.f32.gmra.mxu0 %v13037_v60 }
 0x4dd   : >> { %v4602_v5 = vand.u32 4294901760, %v4601_v0 }
 0x4de   : >> { %4587 = vmatmul.f32.gmra.mxu1 %v4586_v9 }
 0x4e1   : >> { %4684 = vmatmul.f32.gmra.mxu2 %v13243_v42 }
 0x4e3   : >> { %4417 = vmatmul.f32.gmra.mxu3 %v13037_v60 }
 0x4e4   : >> { %4486 = vmatmul.f32.gmra.mxu0 %v13035_v46 }
 0x4e6   : >> { %4595 = vmatmul.f32.gmra.mxu1 %v4594_v56 }
 0x4e9   : >> { %4688 = vmatmul.f32.gmra.mxu2 %v13259_v23 }
 0x4eb   : >> { %4421 = vmatmul.f32.gmra.mxu3 %v13035_v46 }
 0x4ec   : >> { %4490 = vmatmul.f32.gmra.mxu0 %v13033_v25 }
 0x4ed   : >> { %v13295_v4 = vpop.f32.mrf.mxu0 }
 0x4ee   : >> { %4603 = vmatmul.f32.gmra.mxu1 %v4602_v5 }
 0x4ef   : >> { %v13297_v31 = vpop.f32.mrf.mxu1 }
 0x4f0   : >> { %v3899_v60 = vpop.f32.mrf.mxu2 }
 0x4f1   : >> { %3902 = vst.msk [vmem:[#allocation4 + $0x2] sm:$0x1] %vm1545_vm1, %v3899_v60  ;;  %4692 = vmatmul.f32.gmra.mxu2 %v13275_v2 }
 0x4f3   : >> { %4425 = vmatmul.f32.gmra.mxu3 %v13033_v25 }
 0x4f4   : >> { %4796 = vmatmul.f32.vlgmr.msra.gmra.mxu0 %v4544_v51 }
 0x4f5   : >> { %v13304_v52 = vpop.f32.mrf.mxu0 }
 0x4f6   : >> { %4883 = vmatmul.f32.vlgmr.msra.gmra.mxu1 %v13164_v27 }
 0x4f7   : >> { %v13307_v46 = vpop.f32.mrf.mxu1 }
 0x4f8   : >> { %v13309_v11 = vpop.f32.mrf.mxu2 }
 0x4f9   : >> { %4940 = vmatmul.f32.vlgmr.msra.gmra.mxu2 %v13164_v27 }
 0x4fb   : >> { %v13312_v45 = vpop.f32.mrf.mxu3  ;;  %4730 = vmatmul.f32.vlgmr.msrb.gmra.mxu3 %v13173_v41 }
 0x4fc   : >> { %4802 = vmatmul.f32.gmra.mxu0 %v4552_v48  ;;  %v4132_v0 = vadd.f32 %v13295_v4, %v13312_v45 }
 0x4fe   : >> { %4887 = vmatmul.f32.gmra.mxu1 %v13178_v62 }
 0x4ff   : >> { %v13318_v25 = vpop.f32.mrf.mxu0 }
 0x501   : >> { %4944 = vmatmul.f32.gmra.mxu2 %v13178_v62 }
 0x502   : >> { %v13320_v55 = vpop.f32.mrf.mxu1  ;;  %v13322_v51 = vpop.f32.mrf.mxu2 }
 0x503   : >> { %4735 = vmatmul.f32.gmra.mxu3 %v13190_v44 }
 0x504   : >> { %4808 = vmatmul.f32.gmra.mxu0 %v4560_v7 }
 0x505   : >> { %v13328_v27 = vpop.f32.mrf.mxu3 }
 0x506   : >> { %4891 = vmatmul.f32.gmra.mxu1 %v13195_v28 }
 0x509   : >> { %v13331_v41 = vpop.f32.mrf.mxu0  ;;  %4948 = vmatmul.f32.gmra.mxu2 %v13195_v28 }
 0x50b   : >> { %v13334_v32 = vpop.f32.mrf.mxu1  ;;  %4740 = vmatmul.f32.gmra.mxu3 %v13206_v47 }
 0x50c   : >> { %v13337_v43 = vpop.f32.mrf.mxu2  ;;  %4814 = vmatmul.f32.gmra.mxu0 %v4568_v30 }
 0x50e   : >> { %4895 = vmatmul.f32.gmra.mxu1 %v13211_v12  ;;  %v13342_v62 = vpop.f32.mrf.mxu3 }
 0x511   : >> { %v13344_v44 = vpop.f32.mrf.mxu0  ;;  %4952 = vmatmul.f32.gmra.mxu2 %v13211_v12 }
 0x513   : >> { %v13347_v36 = vpop.f32.mrf.mxu1  ;;  %4745 = vmatmul.f32.gmra.mxu3 %v13222_v33 }
 0x514   : >> { %4820 = vmatmul.f32.gmra.mxu0 %v4576_v13  ;;  %v13352_v29 = vpop.f32.mrf.mxu2 }
 0x516   : >> { %4899 = vmatmul.f32.gmra.mxu1 %v13227_v15  ;;  %v13355_v48 = vpop.f32.mrf.mxu3 }
 0x519   : >> { %v13357_v28 = vpop.f32.mrf.mxu0  ;;  %4956 = vmatmul.f32.gmra.mxu2 %v13227_v15 }
 0x51b   : >> { %v13360_v59 = vpop.f32.mrf.mxu1  ;;  %4750 = vmatmul.f32.gmra.mxu3 %v13238_v34 }
 0x51c   : >> { %4826 = vmatmul.f32.gmra.mxu0 %v4584_v17  ;;  %v13365_v38 = vpop.f32.mrf.mxu2 }
 0x51e   : >> { %4903 = vmatmul.f32.gmra.mxu1 %v13243_v42  ;;  %v13368_v47 = vpop.f32.mrf.mxu3 }
 0x521   : >> { %v13370_v14 = vpop.f32.mrf.mxu0  ;;  %4960 = vmatmul.f32.gmra.mxu2 %v13243_v42 }
 0x523   : >> { %v13373_v21 = vpop.f32.mrf.mxu1  ;;  %4755 = vmatmul.f32.gmra.mxu3 %v13254_v26 }
 0x524   : >> { %4832 = vmatmul.f32.gmra.mxu0 %v4592_v49  ;;  %v13378_v7 = vpop.f32.mrf.mxu2 }
 0x526   : >> { %4907 = vmatmul.f32.gmra.mxu1 %v13259_v23  ;;  %v13381_v12 = vpop.f32.mrf.mxu3 }
 0x529   : >> { %v13383_v39 = vpop.f32.mrf.mxu0  ;;  %4964 = vmatmul.f32.gmra.mxu2 %v13259_v23 }
 0x52b   : >> { %v13386_v3 = vpop.f32.mrf.mxu1  ;;  %4760 = vmatmul.f32.gmra.mxu3 %v13270_v22 }
 0x52c   : >> { %17281 = vst [vmem:[#allocation21_spill] sm:$0xff] %v13386_v3  ;;  %4838 = vmatmul.f32.gmra.mxu0 %v4600_v1  ;;  %v13391_v33 = vpop.f32.mrf.mxu2 }
 0x52d   : >> { %17282 = vst [vmem:[#allocation18_spill] sm:$0xff] %v13391_v33 }
 0x52e   : >> { %4911 = vmatmul.f32.gmra.mxu1 %v13275_v2  ;;  %v13394_v37 = vpop.f32.mrf.mxu3 }
 0x531   : >> { %v4463_v50 = vpop.f32.mrf.mxu0  ;;  %4968 = vmatmul.f32.gmra.mxu2 %v13275_v2 }
 0x533   : >> { %v4548_v30 = vpop.f32.mrf.mxu1  ;;  %4765 = vmatmul.f32.gmra.mxu3 %v13283_v61 }
 0x534   : >> { %v13398_v15 = vpop.f32.mrf.mxu2 }
 0x535   : >> { %17283 = vst [vmem:[#allocation26_spill] sm:$0xff] %v13398_v15  ;;  %v4214_v15 = vadd.f32 %v13297_v31, %v4132_v0 }
 0x536   : >> { %v13400_v18 = vpop.f32.mrf.mxu3 }
 0x539   : >> { %v4467_v6 = vpop.f32.mrf.mxu0 }
 0x53b   : >> { %v13402_v34 = vpop.f32.mrf.mxu1 }
 0x53c   : >> { %v13404_v16 = vpop.f32.mrf.mxu2 }
 0x53e   : >> { %v4398_v20 = vpop.f32.mrf.mxu3 }
 0x541   : >> { %v13406_v13 = vpop.f32.mrf.mxu0 }
 0x543   : >> { %v13408_v42 = vpop.f32.mrf.mxu1 }
 0x544   : >> { %v13410_v54 = vpop.f32.mrf.mxu2 }
 0x546   : >> { %v4402_v19 = vpop.f32.mrf.mxu3 }
 0x549   : >> { %v13412_v26 = vpop.f32.mrf.mxu0 }
 0x54b   : >> { %v13414_v57 = vpop.f32.mrf.mxu1 }
 0x54c   : >> { %v13416_v40 = vpop.f32.mrf.mxu2 }
 0x54e   : >> { %v13418_v17 = vpop.f32.mrf.mxu3 }
 0x551   : >> { %v13420_v23 = vpop.f32.mrf.mxu0 }
 0x553   : >> { %v13422_v24 = vpop.f32.mrf.mxu1 }
 0x554   : >> { %v13424_v10 = vpop.f32.mrf.mxu2 }
 0x556   : >> { %v13426_v22 = vpop.f32.mrf.mxu3 }
 0x559   : >> { %v13428_v58 = vpop.f32.mrf.mxu0 }
 0x55b   : >> { %v13430_v9 = vpop.f32.mrf.mxu1 }
 0x55c   : >> { %17284 = vst [vmem:[#allocation30_spill] sm:$0xff] %v13430_v9  ;;  %v13432_v49 = vpop.f32.mrf.mxu2 }
 0x55e   : >> { %v13434_v2 = vpop.f32.mrf.mxu3 }
 0x561   : >> { %v13436_v35 = vpop.f32.mrf.mxu0 }
 0x562   : >> { %17285 = vst [vmem:[#allocation23_spill] sm:$0xff] %v13436_v35  ;;  %v4136_v35 = vadd.f32 %v13304_v52, %v13328_v27  ;;  %v5112_v52 = vld [vmem:[%s16959_s4 + $0x78] sm:$0xff] }
 0x563   : >> { %v13438_v61 = vpop.f32.mrf.mxu1  ;;  %v13473_v27 = vand.u32 4294901760, %v5112_v52 }
 0x564   : >> { %17286 = vst [vmem:[#allocation31_spill] sm:$0xff] %v13438_v61  ;;  %v13440_v56 = vpop.f32.mrf.mxu2  ;;  %v4288_v61 = vadd.f32 %v13309_v11, %v4214_v15  ;;  %v4219_v33 = vadd.f32 %v13307_v46, %v4136_v35 }
 0x565   : >> { %17287 = vst [vmem:[#allocation20_spill] sm:$0xff] %v13440_v56  ;;  %5114 = vmatpush.msrb.mxu0 %v13473_v27 }
 0x566   : >> { %v13442_v1 = vpop.f32.mrf.mxu3  ;;  %v4399_v4 = vadd.f32 %v4398_v20, %v4288_v61 }
 0x568   : >> { %v4464_v0 = vadd.f32 %v4463_v50, %v4399_v4  ;;  %v5109_v4 = vld [vmem:[%s16959_s4 + $0x60] sm:$0xff] }
 0x569   : >> { %v13446_v5 = vpop.f32.mrf.mxu0 }
 0x56a   : >> { %17288 = vst [vmem:[#allocation14_spill] sm:$0xff] %v13446_v5  ;;  %v4294_v5 = vadd.f32 %v13322_v51, %v4219_v33  ;;  %v4144_v33 = vadd.f32 %v13331_v41, %v13355_v48  ;;  %v4549_v50 = vadd.f32 %v4548_v30, %v4464_v0  ;;  %v13502_v48 = vmul.f32 2.0, %v13028_v53  ;;  %v5058_v30 = vld [vmem:[%s10135_s29 + $0x78] sm:$0xff] }
 0x56b   : >> { %v13448_v60 = vpop.f32.mrf.mxu1  ;;  %5059 = vmatpush.msra.mxu3 %v5058_v30  ;;  %v5108_v30 = vld [vmem:[%s16959_s4 + $0x58] sm:$0xff] }
 0x56c   : >> { %17289 = vst [vmem:[#allocation12_spill] sm:$0xff] %v13448_v60  ;;  %v13451_v3 = vpop.f32.mrf.mxu2  ;;  %v4140_v60 = vadd.f32 %v13318_v25, %v13342_v62  ;;  %v4403_v15 = vadd.f32 %v4402_v19, %v4294_v5  ;;  %v5111_v25 = vld [vmem:[%s16959_s4 + $0x70] sm:$0xff]  ;;  %v13480_v62 = vsub.f32 %v5112_v52, %v13473_v27 }
 0x56d   : >> { %17290 = vst [vmem:[#allocation22_spill] sm:$0xff] %v13451_v3  ;;  %v13482_v51 = vand.u32 4294901760, %v5111_v25 }
 0x56e   : >> { %v13455_v9 = vpop.f32.mrf.mxu3  ;;  %v4224_v46 = vadd.f32 %v13320_v55, %v4140_v60  ;;  %v5110_v55 = vld [vmem:[%s16959_s4 + $0x68] sm:$0xff]  ;;  %v17050_v19 = vand.u32 4294901760, %v13480_v62  ;;  %5341 = vmatpush.msrb.mxu2 %v13480_v62  ;;  %v4468_v5 = vadd.f32 %v4467_v6, %v4403_v15  ;;  %v5057_v60 = vld [vmem:[%s10135_s29 + $0x70] sm:$0xff]  ;;  %v4229_v15 = vadd.f32 %v13334_v32, %v4144_v33 }
 0x56f   : >> { %v13494_v35 = vsub.f32 %v5111_v25, %v13482_v51  ;;  %v13496_v61 = vand.u32 4294901760, %v5110_v55  ;;  %5116 = vmatpush.msrb.mxu0 %v13482_v51  ;;  %v4666_v25 = vadd.f32 %v13404_v16, %v4549_v50  ;;  %5060 = vmatpush.msra.mxu3 %v5057_v60  ;;  %v5107_v60 = vld [vmem:[%s16959_s4 + $0x50] sm:$0xff] }
 0x570   : >> { %v4300_v41 = vadd.f32 %v13337_v43, %v4224_v46  ;;  %v5213_v6 = vsub.f32 %v13480_v62, %v17050_v19  ;;  %v13520_v46 = vand.u32 4294901760, %v5109_v4  ;;  %v13530_v43 = vld [vmem:[#allocation2] sm:$0xff] }
 0x571   : >> { %v13458_v56 = vpop.f32.mrf.mxu0  ;;  %v13518_v53 = vsub.f32 %v5110_v55, %v13496_v61  ;;  %5344 = vmatpush.msrb.mxu2 %v13494_v35  ;;  %5118 = vmatpush.msrb.mxu0 %v13496_v61  ;;  %v17294_v3 = vand.u32 4294901760, %v13494_v35 }
 0x572   : >> { %17293 = vst [vmem:[#allocation17_spill] sm:$0xff] %v13520_v46  ;;  %v5214_v55 = vand.u32 4294901760, %v5213_v6  ;;  %v13537_v16 = vsub.f32 %v5109_v4, %v13520_v46  ;;  %v4306_v6 = vadd.f32 %v13352_v29, %v4229_v15 }
 0x573   : >> { %v13461_v45 = vpop.f32.mrf.mxu1  ;;  %v17051_v32 = vand.u32 4294901760, %v13518_v53  ;;  %5347 = vmatpush.msrb.mxu2 %v13518_v53  ;;  %5120 = vmatpush.msrb.mxu0 %v13520_v46 }
 0x574   : >> { %v13465_v31 = vpop.f32.mrf.mxu2  ;;  %5215 = vmatpush.msrb.mxu1 %v5214_v55  ;;  %v5106_v55 = vld [vmem:[%s16959_s4 + $0x48] sm:$0xff] }
 0x575   : >> { %17291 = vst [vmem:[#allocation29_spill] sm:$0xff] %v13465_v31  ;;  %v4407_v31 = vadd.f32 %v13418_v17, %v4300_v41  ;;  %v4557_v17 = vadd.f32 %v13402_v34, %v4468_v5  ;;  %v13543_v41 = vand.u32 4294901760, %v5108_v30  ;;  %v5225_v4 = vsub.f32 %v13518_v53, %v17051_v32  ;;  %5350 = vmatpush.msrb.mxu2 %v13537_v16 }
 0x576   : >> { %v13471_v11 = vpop.f32.mrf.mxu3  ;;  %v17052_v34 = vand.u32 4294901760, %v13537_v16  ;;  %v13572_v29 = vand.u32 4294901760, %v5106_v55 }
 0x577   : >> { %17292 = vst [vmem:[#allocation13_spill] sm:$0xff] %v13471_v11  ;;  %v5219_v11 = vsub.f32 %v13494_v35, %v17294_v3  ;;  %v4472_v5 = vadd.f32 %v13406_v13, %v4407_v31  ;;  %5122 = vmatpush.msrb.mxu0 %v13543_v41  ;;  %v5226_v32 = vand.u32 4294901760, %v5225_v4  ;;  %v4670_v15 = vadd.f32 %v13410_v54, %v4557_v17  ;;  %v5055_v4 = vld [vmem:[%s10135_s29 + $0x60] sm:$0xff] }
 0x578   : >> { %17295 = vst [vmem:[#allocation19_spill] sm:$0xff] %v13543_v41  ;;  %v5231_v13 = vsub.f32 %v13537_v16, %v17052_v34  ;;  %v5105_v34 = vld [vmem:[%s16959_s4 + $0x40] sm:$0xff] }
 0x579   : >> { %v13490_v20 = vpop.f32.mrf.mxu0  ;;  %v5220_v3 = vand.u32 4294901760, %v5219_v11  ;;  %v13560_v11 = vsub.f32 %v5108_v30, %v13543_v41  ;;  %17297 = vst [vmem:[#allocation24_spill] sm:$0xff] %v13572_v29  ;;  %v4565_v50 = vadd.f32 %v13408_v42, %v4472_v5  ;;  %v4411_v5 = vadd.f32 %v13426_v22, %v4306_v6 }
 0x57b   : >> { %v13511_v52 = vpop.f32.mrf.mxu1  ;;  %5221 = vmatpush.msrb.mxu1 %v5220_v3  ;;  %5353 = vmatpush.msrb.mxu2 %v13560_v11  ;;  %v17298_v41 = vand.u32 4294901760, %v13560_v11 }
 0x57c   : >> { %v13509_v0 = vpop.f32.mrf.mxu2 }
 0x57d   : >> { %5227 = vmatpush.msrb.mxu1 %v5226_v32  ;;  %v5237_v32 = vsub.f32 %v13560_v11, %v17298_v41 }
 0x57e   : >> { %v4731_v19 = vpop.f32.mrf.mxu3 }
 0x57f   : >> { %v4732_v33 = vadd.f32 %v4731_v19, %v4666_v25  ;;  %v13553_v19 = vand.u32 4294901760, %v5107_v60  ;;  %v5238_v46 = vand.u32 4294901760, %v5237_v32 }
 0x581   : >> { %17296 = vst [vmem:[#allocation15_spill] sm:$0xff] %v13553_v19  ;;  %v4798_v25 = vadd.f32 %v13458_v56, %v4732_v33  ;;  %v13570_v31 = vsub.f32 %v5107_v60, %v13553_v19  ;;  %v4148_v56 = vadd.f32 %v13344_v44, %v13368_v47  ;;  %v5056_v33 = vld [vmem:[%s10135_s29 + $0x68] sm:$0xff]  ;;  %5124 = vmatpush.msrb.mxu0 %v13553_v19  ;;  %v4996_v44 = vld [vmem:[%s16957_s2] sm:$0xff]  ;;  %v13591_v54 = vpop.f32.mrf.mxu0  ;;  %v13602_v19 = vmul.f32 2.0, %v13041_v8 }
 0x582   : >> { %5061 = vmatpush.msra.mxu3 %v5056_v33  ;;  %v13595_v60 = vsub.f32 %v5106_v55, %v13572_v29 }
 0x583   : >> { %v4885_v30 = vadd.f32 %v13461_v45, %v4798_v25  ;;  %v5232_v45 = vand.u32 4294901760, %v5231_v13  ;;  %v17061_v17 = vand.u32 4294901760, %v13570_v31  ;;  %v13597_v25 = vand.u32 4294901760, %v5105_v34  ;;  %v5104_v13 = vld [vmem:[%s16959_s4 + $0x38] sm:$0xff]  ;;  %5126 = vmatpush.msrb.mxu0 %v13572_v29  ;;  %5356 = vmatpush.msrb.mxu2 %v13570_v31  ;;  %v13612_v33 = vpop.f32.mrf.mxu1 }
 0x584   : >> { %v13589_v47 = vpop.f32.mrf.mxu2  ;;  %5062 = vmatpush.msra.mxu3 %v5055_v4  ;;  %v5248_v42 = vand.u32 4294901760, %v13595_v60  ;;  %v13621_v41 = vand.u32 4294901760, %v5104_v13  ;;  %v5103_v4 = vld [vmem:[%s16959_s4 + $0x30] sm:$0xff]  ;;  %v4234_v6 = vadd.f32 %v13347_v36, %v4148_v56 }
 0x585   : >> { %v4942_v3 = vadd.f32 %v13509_v0, %v4885_v30  ;;  %5233 = vmatpush.msrb.mxu1 %v5232_v45  ;;  %v5243_v8 = vsub.f32 %v13570_v31, %v17061_v17  ;;  %v13619_v0 = vsub.f32 %v5105_v34, %v13597_v25  ;;  %5128 = vmatpush.msrb.mxu0 %v13597_v25  ;;  %v13641_v32 = vand.u32 4294901760, %v5103_v4 }
 0x586   : >> { %v4736_v55 = vpop.f32.mrf.mxu3  ;;  %5359 = vmatpush.msrb.mxu2 %v13595_v60  ;;  %v5249_v34 = vsub.f32 %v13595_v60, %v5248_v42  ;;  %v13634_v22 = vsub.f32 %v5104_v13, %v13621_v41 }
 0x587   : >> { %v5004_v30 = vmul.f32 %v4996_v44, %v4942_v3  ;;  %v4737_v29 = vadd.f32 %v4736_v55, %v4670_v15  ;;  %v5244_v45 = vand.u32 4294901760, %v5243_v8  ;;  %v17063_v17 = vand.u32 4294901760, %v13619_v0  ;;  %5239 = vmatpush.msrb.mxu1 %v5238_v46  ;;  %5130 = vmatpush.msrb.mxu0 %v13621_v41 }
 0x588   : >> { %v17299_v15 = vsub.f32 %v13502_v48, %v13530_v43  ;;  %v4152_v55 = vadd.f32 %v13357_v28, %v13381_v12  ;;  %v5250_v13 = vand.u32 4294901760, %v5249_v34  ;;  %v17062_v48 = vand.u32 4294901760, %v13634_v22  ;;  %v5102_v43 = vld [vmem:[%s16959_s4 + $0x28] sm:$0xff]  ;;  %5362 = vmatpush.msrb.mxu2 %v13619_v0  ;;  %v5054_v28 = vld [vmem:[%s10135_s29 + $0x58] sm:$0xff]  ;;  %v5053_v12 = vld [vmem:[%s10135_s29 + $0x50] sm:$0xff] }
 0x589   : >> { %v4804_v44 = vadd.f32 %v13490_v20, %v4737_v29  ;;  %v5255_v36 = vsub.f32 %v13619_v0, %v17063_v17  ;;  %v13656_v46 = vmul.f32 2.0, %v13055_v63  ;;  %5245 = vmatpush.msrb.mxu1 %v5244_v45  ;;  %v13661_v29 = vsub.f32 %v5103_v4, %v13641_v32  ;;  %5132 = vmatpush.msrb.mxu0 %v13641_v32  ;;  %v4997_v63 = vld [vmem:[%s16957_s2 + $0x8] sm:$0xff]  ;;  %v5101_v34 = vld [vmem:[%s16959_s4 + $0x20] sm:$0xff] }
 0x58a   : >> { %v5012_v3 = vadd.f32 %v5004_v30, %v17299_v15  ;;  %v13663_v56 = vand.u32 4294901760, %v5102_v43  ;;  %v4674_v8 = vadd.f32 %v13416_v40, %v4565_v50  ;;  %v4476_v30 = vadd.f32 %v13412_v26, %v4411_v5  ;;  %5063 = vmatpush.msra.mxu3 %v5054_v28  ;;  %5365 = vmatpush.msrb.mxu2 %v13634_v22  ;;  %v4981_v40 = vld [vmem:[#allocation2 + $0x8] sm:$0xff]  ;;  %v17317_v60 = vld [vmem:[#allocation15_spill] sm:$0xff] }
 0x58b   : >> { %v4889_v20 = vadd.f32 %v13511_v52, %v4804_v44  ;;  %v5256_v45 = vand.u32 4294901760, %v5255_v36  ;;  %v5261_v4 = vsub.f32 %v13634_v22, %v17062_v48  ;;  %5251 = vmatpush.msrb.mxu1 %v5250_v13  ;;  %v5052_v50 = vld [vmem:[%s10135_s29 + $0x48] sm:$0xff]  ;;  %v5266_v5 = vand.u32 4294901760, %v13661_v29 }
 0x58c   : >> { %5020 = vst [vmem:[#allocation2] sm:$0xff] %v5012_v3  ;;  %v13671_v52 = vpop.f32.mrf.mxu2  ;;  %v13684_v15 = vsub.f32 %v5102_v43, %v13663_v56  ;;  %v13686_v3 = vand.u32 4294901760, %v5101_v34  ;;  %5134 = vmatpush.msrb.mxu0 %v13663_v56  ;;  %v4239_v44 = vadd.f32 %v13360_v59, %v4152_v55  ;;  %v4312_v36 = vadd.f32 %v13365_v38, %v4234_v6  ;;  %v5100_v43 = vld [vmem:[%s16959_s4 + $0x18] sm:$0xff]  ;;  %v13705_v55 = vpop.f32.mrf.mxu1 }
 0x58d   : >> { %v4946_v26 = vadd.f32 %v13589_v47, %v4889_v20  ;;  %v4989_v28 = vsub.f32 %v13602_v19, %v4981_v40  ;;  %v13692_v47 = vpop.f32.mrf.mxu0  ;;  %5064 = vmatpush.msra.mxu3 %v5053_v12  ;;  %v5262_v13 = vand.u32 4294901760, %v5261_v4  ;;  %5368 = vmatpush.msrb.mxu2 %v13661_v29  ;;  %v5267_v59 = vsub.f32 %v13661_v29, %v5266_v5 }
 0x58e   : >> { %v4741_v48 = vpop.f32.mrf.mxu3  ;;  %5257 = vmatpush.msrb.mxu1 %v5256_v45  ;;  %v5272_v38 = vand.u32 4294901760, %v13684_v15  ;;  %5136 = vmatpush.msrb.mxu0 %v13686_v3  ;;  %v4573_v19 = vadd.f32 %v13414_v57, %v4476_v30  ;;  %v4415_v6 = vadd.f32 %v13434_v2, %v4312_v36  ;;  %v13708_v12 = vsub.f32 %v5101_v34, %v13686_v3  ;;  %v4982_v57 = vld [vmem:[#allocation2 + $0x10] sm:$0xff] }
 0x58f   : >> { %v5005_v20 = vmul.f32 %v4997_v63, %v4946_v26  ;;  %v4742_v17 = vadd.f32 %v4741_v48, %v4674_v8  ;;  %5065 = vmatpush.msra.mxu3 %v5052_v50  ;;  %v13710_v48 = vand.u32 4294901760, %v5100_v43  ;;  %v5099_v8 = vld [vmem:[%s16959_s4 + $0x10] sm:$0xff]  ;;  %5371 = vmatpush.msrb.mxu2 %v13684_v15  ;;  %v5268_v2 = vand.u32 4294901760, %v5267_v59  ;;  %v5051_v50 = vld [vmem:[%s10135_s29 + $0x40] sm:$0xff] }
 0x590   : >> { %5263 = vmatpush.msrb.mxu1 %v5262_v13  ;;  %v5273_v30 = vsub.f32 %v13684_v15, %v5272_v38  ;;  %v4990_v4 = vsub.f32 %v13656_v46, %v4982_v57  ;;  %v17064_v34 = vand.u32 4294901760, %v13708_v12  ;;  %v13725_v40 = vand.u32 4294901760, %v5099_v8  ;;  %v5002_v15 = vld [vmem:[%s16957_s2 + $0x30] sm:$0xff] }
 0x591   : >> { %v5013_v63 = vadd.f32 %v5005_v20, %v4989_v28  ;;  %v4810_v45 = vadd.f32 %v13591_v54, %v4742_v17  ;;  %v13723_v26 = vsub.f32 %v5100_v43, %v13710_v48  ;;  %v5098_v54 = vld [vmem:[%s16959_s4 + $0x8] sm:$0xff]  ;;  %5138 = vmatpush.msrb.mxu0 %v13710_v48  ;;  %5374 = vmatpush.msrb.mxu2 %v13708_v12  ;;  %v5050_v28 = vld [vmem:[%s10135_s29 + $0x38] sm:$0xff]  ;;  %v4998_v20 = vld [vmem:[%s16957_s2 + $0x10] sm:$0xff]  ;;  %v17323_v29 = vand.u32 4294901760, %v13708_v12 }
 0x592   : >> { %v4318_v17 = vadd.f32 %v13378_v7, %v4239_v44  ;;  %5269 = vmatpush.msrb.mxu1 %v5268_v2  ;;  %v5274_v36 = vand.u32 4294901760, %v5273_v30  ;;  %v13736_v13 = vand.u32 4294901760, %v5098_v54  ;;  %v4480_v43 = vadd.f32 %v13420_v23, %v4415_v6  ;;  %5066 = vmatpush.msra.mxu3 %v5051_v50 }
 0x593   : >> { %5021 = vst [vmem:[#allocation2 + $0x8] sm:$0xff] %v5013_v63  ;;  %v4893_v46 = vadd.f32 %v13612_v33, %v4810_v45  ;;  %v5279_v7 = vsub.f32 %v13708_v12, %v17064_v34  ;;  %v5284_v33 = vand.u32 4294901760, %v13723_v26  ;;  %v13747_v44 = vsub.f32 %v5099_v8, %v13725_v40  ;;  %v5097_v63 = vld [vmem:[%s16959_s4] sm:$0xff]  ;;  %5140 = vmatpush.msrb.mxu0 %v13725_v40  ;;  %v5049_v45 = vld [vmem:[%s10135_s29 + $0x30] sm:$0xff] }
 0x594   : >> { %v4953_v59 = vpop.f32.mrf.mxu2  ;;  %v4678_v23 = vadd.f32 %v13424_v10, %v4573_v19  ;;  %5275 = vmatpush.msrb.mxu1 %v5274_v36  ;;  %v13757_v57 = vsub.f32 %v5098_v54, %v13736_v13  ;;  %v13759_v2 = vand.u32 4294901760, %v5097_v63  ;;  %5377 = vmatpush.msrb.mxu2 %v13723_v26  ;;  %v4156_v8 = vadd.f32 %v13370_v14, %v13394_v37 }
 0x595   : >> { %v4950_v6 = vadd.f32 %v13671_v52, %v4893_v46  ;;  %5067 = vmatpush.msra.mxu3 %v5050_v28  ;;  %v5280_v50 = vand.u32 4294901760, %v5279_v7  ;;  %v5285_v10 = vsub.f32 %v13723_v26, %v5284_v33  ;;  %v5290_v52 = vand.u32 4294901760, %v13747_v44  ;;  %5142 = vmatpush.msrb.mxu0 %v13736_v13  ;;  %v5048_v46 = vld [vmem:[%s10135_s29 + $0x28] sm:$0xff]  ;;  %v4821_v28 = vpop.f32.mrf.mxu0 }
 0x596   : >> { %v4746_v30 = vpop.f32.mrf.mxu3  ;;  %v5296_v36 = vand.u32 4294901760, %v13757_v57  ;;  %v13772_v34 = vsub.f32 %v5097_v63, %v13759_v2  ;;  %5380 = vmatpush.msrb.mxu2 %v13747_v44  ;;  %v4581_v14 = vadd.f32 %v13422_v24, %v4480_v43  ;;  %v4419_v37 = vadd.f32 %v13442_v1, %v4318_v17  ;;  %v9963_v17 = vld [vmem:[#allocation3 + $0x18] sm:$0xff] }
 0x597   : >> { %v5006_v19 = vmul.f32 %v4998_v20, %v4950_v6  ;;  %v4747_v54 = vadd.f32 %v4746_v30, %v4678_v23  ;;  %5281 = vmatpush.msrb.mxu1 %v5280_v50  ;;  %5068 = vmatpush.msra.mxu3 %v5049_v45  ;;  %v5286_v7 = vand.u32 4294901760, %v5285_v10  ;;  %v5291_v20 = vsub.f32 %v13747_v44, %v5290_v52  ;;  %v4900_v45 = vpop.f32.mrf.mxu1  ;;  %v5047_v30 = vld [vmem:[%s10135_s29 + $0x20] sm:$0xff]  ;;  %v5046_v10 = vld [vmem:[%s10135_s29 + $0x18] sm:$0xff] }
 0x598   : >> { %v5297_v63 = vsub.f32 %v13757_v57, %v5296_v36  ;;  %v17065_v24 = vand.u32 4294901760, %v13772_v34  ;;  %5144 = vmatpush.msrb.mxu0 %v13759_v2  ;;  %5383 = vmatpush.msrb.mxu2 %v13757_v57  ;;  %v4244_v1 = vadd.f32 %v13373_v21, %v4156_v8  ;;  %v4975_v43 = vmul.f32 2.0, %v9963_v17  ;;  %v4999_v8 = vld [vmem:[%s16957_s2 + $0x18] sm:$0xff] }
 0x599   : >> { %v5014_v23 = vadd.f32 %v5006_v19, %v4990_v4  ;;  %v4816_v6 = vadd.f32 %v13692_v47, %v4747_v54  ;;  %5287 = vmatpush.msrb.mxu1 %v5286_v7  ;;  %5069 = vmatpush.msra.mxu3 %v5048_v46  ;;  %v5292_v4 = vand.u32 4294901760, %v5291_v20  ;;  %v17300_v54 = vand.u32 4294901760, %v13480_v62  ;;  %v4983_v20 = vld [vmem:[#allocation2 + $0x18] sm:$0xff] }
 0x59a   : >> { %v5298_v50 = vand.u32 4294901760, %v5297_v63  ;;  %v5303_v19 = vsub.f32 %v13772_v34, %v17065_v24  ;;  %5386 = vmatpush.msrb.mxu2 %v13772_v34  ;;  %v4484_v21 = vadd.f32 %v13428_v58, %v4419_v37  ;;  %v4682_v46 = vadd.f32 %v13432_v49, %v4581_v14  ;;  %v17302_v37 = vld [vmem:[#allocation18_spill] sm:$0xff]  ;;  %v5044_v24 = vld [vmem:[%s10135_s29 + $0x8] sm:$0xff] }
 0x59b   : >> { %5022 = vst [vmem:[#allocation2 + $0x10] sm:$0xff] %v5014_v23  ;;  %v4897_v47 = vadd.f32 %v13705_v55, %v4816_v6  ;;  %5512 = vmatpush.msra.mxu0 %v17300_v54  ;;  %5293 = vmatpush.msrb.mxu1 %v5292_v4  ;;  %v5045_v6 = vld [vmem:[%s10135_s29 + $0x10] sm:$0xff]  ;;  %v17301_v62 = vand.u32 4294901760, %v13494_v35  ;;  %v4991_v63 = vsub.f32 %v4975_v43, %v4983_v20  ;;  %v17303_v49 = vand.u32 4294901760, %v13518_v53 }
 0x59c   : >> { %v4957_v55 = vpop.f32.mrf.mxu2  ;;  %5070 = vmatpush.msra.mxu3 %v5047_v30  ;;  %v5304_v23 = vand.u32 4294901760, %v5303_v19  ;;  %v4160_v58 = vadd.f32 %v13383_v39, %v13400_v18  ;;  %v4324_v4 = vadd.f32 %v17302_v37, %v4244_v1  ;;  %v17305_v39 = vand.u32 4294901760, %v13537_v16  ;;  %v17306_v1 = vld [vmem:[#allocation21_spill] sm:$0xff]  ;;  %v5043_v16 = vld [vmem:[%s10135_s29] sm:$0xff] }
 0x59d   : >> { %v4954_v7 = vadd.f32 %v4953_v59, %v4897_v47  ;;  %5516 = vmatpush.msra.mxu0 %v17301_v62  ;;  %5299 = vmatpush.msrb.mxu1 %v5298_v50  ;;  %v17304_v59 = vld [vmem:[#allocation30_spill] sm:$0xff]  ;;  %v4827_v18 = vpop.f32.mrf.mxu0  ;;  %v17325_v44 = vand.u32 4294901760, %v13772_v34 }
 0x59e   : >> { %v4751_v17 = vpop.f32.mrf.mxu3  ;;  %5071 = vmatpush.msra.mxu3 %v5046_v10  ;;  %v4589_v14 = vadd.f32 %v17304_v59, %v4484_v21  ;;  %v4423_v35 = vadd.f32 %v13455_v9, %v4324_v4  ;;  %v4249_v50 = vadd.f32 %v17306_v1, %v4160_v58  ;;  %v9964_v10 = vld [vmem:[#allocation3 + $0x20] sm:$0xff]  ;;  %v17307_v9 = vand.u32 4294901760, %v13560_v11  ;;  %v17311_v62 = vld [vmem:[#allocation26_spill] sm:$0xff]  ;;  %v17312_v4 = vld [vmem:[#allocation17_spill] sm:$0xff] }
 0x59f   : >> { %v5007_v54 = vmul.f32 %v4999_v8, %v4954_v7  ;;  %v4752_v30 = vadd.f32 %v4751_v17, %v4682_v46  ;;  %5520 = vmatpush.msra.mxu0 %v17303_v49  ;;  %5305 = vmatpush.msrb.mxu1 %v5304_v23  ;;  %v4976_v19 = vmul.f32 2.0, %v9964_v10  ;;  %v4904_v21 = vpop.f32.mrf.mxu1  ;;  %v17308_v8 = vld [vmem:[#allocation20_spill] sm:$0xff]  ;;  %v17310_v11 = vand.u32 4294901760, %v13570_v31  ;;  %v17315_v31 = vld [vmem:[#allocation19_spill] sm:$0xff] }
 0x5a0   : >> { %5072 = vmatpush.msra.mxu3 %v5045_v6  ;;  %v4686_v46 = vadd.f32 %v17308_v8, %v4589_v14  ;;  %v17316_v14 = vand.u32 4294901760, %v13619_v0  ;;  %v4985_v10 = vld [vmem:[#allocation2 + $0x28] sm:$0xff] }
 0x5a1   : >> { %v5015_v43 = vadd.f32 %v5007_v54, %v4991_v63  ;;  %v4822_v47 = vadd.f32 %v4821_v28, %v4752_v30  ;;  %5607 = vmatpush.msra.mxu1 %v13473_v27  ;;  %5524 = vmatpush.msra.mxu0 %v17305_v39  ;;  %v5000_v28 = vld [vmem:[%s16957_s2 + $0x20] sm:$0xff]  ;;  %v4330_v63 = vadd.f32 %v17311_v62, %v4249_v50  ;;  %v17314_v30 = vld [vmem:[#allocation13_spill] sm:$0xff]  ;;  %v17318_v39 = vand.u32 4294901760, %v13634_v22  ;;  %v17322_v8 = vld [vmem:[#allocation12_spill] sm:$0xff] }
 0x5a2   : >> { %5073 = vmatpush.msra.mxu3 %v5044_v24  ;;  %v17309_v24 = vld [vmem:[#allocation23_spill] sm:$0xff] }
 0x5a3   : >> { %5023 = vst [vmem:[#allocation2 + $0x18] sm:$0xff] %v5015_v43  ;;  %v4901_v53 = vadd.f32 %v4900_v45, %v4822_v47  ;;  %5609 = vmatpush.msra.mxu1 %v13482_v51  ;;  %5528 = vmatpush.msra.mxu0 %v17307_v9  ;;  %v4488_v7 = vadd.f32 %v17309_v24, %v4423_v35  ;;  %v4984_v45 = vld [vmem:[#allocation2 + $0x20] sm:$0xff] }
 0x5a4   : >> { %5074 = vmatpush.msra.mxu3 %v5043_v16  ;;  %v4961_v6 = vpop.f32.mrf.mxu2  ;;  %v4992_v17 = vsub.f32 %v4976_v19, %v4984_v45  ;;  %v4427_v49 = vadd.f32 %v17314_v30, %v4330_v63 }
 0x5a5   : >> { %v4958_v20 = vadd.f32 %v4957_v55, %v4901_v53  ;;  %5611 = vmatpush.msra.mxu1 %v13496_v61  ;;  %5532 = vmatpush.msra.mxu0 %v17310_v11  ;;  %v17313_v55 = vld [vmem:[#allocation31_spill] sm:$0xff]  ;;  %v4833_v47 = vpop.f32.mrf.mxu0  ;;  %v17321_v53 = vld [vmem:[#allocation24_spill] sm:$0xff] }
 0x5a6   : >> { %v4756_v23 = vpop.f32.mrf.mxu3  ;;  %5429 = vmatpush.msrb.mxu3 %v13473_v27  ;;  %v4597_v54 = vadd.f32 %v17313_v55, %v4488_v7 }
 0x5a7   : >> { %v5008_v58 = vmul.f32 %v5000_v28, %v4958_v20  ;;  %v4757_v37 = vadd.f32 %v4756_v23, %v4686_v46  ;;  %5613 = vmatpush.msra.mxu1 %v17312_v4  ;;  %5536 = vmatpush.msra.mxu0 %v5248_v42  ;;  %v5001_v42 = vld [vmem:[%s16957_s2 + $0x28] sm:$0xff]  ;;  %v4908_v9 = vpop.f32.mrf.mxu1  ;;  %v9966_v20 = vld [vmem:[#allocation3 + $0x30] sm:$0xff] }
 0x5a8   : >> { %5431 = vmatpush.msrb.mxu3 %v13482_v51  ;;  %v9965_v51 = vld [vmem:[#allocation3 + $0x28] sm:$0xff]  ;;  %v4978_v45 = vmul.f32 2.0, %v9966_v20 }
 0x5a9   : >> { %v5016_v27 = vadd.f32 %v5008_v58, %v4992_v17  ;;  %v4828_v59 = vadd.f32 %v4827_v18, %v4757_v37  ;;  %5615 = vmatpush.msra.mxu1 %v17315_v31  ;;  %5540 = vmatpush.msra.mxu0 %v17316_v14  ;;  %v4977_v43 = vmul.f32 2.0, %v9965_v51  ;;  %v17320_v18 = vld [vmem:[#allocation14_spill] sm:$0xff] }
 0x5aa   : >> { %5433 = vmatpush.msrb.mxu3 %v13496_v61  ;;  %v17319_v61 = vld [vmem:[#allocation22_spill] sm:$0xff]  ;;  %v4492_v1 = vadd.f32 %v17320_v18, %v4427_v49 }
 0x5ab   : >> { %5024 = vst [vmem:[#allocation2 + $0x20] sm:$0xff] %v5016_v27  ;;  %v4905_v35 = vadd.f32 %v4904_v21, %v4828_v59  ;;  %5617 = vmatpush.msra.mxu1 %v17317_v60  ;;  %5544 = vmatpush.msra.mxu0 %v17318_v39  ;;  %v4690_v0 = vadd.f32 %v17319_v61, %v4597_v54  ;;  %v9967_v37 = vld [vmem:[#allocation3 + $0x38] sm:$0xff]  ;;  %v5038_v54 = vstv %s5035_s10  ;;  %s9907_s10 = sshll.u32 %s6207_s26, 7 }
 0x5ac   : >> { %5435 = vmatpush.msrb.mxu3 %v17312_v4  ;;  %v4993_v28 = vsub.f32 %v4977_v43, %v4985_v10  ;;  %v4965_v16 = vpop.f32.mrf.mxu2  ;;  %v4605_v46 = vadd.f32 %v17322_v8, %v4492_v1  ;;  %v4979_v4 = vmul.f32 2.0, %v9967_v37  ;;  %s6211_s15 = sadd.s32 %s9907_s10, %s6210_s11  ;;  %s6257_s10 = sadd.s32 5, %s11253_s28 }
 0x5ad   : >> { %v4962_v50 = vadd.f32 %v4961_v6, %v4905_v35  ;;  %5619 = vmatpush.msra.mxu1 %v17321_v53  ;;  %5548 = vmatpush.msra.mxu0 %v5266_v5  ;;  %v4986_v6 = vld [vmem:[#allocation2 + $0x30] sm:$0xff]  ;;  %v4839_v62 = vpop.f32.mrf.mxu0  ;;  %s6212_s18 = sld [smem:[#allocation8 + %s6211_s15]]  ;;  %s7382_s11 = sshra.s32 %s6257_s10, 7 }
 0x5ae   : >> { %v4761_v19 = vpop.f32.mrf.mxu3  ;;  %5437 = vmatpush.msrb.mxu3 %v17315_v31  ;;  %s7384_s15 = sadd.s32 %s10111_s0, %s7382_s11  ;;  %s7387_s19 = sand.u32 127, %s6257_s10 }
 0x5af   : >> { %v5009_v22 = vmul.f32 %v5001_v42, %v4962_v50  ;;  %v4762_v21 = vadd.f32 %v4761_v19, %v4690_v0  ;;  %5621 = vmatpush.msra.mxu1 %v13597_v25  ;;  %5552 = vmatpush.msra.mxu0 %v5272_v38  ;;  %v17324_v38 = vld [vmem:[#allocation29_spill] sm:$0xff] }
 0x5b0   : >> { %5439 = vmatpush.msrb.mxu3 %v17317_v60  ;;  %v4694_v12 = vadd.f32 %v17324_v38, %v4605_v46 }
 0x5b1   : >> { %v5017_v24 = vadd.f32 %v5009_v22, %v4993_v28  ;;  %v4834_v7 = vadd.f32 %v4833_v47, %v4762_v21  ;;  %5623 = vmatpush.msra.mxu1 %v13621_v41  ;;  %5556 = vmatpush.msra.mxu0 %v17323_v29 }
 0x5b2   : >> { %5441 = vmatpush.msrb.mxu3 %v17321_v53 }
 0x5b3   : >> { %5025 = vst [vmem:[#allocation2 + $0x28] sm:$0xff] %v5017_v24  ;;  %v4909_v5 = vadd.f32 %v4908_v9, %v4834_v7  ;;  %5625 = vmatpush.msra.mxu1 %v13641_v32  ;;  %5560 = vmatpush.msra.mxu0 %v5284_v33  ;;  %v4912_v33 = vpop.f32.mrf.mxu1 }
 0x5b4   : >> { %5443 = vmatpush.msrb.mxu3 %v13597_v25  ;;  %v4994_v25 = vsub.f32 %v4978_v45, %v4986_v6 }
 0x5b5   : >> { %v4966_v23 = vadd.f32 %v4965_v16, %v4909_v5  ;;  %5627 = vmatpush.msra.mxu1 %v13663_v56  ;;  %5564 = vmatpush.msra.mxu0 %v5290_v52 }
 0x5b6   : >> { %v4766_v11 = vpop.f32.mrf.mxu3  ;;  %5445 = vmatpush.msrb.mxu3 %v13621_v41  ;;  %v4969_v41 = vpop.f32.mrf.mxu2 }
 0x5b7   : >> { %v5010_v63 = vmul.f32 %v5002_v15, %v4966_v23  ;;  %v4767_v26 = vadd.f32 %v4766_v11, %v4694_v12  ;;  %5629 = vmatpush.msra.mxu1 %v13686_v3  ;;  %5568 = vmatpush.msra.mxu0 %v5296_v36 }
 0x5b8   : >> { %5447 = vmatpush.msrb.mxu3 %v13641_v32  ;;  %v5003_v32 = vld [vmem:[%s16957_s2 + $0x38] sm:$0xff] }
 0x5b9   : >> { %v5018_v17 = vadd.f32 %v5010_v63, %v4994_v25  ;;  %v4840_v58 = vadd.f32 %v4839_v62, %v4767_v26  ;;  %5631 = vmatpush.msra.mxu1 %v13710_v48  ;;  %5572 = vmatpush.msra.mxu0 %v17325_v44  ;;  %v5089_v44 = vld [vmem:[%s16958_s3] sm:$0xff] }
 0x5ba   : >> { %5449 = vmatpush.msrb.mxu3 %v13663_v56  ;;  %v4987_v56 = vld [vmem:[#allocation2 + $0x38] sm:$0xff] }
 0x5bb   : >> { %5026 = vst [vmem:[#allocation2 + $0x30] sm:$0xff] %v5018_v17  ;;  %v4913_v52 = vadd.f32 %v4912_v33, %v4840_v58  ;;  %5633 = vmatpush.msra.mxu1 %v13725_v40  ;;  %v4995_v34 = vsub.f32 %v4979_v4, %v4987_v56  ;;  %v5090_v4 = vld [vmem:[%s16958_s3 + $0x8] sm:$0xff] }
 0x5bc   : >> { %5451 = vmatpush.msrb.mxu3 %v13686_v3  ;;  %v5037_v3 = vld [vmem:[%s10130_s25] sm:$0x1] }
 0x5bd   : >> { %v4970_v57 = vadd.f32 %v4969_v41, %v4913_v52  ;;  %5635 = vmatpush.msra.mxu1 %v13736_v13  ;;  %v5039_v30 = vmul.f32 %v5038_v54, %v5037_v3  ;;  %v5672_v52 = vsel %vm957_vm0, %v5089_v44, 0 }
 0x5be   : >> { %5453 = vmatpush.msrb.mxu3 %v13710_v48  ;;  %v14040_v37 = vand.u32 4294901760, %v5672_v52 }
 0x5bf   : >> { %v5011_v36 = vmul.f32 %v5003_v32, %v4970_v57  ;;  %5637 = vmatpush.msra.mxu1 %v13759_v2  ;;  %v5675_v57 = vsel %vm957_vm0, %v5090_v4, 0 }
 0x5c0   : >> { %5455 = vmatpush.msrb.mxu3 %v13725_v40  ;;  %v14049_v32 = vsub.f32 %v5672_v52, %v14040_v37 }
 0x5c1   : >> { %v5019_v55 = vadd.f32 %v5011_v36, %v4995_v34  ;;  %v14054_v34 = vand.u32 4294901760, %v5675_v57  ;;  %v5091_v36 = vld [vmem:[%s16958_s3 + $0x10] sm:$0xff] }
 0x5c2   : >> { %5457 = vmatpush.msrb.mxu3 %v13736_v13  ;;  %v5721_v56 = vand.u32 4294901760, %v14049_v32  ;;  %v5678_v54 = vsel %vm957_vm0, %v5091_v36, 0 }
 0x5c3   : >> { %5027 = vst [vmem:[#allocation2 + $0x38] sm:$0xff] %v5019_v55  ;;  %v14066_v3 = vsub.f32 %v5675_v57, %v14054_v34 }
 0x5c4   : >> { %5459 = vmatpush.msrb.mxu3 %v13759_v2  ;;  %v5722_v55 = vsub.f32 %v14049_v32, %v5721_v56 }
 0x5ca   : >> { %v5036_v49 = vld [vmem:[%s12144_s6] sm:$0x1] }
 0x5cb   : >> { %v5040_v27 = vadd.f32 %v5039_v30, %v5036_v49  ;;  %v5723_v30 = vand.u32 4294901760, %v5722_v55  ;;  %v5729_v49 = vand.u32 4294901760, %v14066_v3 }
 0x5cd   : >> { %5041 = vst [vmem:[%s12144_s6] sm:$0x1] %v5040_v27  ;;  %v14071_v27 = vand.u32 4294901760, %v5678_v54 }
 0x5d4   : >> { %v5042_v59 = vld [vmem:[%s12149_s14] sm:$0x1]  ;;  %v5088_v31 = vld [vmem:[#allocation2 + $0x38] sm:$0xff]  ;;  %v5087_v13 = vld [vmem:[#allocation2 + $0x30] sm:$0xff] }
 0x5d5   : >> { %v13904_v48 = vld [vmem:[#allocation2] sm:$0xff]  ;;  %5075 = vmatmul.f32.vlgmr.msra.gmra.mxu3 %v5042_v59  ;;  %v13909_v40 = vand.u32 4294901760, %v5088_v31  ;;  %v5086_v35 = vld [vmem:[#allocation2 + $0x28] sm:$0xff]  ;;  %v13911_v43 = vand.u32 4294901760, %v5087_v13  ;;  %v5084_v47 = vld [vmem:[#allocation2 + $0x18] sm:$0xff] }
 0x5d6   : >> { %v13907_v14 = vand.u32 4294901760, %v13904_v48  ;;  %v5085_v51 = vld [vmem:[#allocation2 + $0x20] sm:$0xff]  ;;  %v13913_v2 = vand.u32 4294901760, %v5086_v35  ;;  %v13917_v42 = vld [vmem:[#allocation2 + $0x8] sm:$0xff]  ;;  %v13931_v18 = vld [vmem:[#allocation2 + $0x10] sm:$0xff]  ;;  %v13934_v1 = vand.u32 4294901760, %v5084_v47 }
 0x5d7   : >> { %v13915_v60 = vand.u32 4294901760, %v5085_v51  ;;  %5704 = vmatpush.msra.mxu2 %v13909_v40  ;;  %v13926_v61 = vand.u32 4294901760, %v13917_v42  ;;  %v13929_v0 = vsub.f32 %v5088_v31, %v13909_v40  ;;  %v13937_v50 = vsub.f32 %v5087_v13, %v13911_v43  ;;  %v5092_v59 = vld [vmem:[%s16958_s3 + $0x18] sm:$0xff] }
 0x5d8   : >> { %5307 = vmatmul.f32.vlgmr.msrb.gmra.mxu1 %v13907_v14  ;;  %v13923_v39 = vsub.f32 %v13904_v48, %v13907_v14  ;;  %v13940_v53 = vsub.f32 %v5086_v35, %v13913_v2  ;;  %v13955_v28 = vand.u32 4294901760, %v13931_v18  ;;  %v13974_v7 = vsub.f32 %v5084_v47, %v13934_v1 }
 0x5d9   : >> { %5955 = vmatpush.msrb.mxu1 %v13909_v40  ;;  %v13947_v19 = vand.u32 4294901760, %v13929_v0  ;;  %v13950_v9 = vsub.f32 %v5085_v51, %v13915_v60  ;;  %5706 = vmatpush.msra.mxu2 %v13911_v43  ;;  %v13958_v22 = vand.u32 4294901760, %v13937_v50  ;;  %v5154_v46 = vsub.f32 %v13917_v42, %v13926_v61 }
 0x5da   : >> { %5389 = vmatmul.f32.vlgmr.msrb.gmra.mxu2 %v13923_v39  ;;  %v13944_v10 = vand.u32 4294901760, %v13923_v39  ;;  %v13961_v21 = vand.u32 4294901760, %v13940_v53  ;;  %v5162_v15 = vsub.f32 %v13931_v18, %v13955_v28  ;;  %v5171_v23 = vand.u32 4294901760, %v13974_v7 }
 0x5db   : >> { %5957 = vmatpush.msrb.mxu1 %v13911_v43  ;;  %v5204_v8 = vsub.f32 %v13929_v0, %v13947_v19  ;;  %5708 = vmatpush.msra.mxu2 %v13913_v2  ;;  %v5196_v24 = vsub.f32 %v13937_v50, %v13958_v22  ;;  %v13980_v20 = vand.u32 4294901760, %v13950_v9  ;;  %v5155_v38 = vand.u32 4294901760, %v5154_v46 }
 0x5dc   : >> { %v5148_v16 = vsub.f32 %v13923_v39, %v13944_v10  ;;  %v5188_v45 = vsub.f32 %v13940_v53, %v13961_v21  ;;  %v5163_v62 = vand.u32 4294901760, %v5162_v15  ;;  %v5172_v63 = vsub.f32 %v13974_v7, %v5171_v23 }
 0x5dd   : >> { %5959 = vmatpush.msrb.mxu1 %v13913_v2  ;;  %5463 = vmatmul.f32.vlgmr.msrb.gmra.mxu3 %v13944_v10  ;;  %v13977_v5 = vand.u32 4294901760, %v5204_v8  ;;  %v13991_v12 = vand.u32 4294901760, %v5196_v24  ;;  %v5180_v6 = vsub.f32 %v13950_v9, %v13980_v20  ;;  %v5156_v25 = vsub.f32 %v5154_v46, %v5155_v38 }
 0x5de   : >> { %v5149_v29 = vand.u32 4294901760, %v5148_v16  ;;  %5710 = vmatpush.msra.mxu2 %v13915_v60  ;;  %v13999_v11 = vand.u32 4294901760, %v5188_v45  ;;  %v5164_v33 = vsub.f32 %v5162_v15, %v5163_v62  ;;  %v5173_v58 = vand.u32 4294901760, %v5172_v63 }
 0x5df   : >> { %5961 = vmatpush.msrb.mxu1 %v13915_v60  ;;  %5797 = vmatpush.msra.mxu3 %v13977_v5  ;;  %v5181_v26 = vand.u32 4294901760, %v5180_v6  ;;  %v5157_v17 = vand.u32 4294901760, %v5156_v25  ;;  %v5730_v31 = vsub.f32 %v14066_v3, %v5729_v49  ;;  %v14082_v13 = vsub.f32 %v5678_v54, %v14071_v27 }
 0x5e0   : >> { %5150 = vmatmul.f32.vlgmr.msrb.gmra.mxu0 %v5149_v29  ;;  %5311 = vmatmul.f32.gmra.mxu1 %v13926_v61  ;;  %v5165_v41 = vand.u32 4294901760, %v5164_v33  ;;  %v5681_v35 = vsel %vm957_vm0, %v5092_v59, 0 }
 0x5e1   : >> { %5712 = vmatpush.msra.mxu2 %v13934_v1  ;;  %5883 = vmatpush.msrb.mxu0 %v13929_v0  ;;  %v5731_v51 = vand.u32 4294901760, %v5730_v31  ;;  %v5737_v47 = vand.u32 4294901760, %v14082_v13 }
 0x5e2   : >> { %5963 = vmatpush.msrb.mxu1 %v13934_v1  ;;  %5394 = vmatmul.f32.gmra.mxu2 %v5154_v46 }
 0x5e3   : >> { %5803 = vmatpush.msra.mxu3 %v13991_v12  ;;  %5714 = vmatpush.msra.mxu2 %v13955_v28 }
 0x5e4   : >> { %5886 = vmatpush.msrb.mxu0 %v13937_v50  ;;  %5965 = vmatpush.msrb.mxu1 %v13955_v28 }
 0x5e5   : >> { %5809 = vmatpush.msra.mxu3 %v13999_v11  ;;  %5716 = vmatpush.msra.mxu2 %v13926_v61 }
 0x5e6   : >> { %5889 = vmatpush.msrb.mxu0 %v13940_v53  ;;  %5967 = vmatpush.msrb.mxu1 %v13926_v61 }
 0x5e7   : >> { %5469 = vmatmul.f32.gmra.mxu3 %v5155_v38  ;;  %5718 = vmatpush.msra.mxu2 %v13907_v14 }
 0x5e8   : >> { %5815 = vmatpush.msra.mxu3 %v5181_v26  ;;  %5892 = vmatpush.msrb.mxu0 %v13950_v9 }
 0x5e9   : >> { %5969 = vmatpush.msrb.mxu1 %v13907_v14  ;;  %6030 = vmatpush.msrb.mxu2 %v13947_v19 }
 0x5ea   : >> { %5158 = vmatmul.f32.gmra.mxu0 %v5157_v17  ;;  %5315 = vmatmul.f32.gmra.mxu1 %v13955_v28 }
 0x5eb   : >> { %5821 = vmatpush.msra.mxu3 %v5173_v58  ;;  %5895 = vmatpush.msrb.mxu0 %v13974_v7 }
 0x5ec   : >> { %6034 = vmatpush.msrb.mxu2 %v13958_v22 }
 0x5ed   : >> { %5399 = vmatmul.f32.gmra.mxu2 %v5162_v15  ;;  %5827 = vmatpush.msra.mxu3 %v5165_v41 }
 0x5ee   : >> { %5898 = vmatpush.msrb.mxu0 %v5162_v15  ;;  %6038 = vmatpush.msrb.mxu2 %v13961_v21 }
 0x5ef   : >> { %5833 = vmatpush.msra.mxu3 %v5157_v17 }
 0x5f0   : >> { %5901 = vmatpush.msrb.mxu0 %v5154_v46  ;;  %6042 = vmatpush.msrb.mxu2 %v13980_v20 }
 0x5f1   : >> { %5475 = vmatmul.f32.gmra.mxu3 %v5163_v62 }
 0x5f2   : >> { %5839 = vmatpush.msra.mxu3 %v5149_v29  ;;  %5904 = vmatpush.msrb.mxu0 %v13923_v39  ;;  %v14087_v39 = vand.u32 4294901760, %v5681_v35 }
 0x5f3   : >> { %6046 = vmatpush.msrb.mxu2 %v5171_v23  ;;  %5166 = vmatmul.f32.gmra.mxu0 %v5165_v41 }
 0x5f4   : >> { %6101 = vmatpush.msrb.mxu3 %v13909_v40  ;;  %5319 = vmatmul.f32.gmra.mxu1 %v13934_v1 }
 0x5f5   : >> { %6050 = vmatpush.msrb.mxu2 %v5163_v62 }
 0x5f6   : >> { %6103 = vmatpush.msrb.mxu3 %v13911_v43  ;;  %5404 = vmatmul.f32.gmra.mxu2 %v13974_v7  ;;  %v5095_v7 = vld [vmem:[%s16958_s3 + $0x30] sm:$0xff] }
 0x5f7   : >> { %6054 = vmatpush.msrb.mxu2 %v5155_v38  ;;  %v5096_v38 = vld [vmem:[%s16958_s3 + $0x38] sm:$0xff] }
 0x5f8   : >> { %6105 = vmatpush.msrb.mxu3 %v13913_v2  ;;  %v5693_v6 = vsel %vm957_vm0, %v5096_v38, 0 }
 0x5f9   : >> { %6058 = vmatpush.msrb.mxu2 %v13944_v10  ;;  %5481 = vmatmul.f32.gmra.mxu3 %v5171_v23  ;;  %v14151_v62 = vand.u32 4294901760, %v5693_v6 }
 0x5fa   : >> { %6107 = vmatpush.msrb.mxu3 %v13915_v60 }
 0x5fb   : >> { %5174 = vmatmul.f32.gmra.mxu0 %v5173_v58  ;;  %v14159_v63 = vsub.f32 %v5693_v6, %v14151_v62 }
 0x5fc   : >> { %6109 = vmatpush.msrb.mxu3 %v13934_v1  ;;  %5323 = vmatmul.f32.gmra.mxu1 %v13915_v60 }
 0x5fd   : >> { %v5777_v33 = vand.u32 4294901760, %v14159_v63 }
 0x5fe   : >> { %6111 = vmatpush.msrb.mxu3 %v13955_v28  ;;  %5409 = vmatmul.f32.gmra.mxu2 %v13950_v9 }
 0x600   : >> { %6113 = vmatpush.msrb.mxu3 %v13926_v61 }
 0x601   : >> { %5487 = vmatmul.f32.gmra.mxu3 %v13980_v20  ;;  %v5690_v20 = vsel %vm957_vm0, %v5095_v7, 0 }
 0x602   : >> { %6115 = vmatpush.msrb.mxu3 %v13907_v14  ;;  %v14135_v15 = vand.u32 4294901760, %v5690_v20 }
 0x603   : >> { %5182 = vmatmul.f32.gmra.mxu0 %v5181_v26 }
 0x604   : >> { %5327 = vmatmul.f32.gmra.mxu1 %v13913_v2  ;;  %v14146_v23 = vsub.f32 %v5690_v20, %v14135_v15 }
 0x606   : >> { %5414 = vmatmul.f32.gmra.mxu2 %v13940_v53  ;;  %v14098_v53 = vsub.f32 %v5681_v35, %v14087_v39 }
 0x609   : >> { %5493 = vmatmul.f32.gmra.mxu3 %v13961_v21 }
 0x60b   : >> { %5190 = vmatmul.f32.gmra.mxu0 %v13999_v11 }
 0x60c   : >> { %5331 = vmatmul.f32.gmra.mxu1 %v13911_v43 }
 0x60e   : >> { %5419 = vmatmul.f32.gmra.mxu2 %v13937_v50  ;;  %v5738_v50 = vsub.f32 %v14082_v13, %v5737_v47 }
 0x611   : >> { %5499 = vmatmul.f32.gmra.mxu3 %v13958_v22  ;;  %v5094_v22 = vld [vmem:[%s16958_s3 + $0x28] sm:$0xff] }
 0x612   : >> { %v5687_v8 = vsel %vm957_vm0, %v5094_v22, 0 }
 0x613   : >> { %5198 = vmatmul.f32.gmra.mxu0 %v13991_v12  ;;  %v14119_v24 = vand.u32 4294901760, %v5687_v8 }
 0x614   : >> { %5335 = vmatmul.f32.gmra.mxu1 %v13909_v40 }
 0x616   : >> { %5424 = vmatmul.f32.gmra.mxu2 %v13929_v0  ;;  %v5093_v0 = vld [vmem:[%s16958_s3 + $0x20] sm:$0xff] }
 0x617   : >> { %v5684_v10 = vsel %vm957_vm0, %v5093_v0, 0 }
 0x618   : >> { %v14103_v9 = vand.u32 4294901760, %v5684_v10 }
 0x619   : >> { %5505 = vmatmul.f32.gmra.mxu3 %v13947_v19  ;;  %v5739_v19 = vand.u32 4294901760, %v5738_v50 }
 0x61a   : >> { %v14114_v16 = vsub.f32 %v5684_v10, %v14103_v9 }
 0x61b   : >> { %5206 = vmatmul.f32.gmra.mxu0 %v13977_v5  ;;  %v14130_v5 = vsub.f32 %v5687_v8, %v14119_v24 }
 0x61c   : >> { %5639 = vmatmul.f32.vlgmr.msra.gmra.mxu1 %v13907_v14 }
 0x61e   : >> { %5724 = vmatmul.f32.vlgmr.msra.gmra.mxu2 %v5723_v30 }
 0x621   : >> { %5841 = vmatmul.f32.vlgmr.msra.gmra.mxu3 %v14040_v37 }
 0x623   : >> { %5574 = vmatmul.f32.vlgmr.msra.gmra.mxu0 %v13907_v14  ;;  %v5745_v14 = vand.u32 4294901760, %v14098_v53 }
 0x624   : >> { %5643 = vmatmul.f32.gmra.mxu1 %v13926_v61 }
 0x625   : >> { %v5746_v21 = vsub.f32 %v14098_v53, %v5745_v14 }
 0x626   : >> { %5732 = vmatmul.f32.gmra.mxu2 %v5731_v51 }
 0x627   : >> { %v5747_v46 = vand.u32 4294901760, %v5746_v21 }
 0x629   : >> { %5845 = vmatmul.f32.gmra.mxu3 %v14054_v34 }
 0x62b   : >> { %5578 = vmatmul.f32.gmra.mxu0 %v13926_v61  ;;  %v5753_v61 = vand.u32 4294901760, %v14114_v16 }
 0x62c   : >> { %5647 = vmatmul.f32.gmra.mxu1 %v13955_v28 }
 0x62d   : >> { %v5754_v29 = vsub.f32 %v14114_v16, %v5753_v61 }
 0x62e   : >> { %5740 = vmatmul.f32.gmra.mxu2 %v5739_v19 }
 0x62f   : >> { %v5755_v45 = vand.u32 4294901760, %v5754_v29 }
 0x631   : >> { %5849 = vmatmul.f32.gmra.mxu3 %v14071_v27 }
 0x633   : >> { %5582 = vmatmul.f32.gmra.mxu0 %v13955_v28  ;;  %v5761_v28 = vand.u32 4294901760, %v14130_v5 }
 0x634   : >> { %5651 = vmatmul.f32.gmra.mxu1 %v13934_v1 }
 0x635   : >> { %v5762_v12 = vsub.f32 %v14130_v5, %v5761_v28 }
 0x636   : >> { %5748 = vmatmul.f32.gmra.mxu2 %v5747_v46 }
 0x637   : >> { %v5763_v11 = vand.u32 4294901760, %v5762_v12 }
 0x639   : >> { %5853 = vmatmul.f32.gmra.mxu3 %v14087_v39 }
 0x63b   : >> { %5586 = vmatmul.f32.gmra.mxu0 %v13934_v1  ;;  %v5769_v1 = vand.u32 4294901760, %v14146_v23 }
 0x63c   : >> { %5655 = vmatmul.f32.gmra.mxu1 %v13915_v60 }
 0x63d   : >> { %v5770_v25 = vsub.f32 %v14146_v23, %v5769_v1 }
 0x63e   : >> { %5756 = vmatmul.f32.gmra.mxu2 %v5755_v45 }
 0x63f   : >> { %v5771_v26 = vand.u32 4294901760, %v5770_v25 }
 0x641   : >> { %5857 = vmatmul.f32.gmra.mxu3 %v14103_v9 }
 0x643   : >> { %5590 = vmatmul.f32.gmra.mxu0 %v13915_v60  ;;  %v5778_v60 = vsub.f32 %v14159_v63, %v5777_v33 }
 0x644   : >> { %5659 = vmatmul.f32.gmra.mxu1 %v13913_v2 }
 0x645   : >> { %v5779_v17 = vand.u32 4294901760, %v5778_v60 }
 0x646   : >> { %5764 = vmatmul.f32.gmra.mxu2 %v5763_v11 }
 0x649   : >> { %5861 = vmatmul.f32.gmra.mxu3 %v14119_v24 }
 0x64b   : >> { %5594 = vmatmul.f32.gmra.mxu0 %v13913_v2 }
 0x64c   : >> { %5663 = vmatmul.f32.gmra.mxu1 %v13911_v43 }
 0x64e   : >> { %5772 = vmatmul.f32.gmra.mxu2 %v5771_v26 }
 0x651   : >> { %5865 = vmatmul.f32.gmra.mxu3 %v14135_v15 }
 0x653   : >> { %5598 = vmatmul.f32.gmra.mxu0 %v13911_v43 }
 0x654   : >> { %5667 = vmatmul.f32.gmra.mxu1 %v13909_v40 }
 0x655   : >> { %v14171_v58 = vpop.f32.mrf.mxu1 }
 0x656   : >> { %5780 = vmatmul.f32.gmra.mxu2 %v5779_v17 }
 0x658   : >> { %v5076_v41 = vpop.f32.mrf.mxu3 }
 0x659   : >> { %5869 = vmatmul.f32.gmra.mxu3 %v14151_v62  ;;  %5079 = vst.msk [vmem:[#allocation4 + $0x3] sm:$0x1] %vm1545_vm1, %v5076_v41 }
 0x65b   : >> { %5602 = vmatmul.f32.gmra.mxu0 %v13909_v40 }
 0x65c   : >> { %5973 = vmatmul.f32.vlgmr.msrb.gmra.mxu1 %v5721_v56 }
 0x65d   : >> { %v14178_v2 = vpop.f32.mrf.mxu0  ;;  %v14180_v44 = vpop.f32.mrf.mxu1 }
 0x65e   : >> { %v14182_v43 = vpop.f32.mrf.mxu2  ;;  %6060 = vmatmul.f32.vlgmr.msrb.gmra.mxu2 %v14040_v37 }
 0x660   : >> { %v14185_v52 = vpop.f32.mrf.mxu3 }
 0x661   : >> { %6117 = vmatmul.f32.vlgmr.msrb.gmra.mxu3 %v14040_v37 }
 0x663   : >> { %5907 = vmatmul.f32.vlgmr.msrb.gmra.mxu0 %v14049_v32 }
 0x664   : >> { %5979 = vmatmul.f32.gmra.mxu1 %v5729_v49 }
 0x666   : >> { %v14191_v40 = vpop.f32.mrf.mxu2  ;;  %6064 = vmatmul.f32.gmra.mxu2 %v14054_v34 }
 0x667   : >> { %v14194_v4 = vpop.f32.mrf.mxu0  ;;  %v14196_v57 = vpop.f32.mrf.mxu1 }
 0x668   : >> { %v5313_v17 = vadd.f32 %v14180_v44, %v14194_v4  ;;  %v6289_v44 = vld [vmem:[%s16959_s4 + $0x78] sm:$0xff] }
 0x669   : >> { %6121 = vmatmul.f32.gmra.mxu3 %v14054_v34 }
 0x66a   : >> { %v14199_v56 = vpop.f32.mrf.mxu3 }
 0x66b   : >> { %5912 = vmatmul.f32.gmra.mxu0 %v14066_v3 }
 0x66c   : >> { %5985 = vmatmul.f32.gmra.mxu1 %v5737_v47 }
 0x66e   : >> { %6068 = vmatmul.f32.gmra.mxu2 %v14071_v27 }
 0x670   : >> { %v14205_v37 = vpop.f32.mrf.mxu2  ;;  %v14207_v32 = vpop.f32.mrf.mxu0 }
 0x671   : >> { %v14209_v36 = vpop.f32.mrf.mxu1  ;;  %6125 = vmatmul.f32.gmra.mxu3 %v14071_v27 }
 0x673   : >> { %5917 = vmatmul.f32.gmra.mxu0 %v14082_v13 }
 0x674   : >> { %v14213_v34 = vpop.f32.mrf.mxu3  ;;  %5991 = vmatmul.f32.gmra.mxu1 %v5745_v14 }
 0x676   : >> { %6072 = vmatmul.f32.gmra.mxu2 %v14087_v39 }
 0x678   : >> { %v14218_v55 = vpop.f32.mrf.mxu0 }
 0x679   : >> { %v14220_v3 = vpop.f32.mrf.mxu1  ;;  %v14222_v54 = vpop.f32.mrf.mxu2  ;;  %6129 = vmatmul.f32.gmra.mxu3 %v14087_v39 }
 0x67b   : >> { %5922 = vmatmul.f32.gmra.mxu0 %v14098_v53 }
 0x67c   : >> { %5997 = vmatmul.f32.gmra.mxu1 %v5753_v61  ;;  %v14228_v30 = vpop.f32.mrf.mxu3 }
 0x67e   : >> { %6076 = vmatmul.f32.gmra.mxu2 %v14103_v9 }
 0x680   : >> { %v14231_v49 = vpop.f32.mrf.mxu0 }
 0x681   : >> { %v14233_v27 = vpop.f32.mrf.mxu1  ;;  %v14235_v59 = vpop.f32.mrf.mxu2  ;;  %6133 = vmatmul.f32.gmra.mxu3 %v14103_v9 }
 0x683   : >> { %5927 = vmatmul.f32.gmra.mxu0 %v14114_v16 }
 0x684   : >> { %6003 = vmatmul.f32.gmra.mxu1 %v5761_v28  ;;  %v14241_v31 = vpop.f32.mrf.mxu3 }
 0x686   : >> { %6080 = vmatmul.f32.gmra.mxu2 %v14119_v24 }
 0x688   : >> { %v14244_v13 = vpop.f32.mrf.mxu0 }
 0x689   : >> { %v14246_v35 = vpop.f32.mrf.mxu1  ;;  %v14248_v51 = vpop.f32.mrf.mxu2  ;;  %6137 = vmatmul.f32.gmra.mxu3 %v14119_v24 }
 0x68b   : >> { %5932 = vmatmul.f32.gmra.mxu0 %v14130_v5 }
 0x68c   : >> { %6009 = vmatmul.f32.gmra.mxu1 %v5769_v1  ;;  %v14254_v47 = vpop.f32.mrf.mxu3 }
 0x68e   : >> { %6084 = vmatmul.f32.gmra.mxu2 %v14135_v15 }
 0x690   : >> { %v14257_v39 = vpop.f32.mrf.mxu0 }
 0x691   : >> { %v14259_v0 = vpop.f32.mrf.mxu1  ;;  %v14261_v50 = vpop.f32.mrf.mxu2  ;;  %6141 = vmatmul.f32.gmra.mxu3 %v14135_v15 }
 0x692   : >> { %17326 = vst [vmem:[#allocation28_spill] sm:$0xff] %v14259_v0 }
 0x693   : >> { %5937 = vmatmul.f32.gmra.mxu0 %v14146_v23 }
 0x694   : >> { %6015 = vmatmul.f32.gmra.mxu1 %v5777_v33  ;;  %v14267_v53 = vpop.f32.mrf.mxu3 }
 0x696   : >> { %6088 = vmatmul.f32.gmra.mxu2 %v14151_v62 }
 0x698   : >> { %v14270_v10 = vpop.f32.mrf.mxu0 }
 0x699   : >> { %v5640_v19 = vpop.f32.mrf.mxu1  ;;  %v14272_v14 = vpop.f32.mrf.mxu2  ;;  %6145 = vmatmul.f32.gmra.mxu3 %v14151_v62 }
 0x69a   : >> { %17327 = vst [vmem:[#allocation25_spill] sm:$0xff] %v14272_v14 }
 0x69b   : >> { %5942 = vmatmul.f32.gmra.mxu0 %v14159_v63  ;;  %v5309_v63 = vadd.f32 %v14171_v58, %v14178_v2 }
 0x69c   : >> { %v14276_v9 = vpop.f32.mrf.mxu3 }
 0x69d   : >> { %17328 = vst [vmem:[#allocation27_spill] sm:$0xff] %v14276_v9  ;;  %v5391_v60 = vadd.f32 %v14182_v43, %v5309_v63 }
 0x69f   : >> { %v5465_v14 = vadd.f32 %v14185_v52, %v5391_v60  ;;  %v14339_v60 = vand.u32 4294901760, %v6289_v44 }
 0x6a0   : >> { %v5575_v22 = vpop.f32.mrf.mxu0 }
 0x6a1   : >> { %v5644_v21 = vpop.f32.mrf.mxu1  ;;  %v5725_v16 = vpop.f32.mrf.mxu2  ;;  %v5576_v58 = vadd.f32 %v5575_v22, %v5465_v14  ;;  %6291 = vmatpush.msra.mxu1 %v14339_v60 }
 0x6a3   : >> { %v5641_v63 = vadd.f32 %v5640_v19, %v5576_v58 }
 0x6a4   : >> { %v14278_v8 = vpop.f32.mrf.mxu3 }
 0x6a5   : >> { %v5726_v19 = vadd.f32 %v5725_v16, %v5641_v63  ;;  %v5321_v16 = vadd.f32 %v14209_v36, %v14218_v55  ;;  %v6286_v63 = vld [vmem:[%s16959_s4 + $0x60] sm:$0xff] }
 0x6a7   : >> { %v5843_v36 = vadd.f32 %v14278_v8, %v5726_v19 }
 0x6a8   : >> { %v5579_v46 = vpop.f32.mrf.mxu0 }
 0x6a9   : >> { %v14280_v61 = vpop.f32.mrf.mxu1  ;;  %v14282_v24 = vpop.f32.mrf.mxu2 }
 0x6ac   : >> { %v14284_v7 = vpop.f32.mrf.mxu3 }
 0x6b0   : >> { %v5583_v29 = vpop.f32.mrf.mxu0 }
 0x6b1   : >> { %v14286_v5 = vpop.f32.mrf.mxu1  ;;  %v14288_v20 = vpop.f32.mrf.mxu2 }
 0x6b4   : >> { %v14290_v45 = vpop.f32.mrf.mxu3 }
 0x6b8   : >> { %v14292_v28 = vpop.f32.mrf.mxu0 }
 0x6b9   : >> { %v14294_v15 = vpop.f32.mrf.mxu1  ;;  %v14296_v38 = vpop.f32.mrf.mxu2 }
 0x6bc   : >> { %v14298_v12 = vpop.f32.mrf.mxu3 }
 0x6c0   : >> { %v14300_v23 = vpop.f32.mrf.mxu0 }
 0x6c1   : >> { %v14302_v6 = vpop.f32.mrf.mxu1  ;;  %v14304_v11 = vpop.f32.mrf.mxu2 }
 0x6c4   : >> { %v14306_v1 = vpop.f32.mrf.mxu3 }
 0x6c8   : >> { %v14308_v62 = vpop.f32.mrf.mxu0 }
 0x6c9   : >> { %v14310_v25 = vpop.f32.mrf.mxu1  ;;  %v14314_v26 = vpop.f32.mrf.mxu2 }
 0x6ca   : >> { %17329 = vst [vmem:[#allocation16_spill] sm:$0xff] %v14310_v25  ;;  %v5396_v25 = vadd.f32 %v14191_v40, %v5313_v17 }
 0x6cc   : >> { %v14316_v33 = vpop.f32.mrf.mxu3  ;;  %v5471_v43 = vadd.f32 %v14199_v56, %v5396_v25  ;;  %v14348_v56 = vsub.f32 %v6289_v44, %v14339_v60  ;;  %v14354_v25 = vmul.f32 2.0, %v13904_v48  ;;  %v14375_v44 = vld [vmem:[#allocation3] sm:$0xff] }
 0x6cd   : >> { %17330 = vst [vmem:[#allocation18_spill] sm:$0xff] %v14316_v33  ;;  %v5317_v33 = vadd.f32 %v14196_v57, %v14207_v32  ;;  %v6288_v57 = vld [vmem:[%s16959_s4 + $0x70] sm:$0xff] }
 0x6ce   : >> { %v5580_v14 = vadd.f32 %v5579_v46, %v5471_v43  ;;  %v14350_v32 = vand.u32 4294901760, %v6288_v57  ;;  %6518 = vmatpush.msra.mxu3 %v14348_v56 }
 0x6cf   : >> { %v5401_v40 = vadd.f32 %v14205_v37, %v5317_v33  ;;  %v6287_v37 = vld [vmem:[%s16959_s4 + $0x68] sm:$0xff]  ;;  %v17066_v33 = vand.u32 4294901760, %v14348_v56 }
 0x6d0   : >> { %v14321_v41 = vpop.f32.mrf.mxu0  ;;  %v14363_v17 = vsub.f32 %v6288_v57, %v14350_v32  ;;  %v14365_v58 = vand.u32 4294901760, %v6287_v37  ;;  %6293 = vmatpush.msra.mxu1 %v14350_v32  ;;  %v5645_v43 = vadd.f32 %v5644_v21, %v5580_v14 }
 0x6d1   : >> { %v14323_v9 = vpop.f32.mrf.mxu1  ;;  %v14326_v0 = vpop.f32.mrf.mxu2  ;;  %v5477_v48 = vadd.f32 %v14213_v34, %v5401_v40  ;;  %v6390_v57 = vsub.f32 %v14348_v56, %v17066_v33  ;;  %v14384_v34 = vand.u32 4294901760, %v6286_v63  ;;  %v6285_v40 = vld [vmem:[%s16959_s4 + $0x58] sm:$0xff] }
 0x6d2   : >> { %17331 = vst [vmem:[#allocation30_spill] sm:$0xff] %v14323_v9  ;;  %6521 = vmatpush.msra.mxu3 %v14363_v17  ;;  %6295 = vmatpush.msra.mxu1 %v14365_v58  ;;  %v5734_v19 = vadd.f32 %v14282_v24, %v5645_v43  ;;  %v6283_v43 = vld [vmem:[%s16959_s4 + $0x48] sm:$0xff] }
 0x6d3   : >> { %17332 = vst [vmem:[#allocation21_spill] sm:$0xff] %v14326_v0  ;;  %v5584_v55 = vadd.f32 %v5583_v29, %v5477_v48  ;;  %v14401_v8 = vsub.f32 %v6286_v63, %v14384_v34  ;;  %v5406_v29 = vadd.f32 %v14222_v54, %v5321_v16  ;;  %v14421_v16 = vmul.f32 2.0, %v13917_v42 }
 0x6d4   : >> { %v14329_v2 = vpop.f32.mrf.mxu3  ;;  %17337 = vst [vmem:[#allocation31_spill] sm:$0xff] %v14384_v34  ;;  %6297 = vmatpush.msra.mxu1 %v14384_v34  ;;  %v14436_v42 = vand.u32 4294901760, %v6283_v43 }
 0x6d5   : >> { %17333 = vst [vmem:[#allocation20_spill] sm:$0xff] %v14329_v2  ;;  %v17071_v0 = vand.u32 4294901760, %v14401_v8  ;;  %v5649_v54 = vadd.f32 %v14280_v61, %v5584_v55  ;;  %v5483_v55 = vadd.f32 %v14228_v30, %v5406_v29 }
 0x6d6   : >> { %17341 = vst [vmem:[#allocation15_spill] sm:$0xff] %v14436_v42 }
 0x6d7   : >> { %v6408_v61 = vsub.f32 %v14401_v8, %v17071_v0  ;;  %v5742_v29 = vadd.f32 %v14288_v20, %v5649_v54 }
 0x6d8   : >> { %v14337_v4 = vpop.f32.mrf.mxu0 }
 0x6d9   : >> { %17334 = vst [vmem:[#allocation23_spill] sm:$0xff] %v14337_v4  ;;  %v5974_v52 = vpop.f32.mrf.mxu1  ;;  %v14342_v22 = vpop.f32.mrf.mxu2  ;;  %v6409_v30 = vand.u32 4294901760, %v6408_v61 }
 0x6da   : >> { %17335 = vst [vmem:[#allocation26_spill] sm:$0xff] %v14342_v22  ;;  %v14382_v22 = vsub.f32 %v6287_v37, %v14365_v58  ;;  %v6391_v37 = vand.u32 4294901760, %v6390_v57  ;;  %v14407_v57 = vand.u32 4294901760, %v6285_v40 }
 0x6dc   : >> { %v14359_v46 = vpop.f32.mrf.mxu3  ;;  %6524 = vmatpush.msra.mxu3 %v14382_v22  ;;  %17338 = vst [vmem:[#allocation13_spill] sm:$0xff] %v14407_v57  ;;  %6392 = vmatpush.msra.mxu2 %v6391_v37  ;;  %v17339_v63 = vand.u32 4294901760, %v14382_v22 }
 0x6dd   : >> { %17336 = vst [vmem:[#allocation17_spill] sm:$0xff] %v14359_v46  ;;  %v17067_v46 = vand.u32 4294901760, %v14363_v17  ;;  %6299 = vmatpush.msra.mxu1 %v14407_v57 }
 0x6de   : >> { %v6402_v4 = vsub.f32 %v14382_v22, %v17339_v63  ;;  %6527 = vmatpush.msra.mxu3 %v14401_v8  ;;  %v6234_v63 = vld [vmem:[%s10135_s29 + $0x70] sm:$0xff] }
 0x6df   : >> { %v6396_v9 = vsub.f32 %v14363_v17, %v17067_v46  ;;  %v6284_v46 = vld [vmem:[%s16959_s4 + $0x50] sm:$0xff] }
 0x6e0   : >> { %v5908_v14 = vpop.f32.mrf.mxu0  ;;  %v14416_v34 = vand.u32 4294901760, %v6284_v46 }
 0x6e1   : >> { %v14394_v33 = vpop.f32.mrf.mxu1  ;;  %v5909_v48 = vadd.f32 %v5908_v14, %v5843_v36  ;;  %v6061_v21 = vpop.f32.mrf.mxu2  ;;  %v6397_v2 = vand.u32 4294901760, %v6396_v9  ;;  %v14424_v9 = vsub.f32 %v6285_v40, %v14407_v57  ;;  %v6403_v14 = vand.u32 4294901760, %v6402_v4 }
 0x6e2   : >> { %17340 = vst [vmem:[#allocation19_spill] sm:$0xff] %v14416_v34  ;;  %v5325_v40 = vadd.f32 %v14220_v3, %v14231_v49  ;;  %6301 = vmatpush.msra.mxu1 %v14416_v34  ;;  %v5847_v4 = vadd.f32 %v14284_v7, %v5734_v19  ;;  %v14452_v49 = vsub.f32 %v6283_v43, %v14436_v42  ;;  %v6233_v19 = vld [vmem:[%s10135_s29 + $0x68] sm:$0xff] }
 0x6e3   : >> { %v5975_v24 = vadd.f32 %v5974_v52, %v5909_v48  ;;  %6398 = vmatpush.msra.mxu2 %v6397_v2  ;;  %v14434_v52 = vsub.f32 %v6284_v46, %v14416_v34  ;;  %v6235_v48 = vld [vmem:[%s10135_s29 + $0x78] sm:$0xff]  ;;  %v17070_v2 = vand.u32 4294901760, %v14424_v9  ;;  %6530 = vmatpush.msra.mxu3 %v14424_v9  ;;  %v6173_v46 = vld [vmem:[%s16957_s2] sm:$0xff]  ;;  %v5588_v43 = vadd.f32 %v14292_v28, %v5483_v55  ;;  %v6280_v28 = vld [vmem:[%s16959_s4 + $0x30] sm:$0xff] }
 0x6e4   : >> { %v6118_v36 = vpop.f32.mrf.mxu3  ;;  %6236 = vmatpush.msra.mxu0 %v6235_v48  ;;  %6303 = vmatpush.msra.mxu1 %v14436_v42  ;;  %v14486_v55 = vld [vmem:[#allocation3 + $0x8] sm:$0xff] }
 0x6e5   : >> { %v6062_v37 = vadd.f32 %v6061_v21, %v5975_v24  ;;  %6404 = vmatpush.msra.mxu2 %v6403_v14  ;;  %v17079_v3 = vand.u32 4294901760, %v14434_v52  ;;  %v6282_v21 = vld [vmem:[%s16959_s4 + $0x40] sm:$0xff]  ;;  %v6414_v7 = vsub.f32 %v14424_v9, %v17070_v2  ;;  %v6281_v14 = vld [vmem:[%s16959_s4 + $0x38] sm:$0xff]  ;;  %6533 = vmatpush.msra.mxu3 %v14434_v52 }
 0x6e6   : >> { %v14462_v48 = vand.u32 4294901760, %v6282_v21  ;;  %6237 = vmatpush.msra.mxu0 %v6234_v63 }
 0x6e7   : >> { %v6119_v24 = vadd.f32 %v6118_v36, %v6062_v37  ;;  %6410 = vmatpush.msra.mxu2 %v6409_v30  ;;  %v6420_v54 = vsub.f32 %v14434_v52, %v17079_v3  ;;  %v17078_v36 = vand.u32 4294901760, %v14452_v49  ;;  %v14476_v37 = vand.u32 4294901760, %v6281_v14  ;;  %6536 = vmatpush.msra.mxu3 %v14452_v49 }
 0x6e8   : >> { %v5913_v61 = vpop.f32.mrf.mxu0  ;;  %v6415_v34 = vand.u32 4294901760, %v6414_v7  ;;  %v14479_v57 = vsub.f32 %v6282_v21, %v14462_v48  ;;  %6305 = vmatpush.msra.mxu1 %v14462_v48  ;;  %6238 = vmatpush.msra.mxu0 %v6233_v19  ;;  %v14494_v30 = vand.u32 4294901760, %v6280_v28  ;;  %v17342_v21 = vsub.f32 %v14354_v25, %v14375_v44 }
 0x6e9   : >> { %v14470_v20 = vpop.f32.mrf.mxu1  ;;  %v6181_v2 = vmul.f32 %v6173_v46, %v6119_v24  ;;  %v5914_v0 = vadd.f32 %v5913_v61, %v5847_v4  ;;  %v6065_v42 = vpop.f32.mrf.mxu2  ;;  %v6421_v63 = vand.u32 4294901760, %v6420_v54  ;;  %v6426_v4 = vsub.f32 %v14452_v49, %v17078_v36 }
 0x6ea   : >> { %v14492_v46 = vsub.f32 %v6281_v14, %v14476_v37  ;;  %v6166_v19 = vsub.f32 %v14421_v16, %v14486_v55  ;;  %6416 = vmatpush.msra.mxu2 %v6415_v34  ;;  %v6431_v61 = vand.u32 4294901760, %v14479_v57  ;;  %6307 = vmatpush.msra.mxu1 %v14476_v37  ;;  %v5411_v14 = vadd.f32 %v14235_v59, %v5325_v40  ;;  %v6232_v59 = vld [vmem:[%s10135_s29 + $0x60] sm:$0xff]  ;;  %v6231_v34 = vld [vmem:[%s10135_s29 + $0x58] sm:$0xff] }
 0x6eb   : >> { %v6189_v24 = vadd.f32 %v6181_v2, %v17342_v21  ;;  %v5981_v7 = vadd.f32 %v14394_v33, %v5914_v0  ;;  %v6427_v36 = vand.u32 4294901760, %v6426_v4  ;;  %v14507_v25 = vsub.f32 %v6280_v28, %v14494_v30  ;;  %v6279_v0 = vld [vmem:[%s16959_s4 + $0x28] sm:$0xff]  ;;  %6539 = vmatpush.msra.mxu3 %v14479_v57  ;;  %6239 = vmatpush.msra.mxu0 %v6232_v59 }
 0x6ec   : >> { %v6122_v54 = vpop.f32.mrf.mxu3  ;;  %v17081_v3 = vand.u32 4294901760, %v14492_v46  ;;  %v14514_v44 = vmul.f32 2.0, %v13931_v18  ;;  %6422 = vmatpush.msra.mxu2 %v6421_v63  ;;  %v6432_v16 = vsub.f32 %v14479_v57, %v6431_v61  ;;  %v14521_v40 = vand.u32 4294901760, %v6279_v0  ;;  %6309 = vmatpush.msra.mxu1 %v14494_v30  ;;  %v6174_v18 = vld [vmem:[%s16957_s2 + $0x8] sm:$0xff]  ;;  %v6278_v63 = vld [vmem:[%s16959_s4 + $0x20] sm:$0xff] }
 0x6ed   : >> { %6197 = vst [vmem:[#allocation3] sm:$0xff] %v6189_v24  ;;  %v6066_v33 = vadd.f32 %v6065_v42, %v5981_v7  ;;  %v5851_v2 = vadd.f32 %v14290_v45, %v5742_v29  ;;  %v5653_v28 = vadd.f32 %v14286_v5, %v5588_v43  ;;  %v17080_v55 = vand.u32 4294901760, %v14507_v25  ;;  %6542 = vmatpush.msra.mxu3 %v14492_v46  ;;  %v6230_v29 = vld [vmem:[%s10135_s29 + $0x50] sm:$0xff] }
 0x6ee   : >> { %v6438_v42 = vsub.f32 %v14492_v46, %v17081_v3  ;;  %6428 = vmatpush.msra.mxu2 %v6427_v36  ;;  %v6433_v5 = vand.u32 4294901760, %v6432_v16  ;;  %v14539_v43 = vsub.f32 %v6279_v0, %v14521_v40  ;;  %v14541_v4 = vand.u32 4294901760, %v6278_v63  ;;  %6311 = vmatpush.msra.mxu1 %v14521_v40  ;;  %v6277_v0 = vld [vmem:[%s16959_s4 + $0x18] sm:$0xff] }
 0x6ef   : >> { %v6123_v45 = vadd.f32 %v6122_v54, %v6066_v33  ;;  %v5489_v21 = vadd.f32 %v14241_v31, %v5411_v14  ;;  %v5329_v24 = vadd.f32 %v14233_v27, %v14244_v13  ;;  %6240 = vmatpush.msra.mxu0 %v6231_v34  ;;  %v6444_v54 = vsub.f32 %v14507_v25, %v17080_v55  ;;  %v6229_v27 = vld [vmem:[%s10135_s29 + $0x48] sm:$0xff] }
 0x6f0   : >> { %v5918_v7 = vpop.f32.mrf.mxu0  ;;  %v6439_v36 = vand.u32 4294901760, %v6438_v42  ;;  %6545 = vmatpush.msra.mxu3 %v14507_v25  ;;  %6434 = vmatpush.msra.mxu2 %v6433_v5  ;;  %v6449_v13 = vand.u32 4294901760, %v14539_v43  ;;  %v14559_v34 = vsub.f32 %v6278_v63, %v14541_v4  ;;  %v5750_v16 = vadd.f32 %v14296_v38, %v5653_v28 }
 0x6f1   : >> { %v14547_v59 = vpop.f32.mrf.mxu1  ;;  %v6182_v33 = vmul.f32 %v6174_v18, %v6123_v45  ;;  %v5919_v31 = vadd.f32 %v5918_v7, %v5851_v2  ;;  %v6069_v14 = vpop.f32.mrf.mxu2  ;;  %6313 = vmatpush.msra.mxu1 %v14541_v4  ;;  %v5592_v42 = vadd.f32 %v14300_v23, %v5489_v21  ;;  %6241 = vmatpush.msra.mxu0 %v6230_v29  ;;  %v6445_v55 = vand.u32 4294901760, %v6444_v54  ;;  %v6276_v2 = vld [vmem:[%s16959_s4 + $0x10] sm:$0xff]  ;;  %v6275_v21 = vld [vmem:[%s16959_s4 + $0x8] sm:$0xff] }
 0x6f2   : >> { %v14564_v3 = vand.u32 4294901760, %v6277_v0  ;;  %6548 = vmatpush.msra.mxu3 %v14539_v43  ;;  %v6159_v45 = vld [vmem:[#allocation3 + $0x10] sm:$0xff]  ;;  %6440 = vmatpush.msra.mxu2 %v6439_v36  ;;  %v6450_v38 = vsub.f32 %v14539_v43, %v6449_v13  ;;  %v6455_v23 = vand.u32 4294901760, %v14559_v34  ;;  %v5416_v28 = vadd.f32 %v14248_v51, %v5329_v24  ;;  %v6228_v36 = vld [vmem:[%s10135_s29 + $0x40] sm:$0xff]  ;;  %v6227_v24 = vld [vmem:[%s10135_s29 + $0x38] sm:$0xff] }
 0x6f3   : >> { %v6190_v18 = vadd.f32 %v6182_v33, %v6166_v19  ;;  %v5987_v63 = vadd.f32 %v14470_v20, %v5919_v31  ;;  %v6167_v29 = vsub.f32 %v14514_v44, %v6159_v45  ;;  %6242 = vmatpush.msra.mxu0 %v6229_v27  ;;  %v14580_v20 = vand.u32 4294901760, %v6276_v2  ;;  %v6274_v27 = vld [vmem:[%s16959_s4] sm:$0xff] }
 0x6f4   : >> { %v6126_v5 = vpop.f32.mrf.mxu3  ;;  %v14578_v19 = vsub.f32 %v6277_v0, %v14564_v3  ;;  %6315 = vmatpush.msra.mxu1 %v14564_v3  ;;  %6446 = vmatpush.msra.mxu2 %v6445_v55  ;;  %v6451_v51 = vand.u32 4294901760, %v6450_v38  ;;  %v6456_v44 = vsub.f32 %v14559_v34, %v6455_v23  ;;  %v14591_v54 = vand.u32 4294901760, %v6275_v21  ;;  %v6175_v55 = vld [vmem:[%s16957_s2 + $0x10] sm:$0xff] }
 0x6f5   : >> { %6198 = vst [vmem:[#allocation3 + $0x8] sm:$0xff] %v6190_v18  ;;  %v6070_v7 = vadd.f32 %v6069_v14, %v5987_v63  ;;  %6551 = vmatpush.msra.mxu3 %v14559_v34  ;;  %v5855_v0 = vadd.f32 %v14298_v12, %v5750_v16  ;;  %v5657_v33 = vadd.f32 %v14294_v15, %v5592_v42  ;;  %v6226_v15 = vld [vmem:[%s10135_s29 + $0x30] sm:$0xff]  ;;  %v14611_v42 = vand.u32 4294901760, %v6274_v27 }
 0x6f6   : >> { %6243 = vmatpush.msra.mxu0 %v6228_v36  ;;  %v6461_v31 = vand.u32 4294901760, %v14578_v19  ;;  %v14601_v14 = vsub.f32 %v6276_v2, %v14580_v20  ;;  %6317 = vmatpush.msra.mxu1 %v14580_v20  ;;  %v6457_v12 = vand.u32 4294901760, %v6456_v44  ;;  %v14609_v16 = vsub.f32 %v6275_v21, %v14591_v54  ;;  %v6179_v34 = vld [vmem:[%s16957_s2 + $0x30] sm:$0xff] }
 0x6f7   : >> { %v6127_v18 = vadd.f32 %v6126_v5, %v6070_v7  ;;  %6452 = vmatpush.msra.mxu2 %v6451_v51  ;;  %6554 = vmatpush.msra.mxu3 %v14578_v19  ;;  %v5495_v2 = vadd.f32 %v14254_v47, %v5416_v28  ;;  %v5333_v63 = vadd.f32 %v14246_v35, %v14257_v39  ;;  %v6225_v51 = vld [vmem:[%s10135_s29 + $0x28] sm:$0xff] }
 0x6f8   : >> { %v5923_v45 = vpop.f32.mrf.mxu0  ;;  %6244 = vmatpush.msra.mxu0 %v6227_v24  ;;  %v6462_v38 = vsub.f32 %v14578_v19, %v6461_v31  ;;  %v6467_v5 = vand.u32 4294901760, %v14601_v14  ;;  %6319 = vmatpush.msra.mxu1 %v14591_v54  ;;  %v6473_v47 = vand.u32 4294901760, %v14609_v16  ;;  %v14625_v28 = vsub.f32 %v6274_v27, %v14611_v42 }
 0x6f9   : >> { %v6183_v21 = vmul.f32 %v6175_v55, %v6127_v18  ;;  %v5924_v7 = vadd.f32 %v5923_v45, %v5855_v0  ;;  %v6073_v36 = vpop.f32.mrf.mxu2  ;;  %6458 = vmatpush.msra.mxu2 %v6457_v12  ;;  %6557 = vmatpush.msra.mxu3 %v14601_v14  ;;  %v5758_v35 = vadd.f32 %v14304_v11, %v5657_v33  ;;  %v5998_v24 = vpop.f32.mrf.mxu1  ;;  %v17343_v33 = vand.u32 4294901760, %v14348_v56  ;;  %v6224_v45 = vld [vmem:[%s10135_s29 + $0x20] sm:$0xff] }
 0x6fa   : >> { %v5596_v39 = vadd.f32 %v14308_v62, %v5495_v2  ;;  %6245 = vmatpush.msra.mxu0 %v6226_v15  ;;  %v6463_v44 = vand.u32 4294901760, %v6462_v38  ;;  %v6468_v0 = vsub.f32 %v14601_v14, %v6467_v5  ;;  %6321 = vmatpush.msra.mxu1 %v14611_v42  ;;  %v6474_v11 = vsub.f32 %v14609_v16, %v6473_v47  ;;  %v9968_v15 = vld [vmem:[#allocation2 + $0x18] sm:$0xff] }
 0x6fb   : >> { %v6191_v55 = vadd.f32 %v6183_v21, %v6167_v29  ;;  %v5993_v27 = vadd.f32 %v14547_v59, %v5924_v7  ;;  %v6479_v62 = vand.u32 4294901760, %v14625_v28  ;;  %6560 = vmatpush.msra.mxu3 %v14609_v16  ;;  %v5421_v18 = vadd.f32 %v14261_v50, %v5333_v63  ;;  %v6223_v21 = vld [vmem:[%s10135_s29 + $0x18] sm:$0xff] }
 0x6fc   : >> { %6689 = vmatpush.msrb.mxu1 %v17343_v33  ;;  %v6130_v12 = vpop.f32.mrf.mxu3  ;;  %v6152_v2 = vmul.f32 2.0, %v9968_v15  ;;  %6464 = vmatpush.msra.mxu2 %v6463_v44  ;;  %v6469_v59 = vand.u32 4294901760, %v6468_v0  ;;  %v6475_v38 = vand.u32 4294901760, %v6474_v11  ;;  %v17344_v7 = vand.u32 4294901760, %v14363_v17  ;;  %v6176_v63 = vld [vmem:[%s16957_s2 + $0x18] sm:$0xff] }
 0x6fd   : >> { %6246 = vmatpush.msra.mxu0 %v6225_v51  ;;  %6199 = vst [vmem:[#allocation3 + $0x10] sm:$0xff] %v6191_v55  ;;  %v6074_v29 = vadd.f32 %v6073_v36, %v5993_v27  ;;  %v6480_v56 = vsub.f32 %v14625_v28, %v6479_v62  ;;  %6563 = vmatpush.msra.mxu3 %v14625_v28  ;;  %v6160_v44 = vld [vmem:[#allocation3 + $0x18] sm:$0xff]  ;;  %v6222_v55 = vld [vmem:[%s10135_s29 + $0x10] sm:$0xff]  ;;  %v17345_v17 = vand.u32 4294901760, %v14382_v22 }
 0x6fe   : >> { %6693 = vmatpush.msrb.mxu1 %v17344_v7  ;;  %v5661_v50 = vadd.f32 %v14302_v6, %v5596_v39  ;;  %6470 = vmatpush.msra.mxu2 %v6469_v59  ;;  %v5859_v36 = vadd.f32 %v14306_v1, %v5758_v35  ;;  %v6168_v27 = vsub.f32 %v6152_v2, %v6160_v44  ;;  %v17346_v39 = vld [vmem:[#allocation28_spill] sm:$0xff]  ;;  %v17347_v35 = vand.u32 4294901760, %v14401_v8  ;;  %v17351_v7 = vld [vmem:[#allocation18_spill] sm:$0xff]  ;;  %v6161_v44 = vld [vmem:[#allocation3 + $0x20] sm:$0xff] }
 0x6ff   : >> { %6247 = vmatpush.msra.mxu0 %v6224_v45  ;;  %v6131_v51 = vadd.f32 %v6130_v12, %v6074_v29  ;;  %v6481_v0 = vand.u32 4294901760, %v6480_v56  ;;  %v5501_v6 = vadd.f32 %v14267_v53, %v5421_v18  ;;  %v5337_v33 = vadd.f32 %v17346_v39, %v14270_v10  ;;  %v6221_v1 = vld [vmem:[%s10135_s29 + $0x8] sm:$0xff] }
 0x700   : >> { %6697 = vmatpush.msrb.mxu1 %v17345_v17  ;;  %v5928_v11 = vpop.f32.mrf.mxu0  ;;  %6476 = vmatpush.msra.mxu2 %v6475_v38  ;;  %v5766_v12 = vadd.f32 %v14314_v26, %v5661_v50  ;;  %v17348_v53 = vand.u32 4294901760, %v14424_v9  ;;  %v17349_v38 = vld [vmem:[#allocation25_spill] sm:$0xff]  ;;  %v9969_v26 = vld [vmem:[#allocation2 + $0x20] sm:$0xff] }
 0x701   : >> { %6248 = vmatpush.msra.mxu0 %v6223_v21  ;;  %v6184_v15 = vmul.f32 %v6176_v63, %v6131_v51  ;;  %v5929_v59 = vadd.f32 %v5928_v11, %v5859_v36  ;;  %v6077_v45 = vpop.f32.mrf.mxu2  ;;  %v5600_v22 = vadd.f32 %v14321_v41, %v5501_v6  ;;  %v6004_v18 = vpop.f32.mrf.mxu1  ;;  %v5426_v8 = vadd.f32 %v17349_v38, %v5337_v33  ;;  %v6220_v9 = vld [vmem:[%s10135_s29] sm:$0xff]  ;;  %v17352_v63 = vld [vmem:[#allocation16_spill] sm:$0xff] }
 0x702   : >> { %6701 = vmatpush.msrb.mxu1 %v17347_v35  ;;  %6482 = vmatpush.msra.mxu2 %v6481_v0  ;;  %v6153_v56 = vmul.f32 2.0, %v9969_v26  ;;  %v17350_v41 = vand.u32 4294901760, %v14434_v52  ;;  %v5863_v50 = vadd.f32 %v17351_v7, %v5766_v12  ;;  %v17353_v52 = vand.u32 4294901760, %v14452_v49  ;;  %v17355_v33 = vld [vmem:[#allocation31_spill] sm:$0xff]  ;;  %v17358_v35 = vld [vmem:[#allocation13_spill] sm:$0xff]  ;;  %v6162_v26 = vld [vmem:[#allocation3 + $0x28] sm:$0xff] }
 0x703   : >> { %6249 = vmatpush.msra.mxu0 %v6222_v55  ;;  %v6192_v2 = vadd.f32 %v6184_v15, %v6168_v27  ;;  %v5999_v29 = vadd.f32 %v5998_v24, %v5929_v59  ;;  %v6177_v24 = vld [vmem:[%s16957_s2 + $0x20] sm:$0xff]  ;;  %v5665_v36 = vadd.f32 %v17352_v63, %v5600_v22  ;;  %v17356_v15 = vld [vmem:[#allocation21_spill] sm:$0xff]  ;;  %v17359_v22 = vand.u32 4294901760, %v14492_v46  ;;  %v17365_v7 = vld [vmem:[#allocation26_spill] sm:$0xff] }
 0x704   : >> { %6784 = vmatpush.msrb.mxu2 %v14339_v60  ;;  %6705 = vmatpush.msrb.mxu1 %v17348_v53  ;;  %v6134_v10 = vpop.f32.mrf.mxu3  ;;  %v17354_v55 = vld [vmem:[#allocation27_spill] sm:$0xff]  ;;  %v6169_v27 = vsub.f32 %v6153_v56, %v6161_v44 }
 0x705   : >> { %6250 = vmatpush.msra.mxu0 %v6221_v1  ;;  %6200 = vst [vmem:[#allocation3 + $0x18] sm:$0xff] %v6192_v2  ;;  %v6078_v21 = vadd.f32 %v6077_v45, %v5999_v29  ;;  %v5507_v17 = vadd.f32 %v17354_v55, %v5426_v8  ;;  %v5774_v59 = vadd.f32 %v17356_v15, %v5665_v36  ;;  %v17357_v45 = vld [vmem:[#allocation23_spill] sm:$0xff]  ;;  %v9970_v2 = vld [vmem:[#allocation2 + $0x28] sm:$0xff]  ;;  %v6215_v15 = vstv %s6212_s18  ;;  %s9908_s18 = sshll.u32 %s7384_s15, 7 }
 0x706   : >> { %6786 = vmatpush.msrb.mxu2 %v14350_v32  ;;  %6709 = vmatpush.msrb.mxu1 %v17350_v41  ;;  %v6154_v57 = vmul.f32 2.0, %v9970_v2  ;;  %v6178_v29 = vld [vmem:[%s16957_s2 + $0x28] sm:$0xff]  ;;  %s7388_s24 = sadd.s32 %s9908_s18, %s7387_s19  ;;  %s7434_s18 = sadd.s32 6, %s11253_s28 }
 0x707   : >> { %v6135_v51 = vadd.f32 %v6134_v10, %v6078_v21  ;;  %6251 = vmatpush.msra.mxu0 %v6220_v9  ;;  %v17361_v10 = vand.u32 4294901760, %v14507_v25  ;;  %v17364_v21 = vld [vmem:[#allocation15_spill] sm:$0xff]  ;;  %s7389_s30 = sld [smem:[#allocation8 + %s7388_s24]]  ;;  %s8559_s19 = sshra.s32 %s7434_s18, 7 }
 0x708   : >> { %6788 = vmatpush.msrb.mxu2 %v14365_v58  ;;  %v5933_v0 = vpop.f32.mrf.mxu0  ;;  %6713 = vmatpush.msrb.mxu1 %v17353_v52  ;;  %v6170_v41 = vsub.f32 %v6154_v57, %v6162_v26  ;;  %s8561_s24 = sadd.s32 %s10111_s0, %s8559_s19  ;;  %s8564_s10 = sand.u32 127, %s7434_s18 }
 0x709   : >> { %6606 = vmatpush.msrb.mxu0 %v14339_v60  ;;  %v6185_v11 = vmul.f32 %v6177_v24, %v6135_v51  ;;  %v5934_v6 = vadd.f32 %v5933_v0, %v5863_v50  ;;  %v6081_v39 = vpop.f32.mrf.mxu2  ;;  %v5604_v60 = vadd.f32 %v17357_v45, %v5507_v17  ;;  %v6010_v53 = vpop.f32.mrf.mxu1  ;;  %v9971_v51 = vld [vmem:[#allocation2 + $0x30] sm:$0xff]  ;;  %s8611_s18 = sadd.s32 7, %s11253_s28 }
 0x70a   : >> { %6790 = vmatpush.msrb.mxu2 %v17355_v33  ;;  %6717 = vmatpush.msrb.mxu1 %v6431_v61  ;;  %v17360_v61 = vld [vmem:[#allocation19_spill] sm:$0xff]  ;;  %v6155_v44 = vmul.f32 2.0, %v9971_v51  ;;  %v6163_v0 = vld [vmem:[#allocation3 + $0x30] sm:$0xff]  ;;  %s9736_s19 = sshra.s32 %s8611_s18, 7 }
 0x70b   : >> { %6608 = vmatpush.msrb.mxu0 %v14350_v32  ;;  %v6193_v1 = vadd.f32 %v6185_v11, %v6169_v27  ;;  %v6005_v49 = vadd.f32 %v6004_v18, %v5934_v6  ;;  %v17363_v18 = vld [vmem:[#allocation30_spill] sm:$0xff] }
 0x70c   : >> { %6792 = vmatpush.msrb.mxu2 %v17358_v35  ;;  %v6138_v12 = vpop.f32.mrf.mxu3  ;;  %6721 = vmatpush.msrb.mxu1 %v17359_v22  ;;  %v5669_v38 = vadd.f32 %v17363_v18, %v5604_v60 }
 0x70d   : >> { %6610 = vmatpush.msrb.mxu0 %v14365_v58  ;;  %6201 = vst [vmem:[#allocation3 + $0x20] sm:$0xff] %v6193_v1  ;;  %v6082_v32 = vadd.f32 %v6081_v39, %v6005_v49  ;;  %v17362_v58 = vld [vmem:[#allocation20_spill] sm:$0xff] }
 0x70e   : >> { %6794 = vmatpush.msrb.mxu2 %v17360_v61  ;;  %6725 = vmatpush.msrb.mxu1 %v17361_v10  ;;  %v5867_v46 = vadd.f32 %v17362_v58, %v5774_v59  ;;  %v5782_v50 = vadd.f32 %v17365_v7, %v5669_v38 }
 0x70f   : >> { %6612 = vmatpush.msrb.mxu0 %v17355_v33  ;;  %v6139_v8 = vadd.f32 %v6138_v12, %v6082_v32 }
 0x710   : >> { %6796 = vmatpush.msrb.mxu2 %v17364_v21  ;;  %v5938_v56 = vpop.f32.mrf.mxu0  ;;  %6729 = vmatpush.msrb.mxu1 %v6449_v13 }
 0x711   : >> { %6614 = vmatpush.msrb.mxu0 %v17358_v35  ;;  %v6186_v24 = vmul.f32 %v6178_v29, %v6139_v8  ;;  %v5939_v25 = vadd.f32 %v5938_v56, %v5867_v46  ;;  %v6085_v9 = vpop.f32.mrf.mxu2  ;;  %v6016_v55 = vpop.f32.mrf.mxu1 }
 0x712   : >> { %6798 = vmatpush.msrb.mxu2 %v14462_v48  ;;  %6733 = vmatpush.msrb.mxu1 %v6455_v23  ;;  %v17366_v23 = vld [vmem:[#allocation17_spill] sm:$0xff] }
 0x713   : >> { %6616 = vmatpush.msrb.mxu0 %v17360_v61  ;;  %v6194_v63 = vadd.f32 %v6186_v24, %v6170_v41  ;;  %v6011_v36 = vadd.f32 %v6010_v53, %v5939_v25  ;;  %v5871_v19 = vadd.f32 %v17366_v23, %v5782_v50 }
 0x714   : >> { %6800 = vmatpush.msrb.mxu2 %v14476_v37  ;;  %v6142_v43 = vpop.f32.mrf.mxu3  ;;  %6737 = vmatpush.msrb.mxu1 %v6461_v31 }
 0x715   : >> { %6618 = vmatpush.msrb.mxu0 %v17364_v21  ;;  %6202 = vst [vmem:[#allocation3 + $0x28] sm:$0xff] %v6194_v63  ;;  %v6086_v13 = vadd.f32 %v6085_v9, %v6011_v36 }
 0x716   : >> { %6802 = vmatpush.msrb.mxu2 %v14494_v30  ;;  %6741 = vmatpush.msrb.mxu1 %v6467_v5 }
 0x717   : >> { %6620 = vmatpush.msrb.mxu0 %v14462_v48  ;;  %v6143_v31 = vadd.f32 %v6142_v43, %v6086_v13  ;;  %v6171_v48 = vsub.f32 %v6155_v44, %v6163_v0 }
 0x718   : >> { %6804 = vmatpush.msrb.mxu2 %v14521_v40  ;;  %v5943_v52 = vpop.f32.mrf.mxu0  ;;  %6745 = vmatpush.msrb.mxu1 %v6473_v47  ;;  %v9972_v47 = vld [vmem:[#allocation2 + $0x38] sm:$0xff] }
 0x719   : >> { %6622 = vmatpush.msrb.mxu0 %v14476_v37  ;;  %v6187_v17 = vmul.f32 %v6179_v34, %v6143_v31  ;;  %v5944_v14 = vadd.f32 %v5943_v52, %v5871_v19  ;;  %v6089_v5 = vpop.f32.mrf.mxu2  ;;  %v6156_v6 = vmul.f32 2.0, %v9972_v47 }
 0x71a   : >> { %6806 = vmatpush.msrb.mxu2 %v14541_v4  ;;  %6749 = vmatpush.msrb.mxu1 %v6479_v62 }
 0x71b   : >> { %6624 = vmatpush.msrb.mxu0 %v14494_v30  ;;  %v6195_v27 = vadd.f32 %v6187_v17, %v6171_v48  ;;  %v6017_v11 = vadd.f32 %v6016_v55, %v5944_v14  ;;  %v6180_v30 = vld [vmem:[%s16957_s2 + $0x38] sm:$0xff] }
 0x71c   : >> { %6808 = vmatpush.msrb.mxu2 %v14564_v3  ;;  %v6146_v37 = vpop.f32.mrf.mxu3 }
 0x71d   : >> { %6626 = vmatpush.msrb.mxu0 %v14521_v40  ;;  %6203 = vst [vmem:[#allocation3 + $0x30] sm:$0xff] %v6195_v27  ;;  %v6090_v16 = vadd.f32 %v6089_v5, %v6017_v11  ;;  %v6164_v40 = vld [vmem:[#allocation3 + $0x38] sm:$0xff] }
 0x71e   : >> { %6810 = vmatpush.msrb.mxu2 %v14580_v20  ;;  %v6172_v62 = vsub.f32 %v6156_v6, %v6164_v40  ;;  %v6267_v6 = vld [vmem:[%s16958_s3 + $0x8] sm:$0xff] }
 0x71f   : >> { %6628 = vmatpush.msrb.mxu0 %v14541_v4  ;;  %v6147_v28 = vadd.f32 %v6146_v37, %v6090_v16  ;;  %v6214_v4 = vld [vmem:[%s10130_s25] sm:$0x1] }
 0x720   : >> { %6812 = vmatpush.msrb.mxu2 %v14591_v54  ;;  %v6216_v59 = vmul.f32 %v6215_v15, %v6214_v4  ;;  %v6266_v37 = vld [vmem:[%s16958_s3] sm:$0xff] }
 0x721   : >> { %6630 = vmatpush.msrb.mxu0 %v14564_v3  ;;  %v6188_v39 = vmul.f32 %v6180_v30, %v6147_v28  ;;  %v6849_v16 = vsel %vm957_vm0, %v6266_v37, 0  ;;  %v6852_v28 = vsel %vm957_vm0, %v6267_v6, 0 }
 0x722   : >> { %6814 = vmatpush.msrb.mxu2 %v14611_v42  ;;  %v14892_v47 = vand.u32 4294901760, %v6849_v16 }
 0x723   : >> { %6632 = vmatpush.msrb.mxu0 %v14580_v20  ;;  %v6196_v33 = vadd.f32 %v6188_v39, %v6172_v62  ;;  %v14906_v62 = vand.u32 4294901760, %v6852_v28  ;;  %v6268_v39 = vld [vmem:[%s16958_s3 + $0x10] sm:$0xff] }
 0x724   : >> { %v14901_v30 = vsub.f32 %v6849_v16, %v14892_v47  ;;  %v6855_v15 = vsel %vm957_vm0, %v6268_v39, 0 }
 0x725   : >> { %6634 = vmatpush.msrb.mxu0 %v14591_v54  ;;  %6204 = vst [vmem:[#allocation3 + $0x38] sm:$0xff] %v6196_v33  ;;  %v14918_v4 = vsub.f32 %v6852_v28, %v14906_v62 }
 0x726   : >> { %v6898_v40 = vand.u32 4294901760, %v14901_v30 }
 0x727   : >> { %6636 = vmatpush.msrb.mxu0 %v14611_v42 }
 0x728   : >> { %v6899_v33 = vsub.f32 %v14901_v30, %v6898_v40 }
 0x72c   : >> { %v6213_v45 = vld [vmem:[%s11286_s22] sm:$0x1] }
 0x72d   : >> { %v6217_v60 = vadd.f32 %v6216_v59, %v6213_v45  ;;  %v6900_v59 = vand.u32 4294901760, %v6899_v33  ;;  %v6906_v45 = vand.u32 4294901760, %v14918_v4 }
 0x72f   : >> { %6218 = vst [vmem:[%s11286_s22] sm:$0x1] %v6217_v60  ;;  %v14923_v60 = vand.u32 4294901760, %v6855_v15 }
 0x736   : >> { %v6219_v1 = vld [vmem:[%s11291_s23] sm:$0x1]  ;;  %v6265_v49 = vld [vmem:[#allocation3 + $0x38] sm:$0xff]  ;;  %v6264_v54 = vld [vmem:[#allocation3 + $0x30] sm:$0xff] }
 0x737   : >> { %v14756_v3 = vld [vmem:[#allocation3] sm:$0xff]  ;;  %6252 = vmatmul.f32.vlgmr.msra.gmra.mxu0 %v6219_v1  ;;  %v14761_v20 = vand.u32 4294901760, %v6265_v49  ;;  %v6263_v12 = vld [vmem:[#allocation3 + $0x28] sm:$0xff]  ;;  %v14763_v32 = vand.u32 4294901760, %v6264_v54  ;;  %v6261_v61 = vld [vmem:[#allocation3 + $0x18] sm:$0xff] }
 0x738   : >> { %v14759_v35 = vand.u32 4294901760, %v14756_v3  ;;  %v6262_v22 = vld [vmem:[#allocation3 + $0x20] sm:$0xff]  ;;  %v14765_v42 = vand.u32 4294901760, %v6263_v12  ;;  %v14769_v57 = vld [vmem:[#allocation3 + $0x8] sm:$0xff]  ;;  %v14783_v58 = vld [vmem:[#allocation3 + $0x10] sm:$0xff]  ;;  %v14786_v46 = vand.u32 4294901760, %v6261_v61 }
 0x739   : >> { %v14767_v2 = vand.u32 4294901760, %v6262_v22  ;;  %6881 = vmatpush.msrb.mxu3 %v14761_v20  ;;  %v14778_v53 = vand.u32 4294901760, %v14769_v57  ;;  %v14781_v10 = vsub.f32 %v6265_v49, %v14761_v20  ;;  %v14789_v18 = vsub.f32 %v6264_v54, %v14763_v32  ;;  %v6269_v1 = vld [vmem:[%s16958_s3 + $0x18] sm:$0xff] }
 0x73a   : >> { %6484 = vmatmul.f32.vlgmr.msra.gmra.mxu2 %v14759_v35  ;;  %v14775_v29 = vsub.f32 %v14756_v3, %v14759_v35  ;;  %v14792_v38 = vsub.f32 %v6263_v12, %v14765_v42  ;;  %v14807_v56 = vand.u32 4294901760, %v14783_v58  ;;  %v14826_v63 = vsub.f32 %v6261_v61, %v14786_v46 }
 0x73b   : >> { %7132 = vmatpush.msra.mxu2 %v14761_v20  ;;  %v14799_v21 = vand.u32 4294901760, %v14781_v10  ;;  %v14802_v26 = vsub.f32 %v6262_v22, %v14767_v2  ;;  %6883 = vmatpush.msrb.mxu3 %v14763_v32  ;;  %v14810_v41 = vand.u32 4294901760, %v14789_v18  ;;  %v6331_v7 = vsub.f32 %v14769_v57, %v14778_v53 }
 0x73c   : >> { %6566 = vmatmul.f32.vlgmr.msra.gmra.mxu3 %v14775_v29  ;;  %v14796_v8 = vand.u32 4294901760, %v14775_v29  ;;  %v14813_v24 = vand.u32 4294901760, %v14792_v38  ;;  %v6339_v44 = vsub.f32 %v14783_v58, %v14807_v56  ;;  %v6348_v19 = vand.u32 4294901760, %v14826_v63 }
 0x73d   : >> { %7134 = vmatpush.msra.mxu2 %v14763_v32  ;;  %v6381_v9 = vsub.f32 %v14781_v10, %v14799_v21  ;;  %6885 = vmatpush.msrb.mxu3 %v14765_v42  ;;  %v6373_v50 = vsub.f32 %v14789_v18, %v14810_v41  ;;  %v14832_v13 = vand.u32 4294901760, %v14802_v26  ;;  %v6332_v34 = vand.u32 4294901760, %v6331_v7 }
 0x73e   : >> { %v6325_v25 = vsub.f32 %v14775_v29, %v14796_v8  ;;  %v6365_v51 = vsub.f32 %v14792_v38, %v14813_v24  ;;  %v6340_v52 = vand.u32 4294901760, %v6339_v44  ;;  %v6349_v48 = vsub.f32 %v14826_v63, %v6348_v19 }
 0x73f   : >> { %7136 = vmatpush.msra.mxu2 %v14765_v42  ;;  %6640 = vmatmul.f32.vlgmr.msrb.gmra.mxu0 %v14796_v8  ;;  %v14829_v43 = vand.u32 4294901760, %v6381_v9  ;;  %v14843_v23 = vand.u32 4294901760, %v6373_v50  ;;  %v6357_v31 = vsub.f32 %v14802_v26, %v14832_v13  ;;  %v6333_v55 = vsub.f32 %v6331_v7, %v6332_v34 }
 0x740   : >> { %v6326_v36 = vand.u32 4294901760, %v6325_v25  ;;  %6887 = vmatpush.msrb.mxu3 %v14767_v2  ;;  %v14851_v0 = vand.u32 4294901760, %v6365_v51  ;;  %v6341_v14 = vsub.f32 %v6339_v44, %v6340_v52  ;;  %v6350_v27 = vand.u32 4294901760, %v6349_v48 }
 0x741   : >> { %7138 = vmatpush.msra.mxu2 %v14767_v2  ;;  %6974 = vmatpush.msra.mxu0 %v14829_v43  ;;  %v6358_v17 = vand.u32 4294901760, %v6357_v31  ;;  %v6334_v5 = vand.u32 4294901760, %v6333_v55  ;;  %v6907_v49 = vsub.f32 %v14918_v4, %v6906_v45  ;;  %v14934_v54 = vsub.f32 %v6855_v15, %v14923_v60 }
 0x742   : >> { %6327 = vmatmul.f32.vlgmr.msra.gmra.mxu1 %v6326_v36  ;;  %6488 = vmatmul.f32.gmra.mxu2 %v14778_v53  ;;  %v6342_v11 = vand.u32 4294901760, %v6341_v14  ;;  %v6858_v12 = vsel %vm957_vm0, %v6269_v1, 0 }
 0x743   : >> { %6889 = vmatpush.msrb.mxu3 %v14786_v46  ;;  %7060 = vmatpush.msra.mxu1 %v14781_v10  ;;  %v6908_v22 = vand.u32 4294901760, %v6907_v49  ;;  %v6914_v61 = vand.u32 4294901760, %v14934_v54 }
 0x744   : >> { %7140 = vmatpush.msra.mxu2 %v14786_v46  ;;  %6571 = vmatmul.f32.gmra.mxu3 %v6331_v7 }
 0x745   : >> { %6980 = vmatpush.msra.mxu0 %v14843_v23  ;;  %6891 = vmatpush.msrb.mxu3 %v14807_v56 }
 0x746   : >> { %7063 = vmatpush.msra.mxu1 %v14789_v18  ;;  %7142 = vmatpush.msra.mxu2 %v14807_v56 }
 0x747   : >> { %6986 = vmatpush.msra.mxu0 %v14851_v0  ;;  %6893 = vmatpush.msrb.mxu3 %v14778_v53 }
 0x748   : >> { %7066 = vmatpush.msra.mxu1 %v14792_v38  ;;  %7144 = vmatpush.msra.mxu2 %v14778_v53 }
 0x749   : >> { %6646 = vmatmul.f32.gmra.mxu0 %v6332_v34  ;;  %6895 = vmatpush.msrb.mxu3 %v14759_v35 }
 0x74a   : >> { %6992 = vmatpush.msra.mxu0 %v6358_v17  ;;  %7069 = vmatpush.msra.mxu1 %v14802_v26 }
 0x74b   : >> { %7146 = vmatpush.msra.mxu2 %v14759_v35  ;;  %7207 = vmatpush.msra.mxu3 %v14799_v21 }
 0x74c   : >> { %6335 = vmatmul.f32.gmra.mxu1 %v6334_v5  ;;  %6492 = vmatmul.f32.gmra.mxu2 %v14807_v56 }
 0x74d   : >> { %6998 = vmatpush.msra.mxu0 %v6350_v27  ;;  %7072 = vmatpush.msra.mxu1 %v14826_v63 }
 0x74e   : >> { %7211 = vmatpush.msra.mxu3 %v14810_v41 }
 0x74f   : >> { %6576 = vmatmul.f32.gmra.mxu3 %v6339_v44  ;;  %7004 = vmatpush.msra.mxu0 %v6342_v11 }
 0x750   : >> { %7075 = vmatpush.msra.mxu1 %v6339_v44  ;;  %7215 = vmatpush.msra.mxu3 %v14813_v24 }
 0x751   : >> { %7010 = vmatpush.msra.mxu0 %v6334_v5 }
 0x752   : >> { %7078 = vmatpush.msra.mxu1 %v6331_v7  ;;  %7219 = vmatpush.msra.mxu3 %v14832_v13 }
 0x753   : >> { %6652 = vmatmul.f32.gmra.mxu0 %v6340_v52 }
 0x754   : >> { %7016 = vmatpush.msra.mxu0 %v6326_v36  ;;  %7081 = vmatpush.msra.mxu1 %v14775_v29  ;;  %v14939_v29 = vand.u32 4294901760, %v6858_v12 }
 0x755   : >> { %7223 = vmatpush.msra.mxu3 %v6348_v19  ;;  %6343 = vmatmul.f32.gmra.mxu1 %v6342_v11 }
 0x756   : >> { %7278 = vmatpush.msrb.mxu0 %v14761_v20  ;;  %6496 = vmatmul.f32.gmra.mxu2 %v14786_v46 }
 0x757   : >> { %7227 = vmatpush.msra.mxu3 %v6340_v52 }
 0x758   : >> { %7280 = vmatpush.msrb.mxu0 %v14763_v32  ;;  %6581 = vmatmul.f32.gmra.mxu3 %v14826_v63  ;;  %v6272_v63 = vld [vmem:[%s16958_s3 + $0x30] sm:$0xff] }
 0x759   : >> { %7231 = vmatpush.msra.mxu3 %v6332_v34  ;;  %v6273_v34 = vld [vmem:[%s16958_s3 + $0x38] sm:$0xff] }
 0x75a   : >> { %7282 = vmatpush.msrb.mxu0 %v14765_v42  ;;  %v6870_v31 = vsel %vm957_vm0, %v6273_v34, 0 }
 0x75b   : >> { %7235 = vmatpush.msra.mxu3 %v14796_v8  ;;  %6658 = vmatmul.f32.gmra.mxu0 %v6348_v19  ;;  %v15003_v52 = vand.u32 4294901760, %v6870_v31 }
 0x75c   : >> { %7284 = vmatpush.msrb.mxu0 %v14767_v2 }
 0x75d   : >> { %6351 = vmatmul.f32.gmra.mxu1 %v6350_v27  ;;  %v15011_v48 = vsub.f32 %v6870_v31, %v15003_v52 }
 0x75e   : >> { %7286 = vmatpush.msrb.mxu0 %v14786_v46  ;;  %6500 = vmatmul.f32.gmra.mxu2 %v14767_v2 }
 0x75f   : >> { %v6954_v14 = vand.u32 4294901760, %v15011_v48 }
 0x760   : >> { %7288 = vmatpush.msrb.mxu0 %v14807_v56  ;;  %6586 = vmatmul.f32.gmra.mxu3 %v14802_v26 }
 0x762   : >> { %7290 = vmatpush.msrb.mxu0 %v14778_v53 }
 0x763   : >> { %6664 = vmatmul.f32.gmra.mxu0 %v14832_v13  ;;  %v6867_v13 = vsel %vm957_vm0, %v6272_v63, 0 }
 0x764   : >> { %7292 = vmatpush.msrb.mxu0 %v14759_v35  ;;  %v14987_v44 = vand.u32 4294901760, %v6867_v13 }
 0x765   : >> { %6359 = vmatmul.f32.gmra.mxu1 %v6358_v17 }
 0x766   : >> { %6504 = vmatmul.f32.gmra.mxu2 %v14765_v42  ;;  %v14998_v19 = vsub.f32 %v6867_v13, %v14987_v44 }
 0x768   : >> { %6591 = vmatmul.f32.gmra.mxu3 %v14792_v38  ;;  %v14950_v38 = vsub.f32 %v6858_v12, %v14939_v29 }
 0x76b   : >> { %6670 = vmatmul.f32.gmra.mxu0 %v14813_v24 }
 0x76d   : >> { %6367 = vmatmul.f32.gmra.mxu1 %v14851_v0 }
 0x76e   : >> { %6508 = vmatmul.f32.gmra.mxu2 %v14763_v32 }
 0x770   : >> { %6596 = vmatmul.f32.gmra.mxu3 %v14789_v18  ;;  %v6915_v18 = vsub.f32 %v14934_v54, %v6914_v61 }
 0x773   : >> { %6676 = vmatmul.f32.gmra.mxu0 %v14810_v41  ;;  %v6271_v41 = vld [vmem:[%s16958_s3 + $0x28] sm:$0xff] }
 0x774   : >> { %v6864_v9 = vsel %vm957_vm0, %v6271_v41, 0 }
 0x775   : >> { %6375 = vmatmul.f32.gmra.mxu1 %v14843_v23  ;;  %v14971_v50 = vand.u32 4294901760, %v6864_v9 }
 0x776   : >> { %6512 = vmatmul.f32.gmra.mxu2 %v14761_v20 }
 0x778   : >> { %6601 = vmatmul.f32.gmra.mxu3 %v14781_v10  ;;  %v6270_v10 = vld [vmem:[%s16958_s3 + $0x20] sm:$0xff] }
 0x779   : >> { %v6861_v8 = vsel %vm957_vm0, %v6270_v10, 0 }
 0x77a   : >> { %v14955_v26 = vand.u32 4294901760, %v6861_v8 }
 0x77b   : >> { %6682 = vmatmul.f32.gmra.mxu0 %v14799_v21  ;;  %v6916_v21 = vand.u32 4294901760, %v6915_v18 }
 0x77c   : >> { %v14966_v25 = vsub.f32 %v6861_v8, %v14955_v26 }
 0x77d   : >> { %6383 = vmatmul.f32.gmra.mxu1 %v14829_v43  ;;  %v14982_v43 = vsub.f32 %v6864_v9, %v14971_v50 }
 0x77e   : >> { %6816 = vmatmul.f32.vlgmr.msrb.gmra.mxu2 %v14759_v35 }
 0x780   : >> { %6901 = vmatmul.f32.vlgmr.msrb.gmra.mxu3 %v6900_v59 }
 0x783   : >> { %7018 = vmatmul.f32.vlgmr.msra.gmra.mxu0 %v14892_v47 }
 0x785   : >> { %6751 = vmatmul.f32.vlgmr.msrb.gmra.mxu1 %v14759_v35  ;;  %v6922_v35 = vand.u32 4294901760, %v14950_v38 }
 0x786   : >> { %6820 = vmatmul.f32.gmra.mxu2 %v14778_v53 }
 0x787   : >> { %v6923_v24 = vsub.f32 %v14950_v38, %v6922_v35 }
 0x788   : >> { %6909 = vmatmul.f32.gmra.mxu3 %v6908_v22 }
 0x789   : >> { %v6924_v7 = vand.u32 4294901760, %v6923_v24 }
 0x78b   : >> { %7022 = vmatmul.f32.gmra.mxu0 %v14906_v62 }
 0x78d   : >> { %6755 = vmatmul.f32.gmra.mxu1 %v14778_v53  ;;  %v6930_v53 = vand.u32 4294901760, %v14966_v25 }
 0x78e   : >> { %6824 = vmatmul.f32.gmra.mxu2 %v14807_v56 }
 0x78f   : >> { %v6931_v36 = vsub.f32 %v14966_v25, %v6930_v53 }
 0x790   : >> { %6917 = vmatmul.f32.gmra.mxu3 %v6916_v21 }
 0x791   : >> { %v6932_v51 = vand.u32 4294901760, %v6931_v36 }
 0x793   : >> { %7026 = vmatmul.f32.gmra.mxu0 %v14923_v60 }
 0x795   : >> { %6759 = vmatmul.f32.gmra.mxu1 %v14807_v56  ;;  %v6938_v56 = vand.u32 4294901760, %v14982_v43 }
 0x796   : >> { %6828 = vmatmul.f32.gmra.mxu2 %v14786_v46 }
 0x797   : >> { %v6939_v23 = vsub.f32 %v14982_v43, %v6938_v56 }
 0x798   : >> { %6925 = vmatmul.f32.gmra.mxu3 %v6924_v7 }
 0x799   : >> { %v6940_v0 = vand.u32 4294901760, %v6939_v23 }
 0x79b   : >> { %7030 = vmatmul.f32.gmra.mxu0 %v14939_v29 }
 0x79d   : >> { %6763 = vmatmul.f32.gmra.mxu1 %v14786_v46  ;;  %v6946_v46 = vand.u32 4294901760, %v14998_v19 }
 0x79e   : >> { %6832 = vmatmul.f32.gmra.mxu2 %v14767_v2 }
 0x79f   : >> { %v6947_v55 = vsub.f32 %v14998_v19, %v6946_v46 }
 0x7a0   : >> { %6933 = vmatmul.f32.gmra.mxu3 %v6932_v51 }
 0x7a1   : >> { %v6948_v17 = vand.u32 4294901760, %v6947_v55 }
 0x7a3   : >> { %7034 = vmatmul.f32.gmra.mxu0 %v14955_v26 }
 0x7a5   : >> { %6767 = vmatmul.f32.gmra.mxu1 %v14767_v2  ;;  %v6955_v2 = vsub.f32 %v15011_v48, %v6954_v14 }
 0x7a6   : >> { %6836 = vmatmul.f32.gmra.mxu2 %v14765_v42 }
 0x7a7   : >> { %v6956_v5 = vand.u32 4294901760, %v6955_v2 }
 0x7a8   : >> { %6941 = vmatmul.f32.gmra.mxu3 %v6940_v0 }
 0x7ab   : >> { %7038 = vmatmul.f32.gmra.mxu0 %v14971_v50 }
 0x7ad   : >> { %6771 = vmatmul.f32.gmra.mxu1 %v14765_v42 }
 0x7ae   : >> { %6840 = vmatmul.f32.gmra.mxu2 %v14763_v32 }
 0x7b0   : >> { %6949 = vmatmul.f32.gmra.mxu3 %v6948_v17 }
 0x7b3   : >> { %7042 = vmatmul.f32.gmra.mxu0 %v14987_v44 }
 0x7b4   : >> { %v6253_v27 = vpop.f32.mrf.mxu0 }
 0x7b5   : >> { %6775 = vmatmul.f32.gmra.mxu1 %v14763_v32  ;;  %6256 = vst.msk [vmem:[#allocation4 + $0x4] sm:$0x1] %vm1545_vm1, %v6253_v27 }
 0x7b6   : >> { %6844 = vmatmul.f32.gmra.mxu2 %v14761_v20 }
 0x7b8   : >> { %6957 = vmatmul.f32.gmra.mxu3 %v6956_v5 }
 0x7bb   : >> { %7046 = vmatmul.f32.gmra.mxu0 %v15003_v52 }
 0x7bc   : >> { %v15027_v11 = vpop.f32.mrf.mxu0 }
 0x7bd   : >> { %v15025_v42 = vpop.f32.mrf.mxu2  ;;  %6779 = vmatmul.f32.gmra.mxu1 %v14761_v20 }
 0x7be   : >> { %7150 = vmatmul.f32.vlgmr.msra.gmra.mxu2 %v6898_v40 }
 0x7bf   : >> { %v15032_v37 = vpop.f32.mrf.mxu1  ;;  %v15034_v16 = vpop.f32.mrf.mxu3 }
 0x7c0   : >> { %7237 = vmatmul.f32.vlgmr.msra.gmra.mxu3 %v14892_v47  ;;  %v6486_v17 = vadd.f32 %v15025_v42, %v15032_v37 }
 0x7c3   : >> { %7294 = vmatmul.f32.vlgmr.msrb.gmra.mxu0 %v14892_v47 }
 0x7c5   : >> { %7084 = vmatmul.f32.vlgmr.msra.gmra.mxu1 %v14901_v30  ;;  %v15039_v32 = vpop.f32.mrf.mxu2 }
 0x7c6   : >> { %v15041_v6 = vpop.f32.mrf.mxu0  ;;  %7156 = vmatmul.f32.gmra.mxu2 %v6906_v45 }
 0x7c7   : >> { %v15045_v20 = vpop.f32.mrf.mxu3 }
 0x7c8   : >> { %7241 = vmatmul.f32.gmra.mxu3 %v14906_v62 }
 0x7c9   : >> { %v15048_v28 = vpop.f32.mrf.mxu1 }
 0x7ca   : >> { %v6490_v27 = vadd.f32 %v15039_v32, %v15048_v28  ;;  %v7466_v32 = vld [vmem:[%s16959_s4 + $0x78] sm:$0xff] }
 0x7cb   : >> { %7298 = vmatmul.f32.gmra.mxu0 %v14906_v62 }
 0x7cd   : >> { %7089 = vmatmul.f32.gmra.mxu1 %v14918_v4 }
 0x7ce   : >> { %7162 = vmatmul.f32.gmra.mxu2 %v6914_v61 }
 0x7cf   : >> { %v15054_v47 = vpop.f32.mrf.mxu2 }
 0x7d0   : >> { %v15056_v30 = vpop.f32.mrf.mxu0  ;;  %7245 = vmatmul.f32.gmra.mxu3 %v14923_v60 }
 0x7d2   : >> { %v15059_v40 = vpop.f32.mrf.mxu3  ;;  %v15061_v39 = vpop.f32.mrf.mxu1 }
 0x7d3   : >> { %7302 = vmatmul.f32.gmra.mxu0 %v14923_v60  ;;  %v6494_v42 = vadd.f32 %v15054_v47, %v15061_v39  ;;  %v7465_v39 = vld [vmem:[%s16959_s4 + $0x70] sm:$0xff] }
 0x7d5   : >> { %7094 = vmatmul.f32.gmra.mxu1 %v14934_v54 }
 0x7d6   : >> { %7168 = vmatmul.f32.gmra.mxu2 %v6922_v35 }
 0x7d8   : >> { %7249 = vmatmul.f32.gmra.mxu3 %v14939_v29  ;;  %v15070_v33 = vpop.f32.mrf.mxu0 }
 0x7d9   : >> { %v15068_v62 = vpop.f32.mrf.mxu2 }
 0x7da   : >> { %v15072_v4 = vpop.f32.mrf.mxu1 }
 0x7db   : >> { %v15074_v15 = vpop.f32.mrf.mxu3  ;;  %7306 = vmatmul.f32.gmra.mxu0 %v14939_v29 }
 0x7dd   : >> { %7099 = vmatmul.f32.gmra.mxu1 %v14950_v38 }
 0x7de   : >> { %7174 = vmatmul.f32.gmra.mxu2 %v6930_v53 }
 0x7e0   : >> { %7253 = vmatmul.f32.gmra.mxu3 %v14955_v26  ;;  %v15083_v45 = vpop.f32.mrf.mxu0 }
 0x7e1   : >> { %v15081_v59 = vpop.f32.mrf.mxu2 }
 0x7e2   : >> { %v15085_v60 = vpop.f32.mrf.mxu1 }
 0x7e3   : >> { %v15087_v1 = vpop.f32.mrf.mxu3  ;;  %7310 = vmatmul.f32.gmra.mxu0 %v14955_v26 }
 0x7e5   : >> { %7104 = vmatmul.f32.gmra.mxu1 %v14966_v25 }
 0x7e6   : >> { %7180 = vmatmul.f32.gmra.mxu2 %v6938_v56 }
 0x7e8   : >> { %7257 = vmatmul.f32.gmra.mxu3 %v14971_v50  ;;  %v15096_v54 = vpop.f32.mrf.mxu0 }
 0x7e9   : >> { %v15094_v49 = vpop.f32.mrf.mxu2 }
 0x7ea   : >> { %v15098_v12 = vpop.f32.mrf.mxu1 }
 0x7eb   : >> { %v15100_v22 = vpop.f32.mrf.mxu3  ;;  %7314 = vmatmul.f32.gmra.mxu0 %v14971_v50 }
 0x7ed   : >> { %7109 = vmatmul.f32.gmra.mxu1 %v14982_v43 }
 0x7ee   : >> { %7186 = vmatmul.f32.gmra.mxu2 %v6946_v46 }
 0x7f0   : >> { %7261 = vmatmul.f32.gmra.mxu3 %v14987_v44  ;;  %v15109_v29 = vpop.f32.mrf.mxu0 }
 0x7f1   : >> { %v15107_v61 = vpop.f32.mrf.mxu2  ;;  %17367 = vst [vmem:[#allocation22_spill] sm:$0xff] %v15109_v29 }
 0x7f2   : >> { %v15111_v10 = vpop.f32.mrf.mxu1 }
 0x7f3   : >> { %v15113_v18 = vpop.f32.mrf.mxu3  ;;  %7318 = vmatmul.f32.gmra.mxu0 %v14987_v44 }
 0x7f5   : >> { %7114 = vmatmul.f32.gmra.mxu1 %v14998_v19 }
 0x7f6   : >> { %7192 = vmatmul.f32.gmra.mxu2 %v6954_v14  ;;  %v6568_v14 = vadd.f32 %v15034_v16, %v6486_v17 }
 0x7f8   : >> { %7265 = vmatmul.f32.gmra.mxu3 %v15003_v52  ;;  %v15122_v8 = vpop.f32.mrf.mxu0 }
 0x7f9   : >> { %v15120_v38 = vpop.f32.mrf.mxu2  ;;  %17368 = vst [vmem:[#allocation14_spill] sm:$0xff] %v15122_v8 }
 0x7fa   : >> { %v15124_v21 = vpop.f32.mrf.mxu1 }
 0x7fb   : >> { %v15126_v35 = vpop.f32.mrf.mxu3  ;;  %7322 = vmatmul.f32.gmra.mxu0 %v15003_v52 }
 0x7fc   : >> { %17369 = vst [vmem:[#allocation24_spill] sm:$0xff] %v15126_v35 }
 0x7fd   : >> { %7119 = vmatmul.f32.gmra.mxu1 %v15011_v48 }
 0x800   : >> { %v15130_v41 = vpop.f32.mrf.mxu0 }
 0x801   : >> { %v6817_v26 = vpop.f32.mrf.mxu2 }
 0x802   : >> { %v6752_v24 = vpop.f32.mrf.mxu1 }
 0x803   : >> { %v6902_v25 = vpop.f32.mrf.mxu3 }
 0x808   : >> { %v15132_v7 = vpop.f32.mrf.mxu0 }
 0x809   : >> { %v6821_v9 = vpop.f32.mrf.mxu2 }
 0x80a   : >> { %v6756_v53 = vpop.f32.mrf.mxu1 }
 0x80b   : >> { %v15134_v50 = vpop.f32.mrf.mxu3 }
 0x810   : >> { %v15138_v36 = vpop.f32.mrf.mxu0 }
 0x811   : >> { %v15136_v63 = vpop.f32.mrf.mxu2 }
 0x812   : >> { %v6760_v43 = vpop.f32.mrf.mxu1 }
 0x813   : >> { %v15140_v13 = vpop.f32.mrf.mxu3 }
 0x818   : >> { %v15144_v56 = vpop.f32.mrf.mxu0 }
 0x819   : >> { %v15142_v51 = vpop.f32.mrf.mxu2 }
 0x81a   : >> { %v15146_v44 = vpop.f32.mrf.mxu1 }
 0x81b   : >> { %v15148_v34 = vpop.f32.mrf.mxu3 }
 0x820   : >> { %v15152_v19 = vpop.f32.mrf.mxu0 }
 0x821   : >> { %v15150_v23 = vpop.f32.mrf.mxu2 }
 0x822   : >> { %v15154_v31 = vpop.f32.mrf.mxu1 }
 0x823   : >> { %v15156_v0 = vpop.f32.mrf.mxu3 }
 0x828   : >> { %v15160_v52 = vpop.f32.mrf.mxu0 }
 0x829   : >> { %v15158_v46 = vpop.f32.mrf.mxu2  ;;  %17370 = vst [vmem:[#allocation12_spill] sm:$0xff] %v15160_v52  ;;  %v6642_v52 = vadd.f32 %v15027_v11, %v6568_v14 }
 0x82a   : >> { %v15162_v55 = vpop.f32.mrf.mxu1 }
 0x82b   : >> { %v15164_v48 = vpop.f32.mrf.mxu3  ;;  %v6753_v29 = vadd.f32 %v6752_v24, %v6642_v52  ;;  %v6578_v24 = vadd.f32 %v15059_v40, %v6494_v42  ;;  %v15208_v52 = vmul.f32 2.0, %v14756_v3  ;;  %v7464_v40 = vld [vmem:[%s16959_s4 + $0x68] sm:$0xff] }
 0x82c   : >> { %17371 = vst [vmem:[#allocation29_spill] sm:$0xff] %v15164_v48  ;;  %v6573_v48 = vadd.f32 %v15045_v20, %v6490_v27  ;;  %v15195_v20 = vand.u32 4294901760, %v7466_v32  ;;  %v15217_v14 = vand.u32 4294901760, %v7464_v40  ;;  %v7463_v27 = vld [vmem:[%s16959_s4 + $0x60] sm:$0xff] }
 0x82d   : >> { %v6818_v17 = vadd.f32 %v6817_v26, %v6753_v29 }
 0x82e   : >> { %v15202_v29 = vsub.f32 %v7466_v32, %v15195_v20  ;;  %7468 = vmatpush.msrb.mxu2 %v15195_v20  ;;  %v15227_v32 = vld [vmem:[#allocation2] sm:$0xff] }
 0x82f   : >> { %v6903_v26 = vadd.f32 %v6902_v25, %v6818_v17  ;;  %v6498_v25 = vadd.f32 %v15068_v62, %v15072_v4  ;;  %v15236_v62 = vand.u32 4294901760, %v7463_v27 }
 0x830   : >> { %v15171_v5 = vpop.f32.mrf.mxu0  ;;  %7695 = vmatpush.msra.mxu0 %v15202_v29 }
 0x831   : >> { %v15169_v2 = vpop.f32.mrf.mxu2  ;;  %17372 = vst [vmem:[#allocation28_spill] sm:$0xff] %v15171_v5  ;;  %v6648_v5 = vadd.f32 %v15041_v6, %v6573_v48  ;;  %v15204_v6 = vand.u32 4294901760, %v7465_v39 }
 0x832   : >> { %v15175_v8 = vpop.f32.mrf.mxu1  ;;  %17378 = vst [vmem:[#allocation21_spill] sm:$0xff] %v15236_v62 }
 0x833   : >> { %v15177_v35 = vpop.f32.mrf.mxu3  ;;  %v6757_v47 = vadd.f32 %v6756_v53, %v6648_v5  ;;  %v17082_v53 = vand.u32 4294901760, %v15202_v29  ;;  %v15215_v48 = vsub.f32 %v7465_v39, %v15204_v6  ;;  %7470 = vmatpush.msrb.mxu2 %v15204_v6  ;;  %v6654_v5 = vadd.f32 %v15056_v30, %v6578_v24  ;;  %v7462_v24 = vld [vmem:[%s16959_s4 + $0x58] sm:$0xff] }
 0x834   : >> { %17373 = vst [vmem:[#allocation25_spill] sm:$0xff] %v15177_v35  ;;  %v7020_v30 = vadd.f32 %v15130_v41, %v6903_v26  ;;  %v15251_v35 = vsub.f32 %v7463_v27, %v15236_v62  ;;  %v6583_v41 = vadd.f32 %v15074_v15, %v6498_v25  ;;  %v15271_v25 = vmul.f32 2.0, %v14769_v57 }
 0x835   : >> { %v6822_v3 = vadd.f32 %v6821_v9, %v6757_v47  ;;  %v7567_v39 = vsub.f32 %v15202_v29, %v17082_v53  ;;  %7472 = vmatpush.msrb.mxu2 %v15217_v14  ;;  %7698 = vmatpush.msra.mxu0 %v15215_v48  ;;  %v6761_v4 = vadd.f32 %v6760_v43, %v6654_v5  ;;  %v15257_v5 = vand.u32 4294901760, %v7462_v24 }
 0x836   : >> { %v17086_v9 = vand.u32 4294901760, %v15251_v35 }
 0x837   : >> { %7474 = vmatpush.msrb.mxu2 %v15236_v62  ;;  %v6911_v43 = vadd.f32 %v15134_v50, %v6822_v3  ;;  %17379 = vst [vmem:[#allocation23_spill] sm:$0xff] %v15257_v5  ;;  %v6826_v15 = vadd.f32 %v15136_v63, %v6761_v4  ;;  %v7460_v3 = vld [vmem:[%s16959_s4 + $0x48] sm:$0xff]  ;;  %v6660_v4 = vadd.f32 %v15070_v33, %v6583_v41  ;;  %v7459_v41 = vld [vmem:[%s16959_s4 + $0x40] sm:$0xff] }
 0x838   : >> { %v15185_v16 = vpop.f32.mrf.mxu0  ;;  %v15286_v57 = vand.u32 4294901760, %v7460_v3 }
 0x839   : >> { %v15183_v37 = vpop.f32.mrf.mxu2  ;;  %17375 = vst [vmem:[#allocation16_spill] sm:$0xff] %v15185_v16  ;;  %v17083_v16 = vand.u32 4294901760, %v15215_v48  ;;  %7476 = vmatpush.msrb.mxu2 %v15257_v5 }
 0x83a   : >> { %17374 = vst [vmem:[#allocation18_spill] sm:$0xff] %v15183_v37  ;;  %v15191_v28 = vpop.f32.mrf.mxu1 }
 0x83b   : >> { %17376 = vst [vmem:[#allocation27_spill] sm:$0xff] %v15191_v28  ;;  %v15193_v11 = vpop.f32.mrf.mxu3  ;;  %v7573_v37 = vsub.f32 %v15215_v48, %v17083_v16 }
 0x83c   : >> { %17377 = vst [vmem:[#allocation31_spill] sm:$0xff] %v15193_v11  ;;  %v15234_v11 = vsub.f32 %v7464_v40, %v15217_v14  ;;  %v7568_v40 = vand.u32 4294901760, %v7567_v39  ;;  %v7461_v39 = vld [vmem:[%s16959_s4 + $0x50] sm:$0xff] }
 0x83d   : >> { %v7574_v16 = vand.u32 4294901760, %v7573_v37  ;;  %v15266_v62 = vand.u32 4294901760, %v7461_v39  ;;  %v15274_v37 = vsub.f32 %v7462_v24, %v15257_v5  ;;  %17381 = vst [vmem:[#allocation19_spill] sm:$0xff] %v15286_v57 }
 0x83e   : >> { %v17087_v28 = vand.u32 4294901760, %v15234_v11  ;;  %7701 = vmatpush.msra.mxu0 %v15234_v11  ;;  %7569 = vmatpush.msrb.mxu3 %v7568_v40  ;;  %v7412_v40 = vld [vmem:[%s10135_s29 + $0x78] sm:$0xff] }
 0x83f   : >> { %17380 = vst [vmem:[#allocation13_spill] sm:$0xff] %v15266_v62  ;;  %v15284_v63 = vsub.f32 %v7461_v39, %v15266_v62  ;;  %7478 = vmatpush.msrb.mxu2 %v15266_v62  ;;  %v7024_v39 = vadd.f32 %v15132_v7, %v6911_v43  ;;  %7413 = vmatpush.msrb.mxu1 %v7412_v40 }
 0x840   : >> { %v7295_v17 = vpop.f32.mrf.mxu0  ;;  %v7579_v27 = vsub.f32 %v15234_v11, %v17087_v28  ;;  %7704 = vmatpush.msra.mxu0 %v15251_v35  ;;  %7575 = vmatpush.msrb.mxu3 %v7574_v16  ;;  %v17088_v16 = vand.u32 4294901760, %v15274_v37  ;;  %v6919_v7 = vadd.f32 %v15140_v13, %v6826_v15  ;;  %v7410_v28 = vld [vmem:[%s10135_s29 + $0x68] sm:$0xff] }
 0x841   : >> { %v7151_v42 = vpop.f32.mrf.mxu2  ;;  %7480 = vmatpush.msrb.mxu2 %v15286_v57 }
 0x842   : >> { %v7085_v47 = vpop.f32.mrf.mxu1  ;;  %7707 = vmatpush.msra.mxu0 %v15274_v37 }
 0x843   : >> { %v7238_v53 = vpop.f32.mrf.mxu3  ;;  %v7086_v26 = vadd.f32 %v7085_v47, %v7020_v30  ;;  %v7580_v30 = vand.u32 4294901760, %v7579_v27  ;;  %v7585_v47 = vsub.f32 %v15251_v35, %v17086_v9  ;;  %v7350_v27 = vld [vmem:[%s16957_s2] sm:$0xff] }
 0x844   : >> { %7710 = vmatpush.msra.mxu0 %v15284_v63 }
 0x845   : >> { %v7152_v50 = vadd.f32 %v7151_v42, %v7086_v26  ;;  %v6502_v42 = vadd.f32 %v15081_v59, %v15085_v60  ;;  %v7411_v26 = vld [vmem:[%s10135_s29 + $0x70] sm:$0xff]  ;;  %7581 = vmatpush.msrb.mxu3 %v7580_v30  ;;  %v7586_v33 = vand.u32 4294901760, %v7585_v47  ;;  %v17096_v60 = vand.u32 4294901760, %v15284_v63  ;;  %v7458_v47 = vld [vmem:[%s16959_s4 + $0x38] sm:$0xff] }
 0x846   : >> { %v15314_v30 = vand.u32 4294901760, %v7459_v41  ;;  %7414 = vmatpush.msrb.mxu1 %v7411_v26 }
 0x847   : >> { %v7239_v24 = vadd.f32 %v7238_v53, %v7152_v50  ;;  %v15304_v53 = vsub.f32 %v7460_v3, %v15286_v57  ;;  %v7591_v50 = vsub.f32 %v15274_v37, %v17088_v16  ;;  %v6765_v3 = vadd.f32 %v15146_v44, %v6660_v4  ;;  %7587 = vmatpush.msrb.mxu3 %v7586_v33  ;;  %v7457_v44 = vld [vmem:[%s16959_s4 + $0x30] sm:$0xff]  ;;  %v15336_v4 = vld [vmem:[#allocation2 + $0x8] sm:$0xff] }
 0x848   : >> { %v15300_v59 = vpop.f32.mrf.mxu0  ;;  %v15329_v57 = vsub.f32 %v7459_v41, %v15314_v30  ;;  %7482 = vmatpush.msrb.mxu2 %v15314_v30  ;;  %7415 = vmatpush.msrb.mxu1 %v7410_v28  ;;  %v15344_v33 = vand.u32 4294901760, %v7457_v44  ;;  %v17382_v41 = vsub.f32 %v15208_v52, %v15227_v32  ;;  %v7343_v28 = vsub.f32 %v15271_v25, %v15336_v4  ;;  %v7456_v52 = vld [vmem:[%s16959_s4 + $0x28] sm:$0xff] }
 0x849   : >> { %v7157_v9 = vpop.f32.mrf.mxu2  ;;  %v7296_v43 = vadd.f32 %v7295_v17, %v7239_v24  ;;  %v7597_v17 = vsub.f32 %v15284_v63, %v17096_v60  ;;  %v17095_v15 = vand.u32 4294901760, %v15304_v53  ;;  %v15326_v24 = vand.u32 4294901760, %v7458_v47  ;;  %7713 = vmatpush.msra.mxu0 %v15304_v53 }
 0x84a   : >> { %v7090_v40 = vpop.f32.mrf.mxu1  ;;  %v7592_v5 = vand.u32 4294901760, %v7591_v50  ;;  %v15356_v60 = vsub.f32 %v7457_v44, %v15344_v33  ;;  %v15370_v25 = vand.u32 4294901760, %v7456_v52 }
 0x84b   : >> { %v7242_v13 = vpop.f32.mrf.mxu3  ;;  %v7358_v16 = vmul.f32 %v7350_v27, %v7296_v43  ;;  %v7091_v62 = vadd.f32 %v7090_v40, %v7024_v39  ;;  %v7598_v26 = vand.u32 4294901760, %v7597_v17  ;;  %v7603_v39 = vsub.f32 %v15304_v53, %v17095_v15  ;;  %7484 = vmatpush.msrb.mxu2 %v15326_v24  ;;  %7716 = vmatpush.msra.mxu0 %v15329_v57 }
 0x84c   : >> { %v15342_v27 = vsub.f32 %v7458_v47, %v15326_v24  ;;  %7593 = vmatpush.msrb.mxu3 %v7592_v5  ;;  %v7608_v40 = vand.u32 4294901760, %v15329_v57  ;;  %v6588_v47 = vadd.f32 %v15087_v1, %v6502_v42  ;;  %v7408_v1 = vld [vmem:[%s10135_s29 + $0x58] sm:$0xff]  ;;  %v7028_v42 = vadd.f32 %v15138_v36, %v6919_v7  ;;  %v7455_v36 = vld [vmem:[%s16959_s4 + $0x20] sm:$0xff] }
 0x84d   : >> { %v7366_v43 = vadd.f32 %v7358_v16, %v17382_v41  ;;  %v7158_v50 = vadd.f32 %v7157_v9, %v7091_v62  ;;  %v7604_v17 = vand.u32 4294901760, %v7603_v39  ;;  %v15363_v62 = vmul.f32 2.0, %v14783_v58  ;;  %v7409_v9 = vld [vmem:[%s10135_s29 + $0x60] sm:$0xff]  ;;  %7486 = vmatpush.msrb.mxu2 %v15344_v33  ;;  %v7351_v58 = vld [vmem:[%s16957_s2 + $0x8] sm:$0xff] }
 0x84e   : >> { %v17097_v15 = vand.u32 4294901760, %v15342_v27  ;;  %7599 = vmatpush.msrb.mxu3 %v7598_v26  ;;  %v7609_v5 = vsub.f32 %v15329_v57, %v7608_v40  ;;  %v6830_v16 = vadd.f32 %v15142_v51, %v6765_v3  ;;  %7416 = vmatpush.msrb.mxu1 %v7409_v9  ;;  %v17098_v26 = vand.u32 4294901760, %v15356_v60  ;;  %v7407_v3 = vld [vmem:[%s10135_s29 + $0x50] sm:$0xff] }
 0x84f   : >> { %7374 = vst [vmem:[#allocation2] sm:$0xff] %v7366_v43  ;;  %v7243_v32 = vadd.f32 %v7242_v13, %v7158_v50  ;;  %7719 = vmatpush.msra.mxu0 %v15342_v27  ;;  %v15391_v39 = vsub.f32 %v7456_v52, %v15370_v25  ;;  %v15393_v41 = vand.u32 4294901760, %v7455_v36  ;;  %7488 = vmatpush.msrb.mxu2 %v15370_v25  ;;  %v7454_v52 = vld [vmem:[%s16959_s4 + $0x18] sm:$0xff]  ;;  %v17400_v57 = vld [vmem:[#allocation13_spill] sm:$0xff] }
 0x850   : >> { %v15378_v44 = vpop.f32.mrf.mxu0  ;;  %v7615_v4 = vsub.f32 %v15342_v27, %v17097_v15  ;;  %7605 = vmatpush.msrb.mxu3 %v7604_v17  ;;  %v7610_v7 = vand.u32 4294901760, %v7609_v5  ;;  %v6506_v43 = vadd.f32 %v15094_v49, %v15098_v12  ;;  %v6666_v50 = vadd.f32 %v15083_v45, %v6588_v47  ;;  %7417 = vmatpush.msrb.mxu1 %v7408_v1  ;;  %v7406_v49 = vld [vmem:[%s10135_s29 + $0x48] sm:$0xff] }
 0x851   : >> { %v7163_v13 = vpop.f32.mrf.mxu2  ;;  %v7300_v51 = vadd.f32 %v15300_v59, %v7243_v32  ;;  %v7621_v17 = vsub.f32 %v15356_v60, %v17098_v26  ;;  %7722 = vmatpush.msra.mxu0 %v15356_v60  ;;  %v7626_v45 = vand.u32 4294901760, %v15391_v39  ;;  %v15409_v12 = vsub.f32 %v7455_v36, %v15393_v41  ;;  %7490 = vmatpush.msrb.mxu2 %v15393_v41 }
 0x852   : >> { %v7095_v9 = vpop.f32.mrf.mxu1  ;;  %v7616_v59 = vand.u32 4294901760, %v7615_v4  ;;  %7611 = vmatpush.msrb.mxu3 %v7610_v7  ;;  %v6927_v47 = vadd.f32 %v15148_v34, %v6830_v16  ;;  %v6769_v1 = vadd.f32 %v15154_v31, %v6666_v50  ;;  %7418 = vmatpush.msrb.mxu1 %v7407_v3  ;;  %v15414_v26 = vand.u32 4294901760, %v7454_v52 }
 0x853   : >> { %v7246_v15 = vpop.f32.mrf.mxu3  ;;  %v7359_v32 = vmul.f32 %v7351_v58, %v7300_v51  ;;  %v7096_v5 = vadd.f32 %v7095_v9, %v7028_v42  ;;  %v7622_v4 = vand.u32 4294901760, %v7621_v17  ;;  %v7453_v42 = vld [vmem:[%s16959_s4 + $0x10] sm:$0xff]  ;;  %7725 = vmatpush.msra.mxu0 %v15391_v39  ;;  %v7627_v34 = vsub.f32 %v15391_v39, %v7626_v45  ;;  %v7405_v9 = vld [vmem:[%s10135_s29 + $0x40] sm:$0xff] }
 0x854   : >> { %v7336_v51 = vld [vmem:[#allocation2 + $0x10] sm:$0xff]  ;;  %7617 = vmatpush.msrb.mxu3 %v7616_v59  ;;  %v17099_v31 = vand.u32 4294901760, %v15409_v12  ;;  %v6593_v16 = vadd.f32 %v15100_v22, %v6506_v43  ;;  %7419 = vmatpush.msrb.mxu1 %v7406_v49  ;;  %v15427_v3 = vsub.f32 %v7454_v52, %v15414_v26  ;;  %v7404_v22 = vld [vmem:[%s10135_s29 + $0x38] sm:$0xff]  ;;  %v7032_v17 = vadd.f32 %v15144_v56, %v6927_v47 }
 0x855   : >> { %v7367_v58 = vadd.f32 %v7359_v32, %v7343_v28  ;;  %v7164_v36 = vadd.f32 %v7163_v13, %v7096_v5  ;;  %v7344_v7 = vsub.f32 %v15363_v62, %v7336_v51  ;;  %v15429_v28 = vand.u32 4294901760, %v7453_v42  ;;  %v7452_v13 = vld [vmem:[%s16959_s4 + $0x8] sm:$0xff]  ;;  %7492 = vmatpush.msrb.mxu2 %v15414_v26  ;;  %7728 = vmatpush.msra.mxu0 %v15409_v12  ;;  %v7403_v47 = vld [vmem:[%s10135_s29 + $0x30] sm:$0xff] }
 0x856   : >> { %7623 = vmatpush.msrb.mxu3 %v7622_v4  ;;  %v7628_v59 = vand.u32 4294901760, %v7627_v34  ;;  %v7633_v62 = vsub.f32 %v15409_v12, %v17099_v31  ;;  %v15440_v43 = vand.u32 4294901760, %v7452_v13  ;;  %v6834_v52 = vadd.f32 %v15150_v23, %v6769_v1  ;;  %7420 = vmatpush.msrb.mxu1 %v7405_v9 }
 0x857   : >> { %7375 = vst [vmem:[#allocation2 + $0x8] sm:$0xff] %v7367_v58  ;;  %v7247_v50 = vadd.f32 %v7246_v15, %v7164_v36  ;;  %v7352_v15 = vld [vmem:[%s16957_s2 + $0x10] sm:$0xff]  ;;  %v7638_v49 = vand.u32 4294901760, %v15427_v3  ;;  %v15450_v4 = vsub.f32 %v7453_v42, %v15429_v28  ;;  %v7451_v58 = vld [vmem:[%s16959_s4] sm:$0xff]  ;;  %7494 = vmatpush.msrb.mxu2 %v15429_v28  ;;  %7731 = vmatpush.msra.mxu0 %v15427_v3 }
 0x858   : >> { %v7307_v5 = vpop.f32.mrf.mxu0  ;;  %7629 = vmatpush.msrb.mxu3 %v7628_v59  ;;  %v7634_v23 = vand.u32 4294901760, %v7633_v62  ;;  %v15459_v1 = vsub.f32 %v7452_v13, %v15440_v43  ;;  %v15461_v36 = vand.u32 4294901760, %v7451_v58  ;;  %v6510_v42 = vadd.f32 %v15107_v61, %v15111_v10  ;;  %7421 = vmatpush.msrb.mxu1 %v7404_v22  ;;  %v7402_v62 = vld [vmem:[%s10135_s29 + $0x28] sm:$0xff] }
 0x859   : >> { %v7169_v32 = vpop.f32.mrf.mxu2  ;;  %v7304_v56 = vadd.f32 %v15378_v44, %v7247_v50  ;;  %v6672_v51 = vadd.f32 %v15096_v54, %v6593_v16  ;;  %v7639_v44 = vsub.f32 %v15427_v3, %v7638_v49  ;;  %v7644_v50 = vand.u32 4294901760, %v15450_v4  ;;  %7496 = vmatpush.msrb.mxu2 %v15440_v43  ;;  %7734 = vmatpush.msra.mxu0 %v15450_v4 }
 0x85a   : >> { %v7100_v34 = vpop.f32.mrf.mxu1  ;;  %7635 = vmatpush.msrb.mxu3 %v7634_v23  ;;  %v7650_v31 = vand.u32 4294901760, %v15459_v1  ;;  %v15475_v61 = vsub.f32 %v7451_v58, %v15461_v36  ;;  %v6935_v54 = vadd.f32 %v15156_v0, %v6834_v52  ;;  %7422 = vmatpush.msrb.mxu1 %v7403_v47  ;;  %v6598_v52 = vadd.f32 %v15113_v18, %v6510_v42  ;;  %v7401_v47 = vld [vmem:[%s10135_s29 + $0x20] sm:$0xff]  ;;  %v7353_v42 = vld [vmem:[%s16957_s2 + $0x18] sm:$0xff] }
 0x85b   : >> { %v7250_v9 = vpop.f32.mrf.mxu3  ;;  %v7360_v13 = vmul.f32 %v7352_v15, %v7304_v56  ;;  %v7101_v59 = vadd.f32 %v7100_v34, %v7032_v17  ;;  %v6773_v10 = vadd.f32 %v15162_v55, %v6672_v51  ;;  %v7640_v16 = vand.u32 4294901760, %v7639_v44  ;;  %7498 = vmatpush.msrb.mxu2 %v15461_v36  ;;  %7737 = vmatpush.msra.mxu0 %v15459_v1  ;;  %v9973_v56 = vld [vmem:[#allocation3 + $0x18] sm:$0xff] }
 0x85c   : >> { %v7645_v22 = vsub.f32 %v15450_v4, %v7644_v50  ;;  %v7651_v58 = vsub.f32 %v15459_v1, %v7650_v31  ;;  %v7656_v0 = vand.u32 4294901760, %v15475_v61  ;;  %v17383_v55 = vand.u32 4294901760, %v15202_v29  ;;  %7423 = vmatpush.msrb.mxu1 %v7402_v62  ;;  %v7400_v34 = vld [vmem:[%s10135_s29 + $0x18] sm:$0xff] }
 0x85d   : >> { %v7368_v17 = vadd.f32 %v7360_v13, %v7344_v7  ;;  %v7170_v15 = vadd.f32 %v7169_v32, %v7101_v59  ;;  %v7329_v23 = vmul.f32 2.0, %v9973_v56  ;;  %7641 = vmatpush.msrb.mxu3 %v7640_v16  ;;  %v17384_v44 = vand.u32 4294901760, %v15215_v48  ;;  %7740 = vmatpush.msra.mxu0 %v15475_v61  ;;  %v7337_v16 = vld [vmem:[#allocation2 + $0x18] sm:$0xff]  ;;  %v7399_v48 = vld [vmem:[%s10135_s29 + $0x10] sm:$0xff] }
 0x85e   : >> { %7866 = vmatpush.msra.mxu2 %v17383_v55  ;;  %v7646_v7 = vand.u32 4294901760, %v7645_v22  ;;  %v7652_v51 = vand.u32 4294901760, %v7651_v58  ;;  %v7657_v29 = vsub.f32 %v15475_v61, %v7656_v0  ;;  %v6838_v18 = vadd.f32 %v15158_v46, %v6773_v10  ;;  %7424 = vmatpush.msrb.mxu1 %v7401_v47  ;;  %v17386_v55 = vld [vmem:[#allocation22_spill] sm:$0xff] }
 0x85f   : >> { %7376 = vst [vmem:[#allocation2 + $0x10] sm:$0xff] %v7368_v17  ;;  %v7251_v32 = vadd.f32 %v7250_v9, %v7170_v15  ;;  %v7036_v59 = vadd.f32 %v15152_v19, %v6935_v54  ;;  %v17385_v17 = vand.u32 4294901760, %v15234_v11  ;;  %v7345_v15 = vsub.f32 %v7329_v23, %v7337_v16  ;;  %v7398_v19 = vld [vmem:[%s10135_s29 + $0x8] sm:$0xff]  ;;  %v17388_v54 = vld [vmem:[#allocation29_spill] sm:$0xff]  ;;  %v9977_v1 = vld [vmem:[#allocation3 + $0x38] sm:$0xff] }
 0x860   : >> { %7870 = vmatpush.msra.mxu2 %v17384_v44  ;;  %v7311_v13 = vpop.f32.mrf.mxu0  ;;  %7647 = vmatpush.msrb.mxu3 %v7646_v7  ;;  %v7658_v22 = vand.u32 4294901760, %v7657_v29  ;;  %v6514_v58 = vadd.f32 %v15120_v38, %v15124_v21  ;;  %v6678_v56 = vadd.f32 %v17386_v55, %v6598_v52  ;;  %v17389_v38 = vand.u32 4294901760, %v15274_v37  ;;  %v17390_v21 = vld [vmem:[#allocation24_spill] sm:$0xff] }
 0x861   : >> { %v7175_v9 = vpop.f32.mrf.mxu2  ;;  %v7308_v62 = vadd.f32 %v7307_v5, %v7251_v32  ;;  %7425 = vmatpush.msrb.mxu1 %v7400_v34  ;;  %v17387_v5 = vand.u32 4294901760, %v15251_v35  ;;  %v6943_v32 = vadd.f32 %v17388_v54, %v6838_v18  ;;  %v9974_v34 = vld [vmem:[#allocation3 + $0x20] sm:$0xff]  ;;  %v17391_v44 = vand.u32 4294901760, %v15284_v63  ;;  %v17392_v37 = vld [vmem:[#allocation12_spill] sm:$0xff] }
 0x862   : >> { %7874 = vmatpush.msra.mxu2 %v17385_v17  ;;  %v7105_v46 = vpop.f32.mrf.mxu1  ;;  %7653 = vmatpush.msrb.mxu3 %v7652_v51  ;;  %v6777_v11 = vadd.f32 %v15175_v8, %v6678_v56  ;;  %v6603_v52 = vadd.f32 %v17390_v21, %v6514_v58  ;;  %v7330_v29 = vmul.f32 2.0, %v9974_v34  ;;  %v7354_v8 = vld [vmem:[%s16957_s2 + $0x20] sm:$0xff]  ;;  %v17393_v63 = vand.u32 4294901760, %v15304_v53  ;;  %v17395_v56 = vld [vmem:[#allocation21_spill] sm:$0xff] }
 0x863   : >> { %v7254_v10 = vpop.f32.mrf.mxu3  ;;  %v7361_v7 = vmul.f32 %v7353_v42, %v7308_v62  ;;  %v7106_v47 = vadd.f32 %v7105_v46, %v7036_v59  ;;  %7426 = vmatpush.msrb.mxu1 %v7399_v48  ;;  %v7397_v42 = vld [vmem:[%s10135_s29] sm:$0xff] }
 0x864   : >> { %7878 = vmatpush.msra.mxu2 %v17387_v5  ;;  %7659 = vmatpush.msrb.mxu3 %v7658_v22  ;;  %v6842_v59 = vadd.f32 %v15169_v2, %v6777_v11  ;;  %v7338_v22 = vld [vmem:[#allocation2 + $0x20] sm:$0xff]  ;;  %v17396_v2 = vld [vmem:[#allocation25_spill] sm:$0xff]  ;;  %v17399_v5 = vand.u32 4294901760, %v15342_v27 }
 0x865   : >> { %v7369_v23 = vadd.f32 %v7361_v7, %v7345_v15  ;;  %v7176_v51 = vadd.f32 %v7175_v9, %v7106_v47  ;;  %7427 = vmatpush.msrb.mxu1 %v7398_v19  ;;  %v7040_v9 = vadd.f32 %v17392_v37, %v6943_v32  ;;  %v17394_v15 = vld [vmem:[#allocation14_spill] sm:$0xff]  ;;  %v17397_v7 = vld [vmem:[#allocation27_spill] sm:$0xff] }
 0x866   : >> { %7961 = vmatpush.msra.mxu3 %v15195_v20  ;;  %7882 = vmatpush.msra.mxu2 %v17389_v38  ;;  %v6684_v46 = vadd.f32 %v17394_v15, %v6603_v52  ;;  %v17398_v53 = vld [vmem:[#allocation23_spill] sm:$0xff] }
 0x867   : >> { %7377 = vst [vmem:[#allocation2 + $0x18] sm:$0xff] %v7369_v23  ;;  %v7255_v35 = vadd.f32 %v7254_v10, %v7176_v51  ;;  %7428 = vmatpush.msrb.mxu1 %v7397_v42  ;;  %v7346_v10 = vsub.f32 %v7330_v29, %v7338_v22  ;;  %v17401_v23 = vand.u32 4294901760, %v15356_v60  ;;  %v17403_v51 = vld [vmem:[#allocation18_spill] sm:$0xff]  ;;  %v17404_v52 = vld [vmem:[#allocation19_spill] sm:$0xff]  ;;  %v17405_v42 = vand.u32 4294901760, %v15409_v12  ;;  %v7356_v12 = vld [vmem:[%s16957_s2 + $0x30] sm:$0xff] }
 0x868   : >> { %7963 = vmatpush.msra.mxu3 %v15204_v6  ;;  %7886 = vmatpush.msra.mxu2 %v17391_v44  ;;  %v7315_v16 = vpop.f32.mrf.mxu0  ;;  %v6781_v47 = vadd.f32 %v17397_v7, %v6684_v46  ;;  %v17406_v37 = vld [vmem:[#allocation31_spill] sm:$0xff]  ;;  %v17407_v22 = vld [vmem:[#allocation16_spill] sm:$0xff] }
 0x869   : >> { %v7181_v18 = vpop.f32.mrf.mxu2  ;;  %v7312_v62 = vadd.f32 %v7311_v13, %v7255_v35  ;;  %7783 = vmatpush.msra.mxu1 %v15195_v20  ;;  %v6951_v13 = vadd.f32 %v17396_v2, %v6842_v59  ;;  %v7339_v35 = vld [vmem:[#allocation2 + $0x28] sm:$0xff]  ;;  %v7392_v2 = vstv %s7389_s30  ;;  %s9909_s30 = sshll.u32 %s8561_s24, 7  ;;  %s9738_s24 = sadd.s32 %s10111_s0, %s9736_s19 }
 0x86a   : >> { %7965 = vmatpush.msra.mxu3 %v15217_v14  ;;  %v7110_v48 = vpop.f32.mrf.mxu1  ;;  %7890 = vmatpush.msra.mxu2 %v17393_v63  ;;  %v6846_v38 = vadd.f32 %v17403_v51, %v6781_v47  ;;  %s8565_s11 = sadd.s32 %s9909_s30, %s8564_s10  ;;  %s9910_s30 = sshll.u32 %s9738_s24, 7 }
 0x86b   : >> { %v7258_v17 = vpop.f32.mrf.mxu3  ;;  %v7362_v58 = vmul.f32 %v7354_v8, %v7312_v62  ;;  %v7111_v55 = vadd.f32 %v7110_v48, %v7040_v9  ;;  %7785 = vmatpush.msra.mxu1 %v15204_v6  ;;  %v9975_v6 = vld [vmem:[#allocation3 + $0x28] sm:$0xff]  ;;  %v7340_v48 = vld [vmem:[#allocation2 + $0x30] sm:$0xff]  ;;  %s8566_s17 = sld [smem:[#allocation8 + %s8565_s11]]  ;;  %s9741_s10 = sand.u32 127, %s8611_s18 }
 0x86c   : >> { %7967 = vmatpush.msra.mxu3 %v17395_v56  ;;  %7894 = vmatpush.msra.mxu2 %v7608_v40  ;;  %v7331_v32 = vmul.f32 2.0, %v9975_v6  ;;  %v7355_v40 = vld [vmem:[%s16957_s2 + $0x28] sm:$0xff]  ;;  %v6959_v9 = vadd.f32 %v17406_v37, %v6846_v38  ;;  %s9742_s11 = sadd.s32 %s9910_s30, %s9741_s10 }
 0x86d   : >> { %v7370_v20 = vadd.f32 %v7362_v58, %v7346_v10  ;;  %v7182_v19 = vadd.f32 %v7181_v18, %v7111_v55  ;;  %7787 = vmatpush.msra.mxu1 %v15217_v14  ;;  %v17402_v14 = vld [vmem:[#allocation28_spill] sm:$0xff]  ;;  %v7333_v58 = vmul.f32 2.0, %v9977_v1 }
 0x86e   : >> { %7969 = vmatpush.msra.mxu3 %v17398_v53  ;;  %7898 = vmatpush.msra.mxu2 %v17399_v5  ;;  %v7044_v27 = vadd.f32 %v17402_v14, %v6951_v13  ;;  %v7347_v44 = vsub.f32 %v7331_v32, %v7339_v35  ;;  %v7048_v3 = vadd.f32 %v17407_v22, %v6959_v9 }
 0x86f   : >> { %7378 = vst [vmem:[#allocation2 + $0x20] sm:$0xff] %v7370_v20  ;;  %v7259_v54 = vadd.f32 %v7258_v17, %v7182_v19  ;;  %7789 = vmatpush.msra.mxu1 %v17395_v56 }
 0x870   : >> { %7971 = vmatpush.msra.mxu3 %v17400_v57  ;;  %7902 = vmatpush.msra.mxu2 %v17401_v23  ;;  %v7319_v18 = vpop.f32.mrf.mxu0 }
 0x871   : >> { %v7187_v11 = vpop.f32.mrf.mxu2  ;;  %v7316_v21 = vadd.f32 %v7315_v16, %v7259_v54  ;;  %7791 = vmatpush.msra.mxu1 %v17398_v53 }
 0x872   : >> { %7973 = vmatpush.msra.mxu3 %v17404_v52  ;;  %v7115_v34 = vpop.f32.mrf.mxu1  ;;  %7906 = vmatpush.msra.mxu2 %v7626_v45  ;;  %v9976_v45 = vld [vmem:[#allocation3 + $0x30] sm:$0xff] }
 0x873   : >> { %v7262_v29 = vpop.f32.mrf.mxu3  ;;  %v7363_v60 = vmul.f32 %v7355_v40, %v7316_v21  ;;  %v7116_v8 = vadd.f32 %v7115_v34, %v7044_v27  ;;  %7793 = vmatpush.msra.mxu1 %v17400_v57  ;;  %v7332_v16 = vmul.f32 2.0, %v9976_v45 }
 0x874   : >> { %7975 = vmatpush.msra.mxu3 %v15314_v30  ;;  %7910 = vmatpush.msra.mxu2 %v17405_v42 }
 0x875   : >> { %v7371_v59 = vadd.f32 %v7363_v60, %v7347_v44  ;;  %v7188_v62 = vadd.f32 %v7187_v11, %v7116_v8  ;;  %7795 = vmatpush.msra.mxu1 %v17404_v52 }
 0x876   : >> { %7977 = vmatpush.msra.mxu3 %v15326_v24  ;;  %7914 = vmatpush.msra.mxu2 %v7638_v49 }
 0x877   : >> { %7379 = vst [vmem:[#allocation2 + $0x28] sm:$0xff] %v7371_v59  ;;  %v7263_v39 = vadd.f32 %v7262_v29, %v7188_v62  ;;  %7797 = vmatpush.msra.mxu1 %v15314_v30  ;;  %v7348_v30 = vsub.f32 %v7332_v16, %v7340_v48 }
 0x878   : >> { %7979 = vmatpush.msra.mxu3 %v15344_v33  ;;  %7918 = vmatpush.msra.mxu2 %v7644_v50 }
 0x879   : >> { %v7320_v49 = vadd.f32 %v7319_v18, %v7263_v39  ;;  %v7193_v63 = vpop.f32.mrf.mxu2  ;;  %7799 = vmatpush.msra.mxu1 %v15326_v24  ;;  %v7323_v24 = vpop.f32.mrf.mxu0 }
 0x87a   : >> { %7981 = vmatpush.msra.mxu3 %v15370_v25  ;;  %v7120_v17 = vpop.f32.mrf.mxu1  ;;  %7922 = vmatpush.msra.mxu2 %v7650_v31 }
 0x87b   : >> { %v7364_v15 = vmul.f32 %v7356_v12, %v7320_v49  ;;  %v7121_v4 = vadd.f32 %v7120_v17, %v7048_v3  ;;  %v7266_v50 = vpop.f32.mrf.mxu3  ;;  %7801 = vmatpush.msra.mxu1 %v15344_v33  ;;  %v7357_v33 = vld [vmem:[%s16957_s2 + $0x38] sm:$0xff] }
 0x87c   : >> { %7983 = vmatpush.msra.mxu3 %v15393_v41  ;;  %7926 = vmatpush.msra.mxu2 %v7656_v0 }
 0x87d   : >> { %v7372_v46 = vadd.f32 %v7364_v15, %v7348_v30  ;;  %v7194_v10 = vadd.f32 %v7193_v63, %v7121_v4  ;;  %7803 = vmatpush.msra.mxu1 %v15370_v25  ;;  %v7341_v25 = vld [vmem:[#allocation2 + $0x38] sm:$0xff] }
 0x87e   : >> { %7985 = vmatpush.msra.mxu3 %v15414_v26  ;;  %v7349_v0 = vsub.f32 %v7333_v58, %v7341_v25 }
 0x87f   : >> { %7380 = vst [vmem:[#allocation2 + $0x30] sm:$0xff] %v7372_v46  ;;  %v7267_v31 = vadd.f32 %v7266_v50, %v7194_v10  ;;  %7805 = vmatpush.msra.mxu1 %v15393_v41  ;;  %v7391_v41 = vld [vmem:[%s10130_s25] sm:$0x1] }
 0x880   : >> { %7987 = vmatpush.msra.mxu3 %v15429_v28  ;;  %v7393_v13 = vmul.f32 %v7392_v2, %v7391_v41  ;;  %v7445_v41 = vld [vmem:[%s16958_s3 + $0x10] sm:$0xff] }
 0x881   : >> { %v7324_v61 = vadd.f32 %v7323_v24, %v7267_v31  ;;  %7807 = vmatpush.msra.mxu1 %v15414_v26  ;;  %v7443_v24 = vld [vmem:[%s16958_s3] sm:$0xff]  ;;  %v8032_v2 = vsel %vm957_vm0, %v7445_v41, 0 }
 0x882   : >> { %7989 = vmatpush.msra.mxu3 %v15440_v43  ;;  %v8026_v31 = vsel %vm957_vm0, %v7443_v24, 0 }
 0x883   : >> { %v7365_v55 = vmul.f32 %v7357_v33, %v7324_v61  ;;  %7809 = vmatpush.msra.mxu1 %v15429_v28  ;;  %v15741_v1 = vand.u32 4294901760, %v8026_v31  ;;  %v7444_v33 = vld [vmem:[%s16958_s3 + $0x8] sm:$0xff] }
 0x884   : >> { %7991 = vmatpush.msra.mxu3 %v15461_v36  ;;  %v8029_v61 = vsel %vm957_vm0, %v7444_v33, 0 }
 0x885   : >> { %v7373_v56 = vadd.f32 %v7365_v55, %v7349_v0  ;;  %7811 = vmatpush.msra.mxu1 %v15440_v43  ;;  %v15747_v58 = vsub.f32 %v8026_v31, %v15741_v1  ;;  %v15755_v0 = vand.u32 4294901760, %v8029_v61 }
 0x887   : >> { %7381 = vst [vmem:[#allocation2 + $0x38] sm:$0xff] %v7373_v56  ;;  %7813 = vmatpush.msra.mxu1 %v15461_v36  ;;  %v8075_v25 = vand.u32 4294901760, %v15747_v58  ;;  %v15764_v56 = vsub.f32 %v8029_v61, %v15755_v0 }
 0x889   : >> { %v8076_v55 = vsub.f32 %v15747_v58, %v8075_v25 }
 0x88e   : >> { %v7390_v7 = vld [vmem:[%s12144_s6] sm:$0x1] }
 0x88f   : >> { %v7394_v47 = vadd.f32 %v7393_v13, %v7390_v7  ;;  %v8077_v13 = vand.u32 4294901760, %v8076_v55  ;;  %v8083_v7 = vand.u32 4294901760, %v15764_v56 }
 0x891   : >> { %7395 = vst [vmem:[%s12144_s6] sm:$0x1] %v7394_v47  ;;  %v15772_v47 = vand.u32 4294901760, %v8032_v2 }
 0x898   : >> { %v7396_v20 = vld [vmem:[%s12149_s14] sm:$0x1]  ;;  %v7442_v19 = vld [vmem:[#allocation2 + $0x38] sm:$0xff]  ;;  %v7441_v43 = vld [vmem:[#allocation2 + $0x30] sm:$0xff] }
 0x899   : >> { %v15605_v26 = vld [vmem:[#allocation2] sm:$0xff]  ;;  %7429 = vmatmul.f32.vlgmr.msrb.gmra.mxu1 %v7396_v20  ;;  %v15610_v28 = vand.u32 4294901760, %v7442_v19  ;;  %v7440_v5 = vld [vmem:[#allocation2 + $0x28] sm:$0xff]  ;;  %v15612_v6 = vand.u32 4294901760, %v7441_v43  ;;  %v7438_v40 = vld [vmem:[#allocation2 + $0x18] sm:$0xff]  ;;  %v8084_v20 = vsub.f32 %v15764_v56, %v8083_v7 }
 0x89a   : >> { %v15608_v53 = vand.u32 4294901760, %v15605_v26  ;;  %v7439_v54 = vld [vmem:[#allocation2 + $0x20] sm:$0xff]  ;;  %v15614_v36 = vand.u32 4294901760, %v7440_v5  ;;  %v15618_v57 = vld [vmem:[#allocation2 + $0x8] sm:$0xff]  ;;  %v15632_v27 = vld [vmem:[#allocation2 + $0x10] sm:$0xff]  ;;  %v15635_v51 = vand.u32 4294901760, %v7438_v40 }
 0x89b   : >> { %v15616_v32 = vand.u32 4294901760, %v7439_v54  ;;  %8058 = vmatpush.msrb.mxu0 %v15610_v28  ;;  %v15627_v23 = vand.u32 4294901760, %v15618_v57  ;;  %v15630_v14 = vsub.f32 %v7442_v19, %v15610_v28  ;;  %v15638_v38 = vsub.f32 %v7441_v43, %v15612_v6  ;;  %v7446_v43 = vld [vmem:[%s16958_s3 + $0x18] sm:$0xff] }
 0x89c   : >> { %7661 = vmatmul.f32.vlgmr.msrb.gmra.mxu3 %v15608_v53  ;;  %v15624_v11 = vsub.f32 %v15605_v26, %v15608_v53  ;;  %v15641_v21 = vsub.f32 %v7440_v5, %v15614_v36  ;;  %v15656_v29 = vand.u32 4294901760, %v15632_v27  ;;  %v15675_v9 = vsub.f32 %v7438_v40, %v15635_v51 }
 0x89d   : >> { %8309 = vmatpush.msrb.mxu3 %v15610_v28  ;;  %v15648_v35 = vand.u32 4294901760, %v15630_v14  ;;  %v15651_v34 = vsub.f32 %v7439_v54, %v15616_v32  ;;  %8060 = vmatpush.msrb.mxu0 %v15612_v6  ;;  %v15659_v44 = vand.u32 4294901760, %v15638_v38  ;;  %v7508_v42 = vsub.f32 %v15618_v57, %v15627_v23 }
 0x89e   : >> { %7743 = vmatmul.f32.vlgmr.msra.gmra.mxu0 %v15624_v11  ;;  %v15645_v52 = vand.u32 4294901760, %v15624_v11  ;;  %v15662_v60 = vand.u32 4294901760, %v15641_v21  ;;  %v7516_v16 = vsub.f32 %v15632_v27, %v15656_v29  ;;  %v7525_v3 = vand.u32 4294901760, %v15675_v9 }
 0x89f   : >> { %8311 = vmatpush.msrb.mxu3 %v15612_v6  ;;  %v7558_v18 = vsub.f32 %v15630_v14, %v15648_v35  ;;  %8062 = vmatpush.msrb.mxu0 %v15614_v36  ;;  %v7550_v37 = vsub.f32 %v15638_v38, %v15659_v44  ;;  %v15681_v39 = vand.u32 4294901760, %v15651_v34  ;;  %v7509_v12 = vand.u32 4294901760, %v7508_v42 }
 0x8a0   : >> { %v7502_v8 = vsub.f32 %v15624_v11, %v15645_v52  ;;  %v7542_v45 = vsub.f32 %v15641_v21, %v15662_v60  ;;  %v7517_v17 = vand.u32 4294901760, %v7516_v16  ;;  %v7526_v30 = vsub.f32 %v15675_v9, %v7525_v3 }
 0x8a1   : >> { %8313 = vmatpush.msrb.mxu3 %v15614_v36  ;;  %7817 = vmatmul.f32.vlgmr.msra.gmra.mxu1 %v15645_v52  ;;  %v15678_v62 = vand.u32 4294901760, %v7558_v18  ;;  %v15692_v22 = vand.u32 4294901760, %v7550_v37  ;;  %v7534_v49 = vsub.f32 %v15651_v34, %v15681_v39  ;;  %v7510_v63 = vsub.f32 %v7508_v42, %v7509_v12 }
 0x8a2   : >> { %v7503_v59 = vand.u32 4294901760, %v7502_v8  ;;  %8064 = vmatpush.msrb.mxu0 %v15616_v32  ;;  %v15700_v48 = vand.u32 4294901760, %v7542_v45  ;;  %v7518_v4 = vsub.f32 %v7516_v16, %v7517_v17  ;;  %v7527_v46 = vand.u32 4294901760, %v7526_v30  ;;  %v7448_v8 = vld [vmem:[%s16958_s3 + $0x28] sm:$0xff] }
 0x8a3   : >> { %8315 = vmatpush.msrb.mxu3 %v15616_v32  ;;  %8151 = vmatpush.msrb.mxu1 %v15678_v62  ;;  %v7535_v15 = vand.u32 4294901760, %v7534_v49  ;;  %v7511_v50 = vand.u32 4294901760, %v7510_v63  ;;  %v15780_v19 = vsub.f32 %v8032_v2, %v15772_v47  ;;  %v8035_v5 = vsel %vm957_vm0, %v7446_v43, 0 }
 0x8a4   : >> { %7504 = vmatmul.f32.vlgmr.msrb.gmra.mxu2 %v7503_v59  ;;  %7665 = vmatmul.f32.gmra.mxu3 %v15627_v23  ;;  %v7519_v10 = vand.u32 4294901760, %v7518_v4  ;;  %v8085_v54 = vand.u32 4294901760, %v8084_v20  ;;  %v8041_v18 = vsel %vm957_vm0, %v7448_v8, 0 }
 0x8a5   : >> { %8066 = vmatpush.msrb.mxu0 %v15635_v51  ;;  %8237 = vmatpush.msrb.mxu2 %v15630_v14  ;;  %v8091_v40 = vand.u32 4294901760, %v15780_v19  ;;  %v15820_v37 = vand.u32 4294901760, %v8041_v18 }
 0x8a6   : >> { %8317 = vmatpush.msrb.mxu3 %v15635_v51  ;;  %7748 = vmatmul.f32.gmra.mxu0 %v7508_v42 }
 0x8a7   : >> { %8157 = vmatpush.msrb.mxu1 %v15692_v22  ;;  %8068 = vmatpush.msrb.mxu0 %v15656_v29 }
 0x8a8   : >> { %8240 = vmatpush.msrb.mxu2 %v15638_v38  ;;  %8319 = vmatpush.msrb.mxu3 %v15656_v29 }
 0x8a9   : >> { %8163 = vmatpush.msrb.mxu1 %v15700_v48  ;;  %8070 = vmatpush.msrb.mxu0 %v15627_v23 }
 0x8aa   : >> { %8243 = vmatpush.msrb.mxu2 %v15641_v21  ;;  %8321 = vmatpush.msrb.mxu3 %v15627_v23 }
 0x8ab   : >> { %7823 = vmatmul.f32.gmra.mxu1 %v7509_v12  ;;  %8072 = vmatpush.msrb.mxu0 %v15608_v53 }
 0x8ac   : >> { %8169 = vmatpush.msrb.mxu1 %v7535_v15  ;;  %8246 = vmatpush.msrb.mxu2 %v15651_v34 }
 0x8ad   : >> { %8323 = vmatpush.msrb.mxu3 %v15608_v53  ;;  %8384 = vmatpush.msra.mxu0 %v15648_v35 }
 0x8ae   : >> { %7512 = vmatmul.f32.gmra.mxu2 %v7511_v50  ;;  %7669 = vmatmul.f32.gmra.mxu3 %v15656_v29 }
 0x8af   : >> { %8175 = vmatpush.msrb.mxu1 %v7527_v46  ;;  %8249 = vmatpush.msrb.mxu2 %v15675_v9 }
 0x8b0   : >> { %8388 = vmatpush.msra.mxu0 %v15659_v44 }
 0x8b1   : >> { %7753 = vmatmul.f32.gmra.mxu0 %v7516_v16  ;;  %8181 = vmatpush.msrb.mxu1 %v7519_v10 }
 0x8b2   : >> { %8252 = vmatpush.msrb.mxu2 %v7516_v16  ;;  %8392 = vmatpush.msra.mxu0 %v15662_v60 }
 0x8b3   : >> { %8187 = vmatpush.msrb.mxu1 %v7511_v50 }
 0x8b4   : >> { %8255 = vmatpush.msrb.mxu2 %v7508_v42  ;;  %8396 = vmatpush.msra.mxu0 %v15681_v39 }
 0x8b5   : >> { %7829 = vmatmul.f32.gmra.mxu1 %v7517_v17 }
 0x8b6   : >> { %8193 = vmatpush.msrb.mxu1 %v7503_v59  ;;  %8258 = vmatpush.msrb.mxu2 %v15624_v11  ;;  %v15788_v11 = vand.u32 4294901760, %v8035_v5  ;;  %v15828_v59 = vsub.f32 %v8041_v18, %v15820_v37 }
 0x8b7   : >> { %8400 = vmatpush.msra.mxu0 %v7525_v3  ;;  %7520 = vmatmul.f32.gmra.mxu2 %v7519_v10 }
 0x8b8   : >> { %8455 = vmatpush.msra.mxu1 %v15610_v28  ;;  %7673 = vmatmul.f32.gmra.mxu3 %v15635_v51 }
 0x8b9   : >> { %8404 = vmatpush.msra.mxu0 %v7517_v17 }
 0x8ba   : >> { %8457 = vmatpush.msra.mxu1 %v15612_v6  ;;  %7758 = vmatmul.f32.gmra.mxu0 %v15675_v9 }
 0x8bb   : >> { %8408 = vmatpush.msra.mxu0 %v7509_v12 }
 0x8bc   : >> { %8459 = vmatpush.msra.mxu1 %v15614_v36 }
 0x8bd   : >> { %8412 = vmatpush.msra.mxu0 %v15645_v52  ;;  %7835 = vmatmul.f32.gmra.mxu1 %v7525_v3  ;;  %v7450_v3 = vld [vmem:[%s16958_s3 + $0x38] sm:$0xff] }
 0x8be   : >> { %8461 = vmatpush.msra.mxu1 %v15616_v32  ;;  %v8047_v49 = vsel %vm957_vm0, %v7450_v3, 0 }
 0x8bf   : >> { %7528 = vmatmul.f32.gmra.mxu2 %v7527_v46  ;;  %v15852_v17 = vand.u32 4294901760, %v8047_v49 }
 0x8c0   : >> { %8463 = vmatpush.msra.mxu1 %v15635_v51  ;;  %7677 = vmatmul.f32.gmra.mxu3 %v15616_v32 }
 0x8c1   : >> { %v15860_v30 = vsub.f32 %v8047_v49, %v15852_v17 }
 0x8c2   : >> { %8465 = vmatpush.msra.mxu1 %v15656_v29  ;;  %7763 = vmatmul.f32.gmra.mxu0 %v15651_v34 }
 0x8c3   : >> { %v8131_v4 = vand.u32 4294901760, %v15860_v30 }
 0x8c4   : >> { %8467 = vmatpush.msra.mxu1 %v15627_v23 }
 0x8c5   : >> { %7841 = vmatmul.f32.gmra.mxu1 %v15681_v39 }
 0x8c6   : >> { %8469 = vmatpush.msra.mxu1 %v15608_v53 }
 0x8c7   : >> { %7536 = vmatmul.f32.gmra.mxu2 %v7535_v15 }
 0x8c8   : >> { %7681 = vmatmul.f32.gmra.mxu3 %v15614_v36 }
 0x8ca   : >> { %7768 = vmatmul.f32.gmra.mxu0 %v15641_v21  ;;  %v7447_v21 = vld [vmem:[%s16958_s3 + $0x20] sm:$0xff] }
 0x8cb   : >> { %v8038_v52 = vsel %vm957_vm0, %v7447_v21, 0 }
 0x8cc   : >> { %v15804_v34 = vand.u32 4294901760, %v8038_v52 }
 0x8cd   : >> { %7847 = vmatmul.f32.gmra.mxu1 %v15662_v60 }
 0x8ce   : >> { %v15812_v60 = vsub.f32 %v8038_v52, %v15804_v34 }
 0x8cf   : >> { %7544 = vmatmul.f32.gmra.mxu2 %v15700_v48 }
 0x8d0   : >> { %7685 = vmatmul.f32.gmra.mxu3 %v15612_v6 }
 0x8d2   : >> { %7773 = vmatmul.f32.gmra.mxu0 %v15638_v38  ;;  %v15796_v38 = vsub.f32 %v8035_v5, %v15788_v11 }
 0x8d5   : >> { %7853 = vmatmul.f32.gmra.mxu1 %v15659_v44 }
 0x8d7   : >> { %7552 = vmatmul.f32.gmra.mxu2 %v15692_v22 }
 0x8d8   : >> { %7689 = vmatmul.f32.gmra.mxu3 %v15610_v28 }
 0x8da   : >> { %7778 = vmatmul.f32.gmra.mxu0 %v15630_v14  ;;  %v8092_v14 = vsub.f32 %v15780_v19, %v8091_v40 }
 0x8dd   : >> { %7859 = vmatmul.f32.gmra.mxu1 %v15648_v35  ;;  %v8093_v35 = vand.u32 4294901760, %v8092_v14 }
 0x8df   : >> { %7560 = vmatmul.f32.gmra.mxu2 %v15678_v62  ;;  %v7449_v62 = vld [vmem:[%s16958_s3 + $0x30] sm:$0xff] }
 0x8e0   : >> { %7993 = vmatmul.f32.vlgmr.msra.gmra.mxu3 %v15608_v53  ;;  %v8044_v39 = vsel %vm957_vm0, %v7449_v62, 0 }
 0x8e1   : >> { %v15836_v16 = vand.u32 4294901760, %v8044_v39 }
 0x8e2   : >> { %8078 = vmatmul.f32.vlgmr.msrb.gmra.mxu0 %v8077_v13 }
 0x8e3   : >> { %v15844_v22 = vsub.f32 %v8044_v39, %v15836_v16 }
 0x8e5   : >> { %8195 = vmatmul.f32.vlgmr.msrb.gmra.mxu1 %v15741_v1 }
 0x8e7   : >> { %7928 = vmatmul.f32.vlgmr.msra.gmra.mxu2 %v15608_v53  ;;  %v8099_v53 = vand.u32 4294901760, %v15796_v38 }
 0x8e8   : >> { %7997 = vmatmul.f32.gmra.mxu3 %v15627_v23 }
 0x8e9   : >> { %v8100_v44 = vsub.f32 %v15796_v38, %v8099_v53 }
 0x8ea   : >> { %8086 = vmatmul.f32.gmra.mxu0 %v8085_v54 }
 0x8eb   : >> { %v8101_v42 = vand.u32 4294901760, %v8100_v44 }
 0x8ed   : >> { %8199 = vmatmul.f32.gmra.mxu1 %v15755_v0 }
 0x8ef   : >> { %7932 = vmatmul.f32.gmra.mxu2 %v15627_v23  ;;  %v8107_v23 = vand.u32 4294901760, %v15812_v60 }
 0x8f0   : >> { %8001 = vmatmul.f32.gmra.mxu3 %v15656_v29 }
 0x8f1   : >> { %v8108_v9 = vsub.f32 %v15812_v60, %v8107_v23 }
 0x8f2   : >> { %8094 = vmatmul.f32.gmra.mxu0 %v8093_v35 }
 0x8f3   : >> { %v8109_v45 = vand.u32 4294901760, %v8108_v9 }
 0x8f5   : >> { %8203 = vmatmul.f32.gmra.mxu1 %v15772_v47 }
 0x8f7   : >> { %7936 = vmatmul.f32.gmra.mxu2 %v15656_v29  ;;  %v8115_v29 = vand.u32 4294901760, %v15828_v59 }
 0x8f8   : >> { %8005 = vmatmul.f32.gmra.mxu3 %v15635_v51 }
 0x8f9   : >> { %v8116_v12 = vsub.f32 %v15828_v59, %v8115_v29 }
 0x8fa   : >> { %8102 = vmatmul.f32.gmra.mxu0 %v8101_v42 }
 0x8fb   : >> { %v8117_v48 = vand.u32 4294901760, %v8116_v12 }
 0x8fd   : >> { %8207 = vmatmul.f32.gmra.mxu1 %v15788_v11 }
 0x8ff   : >> { %7940 = vmatmul.f32.gmra.mxu2 %v15635_v51  ;;  %v8123_v51 = vand.u32 4294901760, %v15844_v22 }
 0x900   : >> { %8009 = vmatmul.f32.gmra.mxu3 %v15616_v32 }
 0x901   : >> { %v8124_v63 = vsub.f32 %v15844_v22, %v8123_v51 }
 0x902   : >> { %8110 = vmatmul.f32.gmra.mxu0 %v8109_v45 }
 0x903   : >> { %v8125_v15 = vand.u32 4294901760, %v8124_v63 }
 0x905   : >> { %8211 = vmatmul.f32.gmra.mxu1 %v15804_v34 }
 0x907   : >> { %7944 = vmatmul.f32.gmra.mxu2 %v15616_v32  ;;  %v8132_v32 = vsub.f32 %v15860_v30, %v8131_v4 }
 0x908   : >> { %8013 = vmatmul.f32.gmra.mxu3 %v15614_v36 }
 0x909   : >> { %v8133_v50 = vand.u32 4294901760, %v8132_v32 }
 0x90a   : >> { %8118 = vmatmul.f32.gmra.mxu0 %v8117_v48 }
 0x90d   : >> { %8215 = vmatmul.f32.gmra.mxu1 %v15820_v37 }
 0x90f   : >> { %7948 = vmatmul.f32.gmra.mxu2 %v15614_v36 }
 0x910   : >> { %8017 = vmatmul.f32.gmra.mxu3 %v15612_v6 }
 0x912   : >> { %8126 = vmatmul.f32.gmra.mxu0 %v8125_v15 }
 0x915   : >> { %8219 = vmatmul.f32.gmra.mxu1 %v15836_v16 }
 0x916   : >> { %v7430_v46 = vpop.f32.mrf.mxu1 }
 0x917   : >> { %7952 = vmatmul.f32.gmra.mxu2 %v15612_v6  ;;  %7433 = vst.msk [vmem:[#allocation4 + $0x5] sm:$0x1] %vm1545_vm1, %v7430_v46 }
 0x918   : >> { %8021 = vmatmul.f32.gmra.mxu3 %v15610_v28 }
 0x91a   : >> { %8134 = vmatmul.f32.gmra.mxu0 %v8133_v50 }
 0x91b   : >> { %v15873_v10 = vpop.f32.mrf.mxu0 }
 0x91d   : >> { %8223 = vmatmul.f32.gmra.mxu1 %v15852_v17 }
 0x91e   : >> { %v15878_v24 = vpop.f32.mrf.mxu1 }
 0x91f   : >> { %v15876_v36 = vpop.f32.mrf.mxu3  ;;  %7956 = vmatmul.f32.gmra.mxu2 %v15610_v28 }
 0x920   : >> { %8327 = vmatmul.f32.vlgmr.msrb.gmra.mxu3 %v8075_v25 }
 0x922   : >> { %8414 = vmatmul.f32.vlgmr.msra.gmra.mxu0 %v15741_v1 }
 0x923   : >> { %v15884_v6 = vpop.f32.mrf.mxu0 }
 0x925   : >> { %8471 = vmatmul.f32.vlgmr.msra.gmra.mxu1 %v15741_v1 }
 0x927   : >> { %v15887_v31 = vpop.f32.mrf.mxu2  ;;  %8261 = vmatmul.f32.vlgmr.msrb.gmra.mxu2 %v15747_v58  ;;  %v15890_v33 = vpop.f32.mrf.mxu3 }
 0x928   : >> { %v15892_v61 = vpop.f32.mrf.mxu1  ;;  %8333 = vmatmul.f32.gmra.mxu3 %v8083_v7  ;;  %v7663_v32 = vadd.f32 %v15876_v36, %v15887_v31 }
 0x92a   : >> { %8418 = vmatmul.f32.gmra.mxu0 %v15755_v0 }
 0x92d   : >> { %8475 = vmatmul.f32.gmra.mxu1 %v15755_v0 }
 0x92e   : >> { %v15897_v28 = vpop.f32.mrf.mxu0 }
 0x92f   : >> { %8266 = vmatmul.f32.gmra.mxu2 %v15764_v56 }
 0x930   : >> { %8339 = vmatmul.f32.gmra.mxu3 %v8091_v40 }
 0x931   : >> { %v15903_v1 = vpop.f32.mrf.mxu2  ;;  %v15905_v58 = vpop.f32.mrf.mxu3 }
 0x932   : >> { %v15907_v25 = vpop.f32.mrf.mxu1  ;;  %8422 = vmatmul.f32.gmra.mxu0 %v15772_v47 }
 0x935   : >> { %8479 = vmatmul.f32.gmra.mxu1 %v15772_v47 }
 0x937   : >> { %v15911_v55 = vpop.f32.mrf.mxu0  ;;  %8271 = vmatmul.f32.gmra.mxu2 %v15780_v19 }
 0x938   : >> { %8345 = vmatmul.f32.gmra.mxu3 %v8099_v53 }
 0x93a   : >> { %8426 = vmatmul.f32.gmra.mxu0 %v15788_v11  ;;  %v15917_v0 = vpop.f32.mrf.mxu2  ;;  %v15921_v41 = vpop.f32.mrf.mxu1 }
 0x93b   : >> { %v15919_v56 = vpop.f32.mrf.mxu3 }
 0x93d   : >> { %8483 = vmatmul.f32.gmra.mxu1 %v15788_v11 }
 0x93f   : >> { %v15924_v2 = vpop.f32.mrf.mxu0  ;;  %8276 = vmatmul.f32.gmra.mxu2 %v15796_v38 }
 0x940   : >> { %8351 = vmatmul.f32.gmra.mxu3 %v8107_v23 }
 0x942   : >> { %8430 = vmatmul.f32.gmra.mxu0 %v15804_v34  ;;  %v15930_v13 = vpop.f32.mrf.mxu2  ;;  %v15934_v47 = vpop.f32.mrf.mxu1 }
 0x943   : >> { %v15932_v7 = vpop.f32.mrf.mxu3 }
 0x945   : >> { %8487 = vmatmul.f32.gmra.mxu1 %v15804_v34 }
 0x947   : >> { %v15937_v20 = vpop.f32.mrf.mxu0  ;;  %8281 = vmatmul.f32.gmra.mxu2 %v15812_v60 }
 0x948   : >> { %8357 = vmatmul.f32.gmra.mxu3 %v8115_v29 }
 0x94a   : >> { %8434 = vmatmul.f32.gmra.mxu0 %v15820_v37  ;;  %v15943_v19 = vpop.f32.mrf.mxu2  ;;  %v15947_v5 = vpop.f32.mrf.mxu1 }
 0x94b   : >> { %v15945_v43 = vpop.f32.mrf.mxu3 }
 0x94d   : >> { %8491 = vmatmul.f32.gmra.mxu1 %v15820_v37 }
 0x94f   : >> { %v15950_v54 = vpop.f32.mrf.mxu0  ;;  %8286 = vmatmul.f32.gmra.mxu2 %v15828_v59 }
 0x950   : >> { %8363 = vmatmul.f32.gmra.mxu3 %v8123_v51 }
 0x952   : >> { %8438 = vmatmul.f32.gmra.mxu0 %v15836_v16  ;;  %v15956_v40 = vpop.f32.mrf.mxu2  ;;  %v15960_v14 = vpop.f32.mrf.mxu1 }
 0x953   : >> { %v15958_v11 = vpop.f32.mrf.mxu3 }
 0x955   : >> { %8495 = vmatmul.f32.gmra.mxu1 %v15836_v16 }
 0x957   : >> { %v15963_v38 = vpop.f32.mrf.mxu0  ;;  %8291 = vmatmul.f32.gmra.mxu2 %v15844_v22 }
 0x958   : >> { %17408 = vst [vmem:[#allocation20_spill] sm:$0xff] %v15963_v38  ;;  %8369 = vmatmul.f32.gmra.mxu3 %v8131_v4  ;;  %v7667_v38 = vadd.f32 %v15890_v33, %v15903_v1  ;;  %v8643_v33 = vld [vmem:[%s16959_s4 + $0x78] sm:$0xff] }
 0x95a   : >> { %8442 = vmatmul.f32.gmra.mxu0 %v15852_v17  ;;  %v15969_v21 = vpop.f32.mrf.mxu2  ;;  %v15973_v35 = vpop.f32.mrf.mxu1 }
 0x95b   : >> { %v15971_v52 = vpop.f32.mrf.mxu3  ;;  %17410 = vst [vmem:[#allocation15_spill] sm:$0xff] %v15973_v35  ;;  %v7745_v35 = vadd.f32 %v15873_v10, %v7663_v32 }
 0x95c   : >> { %17409 = vst [vmem:[#allocation30_spill] sm:$0xff] %v15971_v52 }
 0x95d   : >> { %8499 = vmatmul.f32.gmra.mxu1 %v15852_v17 }
 0x95f   : >> { %v8079_v53 = vpop.f32.mrf.mxu0  ;;  %8296 = vmatmul.f32.gmra.mxu2 %v15860_v30 }
 0x962   : >> { %v15977_v34 = vpop.f32.mrf.mxu2  ;;  %v15979_v60 = vpop.f32.mrf.mxu1 }
 0x963   : >> { %v7994_v44 = vpop.f32.mrf.mxu3 }
 0x967   : >> { %v15981_v8 = vpop.f32.mrf.mxu0 }
 0x96a   : >> { %v7929_v18 = vpop.f32.mrf.mxu2  ;;  %v15983_v23 = vpop.f32.mrf.mxu1 }
 0x96b   : >> { %v7998_v42 = vpop.f32.mrf.mxu3 }
 0x96f   : >> { %v15985_v37 = vpop.f32.mrf.mxu0 }
 0x972   : >> { %v7933_v9 = vpop.f32.mrf.mxu2  ;;  %v15989_v62 = vpop.f32.mrf.mxu1 }
 0x973   : >> { %v15987_v59 = vpop.f32.mrf.mxu3 }
 0x977   : >> { %v15991_v39 = vpop.f32.mrf.mxu0 }
 0x97a   : >> { %v7937_v45 = vpop.f32.mrf.mxu2  ;;  %v15995_v16 = vpop.f32.mrf.mxu1 }
 0x97b   : >> { %v15993_v29 = vpop.f32.mrf.mxu3 }
 0x97f   : >> { %v15997_v12 = vpop.f32.mrf.mxu0 }
 0x982   : >> { %v15999_v22 = vpop.f32.mrf.mxu2  ;;  %v16003_v49 = vpop.f32.mrf.mxu1 }
 0x983   : >> { %v16001_v3 = vpop.f32.mrf.mxu3 }
 0x987   : >> { %v16005_v48 = vpop.f32.mrf.mxu0 }
 0x988   : >> { %17411 = vst [vmem:[#allocation26_spill] sm:$0xff] %v16005_v48 }
 0x98a   : >> { %v16007_v51 = vpop.f32.mrf.mxu2  ;;  %v16011_v63 = vpop.f32.mrf.mxu1 }
 0x98b   : >> { %v16009_v17 = vpop.f32.mrf.mxu3  ;;  %17412 = vst [vmem:[#allocation17_spill] sm:$0xff] %v16011_v63 }
 0x98f   : >> { %v16013_v30 = vpop.f32.mrf.mxu0 }
 0x990   : >> { %17413 = vst [vmem:[#allocation22_spill] sm:$0xff] %v16013_v30  ;;  %v7819_v30 = vadd.f32 %v15878_v24, %v7745_v35  ;;  %v16046_v35 = vand.u32 4294901760, %v8643_v33 }
 0x992   : >> { %v16015_v15 = vpop.f32.mrf.mxu2  ;;  %v16021_v50 = vpop.f32.mrf.mxu1  ;;  %v7930_v36 = vadd.f32 %v7929_v18, %v7819_v30  ;;  %8645 = vmatpush.msra.mxu3 %v16046_v35  ;;  %v16061_v30 = vmul.f32 2.0, %v15605_v26 }
 0x993   : >> { %v16017_v4 = vpop.f32.mrf.mxu3  ;;  %17415 = vst [vmem:[#allocation24_spill] sm:$0xff] %v16021_v50 }
 0x994   : >> { %17414 = vst [vmem:[#allocation29_spill] sm:$0xff] %v16017_v4  ;;  %v7750_v4 = vadd.f32 %v15884_v6, %v7667_v38  ;;  %v7995_v10 = vadd.f32 %v7994_v44, %v7930_v36 }
 0x996   : >> { %v7825_v32 = vadd.f32 %v15892_v61, %v7750_v4  ;;  %v16055_v61 = vsub.f32 %v8643_v33, %v16046_v35  ;;  %v8080_v44 = vadd.f32 %v8079_v53, %v7995_v10  ;;  %v7675_v53 = vadd.f32 %v15919_v56, %v15930_v13  ;;  %v16082_v33 = vld [vmem:[#allocation3] sm:$0xff] }
 0x997   : >> { %v16023_v46 = vpop.f32.mrf.mxu0 }
 0x998   : >> { %17416 = vst [vmem:[#allocation12_spill] sm:$0xff] %v16023_v46  ;;  %v7671_v46 = vadd.f32 %v15905_v58, %v15917_v0  ;;  %v7934_v38 = vadd.f32 %v7933_v9, %v7825_v32  ;;  %v8642_v58 = vld [vmem:[%s16959_s4 + $0x70] sm:$0xff]  ;;  %v17100_v9 = vand.u32 4294901760, %v16055_v61  ;;  %8872 = vmatpush.msrb.mxu1 %v16055_v61  ;;  %v8640_v32 = vld [vmem:[%s16959_s4 + $0x60] sm:$0xff] }
 0x999   : >> { %v16057_v0 = vand.u32 4294901760, %v8642_v58  ;;  %v16091_v56 = vand.u32 4294901760, %v8640_v32 }
 0x99a   : >> { %v16028_v48 = vpop.f32.mrf.mxu2  ;;  %v16033_v52 = vpop.f32.mrf.mxu1  ;;  %v7755_v6 = vadd.f32 %v15897_v28, %v7671_v46  ;;  %v8641_v28 = vld [vmem:[%s16959_s4 + $0x68] sm:$0xff]  ;;  %v7999_v26 = vadd.f32 %v7998_v42, %v7934_v38 }
 0x99b   : >> { %v16030_v63 = vpop.f32.mrf.mxu3  ;;  %17418 = vst [vmem:[#allocation21_spill] sm:$0xff] %v16033_v52  ;;  %v16068_v4 = vsub.f32 %v8642_v58, %v16057_v0  ;;  %v16070_v46 = vand.u32 4294901760, %v8641_v28  ;;  %8647 = vmatpush.msra.mxu3 %v16057_v0  ;;  %v8744_v58 = vsub.f32 %v16055_v61, %v17100_v9 }
 0x99c   : >> { %17417 = vst [vmem:[#allocation14_spill] sm:$0xff] %v16030_v63  ;;  %v7831_v36 = vadd.f32 %v15907_v25, %v7755_v6  ;;  %v8197_v25 = vadd.f32 %v15979_v60, %v8080_v44  ;;  %v8639_v6 = vld [vmem:[%s16959_s4 + $0x58] sm:$0xff]  ;;  %v16108_v60 = vsub.f32 %v8640_v32, %v16091_v56  ;;  %v8088_v44 = vadd.f32 %v15981_v8, %v7999_v26 }
 0x99d   : >> { %17420 = vst [vmem:[#allocation27_spill] sm:$0xff] %v16070_v46  ;;  %v17101_v52 = vand.u32 4294901760, %v16068_v4  ;;  %v16089_v63 = vsub.f32 %v8641_v28, %v16070_v46  ;;  %8649 = vmatpush.msra.mxu3 %v16070_v46  ;;  %8875 = vmatpush.msrb.mxu1 %v16068_v4  ;;  %v8745_v28 = vand.u32 4294901760, %v8744_v58  ;;  %v16116_v58 = vand.u32 4294901760, %v8639_v6 }
 0x99e   : >> { %17421 = vst [vmem:[#allocation23_spill] sm:$0xff] %v16091_v56  ;;  %v7938_v13 = vadd.f32 %v7937_v45, %v7831_v36  ;;  %v7760_v45 = vadd.f32 %v15911_v55, %v7675_v53  ;;  %v17108_v46 = vand.u32 4294901760, %v16108_v60  ;;  %v16130_v26 = vmul.f32 2.0, %v15618_v57 }
 0x99f   : >> { %v16036_v31 = vpop.f32.mrf.mxu0  ;;  %v8750_v50 = vsub.f32 %v16068_v4, %v17101_v52  ;;  %8651 = vmatpush.msra.mxu3 %v16091_v56  ;;  %8878 = vmatpush.msrb.mxu1 %v16089_v63  ;;  %17422 = vst [vmem:[#allocation13_spill] sm:$0xff] %v16116_v58  ;;  %v8638_v52 = vld [vmem:[%s16959_s4 + $0x50] sm:$0xff] }
 0x9a0   : >> { %8746 = vmatpush.msrb.mxu0 %v8745_v28  ;;  %v16125_v55 = vand.u32 4294901760, %v8638_v52  ;;  %v8003_v8 = vadd.f32 %v15987_v59, %v7938_v13  ;;  %v8762_v28 = vsub.f32 %v16108_v60, %v17108_v46  ;;  %v7837_v13 = vadd.f32 %v15921_v41, %v7760_v45 }
 0x9a1   : >> { %v8751_v32 = vand.u32 4294901760, %v8750_v50  ;;  %8881 = vmatpush.msrb.mxu1 %v16108_v60  ;;  %v16133_v50 = vsub.f32 %v8639_v6, %v16116_v58  ;;  %8653 = vmatpush.msra.mxu3 %v16116_v58 }
 0x9a2   : >> { %v16044_v1 = vpop.f32.mrf.mxu2  ;;  %v16049_v18 = vpop.f32.mrf.mxu1  ;;  %17423 = vst [vmem:[#allocation28_spill] sm:$0xff] %v16125_v55  ;;  %v16143_v59 = vsub.f32 %v8638_v52, %v16125_v55  ;;  %v8201_v52 = vadd.f32 %v15983_v23, %v8088_v44  ;;  %v8763_v41 = vand.u32 4294901760, %v8762_v28  ;;  %v8096_v45 = vadd.f32 %v15985_v37, %v8003_v8 }
 0x9a3   : >> { %17419 = vst [vmem:[#allocation25_spill] sm:$0xff] %v16044_v1  ;;  %v8328_v24 = vpop.f32.mrf.mxu3  ;;  %v17106_v1 = vand.u32 4294901760, %v16089_v63  ;;  %8752 = vmatpush.msrb.mxu0 %v8751_v32  ;;  %8655 = vmatpush.msra.mxu3 %v16125_v55  ;;  %v8527_v32 = vld [vmem:[%s16957_s2] sm:$0xff]  ;;  %v7942_v37 = vadd.f32 %v15999_v22, %v7837_v13  ;;  %v8634_v22 = vld [vmem:[%s16959_s4 + $0x30] sm:$0xff] }
 0x9a4   : >> { %8884 = vmatpush.msrb.mxu1 %v16133_v50 }
 0x9a5   : >> { %v8756_v56 = vsub.f32 %v16089_v63, %v17106_v1  ;;  %v8588_v1 = vld [vmem:[%s10135_s29 + $0x70] sm:$0xff] }
 0x9a6   : >> { %8887 = vmatpush.msrb.mxu1 %v16143_v59 }
 0x9a7   : >> { %v16077_v10 = vpop.f32.mrf.mxu0 }
 0x9aa   : >> { %v8262_v38 = vpop.f32.mrf.mxu2  ;;  %v16114_v42 = vpop.f32.mrf.mxu1 }
 0x9ab   : >> { %v16101_v9 = vpop.f32.mrf.mxu3  ;;  %v8263_v36 = vadd.f32 %v8262_v38, %v8197_v25  ;;  %v8637_v25 = vld [vmem:[%s16959_s4 + $0x48] sm:$0xff]  ;;  %v8757_v38 = vand.u32 4294901760, %v8756_v56  ;;  %v17107_v56 = vand.u32 4294901760, %v16133_v50 }
 0x9ac   : >> { %v16145_v57 = vand.u32 4294901760, %v8637_v25 }
 0x9ad   : >> { %v8329_v53 = vadd.f32 %v8328_v24, %v8263_v36  ;;  %v7679_v24 = vadd.f32 %v15932_v7, %v15943_v19  ;;  %v8589_v36 = vld [vmem:[%s10135_s29 + $0x78] sm:$0xff]  ;;  %8758 = vmatpush.msrb.mxu0 %v8757_v38  ;;  %v17116_v7 = vand.u32 4294901760, %v16143_v59  ;;  %v8587_v38 = vld [vmem:[%s10135_s29 + $0x68] sm:$0xff] }
 0x9ae   : >> { %17424 = vst [vmem:[#allocation18_spill] sm:$0xff] %v16145_v57  ;;  %8590 = vmatpush.msra.mxu2 %v8589_v36  ;;  %v16162_v19 = vsub.f32 %v8637_v25, %v16145_v57  ;;  %v8635_v25 = vld [vmem:[%s16959_s4 + $0x38] sm:$0xff]  ;;  %8657 = vmatpush.msra.mxu3 %v16145_v57 }
 0x9af   : >> { %v8416_v6 = vadd.f32 %v16036_v31, %v8329_v53  ;;  %v8636_v31 = vld [vmem:[%s16959_s4 + $0x40] sm:$0xff]  ;;  %v16169_v44 = vpop.f32.mrf.mxu0  ;;  %v8768_v53 = vsub.f32 %v16133_v50, %v17107_v56  ;;  %8764 = vmatpush.msrb.mxu0 %v8763_v41  ;;  %v16189_v56 = vand.u32 4294901760, %v8635_v25 }
 0x9b0   : >> { %v16175_v28 = vand.u32 4294901760, %v8636_v31  ;;  %8591 = vmatpush.msra.mxu2 %v8588_v1  ;;  %v17115_v36 = vand.u32 4294901760, %v16162_v19  ;;  %8890 = vmatpush.msrb.mxu1 %v16162_v19  ;;  %v16199_v1 = vld [vmem:[#allocation3 + $0x8] sm:$0xff] }
 0x9b1   : >> { %v8473_v23 = vadd.f32 %v16049_v18, %v8416_v6  ;;  %v8774_v6 = vsub.f32 %v16143_v59, %v17116_v7  ;;  %v8769_v57 = vand.u32 4294901760, %v8768_v53 }
 0x9b2   : >> { %v8267_v18 = vpop.f32.mrf.mxu2  ;;  %v16192_v58 = vsub.f32 %v8636_v31, %v16175_v28  ;;  %8659 = vmatpush.msra.mxu3 %v16175_v28  ;;  %v16201_v13 = vpop.f32.mrf.mxu1  ;;  %8592 = vmatpush.msra.mxu2 %v8587_v38  ;;  %v16209_v31 = vand.u32 4294901760, %v8634_v22  ;;  %v8520_v38 = vsub.f32 %v16130_v26, %v16199_v1 }
 0x9b3   : >> { %v16183_v8 = vpop.f32.mrf.mxu3  ;;  %v8535_v46 = vmul.f32 %v8527_v32, %v8473_v23  ;;  %v8268_v55 = vadd.f32 %v8267_v18, %v8201_v52  ;;  %v8775_v41 = vand.u32 4294901760, %v8774_v6  ;;  %v8780_v52 = vsub.f32 %v16162_v19, %v17115_v36  ;;  %8770 = vmatpush.msrb.mxu0 %v8769_v57 }
 0x9b4   : >> { %v16207_v32 = vsub.f32 %v8635_v25, %v16189_v56  ;;  %v17425_v23 = vsub.f32 %v16061_v30, %v16082_v33  ;;  %v8785_v6 = vand.u32 4294901760, %v16192_v58  ;;  %8661 = vmatpush.msra.mxu3 %v16189_v56  ;;  %v7765_v25 = vadd.f32 %v15924_v2, %v7679_v24  ;;  %8893 = vmatpush.msrb.mxu1 %v16192_v58  ;;  %v8586_v2 = vld [vmem:[%s10135_s29 + $0x60] sm:$0xff] }
 0x9b5   : >> { %v8335_v18 = vadd.f32 %v16101_v9, %v8268_v55  ;;  %v8781_v36 = vand.u32 4294901760, %v8780_v52  ;;  %v16222_v30 = vsub.f32 %v8634_v22, %v16209_v31  ;;  %v8633_v9 = vld [vmem:[%s16959_s4 + $0x28] sm:$0xff]  ;;  %v16230_v33 = vmul.f32 2.0, %v15632_v27  ;;  %8776 = vmatpush.msrb.mxu0 %v8775_v41  ;;  %v8585_v55 = vld [vmem:[%s10135_s29 + $0x58] sm:$0xff]  ;;  %8593 = vmatpush.msra.mxu2 %v8586_v2  ;;  %v8632_v41 = vld [vmem:[%s16959_s4 + $0x20] sm:$0xff] }
 0x9b6   : >> { %v8543_v53 = vadd.f32 %v8535_v46, %v17425_v23  ;;  %v17118_v7 = vand.u32 4294901760, %v16207_v32  ;;  %v8786_v26 = vsub.f32 %v16192_v58, %v8785_v6  ;;  %v16237_v57 = vand.u32 4294901760, %v8633_v9  ;;  %8663 = vmatpush.msra.mxu3 %v16209_v31  ;;  %v8528_v27 = vld [vmem:[%s16957_s2 + $0x8] sm:$0xff]  ;;  %8896 = vmatpush.msrb.mxu1 %v16207_v32 }
 0x9b7   : >> { %v8420_v46 = vadd.f32 %v16077_v10, %v8335_v18  ;;  %v8205_v24 = vadd.f32 %v15989_v62, %v8096_v45  ;;  %v8007_v22 = vadd.f32 %v15993_v29, %v7942_v37  ;;  %v17117_v1 = vand.u32 4294901760, %v16222_v30  ;;  %8782 = vmatpush.msrb.mxu0 %v8781_v36  ;;  %v8584_v45 = vld [vmem:[%s10135_s29 + $0x50] sm:$0xff]  ;;  %8594 = vmatpush.msra.mxu2 %v8585_v55  ;;  %v8532_v58 = vld [vmem:[%s16957_s2 + $0x28] sm:$0xff] }
 0x9b8   : >> { %8551 = vst [vmem:[#allocation3] sm:$0xff] %v8543_v53  ;;  %v8792_v10 = vsub.f32 %v16207_v32, %v17118_v7  ;;  %v8787_v29 = vand.u32 4294901760, %v8786_v26  ;;  %v16256_v37 = vsub.f32 %v8633_v9, %v16237_v57  ;;  %v16258_v52 = vand.u32 4294901760, %v8632_v41  ;;  %8665 = vmatpush.msra.mxu3 %v16237_v57  ;;  %v8631_v9 = vld [vmem:[%s16959_s4 + $0x18] sm:$0xff]  ;;  %8899 = vmatpush.msrb.mxu1 %v16222_v30 }
 0x9b9   : >> { %v8477_v62 = vadd.f32 %v16114_v42, %v8420_v46  ;;  %v7683_v23 = vadd.f32 %v15945_v43, %v15956_v40  ;;  %v7843_v53 = vadd.f32 %v15934_v47, %v7765_v25  ;;  %v8798_v36 = vsub.f32 %v16222_v30, %v17117_v1  ;;  %v8583_v43 = vld [vmem:[%s10135_s29 + $0x48] sm:$0xff]  ;;  %8595 = vmatpush.msra.mxu2 %v8584_v45 }
 0x9ba   : >> { %v8272_v18 = vpop.f32.mrf.mxu2  ;;  %v8793_v42 = vand.u32 4294901760, %v8792_v10  ;;  %8788 = vmatpush.msrb.mxu0 %v8787_v29  ;;  %v8803_v47 = vand.u32 4294901760, %v16256_v37  ;;  %v16276_v40 = vsub.f32 %v8632_v41, %v16258_v52  ;;  %8667 = vmatpush.msra.mxu3 %v16258_v52  ;;  %v8104_v25 = vadd.f32 %v15991_v39, %v8007_v22  ;;  %v16281_v10 = vpop.f32.mrf.mxu0 }
 0x9bb   : >> { %v16264_v2 = vpop.f32.mrf.mxu3  ;;  %v8536_v46 = vmul.f32 %v8528_v27, %v8477_v62  ;;  %v8273_v26 = vadd.f32 %v8272_v18, %v8205_v24  ;;  %v7946_v55 = vadd.f32 %v16007_v51, %v7843_v53  ;;  %v8799_v1 = vand.u32 4294901760, %v8798_v36  ;;  %v8630_v24 = vld [vmem:[%s16959_s4 + $0x10] sm:$0xff]  ;;  %8902 = vmatpush.msrb.mxu1 %v16256_v37  ;;  %v16296_v45 = vpop.f32.mrf.mxu1  ;;  %8596 = vmatpush.msra.mxu2 %v8583_v43  ;;  %v8629_v53 = vld [vmem:[%s16959_s4 + $0x8] sm:$0xff]  ;;  %v8628_v43 = vld [vmem:[%s16959_s4] sm:$0xff] }
 0x9bc   : >> { %v16283_v7 = vand.u32 4294901760, %v8631_v9  ;;  %v8513_v62 = vld [vmem:[#allocation3 + $0x10] sm:$0xff]  ;;  %8794 = vmatpush.msrb.mxu0 %v8793_v42  ;;  %v8804_v39 = vsub.f32 %v16256_v37, %v8803_v47  ;;  %v8809_v51 = vand.u32 4294901760, %v16276_v40  ;;  %v7770_v22 = vadd.f32 %v15937_v20, %v7683_v23  ;;  %v8582_v20 = vld [vmem:[%s10135_s29 + $0x40] sm:$0xff]  ;;  %v8581_v23 = vld [vmem:[%s10135_s29 + $0x38] sm:$0xff] }
 0x9bd   : >> { %v8544_v27 = vadd.f32 %v8536_v46, %v8520_v38  ;;  %v8341_v41 = vadd.f32 %v16183_v8, %v8273_v26  ;;  %v8521_v29 = vsub.f32 %v16230_v33, %v8513_v62  ;;  %v16301_v8 = vand.u32 4294901760, %v8630_v24  ;;  %8905 = vmatpush.msrb.mxu1 %v16276_v40  ;;  %8597 = vmatpush.msra.mxu2 %v8582_v20  ;;  %v8579_v20 = vld [vmem:[%s10135_s29 + $0x28] sm:$0xff] }
 0x9be   : >> { %v16299_v38 = vsub.f32 %v8631_v9, %v16283_v7  ;;  %8669 = vmatpush.msra.mxu3 %v16283_v7  ;;  %8800 = vmatpush.msrb.mxu0 %v8799_v1  ;;  %v8805_v33 = vand.u32 4294901760, %v8804_v39  ;;  %v8810_v42 = vsub.f32 %v16276_v40, %v8809_v51  ;;  %v16313_v36 = vand.u32 4294901760, %v8629_v53  ;;  %v8533_v40 = vld [vmem:[%s16957_s2 + $0x30] sm:$0xff] }
 0x9bf   : >> { %8552 = vst [vmem:[#allocation3 + $0x8] sm:$0xff] %v8544_v27  ;;  %v8424_v18 = vadd.f32 %v16169_v44, %v8341_v41  ;;  %v8209_v9 = vadd.f32 %v15995_v16, %v8104_v25  ;;  %v8011_v46 = vadd.f32 %v16001_v3, %v7946_v55  ;;  %v8529_v44 = vld [vmem:[%s16957_s2 + $0x10] sm:$0xff]  ;;  %v16323_v26 = vsub.f32 %v8630_v24, %v16301_v8 }
 0x9c0   : >> { %v8815_v1 = vand.u32 4294901760, %v16299_v38  ;;  %8671 = vmatpush.msra.mxu3 %v16301_v8  ;;  %8806 = vmatpush.msrb.mxu0 %v8805_v33  ;;  %v8811_v3 = vand.u32 4294901760, %v8810_v42  ;;  %v8580_v25 = vld [vmem:[%s10135_s29 + $0x30] sm:$0xff]  ;;  %v16332_v55 = vsub.f32 %v8629_v53, %v16313_v36  ;;  %v16334_v27 = vand.u32 4294901760, %v8628_v43 }
 0x9c1   : >> { %v8481_v16 = vadd.f32 %v16201_v13, %v8424_v18  ;;  %8908 = vmatpush.msrb.mxu1 %v16299_v38  ;;  %v7687_v24 = vadd.f32 %v15958_v11, %v15969_v21  ;;  %v7849_v41 = vadd.f32 %v15947_v5, %v7770_v22  ;;  %8598 = vmatpush.msra.mxu2 %v8581_v23  ;;  %v8821_v39 = vand.u32 4294901760, %v16323_v26 }
 0x9c2   : >> { %v8277_v62 = vpop.f32.mrf.mxu2  ;;  %v8816_v13 = vsub.f32 %v16299_v38, %v8815_v1  ;;  %8673 = vmatpush.msra.mxu3 %v16313_v36  ;;  %8812 = vmatpush.msrb.mxu0 %v8811_v3  ;;  %v8827_v33 = vand.u32 4294901760, %v16332_v55  ;;  %v16348_v11 = vsub.f32 %v8628_v43, %v16334_v27  ;;  %v8112_v5 = vadd.f32 %v15997_v12, %v8011_v46  ;;  %v9978_v3 = vld [vmem:[#allocation2 + $0x18] sm:$0xff] }
 0x9c3   : >> { %v8537_v53 = vmul.f32 %v8529_v44, %v8481_v16  ;;  %v8278_v18 = vadd.f32 %v8277_v62, %v8209_v9  ;;  %8911 = vmatpush.msrb.mxu1 %v16323_v26  ;;  %v7950_v21 = vadd.f32 %v16015_v15, %v7849_v41  ;;  %v8352_v22 = vpop.f32.mrf.mxu3  ;;  %8599 = vmatpush.msra.mxu2 %v8580_v25  ;;  %v17426_v46 = vand.u32 4294901760, %v16055_v61  ;;  %v8431_v16 = vpop.f32.mrf.mxu0  ;;  %v8578_v41 = vld [vmem:[%s10135_s29 + $0x20] sm:$0xff] }
 0x9c4   : >> { %v8817_v23 = vand.u32 4294901760, %v8816_v13  ;;  %v8822_v42 = vsub.f32 %v16323_v26, %v8821_v39  ;;  %8675 = vmatpush.msra.mxu3 %v16334_v27  ;;  %v8828_v12 = vsub.f32 %v16332_v55, %v8827_v33  ;;  %v8833_v15 = vand.u32 4294901760, %v16348_v11  ;;  %v8577_v13 = vld [vmem:[%s10135_s29 + $0x18] sm:$0xff] }
 0x9c5   : >> { %v8545_v9 = vadd.f32 %v8537_v53, %v8521_v29  ;;  %v8347_v44 = vadd.f32 %v16264_v2, %v8278_v18  ;;  %8914 = vmatpush.msrb.mxu1 %v16332_v55  ;;  %v7775_v43 = vadd.f32 %v15950_v54, %v7687_v24  ;;  %8600 = vmatpush.msra.mxu2 %v8579_v20  ;;  %v8506_v25 = vmul.f32 2.0, %v9978_v3  ;;  %v8530_v54 = vld [vmem:[%s16957_s2 + $0x18] sm:$0xff] }
 0x9c6   : >> { %9043 = vmatpush.msrb.mxu3 %v17426_v46  ;;  %8818 = vmatpush.msrb.mxu0 %v8817_v23  ;;  %v8823_v29 = vand.u32 4294901760, %v8822_v42  ;;  %v8829_v62 = vand.u32 4294901760, %v8828_v12  ;;  %v8834_v61 = vsub.f32 %v16348_v11, %v8833_v15  ;;  %v17427_v53 = vand.u32 4294901760, %v16068_v4  ;;  %v8576_v42 = vld [vmem:[%s10135_s29 + $0x10] sm:$0xff]  ;;  %v17429_v46 = vld [vmem:[#allocation30_spill] sm:$0xff] }
 0x9c7   : >> { %8553 = vst [vmem:[#allocation3 + $0x10] sm:$0xff] %v8545_v9  ;;  %v8428_v2 = vadd.f32 %v16281_v10, %v8347_v44  ;;  %8917 = vmatpush.msrb.mxu1 %v16348_v11  ;;  %v8488_v10 = vpop.f32.mrf.mxu1  ;;  %8601 = vmatpush.msra.mxu2 %v8578_v41  ;;  %v8213_v24 = vadd.f32 %v16003_v49, %v8112_v5  ;;  %v17428_v4 = vand.u32 4294901760, %v16089_v63  ;;  %v8514_v44 = vld [vmem:[#allocation3 + $0x18] sm:$0xff] }
 0x9c8   : >> { %9047 = vmatpush.msrb.mxu3 %v17427_v53  ;;  %8824 = vmatpush.msrb.mxu0 %v8823_v29  ;;  %v8015_v18 = vadd.f32 %v16009_v17, %v7950_v21  ;;  %v8835_v23 = vand.u32 4294901760, %v8834_v61  ;;  %v7855_v9 = vadd.f32 %v15960_v14, %v7775_v43  ;;  %v7691_v29 = vadd.f32 %v17429_v46, %v15977_v34  ;;  %v8575_v17 = vld [vmem:[%s10135_s29 + $0x8] sm:$0xff]  ;;  %v17431_v14 = vld [vmem:[#allocation26_spill] sm:$0xff]  ;;  %v8574_v61 = vld [vmem:[%s10135_s29] sm:$0xff] }
 0x9c9   : >> { %v8485_v20 = vadd.f32 %v16296_v45, %v8428_v2  ;;  %8602 = vmatpush.msra.mxu2 %v8577_v13  ;;  %v8522_v3 = vsub.f32 %v8506_v25, %v8514_v44  ;;  %v17430_v45 = vand.u32 4294901760, %v16108_v60  ;;  %v17432_v34 = vand.u32 4294901760, %v16133_v50  ;;  %v9979_v25 = vld [vmem:[#allocation2 + $0x20] sm:$0xff]  ;;  %v17433_v60 = vld [vmem:[#allocation20_spill] sm:$0xff] }
 0x9ca   : >> { %9051 = vmatpush.msrb.mxu3 %v17428_v4  ;;  %v8282_v12 = vpop.f32.mrf.mxu2  ;;  %8830 = vmatpush.msrb.mxu0 %v8829_v62  ;;  %v7954_v21 = vadd.f32 %v16028_v48, %v7855_v9  ;;  %v8120_v63 = vadd.f32 %v17431_v14, %v8015_v18  ;;  %v8507_v41 = vmul.f32 2.0, %v9979_v25  ;;  %v7780_v13 = vadd.f32 %v17433_v60, %v7691_v29  ;;  %v8531_v50 = vld [vmem:[%s16957_s2 + $0x20] sm:$0xff]  ;;  %v17436_v18 = vld [vmem:[#allocation17_spill] sm:$0xff]  ;;  %v17447_v25 = vld [vmem:[#allocation24_spill] sm:$0xff] }
 0x9cb   : >> { %v8538_v49 = vmul.f32 %v8530_v54, %v8485_v20  ;;  %v8283_v5 = vadd.f32 %v8282_v12, %v8213_v24  ;;  %8603 = vmatpush.msra.mxu2 %v8576_v42  ;;  %v8358_v62 = vpop.f32.mrf.mxu3  ;;  %v17434_v53 = vand.u32 4294901760, %v16143_v59  ;;  %v8435_v24 = vpop.f32.mrf.mxu0  ;;  %v8515_v42 = vld [vmem:[#allocation3 + $0x20] sm:$0xff]  ;;  %v17438_v44 = vand.u32 4294901760, %v16162_v19  ;;  %v17443_v14 = vld [vmem:[#allocation13_spill] sm:$0xff] }
 0x9cc   : >> { %9055 = vmatpush.msrb.mxu3 %v17430_v45  ;;  %8836 = vmatpush.msrb.mxu0 %v8835_v23  ;;  %v8217_v20 = vadd.f32 %v17436_v18, %v8120_v63  ;;  %v17437_v4 = vld [vmem:[#allocation27_spill] sm:$0xff]  ;;  %v17444_v19 = vand.u32 4294901760, %v16207_v32 }
 0x9cd   : >> { %v8546_v43 = vadd.f32 %v8538_v49, %v8522_v3  ;;  %v8353_v2 = vadd.f32 %v8352_v22, %v8283_v5  ;;  %8604 = vmatpush.msra.mxu2 %v8575_v17  ;;  %v17435_v22 = vld [vmem:[#allocation29_spill] sm:$0xff]  ;;  %v17439_v12 = vld [vmem:[#allocation15_spill] sm:$0xff] }
 0x9ce   : >> { %9138 = vmatpush.msra.mxu0 %v16046_v35  ;;  %9059 = vmatpush.msrb.mxu3 %v17432_v34  ;;  %v8019_v54 = vadd.f32 %v17435_v22, %v7954_v21  ;;  %v7861_v46 = vadd.f32 %v17439_v12, %v7780_v13  ;;  %v17440_v49 = vld [vmem:[#allocation23_spill] sm:$0xff]  ;;  %v17446_v34 = vand.u32 4294901760, %v16222_v30  ;;  %v17449_v13 = vld [vmem:[#allocation18_spill] sm:$0xff] }
 0x9cf   : >> { %8554 = vst [vmem:[#allocation3 + $0x18] sm:$0xff] %v8546_v43  ;;  %v8432_v48 = vadd.f32 %v8431_v16, %v8353_v2  ;;  %8605 = vmatpush.msra.mxu2 %v8574_v61  ;;  %v8523_v16 = vsub.f32 %v8507_v41, %v8515_v42  ;;  %v8492_v59 = vpop.f32.mrf.mxu1  ;;  %v17445_v2 = vld [vmem:[#allocation28_spill] sm:$0xff]  ;;  %v17448_v41 = vld [vmem:[#allocation14_spill] sm:$0xff] }
 0x9d0   : >> { %9140 = vmatpush.msra.mxu0 %v16057_v0  ;;  %9063 = vmatpush.msrb.mxu3 %v17434_v53  ;;  %v9982_v12 = vld [vmem:[#allocation2 + $0x38] sm:$0xff] }
 0x9d1   : >> { %v8489_v23 = vadd.f32 %v8488_v10, %v8432_v48  ;;  %8960 = vmatpush.msrb.mxu2 %v16046_v35  ;;  %v17441_v10 = vld [vmem:[#allocation22_spill] sm:$0xff]  ;;  %v17442_v35 = vld [vmem:[#allocation25_spill] sm:$0xff]  ;;  %v8516_v48 = vld [vmem:[#allocation3 + $0x28] sm:$0xff] }
 0x9d2   : >> { %9142 = vmatpush.msra.mxu0 %v17437_v4  ;;  %v8287_v9 = vpop.f32.mrf.mxu2  ;;  %9067 = vmatpush.msrb.mxu3 %v17438_v44  ;;  %v8128_v5 = vadd.f32 %v17441_v10, %v8019_v54  ;;  %v7958_v17 = vadd.f32 %v17442_v35, %v7861_v46  ;;  %v8510_v46 = vmul.f32 2.0, %v9982_v12 }
 0x9d3   : >> { %v8539_v29 = vmul.f32 %v8531_v50, %v8489_v23  ;;  %v8288_v3 = vadd.f32 %v8287_v9, %v8217_v20  ;;  %8962 = vmatpush.msrb.mxu2 %v16057_v0  ;;  %v9980_v0 = vld [vmem:[#allocation2 + $0x28] sm:$0xff]  ;;  %v8439_v53 = vpop.f32.mrf.mxu0 }
 0x9d4   : >> { %9144 = vmatpush.msra.mxu0 %v17440_v49  ;;  %9071 = vmatpush.msrb.mxu3 %v8785_v6  ;;  %v8508_v43 = vmul.f32 2.0, %v9980_v0  ;;  %v8364_v6 = vpop.f32.mrf.mxu3  ;;  %v8221_v32 = vadd.f32 %v17447_v25, %v8128_v5 }
 0x9d5   : >> { %v8547_v45 = vadd.f32 %v8539_v29, %v8523_v16  ;;  %v8359_v21 = vadd.f32 %v8358_v62, %v8288_v3  ;;  %8964 = vmatpush.msrb.mxu2 %v17437_v4  ;;  %v8023_v62 = vadd.f32 %v17448_v41, %v7958_v17  ;;  %v8517_v4 = vld [vmem:[#allocation3 + $0x30] sm:$0xff]  ;;  %v8568_v3 = vld [vmem:[%s10130_s25] sm:$0x1] }
 0x9d6   : >> { %9146 = vmatpush.msra.mxu0 %v17443_v14  ;;  %9075 = vmatpush.msrb.mxu3 %v17444_v19  ;;  %v8524_v22 = vsub.f32 %v8508_v43, %v8516_v48 }
 0x9d7   : >> { %8555 = vst [vmem:[#allocation3 + $0x20] sm:$0xff] %v8547_v45  ;;  %v8436_v63 = vadd.f32 %v8435_v24, %v8359_v21  ;;  %8966 = vmatpush.msrb.mxu2 %v17440_v49  ;;  %v8496_v50 = vpop.f32.mrf.mxu1  ;;  %v17450_v24 = vld [vmem:[#allocation12_spill] sm:$0xff]  ;;  %v8569_v49 = vstv %s8566_s17  ;;  %s9743_s17 = sld [smem:[#allocation8 + %s9742_s11]] }
 0x9d8   : >> { %9148 = vmatpush.msra.mxu0 %v17445_v2  ;;  %9079 = vmatpush.msrb.mxu3 %v17446_v34  ;;  %v8136_v18 = vadd.f32 %v17450_v24, %v8023_v62  ;;  %v8570_v10 = vmul.f32 %v8569_v49, %v8568_v3 }
 0x9d9   : >> { %v8493_v60 = vadd.f32 %v8492_v59, %v8436_v63  ;;  %8968 = vmatpush.msrb.mxu2 %v17443_v14 }
 0x9da   : >> { %9150 = vmatpush.msra.mxu0 %v17449_v13  ;;  %v8292_v61 = vpop.f32.mrf.mxu2  ;;  %9083 = vmatpush.msrb.mxu3 %v8803_v47  ;;  %v9981_v47 = vld [vmem:[#allocation2 + $0x30] sm:$0xff] }
 0x9db   : >> { %v8540_v30 = vmul.f32 %v8532_v58, %v8493_v60  ;;  %v8293_v54 = vadd.f32 %v8292_v61, %v8221_v32  ;;  %8970 = vmatpush.msrb.mxu2 %v17445_v2  ;;  %v8509_v42 = vmul.f32 2.0, %v9981_v47 }
 0x9dc   : >> { %9152 = vmatpush.msra.mxu0 %v16175_v28  ;;  %9087 = vmatpush.msrb.mxu3 %v8809_v51  ;;  %v17451_v51 = vld [vmem:[#allocation21_spill] sm:$0xff]  ;;  %v8370_v9 = vpop.f32.mrf.mxu3 }
 0x9dd   : >> { %v8548_v20 = vadd.f32 %v8540_v30, %v8524_v22  ;;  %v8365_v23 = vadd.f32 %v8364_v6, %v8293_v54  ;;  %8972 = vmatpush.msrb.mxu2 %v17449_v13  ;;  %v8225_v38 = vadd.f32 %v17451_v51, %v8136_v18 }
 0x9de   : >> { %9154 = vmatpush.msra.mxu0 %v16189_v56  ;;  %9091 = vmatpush.msrb.mxu3 %v8815_v1 }
 0x9df   : >> { %8556 = vst [vmem:[#allocation3 + $0x28] sm:$0xff] %v8548_v20  ;;  %v8440_v37 = vadd.f32 %v8439_v53, %v8365_v23  ;;  %8974 = vmatpush.msrb.mxu2 %v16175_v28  ;;  %v8525_v28 = vsub.f32 %v8509_v42, %v8517_v4  ;;  %v8500_v55 = vpop.f32.mrf.mxu1 }
 0x9e0   : >> { %9156 = vmatpush.msra.mxu0 %v16209_v31  ;;  %9095 = vmatpush.msrb.mxu3 %v8821_v39  ;;  %v8443_v39 = vpop.f32.mrf.mxu0 }
 0x9e1   : >> { %v8497_v1 = vadd.f32 %v8496_v50, %v8440_v37  ;;  %8976 = vmatpush.msrb.mxu2 %v16189_v56 }
 0x9e2   : >> { %9158 = vmatpush.msra.mxu0 %v16237_v57  ;;  %v8297_v16 = vpop.f32.mrf.mxu2  ;;  %9099 = vmatpush.msrb.mxu3 %v8827_v33 }
 0x9e3   : >> { %v8541_v59 = vmul.f32 %v8533_v40, %v8497_v1  ;;  %v8298_v26 = vadd.f32 %v8297_v16, %v8225_v38  ;;  %8978 = vmatpush.msrb.mxu2 %v16209_v31  ;;  %v8534_v31 = vld [vmem:[%s16957_s2 + $0x38] sm:$0xff] }
 0x9e4   : >> { %9160 = vmatpush.msra.mxu0 %v16258_v52  ;;  %9103 = vmatpush.msrb.mxu3 %v8833_v15 }
 0x9e5   : >> { %v8549_v56 = vadd.f32 %v8541_v59, %v8525_v28  ;;  %v8371_v44 = vadd.f32 %v8370_v9, %v8298_v26  ;;  %8980 = vmatpush.msrb.mxu2 %v16237_v57  ;;  %v8518_v57 = vld [vmem:[#allocation3 + $0x38] sm:$0xff] }
 0x9e6   : >> { %9162 = vmatpush.msra.mxu0 %v16283_v7  ;;  %v8526_v15 = vsub.f32 %v8510_v46, %v8518_v57  ;;  %v8621_v46 = vld [vmem:[%s16958_s3 + $0x8] sm:$0xff] }
 0x9e7   : >> { %8557 = vst [vmem:[#allocation3 + $0x30] sm:$0xff] %v8549_v56  ;;  %v8444_v33 = vadd.f32 %v8443_v39, %v8371_v44  ;;  %8982 = vmatpush.msrb.mxu2 %v16258_v52 }
 0x9e8   : >> { %9164 = vmatpush.msra.mxu0 %v16301_v8 }
 0x9e9   : >> { %v8501_v11 = vadd.f32 %v8500_v55, %v8444_v33  ;;  %8984 = vmatpush.msrb.mxu2 %v16283_v7  ;;  %v8620_v55 = vld [vmem:[%s16958_s3] sm:$0xff] }
 0x9ea   : >> { %9166 = vmatpush.msra.mxu0 %v16313_v36  ;;  %v9203_v33 = vsel %vm957_vm0, %v8620_v55, 0 }
 0x9eb   : >> { %v8542_v29 = vmul.f32 %v8534_v31, %v8501_v11  ;;  %8986 = vmatpush.msrb.mxu2 %v16301_v8  ;;  %v16633_v12 = vand.u32 4294901760, %v9203_v33  ;;  %v9206_v11 = vsel %vm957_vm0, %v8621_v46, 0 }
 0x9ec   : >> { %9168 = vmatpush.msra.mxu0 %v16334_v27 }
 0x9ed   : >> { %v8550_v52 = vadd.f32 %v8542_v29, %v8526_v15  ;;  %8988 = vmatpush.msrb.mxu2 %v16313_v36  ;;  %v16642_v31 = vsub.f32 %v9203_v33, %v16633_v12  ;;  %v16647_v15 = vand.u32 4294901760, %v9206_v11  ;;  %v8622_v29 = vld [vmem:[%s16958_s3 + $0x10] sm:$0xff] }
 0x9ee   : >> { %v9209_v49 = vsel %vm957_vm0, %v8622_v29, 0 }
 0x9ef   : >> { %8558 = vst [vmem:[#allocation3 + $0x38] sm:$0xff] %v8550_v52  ;;  %8990 = vmatpush.msrb.mxu2 %v16334_v27  ;;  %v9252_v57 = vand.u32 4294901760, %v16642_v31  ;;  %v16659_v3 = vsub.f32 %v9206_v11, %v16647_v15 }
 0x9f1   : >> { %v9253_v52 = vsub.f32 %v16642_v31, %v9252_v57 }
 0x9f6   : >> { %v8567_v5 = vld [vmem:[%s11286_s22] sm:$0x1] }
 0x9f7   : >> { %v8571_v35 = vadd.f32 %v8570_v10, %v8567_v5  ;;  %v9254_v10 = vand.u32 4294901760, %v9253_v52  ;;  %v9260_v5 = vand.u32 4294901760, %v16659_v3 }
 0x9f9   : >> { %8572 = vst [vmem:[%s11286_s22] sm:$0x1] %v8571_v35  ;;  %v16664_v35 = vand.u32 4294901760, %v9209_v49  ;;  %s9789_s22 = scalar_lea.vmem %s10140_s12, %s11253_s28 }
 0xa00   : >> { %v8573_v7 = vld [vmem:[%s11291_s23] sm:$0x1]  ;;  %v8619_v45 = vld [vmem:[#allocation3 + $0x38] sm:$0xff]  ;;  %v16488_v36 = vld [vmem:[#allocation3 + $0x30] sm:$0xff] }
 0xa01   : >> { %v16481_v17 = vld [vmem:[#allocation3] sm:$0xff]  ;;  %8606 = vmatmul.f32.vlgmr.msra.gmra.mxu2 %v8573_v7  ;;  %v16486_v8 = vand.u32 4294901760, %v8619_v45  ;;  %v16490_v14 = vld [vmem:[#allocation3 + $0x28] sm:$0xff]  ;;  %v16495_v19 = vand.u32 4294901760, %v16488_v36  ;;  %v16505_v2 = vld [vmem:[#allocation3 + $0x18] sm:$0xff] }
 0xa02   : >> { %v16484_v21 = vand.u32 4294901760, %v16481_v17  ;;  %v16492_v27 = vld [vmem:[#allocation3 + $0x20] sm:$0xff]  ;;  %v16498_v63 = vand.u32 4294901760, %v16490_v14  ;;  %v16503_v43 = vld [vmem:[#allocation3 + $0x8] sm:$0xff]  ;;  %v16519_v25 = vld [vmem:[#allocation3 + $0x10] sm:$0xff]  ;;  %v16523_v32 = vand.u32 4294901760, %v16505_v2 }
 0xa03   : >> { %v16501_v0 = vand.u32 4294901760, %v16492_v27  ;;  %9235 = vmatpush.msra.mxu1 %v16486_v8  ;;  %v16514_v6 = vand.u32 4294901760, %v16503_v43  ;;  %v16517_v34 = vsub.f32 %v8619_v45, %v16486_v8  ;;  %v16527_v41 = vsub.f32 %v16488_v36, %v16495_v19  ;;  %v8623_v7 = vld [vmem:[%s16958_s3 + $0x18] sm:$0xff] }
 0xa04   : >> { %8838 = vmatmul.f32.vlgmr.msrb.gmra.mxu0 %v16484_v21  ;;  %v16511_v58 = vsub.f32 %v16481_v17, %v16484_v21  ;;  %v16531_v62 = vsub.f32 %v16490_v14, %v16498_v63  ;;  %v16547_v61 = vand.u32 4294901760, %v16519_v25  ;;  %v16567_v18 = vsub.f32 %v16505_v2, %v16523_v32 }
 0xa05   : >> { %9486 = vmatpush.msrb.mxu0 %v16486_v8  ;;  %v16538_v13 = vand.u32 4294901760, %v16517_v34  ;;  %v16542_v48 = vsub.f32 %v16492_v27, %v16501_v0  ;;  %9237 = vmatpush.msra.mxu1 %v16495_v19  ;;  %v16550_v53 = vand.u32 4294901760, %v16527_v41  ;;  %v8685_v50 = vsub.f32 %v16503_v43, %v16514_v6 }
 0xa06   : >> { %8920 = vmatmul.f32.vlgmr.msrb.gmra.mxu1 %v16511_v58  ;;  %v16535_v60 = vand.u32 4294901760, %v16511_v58  ;;  %v16553_v22 = vand.u32 4294901760, %v16531_v62  ;;  %v8693_v42 = vsub.f32 %v16519_v25, %v16547_v61  ;;  %v8702_v38 = vand.u32 4294901760, %v16567_v18 }
 0xa07   : >> { %9488 = vmatpush.msrb.mxu0 %v16495_v19  ;;  %v8735_v54 = vsub.f32 %v16517_v34, %v16538_v13  ;;  %9239 = vmatpush.msra.mxu1 %v16498_v63  ;;  %v8727_v24 = vsub.f32 %v16527_v41, %v16550_v53  ;;  %v16573_v37 = vand.u32 4294901760, %v16542_v48  ;;  %v8686_v40 = vand.u32 4294901760, %v8685_v50 }
 0xa08   : >> { %v8679_v30 = vsub.f32 %v16511_v58, %v16535_v60  ;;  %v8719_v47 = vsub.f32 %v16531_v62, %v16553_v22  ;;  %v8694_v16 = vand.u32 4294901760, %v8693_v42  ;;  %v8703_v28 = vsub.f32 %v16567_v18, %v8702_v38 }
 0xa09   : >> { %9490 = vmatpush.msrb.mxu0 %v16498_v63  ;;  %8994 = vmatmul.f32.vlgmr.msrb.gmra.mxu2 %v16535_v60  ;;  %v16570_v23 = vand.u32 4294901760, %v8735_v54  ;;  %v16584_v51 = vand.u32 4294901760, %v8727_v24  ;;  %v8711_v1 = vsub.f32 %v16542_v48, %v16573_v37  ;;  %v8687_v9 = vsub.f32 %v8685_v50, %v8686_v40 }
 0xa0a   : >> { %v8680_v20 = vand.u32 4294901760, %v8679_v30  ;;  %9241 = vmatpush.msra.mxu1 %v16501_v0  ;;  %v16592_v4 = vand.u32 4294901760, %v8719_v47  ;;  %v8695_v26 = vsub.f32 %v8693_v42, %v8694_v16  ;;  %v8704_v56 = vand.u32 4294901760, %v8703_v28  ;;  %v8626_v47 = vld [vmem:[%s16958_s3 + $0x30] sm:$0xff] }
 0xa0b   : >> { %9492 = vmatpush.msrb.mxu0 %v16501_v0  ;;  %9328 = vmatpush.msra.mxu2 %v16570_v23  ;;  %v8712_v59 = vand.u32 4294901760, %v8711_v1  ;;  %v8688_v39 = vand.u32 4294901760, %v8687_v9  ;;  %v9261_v45 = vsub.f32 %v16659_v3, %v9260_v5 }
 0xa0c   : >> { %8681 = vmatmul.f32.vlgmr.msra.gmra.mxu3 %v8680_v20  ;;  %8842 = vmatmul.f32.gmra.mxu0 %v16514_v6  ;;  %v8696_v44 = vand.u32 4294901760, %v8695_v26 }
 0xa0d   : >> { %9243 = vmatpush.msra.mxu1 %v16523_v32  ;;  %9414 = vmatpush.msra.mxu3 %v16517_v34 }
 0xa0e   : >> { %9494 = vmatpush.msrb.mxu0 %v16523_v32  ;;  %8925 = vmatmul.f32.gmra.mxu1 %v8685_v50 }
 0xa0f   : >> { %9334 = vmatpush.msra.mxu2 %v16584_v51  ;;  %9245 = vmatpush.msra.mxu1 %v16547_v61 }
 0xa10   : >> { %9417 = vmatpush.msra.mxu3 %v16527_v41  ;;  %9496 = vmatpush.msrb.mxu0 %v16547_v61 }
 0xa11   : >> { %9340 = vmatpush.msra.mxu2 %v16592_v4  ;;  %9247 = vmatpush.msra.mxu1 %v16514_v6 }
 0xa12   : >> { %9420 = vmatpush.msra.mxu3 %v16531_v62  ;;  %9498 = vmatpush.msrb.mxu0 %v16514_v6 }
 0xa13   : >> { %9000 = vmatmul.f32.gmra.mxu2 %v8686_v40  ;;  %9249 = vmatpush.msra.mxu1 %v16484_v21 }
 0xa14   : >> { %9346 = vmatpush.msra.mxu2 %v8712_v59  ;;  %9423 = vmatpush.msra.mxu3 %v16542_v48 }
 0xa15   : >> { %9500 = vmatpush.msrb.mxu0 %v16484_v21  ;;  %9561 = vmatpush.msrb.mxu1 %v16538_v13 }
 0xa16   : >> { %8689 = vmatmul.f32.gmra.mxu3 %v8688_v39  ;;  %8846 = vmatmul.f32.gmra.mxu0 %v16547_v61 }
 0xa17   : >> { %9352 = vmatpush.msra.mxu2 %v8704_v56  ;;  %9426 = vmatpush.msra.mxu3 %v16567_v18 }
 0xa18   : >> { %9565 = vmatpush.msrb.mxu1 %v16550_v53 }
 0xa19   : >> { %8930 = vmatmul.f32.gmra.mxu1 %v8693_v42  ;;  %9358 = vmatpush.msra.mxu2 %v8696_v44 }
 0xa1a   : >> { %9429 = vmatpush.msra.mxu3 %v8693_v42  ;;  %9569 = vmatpush.msrb.mxu1 %v16553_v22 }
 0xa1b   : >> { %9364 = vmatpush.msra.mxu2 %v8688_v39 }
 0xa1c   : >> { %9432 = vmatpush.msra.mxu3 %v8685_v50  ;;  %9573 = vmatpush.msrb.mxu1 %v16573_v37  ;;  %v8625_v50 = vld [vmem:[%s16958_s3 + $0x28] sm:$0xff] }
 0xa1d   : >> { %9006 = vmatmul.f32.gmra.mxu2 %v8694_v16 }
 0xa1e   : >> { %9370 = vmatpush.msra.mxu2 %v8680_v20  ;;  %9435 = vmatpush.msra.mxu3 %v16511_v58  ;;  %v16675_v58 = vsub.f32 %v9209_v49, %v16664_v35  ;;  %v9218_v20 = vsel %vm957_vm0, %v8625_v50, 0 }
 0xa1f   : >> { %9577 = vmatpush.msrb.mxu1 %v8702_v38  ;;  %8697 = vmatmul.f32.gmra.mxu3 %v8696_v44 }
 0xa20   : >> { %9632 = vmatpush.msrb.mxu2 %v16486_v8  ;;  %8850 = vmatmul.f32.gmra.mxu0 %v16523_v32 }
 0xa21   : >> { %9581 = vmatpush.msrb.mxu1 %v8694_v16 }
 0xa22   : >> { %9634 = vmatpush.msrb.mxu2 %v16495_v19  ;;  %8935 = vmatmul.f32.gmra.mxu1 %v16567_v18 }
 0xa23   : >> { %9585 = vmatpush.msrb.mxu1 %v8686_v40 }
 0xa24   : >> { %9636 = vmatpush.msrb.mxu2 %v16498_v63 }
 0xa25   : >> { %9589 = vmatpush.msrb.mxu1 %v16535_v60  ;;  %9012 = vmatmul.f32.gmra.mxu2 %v8702_v38 }
 0xa26   : >> { %9638 = vmatpush.msrb.mxu2 %v16501_v0 }
 0xa27   : >> { %8705 = vmatmul.f32.gmra.mxu3 %v8704_v56 }
 0xa28   : >> { %9640 = vmatpush.msrb.mxu2 %v16523_v32  ;;  %8854 = vmatmul.f32.gmra.mxu0 %v16501_v0 }
 0xa2a   : >> { %9642 = vmatpush.msrb.mxu2 %v16547_v61  ;;  %8940 = vmatmul.f32.gmra.mxu1 %v16542_v48 }
 0xa2c   : >> { %9644 = vmatpush.msrb.mxu2 %v16514_v6 }
 0xa2d   : >> { %9018 = vmatmul.f32.gmra.mxu2 %v16573_v37  ;;  %v16712_v37 = vand.u32 4294901760, %v9218_v20 }
 0xa2e   : >> { %9646 = vmatpush.msrb.mxu2 %v16484_v21 }
 0xa2f   : >> { %8713 = vmatmul.f32.gmra.mxu3 %v8712_v59  ;;  %v16723_v40 = vsub.f32 %v9218_v20, %v16712_v37 }
 0xa30   : >> { %8858 = vmatmul.f32.gmra.mxu0 %v16498_v63 }
 0xa32   : >> { %8945 = vmatmul.f32.gmra.mxu1 %v16531_v62  ;;  %v9268_v62 = vand.u32 4294901760, %v16675_v58 }
 0xa34   : >> { %v9269_v48 = vsub.f32 %v16675_v58, %v9268_v62 }
 0xa35   : >> { %9024 = vmatmul.f32.gmra.mxu2 %v16553_v22 }
 0xa36   : >> { %v9270_v30 = vand.u32 4294901760, %v9269_v48 }
 0xa37   : >> { %8721 = vmatmul.f32.gmra.mxu3 %v16592_v4  ;;  %v8627_v4 = vld [vmem:[%s16958_s3 + $0x38] sm:$0xff] }
 0xa38   : >> { %8862 = vmatmul.f32.gmra.mxu0 %v16495_v19  ;;  %v9224_v28 = vsel %vm957_vm0, %v8627_v4, 0 }
 0xa39   : >> { %v16744_v26 = vand.u32 4294901760, %v9224_v28 }
 0xa3a   : >> { %8950 = vmatmul.f32.gmra.mxu1 %v16527_v41  ;;  %v9262_v41 = vand.u32 4294901760, %v9261_v45 }
 0xa3b   : >> { %v16752_v56 = vsub.f32 %v9224_v28, %v16744_v26 }
 0xa3d   : >> { %9030 = vmatmul.f32.gmra.mxu2 %v16550_v53  ;;  %v9308_v55 = vand.u32 4294901760, %v16752_v56 }
 0xa3f   : >> { %8729 = vmatmul.f32.gmra.mxu3 %v16584_v51  ;;  %v9221_v51 = vsel %vm957_vm0, %v8626_v47, 0 }
 0xa40   : >> { %8866 = vmatmul.f32.gmra.mxu0 %v16486_v8  ;;  %v16728_v1 = vand.u32 4294901760, %v9221_v51 }
 0xa42   : >> { %8955 = vmatmul.f32.gmra.mxu1 %v16517_v34  ;;  %v9212_v34 = vsel %vm957_vm0, %v8623_v7, 0  ;;  %v16739_v9 = vsub.f32 %v9221_v51, %v16728_v1 }
 0xa43   : >> { %v16680_v60 = vand.u32 4294901760, %v9212_v34 }
 0xa45   : >> { %9036 = vmatmul.f32.gmra.mxu2 %v16538_v13  ;;  %v8624_v13 = vld [vmem:[%s16958_s3 + $0x20] sm:$0xff]  ;;  %v16691_v53 = vsub.f32 %v9212_v34, %v16680_v60 }
 0xa46   : >> { %v9215_v22 = vsel %vm957_vm0, %v8624_v13, 0 }
 0xa47   : >> { %8737 = vmatmul.f32.gmra.mxu3 %v16570_v23  ;;  %v16696_v54 = vand.u32 4294901760, %v9215_v22 }
 0xa48   : >> { %9170 = vmatmul.f32.vlgmr.msra.gmra.mxu0 %v16484_v21 }
 0xa49   : >> { %v16707_v18 = vsub.f32 %v9215_v22, %v16696_v54 }
 0xa4a   : >> { %9255 = vmatmul.f32.vlgmr.msra.gmra.mxu1 %v9254_v10 }
 0xa4d   : >> { %9372 = vmatmul.f32.vlgmr.msra.gmra.mxu2 %v16633_v12 }
 0xa4f   : >> { %9105 = vmatmul.f32.vlgmr.msrb.gmra.mxu3 %v16484_v21  ;;  %v9276_v21 = vand.u32 4294901760, %v16691_v53 }
 0xa50   : >> { %9174 = vmatmul.f32.gmra.mxu0 %v16514_v6 }
 0xa51   : >> { %v9277_v24 = vsub.f32 %v16691_v53, %v9276_v21 }
 0xa52   : >> { %9263 = vmatmul.f32.gmra.mxu1 %v9262_v41 }
 0xa53   : >> { %v9278_v23 = vand.u32 4294901760, %v9277_v24 }
 0xa55   : >> { %9376 = vmatmul.f32.gmra.mxu2 %v16647_v15 }
 0xa57   : >> { %9109 = vmatmul.f32.gmra.mxu3 %v16514_v6  ;;  %v9284_v6 = vand.u32 4294901760, %v16707_v18 }
 0xa58   : >> { %9178 = vmatmul.f32.gmra.mxu0 %v16547_v61 }
 0xa59   : >> { %v9285_v42 = vsub.f32 %v16707_v18, %v9284_v6 }
 0xa5a   : >> { %9271 = vmatmul.f32.gmra.mxu1 %v9270_v30 }
 0xa5b   : >> { %v9286_v38 = vand.u32 4294901760, %v9285_v42 }
 0xa5d   : >> { %9380 = vmatmul.f32.gmra.mxu2 %v16664_v35 }
 0xa5f   : >> { %9113 = vmatmul.f32.gmra.mxu3 %v16547_v61  ;;  %v9292_v61 = vand.u32 4294901760, %v16723_v40 }
 0xa60   : >> { %9182 = vmatmul.f32.gmra.mxu0 %v16523_v32 }
 0xa61   : >> { %v9293_v16 = vsub.f32 %v16723_v40, %v9292_v61 }
 0xa62   : >> { %9279 = vmatmul.f32.gmra.mxu1 %v9278_v23 }
 0xa63   : >> { %v9294_v59 = vand.u32 4294901760, %v9293_v16 }
 0xa65   : >> { %9384 = vmatmul.f32.gmra.mxu2 %v16680_v60 }
 0xa67   : >> { %9117 = vmatmul.f32.gmra.mxu3 %v16523_v32  ;;  %v9300_v32 = vand.u32 4294901760, %v16739_v9 }
 0xa68   : >> { %9186 = vmatmul.f32.gmra.mxu0 %v16501_v0 }
 0xa69   : >> { %v9301_v39 = vsub.f32 %v16739_v9, %v9300_v32 }
 0xa6a   : >> { %9287 = vmatmul.f32.gmra.mxu1 %v9286_v38 }
 0xa6b   : >> { %v9302_v44 = vand.u32 4294901760, %v9301_v39 }
 0xa6d   : >> { %9388 = vmatmul.f32.gmra.mxu2 %v16696_v54 }
 0xa6f   : >> { %9121 = vmatmul.f32.gmra.mxu3 %v16501_v0  ;;  %v9309_v0 = vsub.f32 %v16752_v56, %v9308_v55 }
 0xa70   : >> { %9190 = vmatmul.f32.gmra.mxu0 %v16498_v63 }
 0xa71   : >> { %v9310_v33 = vand.u32 4294901760, %v9309_v0 }
 0xa72   : >> { %9295 = vmatmul.f32.gmra.mxu1 %v9294_v59 }
 0xa75   : >> { %9392 = vmatmul.f32.gmra.mxu2 %v16712_v37 }
 0xa77   : >> { %9125 = vmatmul.f32.gmra.mxu3 %v16498_v63 }
 0xa78   : >> { %9194 = vmatmul.f32.gmra.mxu0 %v16495_v19 }
 0xa7a   : >> { %9303 = vmatmul.f32.gmra.mxu1 %v9302_v44 }
 0xa7d   : >> { %9396 = vmatmul.f32.gmra.mxu2 %v16728_v1 }
 0xa7f   : >> { %9129 = vmatmul.f32.gmra.mxu3 %v16495_v19 }
 0xa80   : >> { %9198 = vmatmul.f32.gmra.mxu0 %v16486_v8 }
 0xa81   : >> { %v8839_v46 = vpop.f32.mrf.mxu0 }
 0xa82   : >> { %9311 = vmatmul.f32.gmra.mxu1 %v9310_v33 }
 0xa83   : >> { %v8921_v11 = vpop.f32.mrf.mxu1 }
 0xa84   : >> { %v8607_v29 = vpop.f32.mrf.mxu2 }
 0xa85   : >> { %8610 = vst.msk [vmem:[#allocation4 + $0x6] sm:$0x1] %vm1545_vm1, %v8607_v29  ;;  %9400 = vmatmul.f32.gmra.mxu2 %v16744_v26 }
 0xa87   : >> { %9133 = vmatmul.f32.gmra.mxu3 %v16486_v8 }
 0xa88   : >> { %9504 = vmatmul.f32.vlgmr.msrb.gmra.mxu0 %v9252_v57 }
 0xa89   : >> { %v8843_v63 = vpop.f32.mrf.mxu0 }
 0xa8a   : >> { %9591 = vmatmul.f32.vlgmr.msrb.gmra.mxu1 %v16633_v12 }
 0xa8b   : >> { %v8926_v52 = vpop.f32.mrf.mxu1 }
 0xa8c   : >> { %v8995_v19 = vpop.f32.mrf.mxu2 }
 0xa8d   : >> { %9648 = vmatmul.f32.vlgmr.msrb.gmra.mxu2 %v16633_v12 }
 0xa8f   : >> { %v8682_v49 = vpop.f32.mrf.mxu3  ;;  %9438 = vmatmul.f32.vlgmr.msra.gmra.mxu3 %v16642_v31 }
 0xa90   : >> { %v8840_v10 = vadd.f32 %v8839_v46, %v8682_v49  ;;  %9510 = vmatmul.f32.gmra.mxu0 %v9260_v5 }
 0xa92   : >> { %v8922_v7 = vadd.f32 %v8921_v11, %v8840_v10  ;;  %9595 = vmatmul.f32.gmra.mxu1 %v16647_v15 }
 0xa93   : >> { %v8847_v8 = vpop.f32.mrf.mxu0 }
 0xa94   : >> { %v16775_v45 = vadd.f32 %v8995_v19, %v8922_v7 }
 0xa95   : >> { %9652 = vmatmul.f32.gmra.mxu2 %v16647_v15 }
 0xa96   : >> { %v8931_v57 = vpop.f32.mrf.mxu1  ;;  %v9001_v34 = vpop.f32.mrf.mxu2 }
 0xa97   : >> { %9443 = vmatmul.f32.gmra.mxu3 %v16659_v3 }
 0xa98   : >> { %9516 = vmatmul.f32.gmra.mxu0 %v9268_v62 }
 0xa99   : >> { %v8690_v12 = vpop.f32.mrf.mxu3 }
 0xa9a   : >> { %v8844_v31 = vadd.f32 %v8843_v63, %v8690_v12  ;;  %9599 = vmatmul.f32.gmra.mxu1 %v16664_v35 }
 0xa9c   : >> { %v8927_v5 = vadd.f32 %v8926_v52, %v8844_v31 }
 0xa9d   : >> { %v8851_v41 = vpop.f32.mrf.mxu0  ;;  %9656 = vmatmul.f32.gmra.mxu2 %v16664_v35 }
 0xa9e   : >> { %v16783_v13 = vadd.f32 %v9001_v34, %v8927_v5 }
 0xa9f   : >> { %v8936_v48 = vpop.f32.mrf.mxu1  ;;  %9448 = vmatmul.f32.gmra.mxu3 %v16675_v58 }
 0xaa0   : >> { %v9007_v22 = vpop.f32.mrf.mxu2  ;;  %9522 = vmatmul.f32.gmra.mxu0 %v9276_v21 }
 0xaa2   : >> { %9603 = vmatmul.f32.gmra.mxu1 %v16680_v60  ;;  %v8698_v15 = vpop.f32.mrf.mxu3 }
 0xaa3   : >> { %v8848_v3 = vadd.f32 %v8847_v8, %v8698_v15 }
 0xaa5   : >> { %v8855_v62 = vpop.f32.mrf.mxu0  ;;  %v8932_v30 = vadd.f32 %v8931_v57, %v8848_v3  ;;  %9660 = vmatmul.f32.gmra.mxu2 %v16680_v60 }
 0xaa7   : >> { %v8941_v50 = vpop.f32.mrf.mxu1  ;;  %9453 = vmatmul.f32.gmra.mxu3 %v16691_v53  ;;  %v16793_v35 = vadd.f32 %v9007_v22, %v8932_v30 }
 0xaa8   : >> { %9528 = vmatmul.f32.gmra.mxu0 %v9284_v6  ;;  %v9013_v58 = vpop.f32.mrf.mxu2 }
 0xaaa   : >> { %9607 = vmatmul.f32.gmra.mxu1 %v16696_v54  ;;  %v8706_v21 = vpop.f32.mrf.mxu3 }
 0xaab   : >> { %v8852_v24 = vadd.f32 %v8851_v41, %v8706_v21 }
 0xaad   : >> { %v8859_v20 = vpop.f32.mrf.mxu0  ;;  %v8937_v23 = vadd.f32 %v8936_v48, %v8852_v24  ;;  %9664 = vmatmul.f32.gmra.mxu2 %v16696_v54 }
 0xaaf   : >> { %v8946_v47 = vpop.f32.mrf.mxu1  ;;  %9458 = vmatmul.f32.gmra.mxu3 %v16707_v18  ;;  %v16800_v60 = vadd.f32 %v9013_v58, %v8937_v23 }
 0xab0   : >> { %9534 = vmatmul.f32.gmra.mxu0 %v9292_v61  ;;  %v9019_v53 = vpop.f32.mrf.mxu2 }
 0xab2   : >> { %9611 = vmatmul.f32.gmra.mxu1 %v16712_v37  ;;  %v8714_v6 = vpop.f32.mrf.mxu3 }
 0xab3   : >> { %v8856_v42 = vadd.f32 %v8855_v62, %v8714_v6 }
 0xab5   : >> { %v8863_v51 = vpop.f32.mrf.mxu0  ;;  %v8942_v38 = vadd.f32 %v8941_v50, %v8856_v42  ;;  %9668 = vmatmul.f32.gmra.mxu2 %v16712_v37 }
 0xab7   : >> { %v8951_v4 = vpop.f32.mrf.mxu1  ;;  %9463 = vmatmul.f32.gmra.mxu3 %v16723_v40  ;;  %v16807_v54 = vadd.f32 %v9019_v53, %v8942_v38 }
 0xab8   : >> { %9540 = vmatmul.f32.gmra.mxu0 %v9300_v32  ;;  %v9025_v18 = vpop.f32.mrf.mxu2 }
 0xaba   : >> { %9615 = vmatmul.f32.gmra.mxu1 %v16728_v1  ;;  %v8722_v61 = vpop.f32.mrf.mxu3 }
 0xabb   : >> { %v8860_v16 = vadd.f32 %v8859_v20, %v8722_v61 }
 0xabd   : >> { %v8867_v28 = vpop.f32.mrf.mxu0  ;;  %v8947_v59 = vadd.f32 %v8946_v47, %v8860_v16  ;;  %9672 = vmatmul.f32.gmra.mxu2 %v16728_v1 }
 0xabf   : >> { %v8956_v39 = vpop.f32.mrf.mxu1  ;;  %9468 = vmatmul.f32.gmra.mxu3 %v16739_v9  ;;  %v16814_v37 = vadd.f32 %v9025_v18, %v8947_v59  ;;  %v9766_v59 = vld [vmem:[%s10135_s29 + $0x78] sm:$0xff] }
 0xac0   : >> { %9546 = vmatmul.f32.gmra.mxu0 %v9308_v55  ;;  %v9031_v40 = vpop.f32.mrf.mxu2  ;;  %9767 = vmatpush.msrb.mxu3 %v9766_v59 }
 0xac2   : >> { %9619 = vmatmul.f32.gmra.mxu1 %v16744_v26  ;;  %v8730_v32 = vpop.f32.mrf.mxu3 }
 0xac3   : >> { %v8864_v44 = vadd.f32 %v8863_v51, %v8730_v32 }
 0xac5   : >> { %v9171_v0 = vpop.f32.mrf.mxu0  ;;  %v8952_v33 = vadd.f32 %v8951_v4, %v8864_v44  ;;  %9676 = vmatmul.f32.gmra.mxu2 %v16744_v26 }
 0xac7   : >> { %v9256_v46 = vpop.f32.mrf.mxu1  ;;  %9473 = vmatmul.f32.gmra.mxu3 %v16752_v56  ;;  %v16819_v1 = vadd.f32 %v9031_v40, %v8952_v33 }
 0xac8   : >> { %v9037_v9 = vpop.f32.mrf.mxu2 }
 0xaca   : >> { %v8738_v11 = vpop.f32.mrf.mxu3 }
 0xacb   : >> { %v8868_v29 = vadd.f32 %v8867_v28, %v8738_v11 }
 0xacd   : >> { %v9175_v55 = vpop.f32.mrf.mxu0  ;;  %v8957_v63 = vadd.f32 %v8956_v39, %v8868_v29  ;;  %v9765_v39 = vld [vmem:[%s10135_s29 + $0x70] sm:$0xff] }
 0xace   : >> { %9768 = vmatpush.msrb.mxu3 %v9765_v39 }
 0xacf   : >> { %v9264_v52 = vpop.f32.mrf.mxu1  ;;  %v16821_v19 = vadd.f32 %v9037_v9, %v8957_v63  ;;  %v9764_v63 = vld [vmem:[%s10135_s29 + $0x68] sm:$0xff] }
 0xad0   : >> { %v9373_v49 = vpop.f32.mrf.mxu2  ;;  %9769 = vmatpush.msrb.mxu3 %v9764_v63 }
 0xad2   : >> { %v9106_v10 = vpop.f32.mrf.mxu3 }
 0xad3   : >> { %v9107_v42 = vadd.f32 %v9106_v10, %v16775_v45  ;;  %v9763_v10 = vld [vmem:[%s10135_s29 + $0x60] sm:$0xff] }
 0xad4   : >> { %9770 = vmatpush.msrb.mxu3 %v9763_v10 }
 0xad5   : >> { %v9179_v7 = vpop.f32.mrf.mxu0  ;;  %v9172_v4 = vadd.f32 %v9171_v0, %v9107_v42 }
 0xad7   : >> { %v16823_v8 = vpop.f32.mrf.mxu1  ;;  %v9257_v61 = vadd.f32 %v9256_v46, %v9172_v4 }
 0xad8   : >> { %v9377_v57 = vpop.f32.mrf.mxu2 }
 0xad9   : >> { %v9374_v44 = vadd.f32 %v9373_v49, %v9257_v61 }
 0xada   : >> { %v9110_v26 = vpop.f32.mrf.mxu3 }
 0xadb   : >> { %v9111_v16 = vadd.f32 %v9110_v26, %v16783_v13  ;;  %v9680_v13 = vmul.f32 2.0, %v16481_v17  ;;  %v9704_v26 = vld [vmem:[%s16957_s2] sm:$0xff] }
 0xadd   : >> { %v16825_v34 = vpop.f32.mrf.mxu0  ;;  %v9176_v33 = vadd.f32 %v9175_v55, %v9111_v16 }
 0xadf   : >> { %v16827_v56 = vpop.f32.mrf.mxu1  ;;  %v9265_v11 = vadd.f32 %v9264_v52, %v9176_v33  ;;  %v9688_v52 = vld [vmem:[#allocation2] sm:$0xff] }
 0xae0   : >> { %v16829_v12 = vpop.f32.mrf.mxu2 }
 0xae1   : >> { %v9378_v55 = vadd.f32 %v9377_v57, %v9265_v11  ;;  %v9762_v57 = vld [vmem:[%s10135_s29 + $0x58] sm:$0xff] }
 0xae2   : >> { %v9114_v31 = vpop.f32.mrf.mxu3  ;;  %9771 = vmatpush.msrb.mxu3 %v9762_v57 }
 0xae3   : >> { %v9115_v0 = vadd.f32 %v9114_v31, %v16793_v35 }
 0xae5   : >> { %v16831_v5 = vpop.f32.mrf.mxu0  ;;  %v9180_v49 = vadd.f32 %v9179_v7, %v9115_v0  ;;  %v9681_v7 = vmul.f32 2.0, %v16503_v43 }
 0xae7   : >> { %v16833_v41 = vpop.f32.mrf.mxu1  ;;  %v9273_v16 = vadd.f32 %v16823_v8, %v9180_v49  ;;  %v9706_v49 = vld [vmem:[%s16957_s2 + $0x10] sm:$0xff] }
 0xae8   : >> { %v16835_v48 = vpop.f32.mrf.mxu2 }
 0xae9   : >> { %v9382_v11 = vadd.f32 %v16829_v12, %v9273_v16 }
 0xaea   : >> { %v9118_v22 = vpop.f32.mrf.mxu3 }
 0xaeb   : >> { %v9119_v59 = vadd.f32 %v9118_v22, %v16800_v60  ;;  %v9689_v60 = vld [vmem:[#allocation2 + $0x8] sm:$0xff] }
 0xaec   : >> { %v9697_v43 = vsub.f32 %v9681_v7, %v9689_v60  ;;  %v9707_v7 = vld [vmem:[%s16957_s2 + $0x18] sm:$0xff] }
 0xaed   : >> { %v16837_v15 = vpop.f32.mrf.mxu0  ;;  %v9184_v8 = vadd.f32 %v16825_v34, %v9119_v59 }
 0xaef   : >> { %v16839_v3 = vpop.f32.mrf.mxu1 }
 0xaf0   : >> { %v16841_v62 = vpop.f32.mrf.mxu2 }
 0xaf2   : >> { %v16843_v30 = vpop.f32.mrf.mxu3 }
 0xaf3   : >> { %v9123_v63 = vadd.f32 %v16843_v30, %v16807_v54  ;;  %v9690_v54 = vld [vmem:[#allocation2 + $0x10] sm:$0xff] }
 0xaf5   : >> { %v16845_v50 = vpop.f32.mrf.mxu0 }
 0xaf7   : >> { %v16847_v58 = vpop.f32.mrf.mxu1 }
 0xaf8   : >> { %v16849_v21 = vpop.f32.mrf.mxu2 }
 0xafa   : >> { %v16851_v24 = vpop.f32.mrf.mxu3 }
 0xafd   : >> { %v16853_v20 = vpop.f32.mrf.mxu0 }
 0xaff   : >> { %v16855_v23 = vpop.f32.mrf.mxu1 }
 0xb00   : >> { %v16857_v47 = vpop.f32.mrf.mxu2 }
 0xb02   : >> { %v16859_v53 = vpop.f32.mrf.mxu3 }
 0xb05   : >> { %v9505_v6 = vpop.f32.mrf.mxu0 }
 0xb07   : >> { %v9592_v51 = vpop.f32.mrf.mxu1 }
 0xb08   : >> { %v16862_v38 = vpop.f32.mrf.mxu2 }
 0xb0a   : >> { %v16864_v18 = vpop.f32.mrf.mxu3 }
 0xb0d   : >> { %v9511_v28 = vpop.f32.mrf.mxu0 }
 0xb0f   : >> { %v9596_v32 = vpop.f32.mrf.mxu1 }
 0xb10   : >> { %v9649_v40 = vpop.f32.mrf.mxu2 }
 0xb12   : >> { %v9439_v45 = vpop.f32.mrf.mxu3 }
 0xb13   : >> { %v9440_v9 = vadd.f32 %v9439_v45, %v9374_v44  ;;  %v9705_v45 = vld [vmem:[%s16957_s2 + $0x8] sm:$0xff] }
 0xb15   : >> { %v9506_v29 = vadd.f32 %v9505_v6, %v9440_v9  ;;  %v9517_v4 = vpop.f32.mrf.mxu0  ;;  %v9696_v6 = vsub.f32 %v9680_v13, %v9688_v52  ;;  %v9281_v13 = vadd.f32 %v16827_v56, %v9184_v8  ;;  %v9188_v56 = vadd.f32 %v16831_v5, %v9123_v63  ;;  %v9692_v63 = vld [vmem:[#allocation2 + $0x20] sm:$0xff] }
 0xb17   : >> { %v9593_v46 = vadd.f32 %v9592_v51, %v9506_v29  ;;  %v9600_v31 = vpop.f32.mrf.mxu1  ;;  %v9386_v52 = vadd.f32 %v16835_v48, %v9281_v13  ;;  %v9754_v13 = vld [vmem:[%s10135_s29 + $0x18] sm:$0xff] }
 0xb18   : >> { %v9653_v42 = vpop.f32.mrf.mxu2 }
 0xb19   : >> { %v9650_v61 = vadd.f32 %v9649_v40, %v9593_v46  ;;  %v9761_v40 = vld [vmem:[%s10135_s29 + $0x50] sm:$0xff] }
 0xb1a   : >> { %v9444_v35 = vpop.f32.mrf.mxu3  ;;  %9772 = vmatpush.msrb.mxu3 %v9761_v40 }
 0xb1b   : >> { %v9712_v17 = vmul.f32 %v9704_v26, %v9650_v61  ;;  %v9445_v51 = vadd.f32 %v9444_v35, %v9378_v55  ;;  %v9682_v26 = vmul.f32 2.0, %v16519_v25  ;;  %v9759_v55 = vld [vmem:[%s10135_s29 + $0x40] sm:$0xff] }
 0xb1d   : >> { %v9720_v39 = vadd.f32 %v9712_v17, %v9696_v6  ;;  %v9512_v44 = vadd.f32 %v9511_v28, %v9445_v51  ;;  %v9523_v28 = vpop.f32.mrf.mxu0  ;;  %v9289_v17 = vadd.f32 %v16833_v41, %v9188_v56  ;;  %v9127_v51 = vadd.f32 %v16851_v24, %v16814_v37  ;;  %v9691_v24 = vld [vmem:[#allocation2 + $0x18] sm:$0xff] }
 0xb1e   : >> { %v9685_v56 = vmul.f32 2.0, %v16490_v14 }
 0xb1f   : >> { %9728 = vst [vmem:[#allocation2] sm:$0xff] %v9720_v39  ;;  %v9597_v33 = vadd.f32 %v9596_v32, %v9512_v44  ;;  %v9604_v46 = vpop.f32.mrf.mxu1  ;;  %v9683_v39 = vmul.f32 2.0, %v16505_v2  ;;  %v9758_v44 = vld [vmem:[%s10135_s29 + $0x38] sm:$0xff]  ;;  %v9390_v41 = vadd.f32 %v16841_v62, %v9289_v17  ;;  %v9192_v40 = vadd.f32 %v16837_v15, %v9127_v51 }
 0xb20   : >> { %v9657_v9 = vpop.f32.mrf.mxu2 }
 0xb21   : >> { %v9654_v0 = vadd.f32 %v9653_v42, %v9597_v33  ;;  %v9760_v42 = vld [vmem:[%s10135_s29 + $0x48] sm:$0xff]  ;;  %v9757_v33 = vld [vmem:[%s10135_s29 + $0x30] sm:$0xff]  ;;  %v9297_v8 = vadd.f32 %v16839_v3, %v9192_v40 }
 0xb22   : >> { %v9449_v22 = vpop.f32.mrf.mxu3  ;;  %9773 = vmatpush.msrb.mxu3 %v9760_v42  ;;  %v9753_v42 = vld [vmem:[%s10135_s29 + $0x10] sm:$0xff] }
 0xb23   : >> { %v9713_v32 = vmul.f32 %v9705_v45, %v9654_v0  ;;  %v9450_v29 = vadd.f32 %v9449_v22, %v9382_v11  ;;  %v9131_v0 = vadd.f32 %v16859_v53, %v16819_v1  ;;  %v9394_v3 = vadd.f32 %v16849_v21, %v9297_v8 }
 0xb24   : >> { %9774 = vmatpush.msrb.mxu3 %v9759_v55  ;;  %v9135_v21 = vadd.f32 %v16864_v18, %v16821_v19  ;;  %v9693_v18 = vld [vmem:[#allocation2 + $0x28] sm:$0xff] }
 0xb25   : >> { %v9721_v10 = vadd.f32 %v9713_v32, %v9697_v43  ;;  %v9518_v12 = vadd.f32 %v9517_v4, %v9450_v29  ;;  %v9698_v4 = vsub.f32 %v9682_v26, %v9690_v54  ;;  %v9529_v6 = vpop.f32.mrf.mxu0  ;;  %v9756_v43 = vld [vmem:[%s10135_s29 + $0x28] sm:$0xff]  ;;  %v9755_v32 = vld [vmem:[%s10135_s29 + $0x20] sm:$0xff]  ;;  %v9196_v1 = vadd.f32 %v16845_v50, %v9131_v0  ;;  %v9695_v0 = vld [vmem:[#allocation2 + $0x38] sm:$0xff] }
 0xb26   : >> { %9775 = vmatpush.msrb.mxu3 %v9758_v44  ;;  %v9708_v29 = vld [vmem:[%s16957_s2 + $0x20] sm:$0xff]  ;;  %v9709_v54 = vld [vmem:[%s16957_s2 + $0x28] sm:$0xff] }
 0xb27   : >> { %9729 = vst [vmem:[#allocation2 + $0x8] sm:$0xff] %v9721_v10  ;;  %v9601_v34 = vadd.f32 %v9600_v31, %v9518_v12  ;;  %v9608_v48 = vpop.f32.mrf.mxu1  ;;  %v9305_v55 = vadd.f32 %v16847_v58, %v9196_v1 }
 0xb28   : >> { %v9661_v61 = vpop.f32.mrf.mxu2  ;;  %9776 = vmatpush.msrb.mxu3 %v9757_v33  ;;  %v9694_v33 = vld [vmem:[#allocation2 + $0x30] sm:$0xff] }
 0xb29   : >> { %v9658_v35 = vadd.f32 %v9657_v9, %v9601_v34  ;;  %v9699_v9 = vsub.f32 %v9683_v39, %v9691_v24  ;;  %v9398_v58 = vadd.f32 %v16857_v47, %v9305_v55 }
 0xb2a   : >> { %v9454_v30 = vpop.f32.mrf.mxu3  ;;  %9777 = vmatpush.msrb.mxu3 %v9756_v43 }
 0xb2b   : >> { %v9714_v25 = vmul.f32 %v9706_v49, %v9658_v35  ;;  %v9455_v31 = vadd.f32 %v9454_v30, %v9386_v52  ;;  %v9751_v35 = vld [vmem:[%s10135_s29] sm:$0xff] }
 0xb2c   : >> { %9778 = vmatpush.msrb.mxu3 %v9755_v32 }
 0xb2d   : >> { %v9722_v16 = vadd.f32 %v9714_v25, %v9698_v4  ;;  %v9524_v59 = vadd.f32 %v9523_v28, %v9455_v31  ;;  %v9535_v62 = vpop.f32.mrf.mxu0  ;;  %v9684_v28 = vmul.f32 2.0, %v16492_v27  ;;  %v9200_v4 = vadd.f32 %v16853_v20, %v9135_v21 }
 0xb2e   : >> { %9779 = vmatpush.msrb.mxu3 %v9754_v13  ;;  %v9686_v20 = vmul.f32 2.0, %v16488_v36 }
 0xb2f   : >> { %9730 = vst [vmem:[#allocation2 + $0x10] sm:$0xff] %v9722_v16  ;;  %v9605_v5 = vadd.f32 %v9604_v46, %v9524_v59  ;;  %v9612_v46 = vpop.f32.mrf.mxu1  ;;  %v9700_v27 = vsub.f32 %v9684_v28, %v9692_v63  ;;  %v9313_v16 = vadd.f32 %v16855_v23, %v9200_v4  ;;  %v9746_v28 = vstv %s9743_s17 }
 0xb30   : >> { %v9665_v57 = vpop.f32.mrf.mxu2  ;;  %9780 = vmatpush.msrb.mxu3 %v9753_v42  ;;  %v9702_v23 = vsub.f32 %v9686_v20, %v9694_v33 }
 0xb31   : >> { %v9662_v37 = vadd.f32 %v9661_v61, %v9605_v5  ;;  %v9752_v61 = vld [vmem:[%s10135_s29 + $0x8] sm:$0xff]  ;;  %v9710_v5 = vld [vmem:[%s16957_s2 + $0x30] sm:$0xff]  ;;  %v9402_v39 = vadd.f32 %v16862_v38, %v9313_v16  ;;  %v9983_v38 = vld [vmem:[#allocation3 + $0x38] sm:$0xff] }
 0xb32   : >> { %v9459_v45 = vpop.f32.mrf.mxu3  ;;  %9781 = vmatpush.msrb.mxu3 %v9752_v61 }
 0xb33   : >> { %v9715_v2 = vmul.f32 %v9707_v7, %v9662_v37  ;;  %v9460_v11 = vadd.f32 %v9459_v45, %v9390_v41 }
 0xb34   : >> { %9782 = vmatpush.msrb.mxu3 %v9751_v35 }
 0xb35   : >> { %v9723_v60 = vadd.f32 %v9715_v2, %v9699_v9  ;;  %v9530_v22 = vadd.f32 %v9529_v6, %v9460_v11  ;;  %v9541_v30 = vpop.f32.mrf.mxu0  ;;  %v9701_v6 = vsub.f32 %v9685_v56, %v9693_v18  ;;  %v9687_v2 = vmul.f32 2.0, %v9983_v38  ;;  %v9711_v11 = vld [vmem:[%s16957_s2 + $0x38] sm:$0xff] }
 0xb37   : >> { %9731 = vst [vmem:[#allocation2 + $0x18] sm:$0xff] %v9723_v60  ;;  %v9609_v15 = vadd.f32 %v9608_v48, %v9530_v22  ;;  %v9616_v31 = vpop.f32.mrf.mxu1  ;;  %v9703_v60 = vsub.f32 %v9687_v2, %v9695_v0 }
 0xb38   : >> { %v9669_v12 = vpop.f32.mrf.mxu2 }
 0xb39   : >> { %v9666_v53 = vadd.f32 %v9665_v57, %v9609_v15  ;;  %v9745_v15 = vld [vmem:[%s10130_s25] sm:$0x1] }
 0xb3a   : >> { %v9464_v10 = vpop.f32.mrf.mxu3  ;;  %v9747_v43 = vmul.f32 %v9746_v28, %v9745_v15 }
 0xb3b   : >> { %v9716_v34 = vmul.f32 %v9708_v29, %v9666_v53  ;;  %v9465_v26 = vadd.f32 %v9464_v10, %v9394_v3 }
 0xb3d   : >> { %v9724_v50 = vadd.f32 %v9716_v34, %v9700_v27  ;;  %v9536_v49 = vadd.f32 %v9535_v62, %v9465_v26  ;;  %v9547_v57 = vpop.f32.mrf.mxu0 }
 0xb3f   : >> { %9732 = vst [vmem:[#allocation2 + $0x20] sm:$0xff] %v9724_v50  ;;  %v9613_v52 = vadd.f32 %v9612_v46, %v9536_v49  ;;  %v9620_v37 = vpop.f32.mrf.mxu1 }
 0xb40   : >> { %v9673_v51 = vpop.f32.mrf.mxu2 }
 0xb41   : >> { %v9670_v19 = vadd.f32 %v9669_v12, %v9613_v52 }
 0xb42   : >> { %v9469_v25 = vpop.f32.mrf.mxu3 }
 0xb43   : >> { %v9717_v14 = vmul.f32 %v9709_v54, %v9670_v19  ;;  %v9470_v17 = vadd.f32 %v9469_v25, %v9398_v58 }
 0xb45   : >> { %v9725_v59 = vadd.f32 %v9717_v14, %v9701_v6  ;;  %v9542_v48 = vadd.f32 %v9541_v30, %v9470_v17 }
 0xb47   : >> { %9733 = vst [vmem:[#allocation2 + $0x28] sm:$0xff] %v9725_v59  ;;  %v9617_v47 = vadd.f32 %v9616_v31, %v9542_v48 }
 0xb48   : >> { %v9677_v45 = vpop.f32.mrf.mxu2 }
 0xb49   : >> { %v9674_v44 = vadd.f32 %v9673_v51, %v9617_v47 }
 0xb4a   : >> { %v9474_v7 = vpop.f32.mrf.mxu3 }
 0xb4b   : >> { %v9718_v41 = vmul.f32 %v9710_v5, %v9674_v44  ;;  %v9475_v40 = vadd.f32 %v9474_v7, %v9402_v39 }
 0xb4d   : >> { %v9726_v24 = vadd.f32 %v9718_v41, %v9702_v23  ;;  %v9548_v36 = vadd.f32 %v9547_v57, %v9475_v40 }
 0xb4f   : >> { %9734 = vst [vmem:[#allocation2 + $0x30] sm:$0xff] %v9726_v24  ;;  %v9621_v9 = vadd.f32 %v9620_v37, %v9548_v36 }
 0xb51   : >> { %v9678_v8 = vadd.f32 %v9677_v45, %v9621_v9 }
 0xb53   : >> { %v9719_v22 = vmul.f32 %v9711_v11, %v9678_v8 }
 0xb55   : >> { %v9727_v62 = vadd.f32 %v9719_v22, %v9703_v60 }
 0xb57   : >> { %9735 = vst [vmem:[#allocation2 + $0x38] sm:$0xff] %v9727_v62 }
 0xb5e   : >> { %v9744_v32 = vld [vmem:[%s12144_s6] sm:$0x1] }
 0xb5f   : >> { %v9748_v29 = vadd.f32 %v9747_v43, %v9744_v32 }
 0xb61   : >> { %9749 = vst [vmem:[%s12144_s6] sm:$0x1] %v9748_v29 }
 0xb68   : >> { %v9750_v46 = vld [vmem:[%s12149_s14] sm:$0x1] }
 0xb69   : >> { %9783 = vmatmul.f32.vlgmr.msrb.gmra.mxu3 %v9750_v46 }
 0xbec   : >> { %v9784_v3 = vpop.f32.mrf.mxu3 }
 0xbed   : >> { %9787 = vst.msk [vmem:[#allocation4 + $0x7] sm:$0x1] %vm1545_vm1, %v9784_v3 }
 0xbf1   : > { %364 = sbr.rel (!%p362_p7) target bundleno = 38 (0x26), region = 101 }
 0xbf4   : >> { %v9788_v1 = vld [vmem:[#allocation4] sm:$0xff] }
 0xbf5   : >> { %9791 = vst.msk [vmem:[%s9789_s22] sm:$0xff] %vm9790_vm2, %v9788_v1 }
 0xbf6 PF: > { %s33_s16 = sadd.s32 1, %s10039_s16  }
 0xbf7   : > { %p30_p8 = scmp.ge.s32.totalorder %s33_s16, 6  }
 0xbf9   :  { %32 = sbr.rel (!%p30_p8) target bundleno = 8 (0x8), region = 112 }
 0xbfe   :  { %9813 = vsyncpa [#allocation9], 1 }
 0xbff   :  { %9815 = vsyncpa [#allocation9 + $0x1], 1 }

</bundles_post_ra>
